<compile_context>
chip_gen: v7x
topology: tpu7x:2x2x1
jax: 0.10.0
libtpu: 0.0.40
codegen_flags: <defaults>
</compile_context>

<pallas_src>
import functools

import jax
import jax.numpy as jnp
from jax.experimental import pallas as pl
from jax.experimental.pallas import tpu as pltpu

CPAD = 128  # channel padding -> lane-dense (multiple of 128) kernel outputs


# ----------------------------------------------------------------------------
# Pallas kernels
# ----------------------------------------------------------------------------
def _conv3x3_relu_pool_kernel(x_ref, w_ref, b_ref, o_ref, *, H, Wp):
    """Fused 3x3 conv (implicit GEMM) + bias + ReLU + 2x2 max-pool.

    x_ref: (Nflat, Cin)   row-major flattened zero-padded image (one sample);
                          row r = hh*Wp + ww of the padded (H+3, Wp) image.
    w_ref: (9, Cin, Cout) conv taps, t = kh*3 + kw, laid out (cin, cout).
    b_ref: (1, Cout)
    o_ref: (Mp, Cout)     pooled values; row g = h*Wp + w holds the max of the
                          2x2 window whose top-left conv output is (h, w).
    """
    M = H * Wp
    # 9 shifted taps accumulated on the MXU; no im2col tensor is materialized.
    acc = jnp.dot(x_ref[0:M, :], w_ref[0], preferred_element_type=jnp.float32)
    for t in range(1, 9):
        kh, kw = divmod(t, 3)
        off = kh * Wp + kw
        acc = acc + jnp.dot(x_ref[off:off + M, :], w_ref[t],
                            preferred_element_type=jnp.float32)
    y = jnp.maximum(acc + b_ref[...], 0.0)            # bias + ReLU epilogue (f32)
    # 2x2 max-pool epilogue: max over the 4 neighbours (g, g+1, g+Wp, g+Wp+1).
    Mp = M - Wp - 1
    o_ref[...] = jnp.maximum(
        jnp.maximum(y[0:Mp, :], y[1:Mp + 1, :]),
        jnp.maximum(y[Wp:Wp + Mp, :], y[Wp + 1:Wp + 1 + Mp, :]),
    )


def _dense_head_kernel(x_ref, w1_ref, b1_ref, w2_ref, b2_ref, o_ref):
    """Whole dense head in one kernel: ReLU(x @ w1 + b1) @ w2 + b2."""
    h = jnp.dot(x_ref[...], w1_ref[...], preferred_element_type=jnp.float32)
    h = jnp.maximum(h + b1_ref[...], 0.0)
    o = jnp.dot(h, w2_ref[...], preferred_element_type=jnp.float32)
    o_ref[...] = o + b2_ref[...]


# ----------------------------------------------------------------------------
# pallas_call wrappers
# ----------------------------------------------------------------------------
def conv3x3_relu_pool(x_flat, w_taps, b_row, *, H, Wp):
    """x_flat: (B, (H+3)*Wp, Cin) flattened padded NHWC; returns (B, Mp, Cout)."""
    B, Nflat, Cin = x_flat.shape
    Cout = w_taps.shape[-1]
    Mp = H * Wp - Wp - 1
    kernel = functools.partial(_conv3x3_relu_pool_kernel, H=H, Wp=Wp)
    return pl.pallas_call(
        kernel,
        out_shape=jax.ShapeDtypeStruct((B, Mp, Cout), jnp.float32),
        grid=(B,),
        in_specs=[
            pl.BlockSpec((None, Nflat, Cin), lambda b: (b, 0, 0)),
            pl.BlockSpec((9, Cin, Cout), lambda b: (0, 0, 0)),
            pl.BlockSpec((1, Cout), lambda b: (0, 0)),
        ],
        out_specs=pl.BlockSpec((None, Mp, Cout), lambda b: (b, 0, 0)),
        # v7x: one sample per TensorCore; harmless serial loop on v5e/v6e.
        compiler_params=pltpu.CompilerParams(dimension_semantics=("parallel",)),
    )(x_flat, w_taps, b_row)


def dense_head(x, w1, b1, w2, b2):
    B, K = x.shape
    N1 = w1.shape[1]
    N2 = w2.shape[1]
    return pl.pallas_call(
        _dense_head_kernel,
        out_shape=jax.ShapeDtypeStruct((B, N2), jnp.float32),
        in_specs=[
            pl.BlockSpec((B, K), lambda: (0, 0)),
            pl.BlockSpec((K, N1), lambda: (0, 0)),
            pl.BlockSpec((1, N1), lambda: (0, 0)),
            pl.BlockSpec((N1, N2), lambda: (0, 0)),
            pl.BlockSpec((1, N2), lambda: (0, 0)),
        ],
        out_specs=pl.BlockSpec((B, N2), lambda: (0, 0)),
    )(x, w1, b1, w2, b2)


# ----------------------------------------------------------------------------
# Thin XLA glue between kernels (small pads / strided slices only)
# ----------------------------------------------------------------------------
def _pad_flatten(x_nhwc, Wp):
    """Zero-pad NHWC to (H+3, Wp) spatially, flatten rows -> (B, (H+3)*Wp, C)."""
    B, H, W, C = x_nhwc.shape
    xp = jnp.pad(x_nhwc, ((0, 0), (1, 2), (1, Wp - W - 1), (0, 0)))
    return xp.reshape(B, (H + 3) * Wp, C)


def _extract_pooled(stored, H, W, Wp):
    """Pick the (even h, even w) rows of the kernel's pooled output."""
    B, Mp, C = stored.shape
    full = jnp.pad(stored, ((0, 0), (0, H * Wp - Mp), (0, 0)))
    return full.reshape(B, H, Wp, C)[:, 0:H:2, 0:W:2, :]   # (B, H//2, W//2, C)


def net_forward(x_nchw, p):
    x = jnp.transpose(x_nchw, (0, 2, 3, 1)).astype(jnp.float32)   # NHWC once
    # (layer, conv H=W, flat-row width Wp = multiple of 8 >= W+2)
    for name, H, Wp in (("c1", 24, 32), ("c2", 12, 16), ("c3", 6, 8)):
        y = conv3x3_relu_pool(_pad_flatten(x, Wp), p[name + "_w"],
                              p[name + "_b"], H=H, Wp=Wp)
        x = _extract_pooled(y, H, H, Wp)
    flat = x.reshape(x.shape[0], 3 * 3 * CPAD)     # (h, w, c_pad) feature order
    out = dense_head(flat, p["fc1_w"], p["fc1_b"], p["fc2_w"], p["fc2_b"])
    return out[:, :3]                              # drop lane padding of fc2


# ----------------------------------------------------------------------------
# One-time weight re-layout (done at init, not per forward)
# ----------------------------------------------------------------------------
def prepare_params(params):
    def prep_conv(w_oihw, b, cin_pad):
        cout, cin = w_oihw.shape[0], w_oihw.shape[1]
        w = jnp.transpose(w_oihw, (2, 3, 1, 0)).reshape(9, cin, cout)  # (t,ci,co)
        w = jnp.pad(w, ((0, 0), (0, cin_pad - cin), (0, CPAD - cout)))
        bb = jnp.pad(b, (0, CPAD - cout)).reshape(1, CPAD)
        return w.astype(jnp.float32), bb.astype(jnp.float32)

    c1w, c1b = prep_conv(params["conv1_w"], params["conv1_b"], cin_pad=3)
    c2w, c2b = prep_conv(params["conv2_w"], params["conv2_b"], cin_pad=CPAD)
    c3w, c3b = prep_conv(params["conv3_w"], params["conv3_b"], cin_pad=CPAD)

    # PyTorch flattens (c, h, w); our activation is (h, w, c_pad): reorder fc1.
    w1 = params["fc1_w"].reshape(128, 64, 3, 3).transpose(0, 2, 3, 1)  # (128,3,3,64)
    w1 = jnp.pad(w1, ((0, 0), (0, 0), (0, 0), (0, CPAD - 64)))
    w1 = w1.reshape(128, 3 * 3 * CPAD).T                               # (1152,128)
    b1 = params["fc1_b"].reshape(1, 128)
    w2 = jnp.pad(params["fc2_w"].T, ((0, 0), (0, CPAD - 3)))           # (128,128)
    b2 = jnp.pad(params["fc2_b"], (0, CPAD - 3)).reshape(1, CPAD)

    return dict(c1_w=c1w, c1_b=c1b, c2_w=c2w, c2_b=c2b, c3_w=c3w, c3_b=c3b,
                fc1_w=w1.astype(jnp.float32), fc1_b=b1.astype(jnp.float32),
                fc2_w=w2.astype(jnp.float32), fc2_b=b2.astype(jnp.float32))


# ----------------------------------------------------------------------------
# Deterministic parameter init (shapes mirror the PyTorch module)
# ----------------------------------------------------------------------------
def init_params(key):
    ks = jax.random.split(key, 10)
    s = 0.05
    return {
        "conv1_w": s * jax.random.normal(ks[0], (32, 3, 3, 3), jnp.float32),
        "conv1_b": s * jax.random.normal(ks[1], (32,), jnp.float32),
        "conv2_w": s * jax.random.normal(ks[2], (64, 32, 3, 3), jnp.float32),
        "conv2_b": s * jax.random.normal(ks[3], (64,), jnp.float32),
        "conv3_w": s * jax.random.normal(ks[4], (64, 64, 3, 3), jnp.float32),
        "conv3_b": s * jax.random.normal(ks[5], (64,), jnp.float32),
        "fc1_w": s * jax.random.normal(ks[6], (128, 64 * 3 * 3), jnp.float32),
        "fc1_b": s * jax.random.normal(ks[7], (128,), jnp.float32),
        "fc2_w": s * jax.random.normal(ks[8], (3, 128), jnp.float32),
        "fc2_b": s * jax.random.normal(ks[9], (3,), jnp.float32),
    }


# Pure-JAX reference (mirrors the PyTorch module) for a self-check.
def reference_forward(x_nchw, params):
    def block(x, w, b):
        y = jax.lax.conv_general_dilated(
            x, w, window_strides=(1, 1), padding=((1, 1), (1, 1)),
            dimension_numbers=("NCHW", "OIHW", "NCHW"))
        y = jnp.maximum(y + b.reshape(1, -1, 1, 1), 0.0)
        return jax.lax.reduce_window(y, -jnp.inf, jax.lax.max,
                                     (1, 1, 2, 2), (1, 1, 2, 2), "VALID")

    x = block(x_nchw, params["conv1_w"], params["conv1_b"])
    x = block(x, params["conv2_w"], params["conv2_b"])
    x = block(x, params["conv3_w"], params["conv3_b"])
    flat = x.reshape(x.shape[0], -1)
    h = jnp.maximum(flat @ params["fc1_w"].T + params["fc1_b"], 0.0)
    return h @ params["fc2_w"].T + params["fc2_b"]


if __name__ == "__main__":
    key = jax.random.PRNGKey(0)
    pkey, xkey = jax.random.split(key)
    params = init_params(pkey)
    prepped = prepare_params(params)   # one-time weight re-layout / padding

    # 24x24 input is required by the 64*3*3 flatten of the dense head.
    x = jax.random.normal(xkey, (2, 3, 24, 24), jnp.float32)   # NCHW like PyTorch

    fwd = jax.jit(net_forward)
    out = jax.block_until_ready(fwd(x, prepped))
    assert out.shape == (2, 3), out.shape

    ref = reference_forward(x, params)
    max_err = float(jnp.max(jnp.abs(out - ref)))
    assert max_err < 2e-2, f"mismatch vs reference: {max_err}"

    print("KERNEL_OK")
</pallas_src>

<mosaic_0001>
module attributes {stable_mosaic.version = 11 : i64} {
  func.func @_conv3x3_relu_pool_kernel(%arg0: i32, %arg1: memref<1x864x3xf32, #tpu.memory_space<vmem>>, %arg2: memref<9x3x128xf32, #tpu.memory_space<vmem>>, %arg3: memref<1x128xf32, #tpu.memory_space<vmem>>, %arg4: memref<1x735x128xf32, #tpu.memory_space<vmem>>) attributes {dimension_semantics = [#tpu.dimension_semantics<parallel>], iteration_bounds = array<i64: 2>, scalar_prefetch = 0 : i64, scratch_operands = 0 : i64, tpu.core_type = #tpu.core_type<tc>, window_params = [{transform_indices = @transform_0, window_bounds = array<i64: 1, 864, 3>}, {pipeline_mode = #tpu.pipeline_mode<synchronous>, transform_indices = @transform_1, window_bounds = array<i64: 9, 3, 128>}, {pipeline_mode = #tpu.pipeline_mode<synchronous>, transform_indices = @transform_2, window_bounds = array<i64: 1, 128>}, {transform_indices = @transform_3, window_bounds = array<i64: 1, 735, 128>}]} {
    %c0 = arith.constant 0 : index
    %c0_0 = arith.constant 0 : index
    %c0_1 = arith.constant 0 : index
    %0 = vector.load %arg1[%c0, %c0_0, %c0_1] : memref<1x864x3xf32, #tpu.memory_space<vmem>>, vector<1x768x3xf32>
    %1 = vector.shape_cast %0 : vector<1x768x3xf32> to vector<768x3xf32>
    %c0_2 = arith.constant 0 : index
    %c0_3 = arith.constant 0 : index
    %c0_4 = arith.constant 0 : index
    %2 = vector.load %arg2[%c0_2, %c0_3, %c0_4] : memref<9x3x128xf32, #tpu.memory_space<vmem>>, vector<1x3x128xf32>
    %3 = vector.shape_cast %2 : vector<1x3x128xf32> to vector<3x128xf32>
    %cst = arith.constant dense<0.000000e+00> : vector<768x128xf32>
    %4 = tpu.matmul %1, %3, %cst {dimension_numbers = #tpu.dot_dimension_numbers<[1], [0], [0], [1], [0, 0, 1, 1], [], []>} : vector<768x3xf32>, vector<3x128xf32>, vector<768x128xf32> -> vector<768x128xf32>
    %c0_5 = arith.constant 0 : index
    %c1 = arith.constant 1 : index
    %c0_6 = arith.constant 0 : index
    %5 = vector.load %arg1[%c0_5, %c1, %c0_6] : memref<1x864x3xf32, #tpu.memory_space<vmem>>, vector<1x768x3xf32>
    %6 = vector.shape_cast %5 : vector<1x768x3xf32> to vector<768x3xf32>
    %c1_7 = arith.constant 1 : index
    %c0_8 = arith.constant 0 : index
    %c0_9 = arith.constant 0 : index
    %7 = vector.load %arg2[%c1_7, %c0_8, %c0_9] : memref<9x3x128xf32, #tpu.memory_space<vmem>>, vector<1x3x128xf32>
    %8 = vector.shape_cast %7 : vector<1x3x128xf32> to vector<3x128xf32>
    %cst_10 = arith.constant dense<0.000000e+00> : vector<768x128xf32>
    %9 = tpu.matmul %6, %8, %cst_10 {dimension_numbers = #tpu.dot_dimension_numbers<[1], [0], [0], [1], [0, 0, 1, 1], [], []>} : vector<768x3xf32>, vector<3x128xf32>, vector<768x128xf32> -> vector<768x128xf32>
    %10 = arith.addf %4, %9 : vector<768x128xf32>
    %c0_11 = arith.constant 0 : index
    %c2 = arith.constant 2 : index
    %c0_12 = arith.constant 0 : index
    %11 = vector.load %arg1[%c0_11, %c2, %c0_12] : memref<1x864x3xf32, #tpu.memory_space<vmem>>, vector<1x768x3xf32>
    %12 = vector.shape_cast %11 : vector<1x768x3xf32> to vector<768x3xf32>
    %c2_13 = arith.constant 2 : index
    %c0_14 = arith.constant 0 : index
    %c0_15 = arith.constant 0 : index
    %13 = vector.load %arg2[%c2_13, %c0_14, %c0_15] : memref<9x3x128xf32, #tpu.memory_space<vmem>>, vector<1x3x128xf32>
    %14 = vector.shape_cast %13 : vector<1x3x128xf32> to vector<3x128xf32>
    %cst_16 = arith.constant dense<0.000000e+00> : vector<768x128xf32>
    %15 = tpu.matmul %12, %14, %cst_16 {dimension_numbers = #tpu.dot_dimension_numbers<[1], [0], [0], [1], [0, 0, 1, 1], [], []>} : vector<768x3xf32>, vector<3x128xf32>, vector<768x128xf32> -> vector<768x128xf32>
    %16 = arith.addf %10, %15 : vector<768x128xf32>
    %c0_17 = arith.constant 0 : index
    %c32 = arith.constant 32 : index
    %c0_18 = arith.constant 0 : index
    %17 = vector.load %arg1[%c0_17, %c32, %c0_18] : memref<1x864x3xf32, #tpu.memory_space<vmem>>, vector<1x768x3xf32>
    %18 = vector.shape_cast %17 : vector<1x768x3xf32> to vector<768x3xf32>
    %c3 = arith.constant 3 : index
    %c0_19 = arith.constant 0 : index
    %c0_20 = arith.constant 0 : index
    %19 = vector.load %arg2[%c3, %c0_19, %c0_20] : memref<9x3x128xf32, #tpu.memory_space<vmem>>, vector<1x3x128xf32>
    %20 = vector.shape_cast %19 : vector<1x3x128xf32> to vector<3x128xf32>
    %cst_21 = arith.constant dense<0.000000e+00> : vector<768x128xf32>
    %21 = tpu.matmul %18, %20, %cst_21 {dimension_numbers = #tpu.dot_dimension_numbers<[1], [0], [0], [1], [0, 0, 1, 1], [], []>} : vector<768x3xf32>, vector<3x128xf32>, vector<768x128xf32> -> vector<768x128xf32>
    %22 = arith.addf %16, %21 : vector<768x128xf32>
    %c0_22 = arith.constant 0 : index
    %c33 = arith.constant 33 : index
    %c0_23 = arith.constant 0 : index
    %23 = vector.load %arg1[%c0_22, %c33, %c0_23] : memref<1x864x3xf32, #tpu.memory_space<vmem>>, vector<1x768x3xf32>
    %24 = vector.shape_cast %23 : vector<1x768x3xf32> to vector<768x3xf32>
    %c4 = arith.constant 4 : index
    %c0_24 = arith.constant 0 : index
    %c0_25 = arith.constant 0 : index
    %25 = vector.load %arg2[%c4, %c0_24, %c0_25] : memref<9x3x128xf32, #tpu.memory_space<vmem>>, vector<1x3x128xf32>
    %26 = vector.shape_cast %25 : vector<1x3x128xf32> to vector<3x128xf32>
    %cst_26 = arith.constant dense<0.000000e+00> : vector<768x128xf32>
    %27 = tpu.matmul %24, %26, %cst_26 {dimension_numbers = #tpu.dot_dimension_numbers<[1], [0], [0], [1], [0, 0, 1, 1], [], []>} : vector<768x3xf32>, vector<3x128xf32>, vector<768x128xf32> -> vector<768x128xf32>
    %28 = arith.addf %22, %27 : vector<768x128xf32>
    %c0_27 = arith.constant 0 : index
    %c34 = arith.constant 34 : index
    %c0_28 = arith.constant 0 : index
    %29 = vector.load %arg1[%c0_27, %c34, %c0_28] : memref<1x864x3xf32, #tpu.memory_space<vmem>>, vector<1x768x3xf32>
    %30 = vector.shape_cast %29 : vector<1x768x3xf32> to vector<768x3xf32>
    %c5 = arith.constant 5 : index
    %c0_29 = arith.constant 0 : index
    %c0_30 = arith.constant 0 : index
    %31 = vector.load %arg2[%c5, %c0_29, %c0_30] : memref<9x3x128xf32, #tpu.memory_space<vmem>>, vector<1x3x128xf32>
    %32 = vector.shape_cast %31 : vector<1x3x128xf32> to vector<3x128xf32>
    %cst_31 = arith.constant dense<0.000000e+00> : vector<768x128xf32>
    %33 = tpu.matmul %30, %32, %cst_31 {dimension_numbers = #tpu.dot_dimension_numbers<[1], [0], [0], [1], [0, 0, 1, 1], [], []>} : vector<768x3xf32>, vector<3x128xf32>, vector<768x128xf32> -> vector<768x128xf32>
    %34 = arith.addf %28, %33 : vector<768x128xf32>
    %c0_32 = arith.constant 0 : index
    %c64 = arith.constant 64 : index
    %c0_33 = arith.constant 0 : index
    %35 = vector.load %arg1[%c0_32, %c64, %c0_33] : memref<1x864x3xf32, #tpu.memory_space<vmem>>, vector<1x768x3xf32>
    %36 = vector.shape_cast %35 : vector<1x768x3xf32> to vector<768x3xf32>
    %c6 = arith.constant 6 : index
    %c0_34 = arith.constant 0 : index
    %c0_35 = arith.constant 0 : index
    %37 = vector.load %arg2[%c6, %c0_34, %c0_35] : memref<9x3x128xf32, #tpu.memory_space<vmem>>, vector<1x3x128xf32>
    %38 = vector.shape_cast %37 : vector<1x3x128xf32> to vector<3x128xf32>
    %cst_36 = arith.constant dense<0.000000e+00> : vector<768x128xf32>
    %39 = tpu.matmul %36, %38, %cst_36 {dimension_numbers = #tpu.dot_dimension_numbers<[1], [0], [0], [1], [0, 0, 1, 1], [], []>} : vector<768x3xf32>, vector<3x128xf32>, vector<768x128xf32> -> vector<768x128xf32>
    %40 = arith.addf %34, %39 : vector<768x128xf32>
    %c0_37 = arith.constant 0 : index
    %c65 = arith.constant 65 : index
    %c0_38 = arith.constant 0 : index
    %41 = vector.load %arg1[%c0_37, %c65, %c0_38] : memref<1x864x3xf32, #tpu.memory_space<vmem>>, vector<1x768x3xf32>
    %42 = vector.shape_cast %41 : vector<1x768x3xf32> to vector<768x3xf32>
    %c7 = arith.constant 7 : index
    %c0_39 = arith.constant 0 : index
    %c0_40 = arith.constant 0 : index
    %43 = vector.load %arg2[%c7, %c0_39, %c0_40] : memref<9x3x128xf32, #tpu.memory_space<vmem>>, vector<1x3x128xf32>
    %44 = vector.shape_cast %43 : vector<1x3x128xf32> to vector<3x128xf32>
    %cst_41 = arith.constant dense<0.000000e+00> : vector<768x128xf32>
    %45 = tpu.matmul %42, %44, %cst_41 {dimension_numbers = #tpu.dot_dimension_numbers<[1], [0], [0], [1], [0, 0, 1, 1], [], []>} : vector<768x3xf32>, vector<3x128xf32>, vector<768x128xf32> -> vector<768x128xf32>
    %46 = arith.addf %40, %45 : vector<768x128xf32>
    %c0_42 = arith.constant 0 : index
    %c66 = arith.constant 66 : index
    %c0_43 = arith.constant 0 : index
    %47 = vector.load %arg1[%c0_42, %c66, %c0_43] : memref<1x864x3xf32, #tpu.memory_space<vmem>>, vector<1x768x3xf32>
    %48 = vector.shape_cast %47 : vector<1x768x3xf32> to vector<768x3xf32>
    %c8 = arith.constant 8 : index
    %c0_44 = arith.constant 0 : index
    %c0_45 = arith.constant 0 : index
    %49 = vector.load %arg2[%c8, %c0_44, %c0_45] : memref<9x3x128xf32, #tpu.memory_space<vmem>>, vector<1x3x128xf32>
    %50 = vector.shape_cast %49 : vector<1x3x128xf32> to vector<3x128xf32>
    %cst_46 = arith.constant dense<0.000000e+00> : vector<768x128xf32>
    %51 = tpu.matmul %48, %50, %cst_46 {dimension_numbers = #tpu.dot_dimension_numbers<[1], [0], [0], [1], [0, 0, 1, 1], [], []>} : vector<768x3xf32>, vector<3x128xf32>, vector<768x128xf32> -> vector<768x128xf32>
    %52 = arith.addf %46, %51 : vector<768x128xf32>
    %c0_47 = arith.constant 0 : index
    %c0_48 = arith.constant 0 : index
    %53 = vector.load %arg3[%c0_47, %c0_48] : memref<1x128xf32, #tpu.memory_space<vmem>>, vector<1x128xf32>
    %54 = vector.broadcast %53 : vector<1x128xf32> to vector<768x128xf32>
    %55 = arith.addf %52, %54 : vector<768x128xf32>
    %cst_49 = arith.constant 0.000000e+00 : f32
    %56 = vector.broadcast %cst_49 : f32 to vector<768x128xf32>
    %57 = arith.maximumf %55, %56 : vector<768x128xf32>
    %58 = vector.extract_strided_slice %57 {offsets = [0, 0], sizes = [735, 128], strides = [1, 1]} : vector<768x128xf32> to vector<735x128xf32>
    %59 = vector.extract_strided_slice %57 {offsets = [1, 0], sizes = [735, 128], strides = [1, 1]} : vector<768x128xf32> to vector<735x128xf32>
    %60 = arith.maximumf %58, %59 : vector<735x128xf32>
    %61 = vector.extract_strided_slice %57 {offsets = [32, 0], sizes = [735, 128], strides = [1, 1]} : vector<768x128xf32> to vector<735x128xf32>
    %62 = vector.extract_strided_slice %57 {offsets = [33, 0], sizes = [735, 128], strides = [1, 1]} : vector<768x128xf32> to vector<735x128xf32>
    %63 = arith.maximumf %61, %62 : vector<735x128xf32>
    %64 = arith.maximumf %60, %63 : vector<735x128xf32>
    %c0_50 = arith.constant 0 : index
    %c0_51 = arith.constant 0 : index
    %c0_52 = arith.constant 0 : index
    %65 = vector.load %arg4[%c0_50, %c0_51, %c0_52] : memref<1x735x128xf32, #tpu.memory_space<vmem>>, vector<1x735x128xf32>
    %66 = vector.shape_cast %65 : vector<1x735x128xf32> to vector<735x128xf32>
    %67 = vector.shape_cast %64 : vector<735x128xf32> to vector<1x735x128xf32>
    tpu.vector_store %arg4[%c0_50, %c0_51, %c0_52], %67 {strides = array<i32>} : memref<1x735x128xf32, #tpu.memory_space<vmem>>, vector<1x735x128xf32>,
    return
  }
  func.func @transform_0(%arg0: i32) -> (i32, i32, i32) {
    %c0_i32 = arith.constant 0 : i32
    %c0_i32_0 = arith.constant 0 : i32
    %c0_i32_1 = arith.constant 0 : i32
    return %arg0, %c0_i32, %c0_i32_0 : i32, i32, i32
  }
  func.func @transform_1(%arg0: i32) -> (i32, i32, i32) {
    %c0_i32 = arith.constant 0 : i32
    %c0_i32_0 = arith.constant 0 : i32
    %c0_i32_1 = arith.constant 0 : i32
    %c0_i32_2 = arith.constant 0 : i32
    return %c0_i32, %c0_i32_0, %c0_i32_1 : i32, i32, i32
  }
  func.func @transform_2(%arg0: i32) -> (i32, i32) {
    %c0_i32 = arith.constant 0 : i32
    %c0_i32_0 = arith.constant 0 : i32
    %c0_i32_1 = arith.constant 0 : i32
    return %c0_i32, %c0_i32_0 : i32, i32
  }
  func.func @transform_3(%arg0: i32) -> (i32, i32, i32) {
    %c0_i32 = arith.constant 0 : i32
    %c0_i32_0 = arith.constant 0 : i32
    %c0_i32_1 = arith.constant 0 : i32
    return %arg0, %c0_i32, %c0_i32_0 : i32, i32, i32
  }
}

module attributes {stable_mosaic.version = 11 : i64} {
  func.func @_conv3x3_relu_pool_kernel(%arg0: i32, %arg1: memref<1x240x128xf32, #tpu.memory_space<vmem>>, %arg2: memref<9x128x128xf32, #tpu.memory_space<vmem>>, %arg3: memref<1x128xf32, #tpu.memory_space<vmem>>, %arg4: memref<1x175x128xf32, #tpu.memory_space<vmem>>) attributes {dimension_semantics = [#tpu.dimension_semantics<parallel>], iteration_bounds = array<i64: 2>, scalar_prefetch = 0 : i64, scratch_operands = 0 : i64, tpu.core_type = #tpu.core_type<tc>, window_params = [{transform_indices = @transform_0, window_bounds = array<i64: 1, 240, 128>}, {pipeline_mode = #tpu.pipeline_mode<synchronous>, transform_indices = @transform_1, window_bounds = array<i64: 9, 128, 128>}, {pipeline_mode = #tpu.pipeline_mode<synchronous>, transform_indices = @transform_2, window_bounds = array<i64: 1, 128>}, {transform_indices = @transform_3, window_bounds = array<i64: 1, 175, 128>}]} {
    %c0 = arith.constant 0 : index
    %c0_0 = arith.constant 0 : index
    %c0_1 = arith.constant 0 : index
    %0 = vector.load %arg1[%c0, %c0_0, %c0_1] : memref<1x240x128xf32, #tpu.memory_space<vmem>>, vector<1x192x128xf32>
    %1 = vector.shape_cast %0 : vector<1x192x128xf32> to vector<192x128xf32>
    %c0_2 = arith.constant 0 : index
    %c0_3 = arith.constant 0 : index
    %c0_4 = arith.constant 0 : index
    %2 = vector.load %arg2[%c0_2, %c0_3, %c0_4] : memref<9x128x128xf32, #tpu.memory_space<vmem>>, vector<1x128x128xf32>
    %3 = vector.shape_cast %2 : vector<1x128x128xf32> to vector<128x128xf32>
    %cst = arith.constant dense<0.000000e+00> : vector<192x128xf32>
    %4 = tpu.matmul %1, %3, %cst {dimension_numbers = #tpu.dot_dimension_numbers<[1], [0], [0], [1], [0, 0, 1, 1], [], []>} : vector<192x128xf32>, vector<128x128xf32>, vector<192x128xf32> -> vector<192x128xf32>
    %c0_5 = arith.constant 0 : index
    %c1 = arith.constant 1 : index
    %c0_6 = arith.constant 0 : index
    %5 = vector.load %arg1[%c0_5, %c1, %c0_6] : memref<1x240x128xf32, #tpu.memory_space<vmem>>, vector<1x192x128xf32>
    %6 = vector.shape_cast %5 : vector<1x192x128xf32> to vector<192x128xf32>
    %c1_7 = arith.constant 1 : index
    %c0_8 = arith.constant 0 : index
    %c0_9 = arith.constant 0 : index
    %7 = vector.load %arg2[%c1_7, %c0_8, %c0_9] : memref<9x128x128xf32, #tpu.memory_space<vmem>>, vector<1x128x128xf32>
    %8 = vector.shape_cast %7 : vector<1x128x128xf32> to vector<128x128xf32>
    %cst_10 = arith.constant dense<0.000000e+00> : vector<192x128xf32>
    %9 = tpu.matmul %6, %8, %cst_10 {dimension_numbers = #tpu.dot_dimension_numbers<[1], [0], [0], [1], [0, 0, 1, 1], [], []>} : vector<192x128xf32>, vector<128x128xf32>, vector<192x128xf32> -> vector<192x128xf32>
    %10 = arith.addf %4, %9 : vector<192x128xf32>
    %c0_11 = arith.constant 0 : index
    %c2 = arith.constant 2 : index
    %c0_12 = arith.constant 0 : index
    %11 = vector.load %arg1[%c0_11, %c2, %c0_12] : memref<1x240x128xf32, #tpu.memory_space<vmem>>, vector<1x192x128xf32>
    %12 = vector.shape_cast %11 : vector<1x192x128xf32> to vector<192x128xf32>
    %c2_13 = arith.constant 2 : index
    %c0_14 = arith.constant 0 : index
    %c0_15 = arith.constant 0 : index
    %13 = vector.load %arg2[%c2_13, %c0_14, %c0_15] : memref<9x128x128xf32, #tpu.memory_space<vmem>>, vector<1x128x128xf32>
    %14 = vector.shape_cast %13 : vector<1x128x128xf32> to vector<128x128xf32>
    %cst_16 = arith.constant dense<0.000000e+00> : vector<192x128xf32>
    %15 = tpu.matmul %12, %14, %cst_16 {dimension_numbers = #tpu.dot_dimension_numbers<[1], [0], [0], [1], [0, 0, 1, 1], [], []>} : vector<192x128xf32>, vector<128x128xf32>, vector<192x128xf32> -> vector<192x128xf32>
    %16 = arith.addf %10, %15 : vector<192x128xf32>
    %c0_17 = arith.constant 0 : index
    %c16 = arith.constant 16 : index
    %c0_18 = arith.constant 0 : index
    %17 = vector.load %arg1[%c0_17, %c16, %c0_18] : memref<1x240x128xf32, #tpu.memory_space<vmem>>, vector<1x192x128xf32>
    %18 = vector.shape_cast %17 : vector<1x192x128xf32> to vector<192x128xf32>
    %c3 = arith.constant 3 : index
    %c0_19 = arith.constant 0 : index
    %c0_20 = arith.constant 0 : index
    %19 = vector.load %arg2[%c3, %c0_19, %c0_20] : memref<9x128x128xf32, #tpu.memory_space<vmem>>, vector<1x128x128xf32>
    %20 = vector.shape_cast %19 : vector<1x128x128xf32> to vector<128x128xf32>
    %cst_21 = arith.constant dense<0.000000e+00> : vector<192x128xf32>
    %21 = tpu.matmul %18, %20, %cst_21 {dimension_numbers = #tpu.dot_dimension_numbers<[1], [0], [0], [1], [0, 0, 1, 1], [], []>} : vector<192x128xf32>, vector<128x128xf32>, vector<192x128xf32> -> vector<192x128xf32>
    %22 = arith.addf %16, %21 : vector<192x128xf32>
    %c0_22 = arith.constant 0 : index
    %c17 = arith.constant 17 : index
    %c0_23 = arith.constant 0 : index
    %23 = vector.load %arg1[%c0_22, %c17, %c0_23] : memref<1x240x128xf32, #tpu.memory_space<vmem>>, vector<1x192x128xf32>
    %24 = vector.shape_cast %23 : vector<1x192x128xf32> to vector<192x128xf32>
    %c4 = arith.constant 4 : index
    %c0_24 = arith.constant 0 : index
    %c0_25 = arith.constant 0 : index
    %25 = vector.load %arg2[%c4, %c0_24, %c0_25] : memref<9x128x128xf32, #tpu.memory_space<vmem>>, vector<1x128x128xf32>
    %26 = vector.shape_cast %25 : vector<1x128x128xf32> to vector<128x128xf32>
    %cst_26 = arith.constant dense<0.000000e+00> : vector<192x128xf32>
    %27 = tpu.matmul %24, %26, %cst_26 {dimension_numbers = #tpu.dot_dimension_numbers<[1], [0], [0], [1], [0, 0, 1, 1], [], []>} : vector<192x128xf32>, vector<128x128xf32>, vector<192x128xf32> -> vector<192x128xf32>
    %28 = arith.addf %22, %27 : vector<192x128xf32>
    %c0_27 = arith.constant 0 : index
    %c18 = arith.constant 18 : index
    %c0_28 = arith.constant 0 : index
    %29 = vector.load %arg1[%c0_27, %c18, %c0_28] : memref<1x240x128xf32, #tpu.memory_space<vmem>>, vector<1x192x128xf32>
    %30 = vector.shape_cast %29 : vector<1x192x128xf32> to vector<192x128xf32>
    %c5 = arith.constant 5 : index
    %c0_29 = arith.constant 0 : index
    %c0_30 = arith.constant 0 : index
    %31 = vector.load %arg2[%c5, %c0_29, %c0_30] : memref<9x128x128xf32, #tpu.memory_space<vmem>>, vector<1x128x128xf32>
    %32 = vector.shape_cast %31 : vector<1x128x128xf32> to vector<128x128xf32>
    %cst_31 = arith.constant dense<0.000000e+00> : vector<192x128xf32>
    %33 = tpu.matmul %30, %32, %cst_31 {dimension_numbers = #tpu.dot_dimension_numbers<[1], [0], [0], [1], [0, 0, 1, 1], [], []>} : vector<192x128xf32>, vector<128x128xf32>, vector<192x128xf32> -> vector<192x128xf32>
    %34 = arith.addf %28, %33 : vector<192x128xf32>
    %c0_32 = arith.constant 0 : index
    %c32 = arith.constant 32 : index
    %c0_33 = arith.constant 0 : index
    %35 = vector.load %arg1[%c0_32, %c32, %c0_33] : memref<1x240x128xf32, #tpu.memory_space<vmem>>, vector<1x192x128xf32>
    %36 = vector.shape_cast %35 : vector<1x192x128xf32> to vector<192x128xf32>
    %c6 = arith.constant 6 : index
    %c0_34 = arith.constant 0 : index
    %c0_35 = arith.constant 0 : index
    %37 = vector.load %arg2[%c6, %c0_34, %c0_35] : memref<9x128x128xf32, #tpu.memory_space<vmem>>, vector<1x128x128xf32>
    %38 = vector.shape_cast %37 : vector<1x128x128xf32> to vector<128x128xf32>
    %cst_36 = arith.constant dense<0.000000e+00> : vector<192x128xf32>
    %39 = tpu.matmul %36, %38, %cst_36 {dimension_numbers = #tpu.dot_dimension_numbers<[1], [0], [0], [1], [0, 0, 1, 1], [], []>} : vector<192x128xf32>, vector<128x128xf32>, vector<192x128xf32> -> vector<192x128xf32>
    %40 = arith.addf %34, %39 : vector<192x128xf32>
    %c0_37 = arith.constant 0 : index
    %c33 = arith.constant 33 : index
    %c0_38 = arith.constant 0 : index
    %41 = vector.load %arg1[%c0_37, %c33, %c0_38] : memref<1x240x128xf32, #tpu.memory_space<vmem>>, vector<1x192x128xf32>
    %42 = vector.shape_cast %41 : vector<1x192x128xf32> to vector<192x128xf32>
    %c7 = arith.constant 7 : index
    %c0_39 = arith.constant 0 : index
    %c0_40 = arith.constant 0 : index
    %43 = vector.load %arg2[%c7, %c0_39, %c0_40] : memref<9x128x128xf32, #tpu.memory_space<vmem>>, vector<1x128x128xf32>
    %44 = vector.shape_cast %43 : vector<1x128x128xf32> to vector<128x128xf32>
    %cst_41 = arith.constant dense<0.000000e+00> : vector<192x128xf32>
    %45 = tpu.matmul %42, %44, %cst_41 {dimension_numbers = #tpu.dot_dimension_numbers<[1], [0], [0], [1], [0, 0, 1, 1], [], []>} : vector<192x128xf32>, vector<128x128xf32>, vector<192x128xf32> -> vector<192x128xf32>
    %46 = arith.addf %40, %45 : vector<192x128xf32>
    %c0_42 = arith.constant 0 : index
    %c34 = arith.constant 34 : index
    %c0_43 = arith.constant 0 : index
    %47 = vector.load %arg1[%c0_42, %c34, %c0_43] : memref<1x240x128xf32, #tpu.memory_space<vmem>>, vector<1x192x128xf32>
    %48 = vector.shape_cast %47 : vector<1x192x128xf32> to vector<192x128xf32>
    %c8 = arith.constant 8 : index
    %c0_44 = arith.constant 0 : index
    %c0_45 = arith.constant 0 : index
    %49 = vector.load %arg2[%c8, %c0_44, %c0_45] : memref<9x128x128xf32, #tpu.memory_space<vmem>>, vector<1x128x128xf32>
    %50 = vector.shape_cast %49 : vector<1x128x128xf32> to vector<128x128xf32>
    %cst_46 = arith.constant dense<0.000000e+00> : vector<192x128xf32>
    %51 = tpu.matmul %48, %50, %cst_46 {dimension_numbers = #tpu.dot_dimension_numbers<[1], [0], [0], [1], [0, 0, 1, 1], [], []>} : vector<192x128xf32>, vector<128x128xf32>, vector<192x128xf32> -> vector<192x128xf32>
    %52 = arith.addf %46, %51 : vector<192x128xf32>
    %c0_47 = arith.constant 0 : index
    %c0_48 = arith.constant 0 : index
    %53 = vector.load %arg3[%c0_47, %c0_48] : memref<1x128xf32, #tpu.memory_space<vmem>>, vector<1x128xf32>
    %54 = vector.broadcast %53 : vector<1x128xf32> to vector<192x128xf32>
    %55 = arith.addf %52, %54 : vector<192x128xf32>
    %cst_49 = arith.constant 0.000000e+00 : f32
    %56 = vector.broadcast %cst_49 : f32 to vector<192x128xf32>
    %57 = arith.maximumf %55, %56 : vector<192x128xf32>
    %58 = vector.extract_strided_slice %57 {offsets = [0, 0], sizes = [175, 128], strides = [1, 1]} : vector<192x128xf32> to vector<175x128xf32>
    %59 = vector.extract_strided_slice %57 {offsets = [1, 0], sizes = [175, 128], strides = [1, 1]} : vector<192x128xf32> to vector<175x128xf32>
    %60 = arith.maximumf %58, %59 : vector<175x128xf32>
    %61 = vector.extract_strided_slice %57 {offsets = [16, 0], sizes = [175, 128], strides = [1, 1]} : vector<192x128xf32> to vector<175x128xf32>
    %62 = vector.extract_strided_slice %57 {offsets = [17, 0], sizes = [175, 128], strides = [1, 1]} : vector<192x128xf32> to vector<175x128xf32>
    %63 = arith.maximumf %61, %62 : vector<175x128xf32>
    %64 = arith.maximumf %60, %63 : vector<175x128xf32>
    %c0_50 = arith.constant 0 : index
    %c0_51 = arith.constant 0 : index
    %c0_52 = arith.constant 0 : index
    %65 = vector.load %arg4[%c0_50, %c0_51, %c0_52] : memref<1x175x128xf32, #tpu.memory_space<vmem>>, vector<1x175x128xf32>
    %66 = vector.shape_cast %65 : vector<1x175x128xf32> to vector<175x128xf32>
    %67 = vector.shape_cast %64 : vector<175x128xf32> to vector<1x175x128xf32>
    tpu.vector_store %arg4[%c0_50, %c0_51, %c0_52], %67 {strides = array<i32>} : memref<1x175x128xf32, #tpu.memory_space<vmem>>, vector<1x175x128xf32>,
    return
  }
  func.func @transform_0(%arg0: i32) -> (i32, i32, i32) {
    %c0_i32 = arith.constant 0 : i32
    %c0_i32_0 = arith.constant 0 : i32
    %c0_i32_1 = arith.constant 0 : i32
    return %arg0, %c0_i32, %c0_i32_0 : i32, i32, i32
  }
  func.func @transform_1(%arg0: i32) -> (i32, i32, i32) {
    %c0_i32 = arith.constant 0 : i32
    %c0_i32_0 = arith.constant 0 : i32
    %c0_i32_1 = arith.constant 0 : i32
    %c0_i32_2 = arith.constant 0 : i32
    return %c0_i32, %c0_i32_0, %c0_i32_1 : i32, i32, i32
  }
  func.func @transform_2(%arg0: i32) -> (i32, i32) {
    %c0_i32 = arith.constant 0 : i32
    %c0_i32_0 = arith.constant 0 : i32
    %c0_i32_1 = arith.constant 0 : i32
    return %c0_i32, %c0_i32_0 : i32, i32
  }
  func.func @transform_3(%arg0: i32) -> (i32, i32, i32) {
    %c0_i32 = arith.constant 0 : i32
    %c0_i32_0 = arith.constant 0 : i32
    %c0_i32_1 = arith.constant 0 : i32
    return %arg0, %c0_i32, %c0_i32_0 : i32, i32, i32
  }
}

module attributes {stable_mosaic.version = 11 : i64} {
  func.func @_conv3x3_relu_pool_kernel(%arg0: i32, %arg1: memref<1x72x128xf32, #tpu.memory_space<vmem>>, %arg2: memref<9x128x128xf32, #tpu.memory_space<vmem>>, %arg3: memref<1x128xf32, #tpu.memory_space<vmem>>, %arg4: memref<1x39x128xf32, #tpu.memory_space<vmem>>) attributes {dimension_semantics = [#tpu.dimension_semantics<parallel>], iteration_bounds = array<i64: 2>, scalar_prefetch = 0 : i64, scratch_operands = 0 : i64, tpu.core_type = #tpu.core_type<tc>, window_params = [{transform_indices = @transform_0, window_bounds = array<i64: 1, 72, 128>}, {pipeline_mode = #tpu.pipeline_mode<synchronous>, transform_indices = @transform_1, window_bounds = array<i64: 9, 128, 128>}, {pipeline_mode = #tpu.pipeline_mode<synchronous>, transform_indices = @transform_2, window_bounds = array<i64: 1, 128>}, {transform_indices = @transform_3, window_bounds = array<i64: 1, 39, 128>}]} {
    %c0 = arith.constant 0 : index
    %c0_0 = arith.constant 0 : index
    %c0_1 = arith.constant 0 : index
    %0 = vector.load %arg1[%c0, %c0_0, %c0_1] : memref<1x72x128xf32, #tpu.memory_space<vmem>>, vector<1x48x128xf32>
    %1 = vector.shape_cast %0 : vector<1x48x128xf32> to vector<48x128xf32>
    %c0_2 = arith.constant 0 : index
    %c0_3 = arith.constant 0 : index
    %c0_4 = arith.constant 0 : index
    %2 = vector.load %arg2[%c0_2, %c0_3, %c0_4] : memref<9x128x128xf32, #tpu.memory_space<vmem>>, vector<1x128x128xf32>
    %3 = vector.shape_cast %2 : vector<1x128x128xf32> to vector<128x128xf32>
    %cst = arith.constant dense<0.000000e+00> : vector<48x128xf32>
    %4 = tpu.matmul %1, %3, %cst {dimension_numbers = #tpu.dot_dimension_numbers<[1], [0], [0], [1], [0, 0, 1, 1], [], []>} : vector<48x128xf32>, vector<128x128xf32>, vector<48x128xf32> -> vector<48x128xf32>
    %c0_5 = arith.constant 0 : index
    %c1 = arith.constant 1 : index
    %c0_6 = arith.constant 0 : index
    %5 = vector.load %arg1[%c0_5, %c1, %c0_6] : memref<1x72x128xf32, #tpu.memory_space<vmem>>, vector<1x48x128xf32>
    %6 = vector.shape_cast %5 : vector<1x48x128xf32> to vector<48x128xf32>
    %c1_7 = arith.constant 1 : index
    %c0_8 = arith.constant 0 : index
    %c0_9 = arith.constant 0 : index
    %7 = vector.load %arg2[%c1_7, %c0_8, %c0_9] : memref<9x128x128xf32, #tpu.memory_space<vmem>>, vector<1x128x128xf32>
    %8 = vector.shape_cast %7 : vector<1x128x128xf32> to vector<128x128xf32>
    %cst_10 = arith.constant dense<0.000000e+00> : vector<48x128xf32>
    %9 = tpu.matmul %6, %8, %cst_10 {dimension_numbers = #tpu.dot_dimension_numbers<[1], [0], [0], [1], [0, 0, 1, 1], [], []>} : vector<48x128xf32>, vector<128x128xf32>, vector<48x128xf32> -> vector<48x128xf32>
    %10 = arith.addf %4, %9 : vector<48x128xf32>
    %c0_11 = arith.constant 0 : index
    %c2 = arith.constant 2 : index
    %c0_12 = arith.constant 0 : index
    %11 = vector.load %arg1[%c0_11, %c2, %c0_12] : memref<1x72x128xf32, #tpu.memory_space<vmem>>, vector<1x48x128xf32>
    %12 = vector.shape_cast %11 : vector<1x48x128xf32> to vector<48x128xf32>
    %c2_13 = arith.constant 2 : index
    %c0_14 = arith.constant 0 : index
    %c0_15 = arith.constant 0 : index
    %13 = vector.load %arg2[%c2_13, %c0_14, %c0_15] : memref<9x128x128xf32, #tpu.memory_space<vmem>>, vector<1x128x128xf32>
    %14 = vector.shape_cast %13 : vector<1x128x128xf32> to vector<128x128xf32>
    %cst_16 = arith.constant dense<0.000000e+00> : vector<48x128xf32>
    %15 = tpu.matmul %12, %14, %cst_16 {dimension_numbers = #tpu.dot_dimension_numbers<[1], [0], [0], [1], [0, 0, 1, 1], [], []>} : vector<48x128xf32>, vector<128x128xf32>, vector<48x128xf32> -> vector<48x128xf32>
    %16 = arith.addf %10, %15 : vector<48x128xf32>
    %c0_17 = arith.constant 0 : index
    %c8 = arith.constant 8 : index
    %c0_18 = arith.constant 0 : index
    %17 = vector.load %arg1[%c0_17, %c8, %c0_18] : memref<1x72x128xf32, #tpu.memory_space<vmem>>, vector<1x48x128xf32>
    %18 = vector.shape_cast %17 : vector<1x48x128xf32> to vector<48x128xf32>
    %c3 = arith.constant 3 : index
    %c0_19 = arith.constant 0 : index
    %c0_20 = arith.constant 0 : index
    %19 = vector.load %arg2[%c3, %c0_19, %c0_20] : memref<9x128x128xf32, #tpu.memory_space<vmem>>, vector<1x128x128xf32>
    %20 = vector.shape_cast %19 : vector<1x128x128xf32> to vector<128x128xf32>
    %cst_21 = arith.constant dense<0.000000e+00> : vector<48x128xf32>
    %21 = tpu.matmul %18, %20, %cst_21 {dimension_numbers = #tpu.dot_dimension_numbers<[1], [0], [0], [1], [0, 0, 1, 1], [], []>} : vector<48x128xf32>, vector<128x128xf32>, vector<48x128xf32> -> vector<48x128xf32>
    %22 = arith.addf %16, %21 : vector<48x128xf32>
    %c0_22 = arith.constant 0 : index
    %c9 = arith.constant 9 : index
    %c0_23 = arith.constant 0 : index
    %23 = vector.load %arg1[%c0_22, %c9, %c0_23] : memref<1x72x128xf32, #tpu.memory_space<vmem>>, vector<1x48x128xf32>
    %24 = vector.shape_cast %23 : vector<1x48x128xf32> to vector<48x128xf32>
    %c4 = arith.constant 4 : index
    %c0_24 = arith.constant 0 : index
    %c0_25 = arith.constant 0 : index
    %25 = vector.load %arg2[%c4, %c0_24, %c0_25] : memref<9x128x128xf32, #tpu.memory_space<vmem>>, vector<1x128x128xf32>
    %26 = vector.shape_cast %25 : vector<1x128x128xf32> to vector<128x128xf32>
    %cst_26 = arith.constant dense<0.000000e+00> : vector<48x128xf32>
    %27 = tpu.matmul %24, %26, %cst_26 {dimension_numbers = #tpu.dot_dimension_numbers<[1], [0], [0], [1], [0, 0, 1, 1], [], []>} : vector<48x128xf32>, vector<128x128xf32>, vector<48x128xf32> -> vector<48x128xf32>
    %28 = arith.addf %22, %27 : vector<48x128xf32>
    %c0_27 = arith.constant 0 : index
    %c10 = arith.constant 10 : index
    %c0_28 = arith.constant 0 : index
    %29 = vector.load %arg1[%c0_27, %c10, %c0_28] : memref<1x72x128xf32, #tpu.memory_space<vmem>>, vector<1x48x128xf32>
    %30 = vector.shape_cast %29 : vector<1x48x128xf32> to vector<48x128xf32>
    %c5 = arith.constant 5 : index
    %c0_29 = arith.constant 0 : index
    %c0_30 = arith.constant 0 : index
    %31 = vector.load %arg2[%c5, %c0_29, %c0_30] : memref<9x128x128xf32, #tpu.memory_space<vmem>>, vector<1x128x128xf32>
    %32 = vector.shape_cast %31 : vector<1x128x128xf32> to vector<128x128xf32>
    %cst_31 = arith.constant dense<0.000000e+00> : vector<48x128xf32>
    %33 = tpu.matmul %30, %32, %cst_31 {dimension_numbers = #tpu.dot_dimension_numbers<[1], [0], [0], [1], [0, 0, 1, 1], [], []>} : vector<48x128xf32>, vector<128x128xf32>, vector<48x128xf32> -> vector<48x128xf32>
    %34 = arith.addf %28, %33 : vector<48x128xf32>
    %c0_32 = arith.constant 0 : index
    %c16 = arith.constant 16 : index
    %c0_33 = arith.constant 0 : index
    %35 = vector.load %arg1[%c0_32, %c16, %c0_33] : memref<1x72x128xf32, #tpu.memory_space<vmem>>, vector<1x48x128xf32>
    %36 = vector.shape_cast %35 : vector<1x48x128xf32> to vector<48x128xf32>
    %c6 = arith.constant 6 : index
    %c0_34 = arith.constant 0 : index
    %c0_35 = arith.constant 0 : index
    %37 = vector.load %arg2[%c6, %c0_34, %c0_35] : memref<9x128x128xf32, #tpu.memory_space<vmem>>, vector<1x128x128xf32>
    %38 = vector.shape_cast %37 : vector<1x128x128xf32> to vector<128x128xf32>
    %cst_36 = arith.constant dense<0.000000e+00> : vector<48x128xf32>
    %39 = tpu.matmul %36, %38, %cst_36 {dimension_numbers = #tpu.dot_dimension_numbers<[1], [0], [0], [1], [0, 0, 1, 1], [], []>} : vector<48x128xf32>, vector<128x128xf32>, vector<48x128xf32> -> vector<48x128xf32>
    %40 = arith.addf %34, %39 : vector<48x128xf32>
    %c0_37 = arith.constant 0 : index
    %c17 = arith.constant 17 : index
    %c0_38 = arith.constant 0 : index
    %41 = vector.load %arg1[%c0_37, %c17, %c0_38] : memref<1x72x128xf32, #tpu.memory_space<vmem>>, vector<1x48x128xf32>
    %42 = vector.shape_cast %41 : vector<1x48x128xf32> to vector<48x128xf32>
    %c7 = arith.constant 7 : index
    %c0_39 = arith.constant 0 : index
    %c0_40 = arith.constant 0 : index
    %43 = vector.load %arg2[%c7, %c0_39, %c0_40] : memref<9x128x128xf32, #tpu.memory_space<vmem>>, vector<1x128x128xf32>
    %44 = vector.shape_cast %43 : vector<1x128x128xf32> to vector<128x128xf32>
    %cst_41 = arith.constant dense<0.000000e+00> : vector<48x128xf32>
    %45 = tpu.matmul %42, %44, %cst_41 {dimension_numbers = #tpu.dot_dimension_numbers<[1], [0], [0], [1], [0, 0, 1, 1], [], []>} : vector<48x128xf32>, vector<128x128xf32>, vector<48x128xf32> -> vector<48x128xf32>
    %46 = arith.addf %40, %45 : vector<48x128xf32>
    %c0_42 = arith.constant 0 : index
    %c18 = arith.constant 18 : index
    %c0_43 = arith.constant 0 : index
    %47 = vector.load %arg1[%c0_42, %c18, %c0_43] : memref<1x72x128xf32, #tpu.memory_space<vmem>>, vector<1x48x128xf32>
    %48 = vector.shape_cast %47 : vector<1x48x128xf32> to vector<48x128xf32>
    %c8_44 = arith.constant 8 : index
    %c0_45 = arith.constant 0 : index
    %c0_46 = arith.constant 0 : index
    %49 = vector.load %arg2[%c8_44, %c0_45, %c0_46] : memref<9x128x128xf32, #tpu.memory_space<vmem>>, vector<1x128x128xf32>
    %50 = vector.shape_cast %49 : vector<1x128x128xf32> to vector<128x128xf32>
    %cst_47 = arith.constant dense<0.000000e+00> : vector<48x128xf32>
    %51 = tpu.matmul %48, %50, %cst_47 {dimension_numbers = #tpu.dot_dimension_numbers<[1], [0], [0], [1], [0, 0, 1, 1], [], []>} : vector<48x128xf32>, vector<128x128xf32>, vector<48x128xf32> -> vector<48x128xf32>
    %52 = arith.addf %46, %51 : vector<48x128xf32>
    %c0_48 = arith.constant 0 : index
    %c0_49 = arith.constant 0 : index
    %53 = vector.load %arg3[%c0_48, %c0_49] : memref<1x128xf32, #tpu.memory_space<vmem>>, vector<1x128xf32>
    %54 = vector.broadcast %53 : vector<1x128xf32> to vector<48x128xf32>
    %55 = arith.addf %52, %54 : vector<48x128xf32>
    %cst_50 = arith.constant 0.000000e+00 : f32
    %56 = vector.broadcast %cst_50 : f32 to vector<48x128xf32>
    %57 = arith.maximumf %55, %56 : vector<48x128xf32>
    %58 = vector.extract_strided_slice %57 {offsets = [0, 0], sizes = [39, 128], strides = [1, 1]} : vector<48x128xf32> to vector<39x128xf32>
    %59 = vector.extract_strided_slice %57 {offsets = [1, 0], sizes = [39, 128], strides = [1, 1]} : vector<48x128xf32> to vector<39x128xf32>
    %60 = arith.maximumf %58, %59 : vector<39x128xf32>
    %61 = vector.extract_strided_slice %57 {offsets = [8, 0], sizes = [39, 128], strides = [1, 1]} : vector<48x128xf32> to vector<39x128xf32>
    %62 = vector.extract_strided_slice %57 {offsets = [9, 0], sizes = [39, 128], strides = [1, 1]} : vector<48x128xf32> to vector<39x128xf32>
    %63 = arith.maximumf %61, %62 : vector<39x128xf32>
    %64 = arith.maximumf %60, %63 : vector<39x128xf32>
    %c0_51 = arith.constant 0 : index
    %c0_52 = arith.constant 0 : index
    %c0_53 = arith.constant 0 : index
    %65 = vector.load %arg4[%c0_51, %c0_52, %c0_53] : memref<1x39x128xf32, #tpu.memory_space<vmem>>, vector<1x39x128xf32>
    %66 = vector.shape_cast %65 : vector<1x39x128xf32> to vector<39x128xf32>
    %67 = vector.shape_cast %64 : vector<39x128xf32> to vector<1x39x128xf32>
    tpu.vector_store %arg4[%c0_51, %c0_52, %c0_53], %67 {strides = array<i32>} : memref<1x39x128xf32, #tpu.memory_space<vmem>>, vector<1x39x128xf32>,
    return
  }
  func.func @transform_0(%arg0: i32) -> (i32, i32, i32) {
    %c0_i32 = arith.constant 0 : i32
    %c0_i32_0 = arith.constant 0 : i32
    %c0_i32_1 = arith.constant 0 : i32
    return %arg0, %c0_i32, %c0_i32_0 : i32, i32, i32
  }
  func.func @transform_1(%arg0: i32) -> (i32, i32, i32) {
    %c0_i32 = arith.constant 0 : i32
    %c0_i32_0 = arith.constant 0 : i32
    %c0_i32_1 = arith.constant 0 : i32
    %c0_i32_2 = arith.constant 0 : i32
    return %c0_i32, %c0_i32_0, %c0_i32_1 : i32, i32, i32
  }
  func.func @transform_2(%arg0: i32) -> (i32, i32) {
    %c0_i32 = arith.constant 0 : i32
    %c0_i32_0 = arith.constant 0 : i32
    %c0_i32_1 = arith.constant 0 : i32
    return %c0_i32, %c0_i32_0 : i32, i32
  }
  func.func @transform_3(%arg0: i32) -> (i32, i32, i32) {
    %c0_i32 = arith.constant 0 : i32
    %c0_i32_0 = arith.constant 0 : i32
    %c0_i32_1 = arith.constant 0 : i32
    return %arg0, %c0_i32, %c0_i32_0 : i32, i32, i32
  }
}

module attributes {stable_mosaic.version = 11 : i64} {
  func.func @_dense_head_kernel(%arg0: memref<2x1152xf32, #tpu.memory_space<vmem>>, %arg1: memref<1152x128xf32, #tpu.memory_space<vmem>>, %arg2: memref<1x128xf32, #tpu.memory_space<vmem>>, %arg3: memref<128x128xf32, #tpu.memory_space<vmem>>, %arg4: memref<1x128xf32, #tpu.memory_space<vmem>>, %arg5: memref<2x128xf32, #tpu.memory_space<vmem>>) attributes {dimension_semantics = [], scalar_prefetch = 0 : i64, scratch_operands = 0 : i64, tpu.core_type = #tpu.core_type<tc>} {
    %c0 = arith.constant 0 : index
    %c0_0 = arith.constant 0 : index
    %0 = vector.load %arg0[%c0, %c0_0] : memref<2x1152xf32, #tpu.memory_space<vmem>>, vector<2x1152xf32>
    %c0_1 = arith.constant 0 : index
    %c0_2 = arith.constant 0 : index
    %1 = vector.load %arg1[%c0_1, %c0_2] : memref<1152x128xf32, #tpu.memory_space<vmem>>, vector<1152x128xf32>
    %cst = arith.constant dense<0.000000e+00> : vector<2x128xf32>
    %2 = tpu.matmul %0, %1, %cst {dimension_numbers = #tpu.dot_dimension_numbers<[1], [0], [0], [1], [0, 0, 1, 1], [], []>} : vector<2x1152xf32>, vector<1152x128xf32>, vector<2x128xf32> -> vector<2x128xf32>
    %c0_3 = arith.constant 0 : index
    %c0_4 = arith.constant 0 : index
    %3 = vector.load %arg2[%c0_3, %c0_4] : memref<1x128xf32, #tpu.memory_space<vmem>>, vector<1x128xf32>
    %4 = vector.broadcast %3 : vector<1x128xf32> to vector<2x128xf32>
    %5 = arith.addf %2, %4 : vector<2x128xf32>
    %cst_5 = arith.constant 0.000000e+00 : f32
    %6 = vector.broadcast %cst_5 : f32 to vector<2x128xf32>
    %7 = arith.maximumf %5, %6 : vector<2x128xf32>
    %c0_6 = arith.constant 0 : index
    %c0_7 = arith.constant 0 : index
    %8 = vector.load %arg3[%c0_6, %c0_7] : memref<128x128xf32, #tpu.memory_space<vmem>>, vector<128x128xf32>
    %cst_8 = arith.constant dense<0.000000e+00> : vector<2x128xf32>
    %9 = tpu.matmul %7, %8, %cst_8 {dimension_numbers = #tpu.dot_dimension_numbers<[1], [0], [0], [1], [0, 0, 1, 1], [], []>} : vector<2x128xf32>, vector<128x128xf32>, vector<2x128xf32> -> vector<2x128xf32>
    %c0_9 = arith.constant 0 : index
    %c0_10 = arith.constant 0 : index
    %10 = vector.load %arg4[%c0_9, %c0_10] : memref<1x128xf32, #tpu.memory_space<vmem>>, vector<1x128xf32>
    %11 = vector.broadcast %10 : vector<1x128xf32> to vector<2x128xf32>
    %12 = arith.addf %9, %11 : vector<2x128xf32>
    %c0_11 = arith.constant 0 : index
    %c0_12 = arith.constant 0 : index
    %13 = vector.load %arg5[%c0_11, %c0_12] : memref<2x128xf32, #tpu.memory_space<vmem>>, vector<2x128xf32>
    tpu.vector_store %arg5[%c0_11, %c0_12], %12 {strides = array<i32>} : memref<2x128xf32, #tpu.memory_space<vmem>>, vector<2x128xf32>,
    return
  }
}

</mosaic_0001>

<bundles_post_ra>
// kernel: net_forward.7
= control target key start
LH: loop header
LB: loop body
LE: loop exit
PB: predicated region body
PF: predicated region fallthrough
CT: control target
= control target key end

     0   :  { %v1141_v43 = vmov 1983009808   ;;  %v182_v45 = vlaneseq  ;;  %s1715_s0 = inlined_call_operand.vmem [shape: f32[2,1152], index: 0, kind: input, shape index: {}]   ;;  %s1716_s1 = inlined_call_operand.vmem [shape: f32[1152,128], index: 1, kind: input, shape index: {}]   ;;  %s1717_s2 = inlined_call_operand.vmem [shape: f32[1,128], index: 2, kind: input, shape index: {}]   ;;  %s1718_s3 = inlined_call_operand.vmem [shape: f32[128,128], index: 3, kind: input, shape index: {}]   ;;  %s1719_s4 = inlined_call_operand.vmem [shape: f32[1,128], index: 4, kind: input, shape index: {}]   ;;  %s1720_s5 = inlined_call_operand.hbm [shape: f32[2,128], index: 5, kind: output, shape index: {}]  }
   0x1   :  { %v40_v0 = vld [vmem:[%s1716_s1 + $0x80] sm:$0xff]  ;;  %v41_v1 = vld [vmem:[%s1716_s1 + $0x88] sm:$0xff]  ;;  %v42_v11 = vld [vmem:[%s1716_s1 + $0x90] sm:$0xff]  ;;  %v180_v44 = vunpack.c.l.s4 %v1141_v43 }
   0x2   :  { %v24_v2 = vld [vmem:[%s1716_s1] sm:$0xff]  ;;  %v934_v3 = vpack.c.bf16 %v41_v1, %v40_v0  ;;  %v25_v4 = vld [vmem:[%s1716_s1 + $0x8] sm:$0xff]  ;;  %v43_v13 = vld [vmem:[%s1716_s1 + $0x98] sm:$0xff]  ;;  %v183_v60 = vshrl.u32 %v182_v45, 7 }
   0x3   :  { %v72_v5 = vld [vmem:[%s1716_s1 + $0x180] sm:$0xff]  ;;  %v73_v6 = vld [vmem:[%s1716_s1 + $0x188] sm:$0xff]  ;;  %v936_v7 = vpack.c.bf16 %v25_v4, %v24_v2  ;;  %v26_v14 = vld [vmem:[%s1716_s1 + $0x10] sm:$0xff]  ;;  %v938_v16 = vpack.c.bf16 %v43_v13, %v42_v11  ;;  %v181_v59 = vunpack.c.0.s8 %v180_v44 }
   0x4   :  { %v966_v8 = vpack.c.bf16 %v73_v6, %v72_v5  ;;  %v56_v9 = vld [vmem:[%s1716_s1 + $0x100] sm:$0xff]  ;;  %v57_v10 = vld [vmem:[%s1716_s1 + $0x108] sm:$0xff]  ;;  %935 = vmatprep.subr.bf16.mxu0 %v934_v3  ;;  %v27_v15 = vld [vmem:[%s1716_s1 + $0x18] sm:$0xff] }
   0x5   :  { %v968_v12 = vpack.c.bf16 %v57_v10, %v56_v9  ;;  %937 = vmatpush3.bf16.msra.mxu0 %v936_v7  ;;  %v940_v17 = vpack.c.bf16 %v27_v15, %v26_v14  ;;  %v74_v18 = vld [vmem:[%s1716_s1 + $0x190] sm:$0xff]  ;;  %v75_v19 = vld [vmem:[%s1716_s1 + $0x198] sm:$0xff]  ;;  %v44_v23 = vld [vmem:[%s1716_s1 + $0xa0] sm:$0xff]  ;;  %v1320_v10 = vsub.s32 %v181_v59, %v183_v60 }
   0x6   :  { %967 = vmatprep.subr.bf16.mxu1 %v966_v8  ;;  %v58_v20 = vld [vmem:[%s1716_s1 + $0x110] sm:$0xff]  ;;  %v970_v21 = vpack.c.bf16 %v75_v19, %v74_v18  ;;  %v59_v22 = vld [vmem:[%s1716_s1 + $0x118] sm:$0xff]  ;;  %v45_v24 = vld [vmem:[%s1716_s1 + $0xa8] sm:$0xff]  ;;  %939 = vmatprep.subr.bf16.mxu0 %v938_v16 }
   0x7   :  { %969 = vmatpush3.bf16.msra.mxu1 %v968_v12  ;;  %v972_v25 = vpack.c.bf16 %v59_v22, %v58_v20  ;;  %v942_v26 = vpack.c.bf16 %v45_v24, %v44_v23  ;;  %v28_v27 = vld [vmem:[%s1716_s1 + $0x20] sm:$0xff]  ;;  %v29_v28 = vld [vmem:[%s1716_s1 + $0x28] sm:$0xff]  ;;  %v46_v35 = vld [vmem:[%s1716_s1 + $0xb0] sm:$0xff] }
   0x8   :  { %v76_v29 = vld [vmem:[%s1716_s1 + $0x1a0] sm:$0xff]  ;;  %971 = vmatprep.subr.bf16.mxu1 %v970_v21  ;;  %v77_v30 = vld [vmem:[%s1716_s1 + $0x1a8] sm:$0xff]  ;;  %v944_v33 = vpack.c.bf16 %v29_v28, %v28_v27  ;;  %v47_v36 = vld [vmem:[%s1716_s1 + $0xb8] sm:$0xff] }
   0x9   :  { %v60_v31 = vld [vmem:[%s1716_s1 + $0x120] sm:$0xff]  ;;  %v61_v32 = vld [vmem:[%s1716_s1 + $0x128] sm:$0xff]  ;;  %941 = vmatpush3.bf16.msra.mxu0 %v940_v17  ;;  %v974_v34 = vpack.c.bf16 %v77_v30, %v76_v29  ;;  %v30_v37 = vld [vmem:[%s1716_s1 + $0x30] sm:$0xff]  ;;  %v946_v39 = vpack.c.bf16 %v47_v36, %v46_v35 }
   0xa   :  { %943 = vmatprep.subr.bf16.mxu0 %v942_v26  ;;  %v976_v38 = vpack.c.bf16 %v61_v32, %v60_v31  ;;  %v31_v40 = vld [vmem:[%s1716_s1 + $0x38] sm:$0xff]  ;;  %v78_v41 = vld [vmem:[%s1716_s1 + $0x1b0] sm:$0xff]  ;;  %v48_v49 = vld [vmem:[%s1716_s1 + $0xc0] sm:$0xff] }
   0xb   :  { %973 = vmatpush3.bf16.msra.mxu1 %v972_v25  ;;  %v79_v42 = vld [vmem:[%s1716_s1 + $0x1b8] sm:$0xff]  ;;  %v62_v47 = vld [vmem:[%s1716_s1 + $0x130] sm:$0xff]  ;;  %v49_v50 = vld [vmem:[%s1716_s1 + $0xc8] sm:$0xff]  ;;  %v948_v51 = vpack.c.bf16 %v31_v40, %v30_v37 }
   0xc   :  { %975 = vmatprep.subr.bf16.mxu1 %v974_v34  ;;  %v978_v46 = vpack.c.bf16 %v79_v42, %v78_v41  ;;  %v63_v48 = vld [vmem:[%s1716_s1 + $0x138] sm:$0xff]  ;;  %v80_v52 = vld [vmem:[%s1716_s1 + $0x1c0] sm:$0xff]  ;;  %v81_v53 = vld [vmem:[%s1716_s1 + $0x1c8] sm:$0xff]  ;;  %v950_v55 = vpack.c.bf16 %v49_v50, %v48_v49 }
   0xd   :  { %945 = vmatpush3.bf16.msra.mxu0 %v944_v33  ;;  %v980_v54 = vpack.c.bf16 %v63_v48, %v62_v47  ;;  %v32_v56 = vld [vmem:[%s1716_s1 + $0x40] sm:$0xff]  ;;  %v33_v57 = vld [vmem:[%s1716_s1 + $0x48] sm:$0xff]  ;;  %v982_v61 = vpack.c.bf16 %v81_v53, %v80_v52  ;;  %v50_v63 = vld [vmem:[%s1716_s1 + $0xd0] sm:$0xff] }
   0xe   :  { %947 = vmatprep.subr.bf16.mxu0 %v946_v39  ;;  %v64_v58 = vld [vmem:[%s1716_s1 + $0x140] sm:$0xff]  ;;  %v65_v62 = vld [vmem:[%s1716_s1 + $0x148] sm:$0xff]  ;;  %v51_v0 = vld [vmem:[%s1716_s1 + $0xd8] sm:$0xff]  ;;  %v952_v3 = vpack.c.bf16 %v33_v57, %v32_v56 }
   0xf   :  { %977 = vmatpush3.bf16.msra.mxu1 %v976_v38  ;;  %v82_v1 = vld [vmem:[%s1716_s1 + $0x1d0] sm:$0xff]  ;;  %v83_v2 = vld [vmem:[%s1716_s1 + $0x1d8] sm:$0xff]  ;;  %v984_v5 = vpack.c.bf16 %v65_v62, %v64_v58  ;;  %v954_v6 = vpack.c.bf16 %v51_v0, %v50_v63  ;;  %v52_v12 = vld [vmem:[%s1716_s1 + $0xe0] sm:$0xff] }
  0x10   :  { %979 = vmatprep.subr.bf16.mxu1 %v978_v46  ;;  %v34_v4 = vld [vmem:[%s1716_s1 + $0x50] sm:$0xff]  ;;  %v35_v7 = vld [vmem:[%s1716_s1 + $0x58] sm:$0xff]  ;;  %v986_v11 = vpack.c.bf16 %v83_v2, %v82_v1  ;;  %v53_v13 = vld [vmem:[%s1716_s1 + $0xe8] sm:$0xff] }
  0x11   :  { %949 = vmatpush3.bf16.msra.mxu0 %v948_v51  ;;  %v66_v8 = vld [vmem:[%s1716_s1 + $0x150] sm:$0xff]  ;;  %v67_v9 = vld [vmem:[%s1716_s1 + $0x158] sm:$0xff]  ;;  %v84_v14 = vld [vmem:[%s1716_s1 + $0x1e0] sm:$0xff]  ;;  %v956_v16 = vpack.c.bf16 %v35_v7, %v34_v4  ;;  %v958_v19 = vpack.c.bf16 %v53_v13, %v52_v12 }
  0x12   :  { %951 = vmatprep.subr.bf16.mxu0 %v950_v55  ;;  %v85_v15 = vld [vmem:[%s1716_s1 + $0x1e8] sm:$0xff]  ;;  %v988_v17 = vpack.c.bf16 %v67_v9, %v66_v8  ;;  %v21_v18 = vld [vmem:[%s1715_s0] sm:$0xff]  ;;  %v54_v27 = vld [vmem:[%s1716_s1 + $0xf0] sm:$0xff] }
  0x13   :  { %981 = vmatpush3.bf16.msra.mxu1 %v980_v54  ;;  %v36_v20 = vld [vmem:[%s1716_s1 + $0x60] sm:$0xff]  ;;  %v37_v21 = vld [vmem:[%s1716_s1 + $0x68] sm:$0xff]  ;;  %v185_v23 = vrot.slane %v21_v18, %v1320_v10  ;;  %v178_v24 = vcombine.high %v21_v18, %v21_v18  ;;  %v990_v25 = vpack.c.bf16 %v85_v15, %v84_v14  ;;  %v55_v28 = vld [vmem:[%s1716_s1 + $0xf8] sm:$0xff] }
  0x14   :  { %983 = vmatprep.subr.bf16.mxu1 %v982_v61  ;;  %v68_v22 = vld [vmem:[%s1716_s1 + $0x160] sm:$0xff]  ;;  %v69_v26 = vld [vmem:[%s1716_s1 + $0x168] sm:$0xff]  ;;  %v86_v29 = vld [vmem:[%s1716_s1 + $0x1f0] sm:$0xff]  ;;  %v960_v33 = vpack.c.bf16 %v37_v21, %v36_v20  ;;  %v962_v35 = vpack.c.bf16 %v55_v28, %v54_v27 }
  0x15   :  { %953 = vmatpush3.bf16.msra.mxu0 %v952_v3  ;;  %v87_v30 = vld [vmem:[%s1716_s1 + $0x1f8] sm:$0xff]  ;;  %v193_v31 = vcombine.high %v185_v23, %v185_v23  ;;  %v192_v32 = vrot.slane %v178_v24, %v1320_v10  ;;  %v992_v34 = vpack.c.bf16 %v69_v26, %v68_v22  ;;  %v38_v36 = vld [vmem:[%s1716_s1 + $0x70] sm:$0xff]  ;;  %v104_v42 = vld [vmem:[%s1716_s1 + $0x280] sm:$0xff] }
  0x16   :  { %955 = vmatprep.subr.bf16.mxu0 %v954_v6  ;;  %v39_v37 = vld [vmem:[%s1716_s1 + $0x78] sm:$0xff]  ;;  %v70_v38 = vld [vmem:[%s1716_s1 + $0x170] sm:$0xff]  ;;  %v994_v40 = vpack.c.bf16 %v87_v30, %v86_v29  ;;  %v105_v43 = vld [vmem:[%s1716_s1 + $0x288] sm:$0xff] }
  0x17   :  { %985 = vmatpush3.bf16.msra.mxu1 %v984_v5  ;;  %v194_v39 = vcombine.high %v192_v32, %v192_v32  ;;  %292 = vmatprep.mubr.f32.mxu0 %v193_v31  ;;  %v71_v41 = vld [vmem:[%s1716_s1 + $0x178] sm:$0xff]  ;;  %v136_v44 = vld [vmem:[%s1716_s1 + $0x380] sm:$0xff]  ;;  %v137_v45 = vld [vmem:[%s1716_s1 + $0x388] sm:$0xff]  ;;  %v964_v46 = vpack.c.bf16 %v39_v37, %v38_v36  ;;  %v998_v48 = vpack.c.bf16 %v105_v43, %v104_v42 }
  0x18   :  { %987 = vmatprep.subr.bf16.mxu1 %v986_v11  ;;  %v996_v47 = vpack.c.bf16 %v71_v41, %v70_v38  ;;  %v88_v49 = vld [vmem:[%s1716_s1 + $0x200] sm:$0xff]  ;;  %v89_v50 = vld [vmem:[%s1716_s1 + $0x208] sm:$0xff]  ;;  %v1030_v52 = vpack.c.bf16 %v137_v45, %v136_v44  ;;  %v106_v54 = vld [vmem:[%s1716_s1 + $0x290] sm:$0xff] }
  0x19   :  { %957 = vmatpush3.bf16.msra.mxu0 %v956_v16  ;;  %362 = vmatprep.mubr.f32.mxu1 %v194_v39  ;;  %v120_v51 = vld [vmem:[%s1716_s1 + $0x300] sm:$0xff]  ;;  %v121_v53 = vld [vmem:[%s1716_s1 + $0x308] sm:$0xff]  ;;  %v107_v55 = vld [vmem:[%s1716_s1 + $0x298] sm:$0xff]  ;;  %v1000_v58 = vpack.c.bf16 %v89_v50, %v88_v49 }
  0x1a   :  { %959 = vmatprep.subr.bf16.mxu0 %v958_v19  ;;  %v138_v56 = vld [vmem:[%s1716_s1 + $0x390] sm:$0xff]  ;;  %v139_v57 = vld [vmem:[%s1716_s1 + $0x398] sm:$0xff]  ;;  %v1032_v59 = vpack.c.bf16 %v121_v53, %v120_v51  ;;  %v1002_v60 = vpack.c.bf16 %v107_v55, %v106_v54  ;;  %v108_v2 = vld [vmem:[%s1716_s1 + $0x2a0] sm:$0xff] }
  0x1b   :  { %989 = vmatpush3.bf16.msra.mxu1 %v988_v17  ;;  %v90_v61 = vld [vmem:[%s1716_s1 + $0x210] sm:$0xff]  ;;  %v91_v62 = vld [vmem:[%s1716_s1 + $0x218] sm:$0xff]  ;;  %v1034_v0 = vpack.c.bf16 %v139_v57, %v138_v56  ;;  %v109_v3 = vld [vmem:[%s1716_s1 + $0x2a8] sm:$0xff] }
  0x1c   :  { %991 = vmatprep.subr.bf16.mxu1 %v990_v25  ;;  %v122_v63 = vld [vmem:[%s1716_s1 + $0x310] sm:$0xff]  ;;  %v123_v1 = vld [vmem:[%s1716_s1 + $0x318] sm:$0xff]  ;;  %v140_v4 = vld [vmem:[%s1716_s1 + $0x3a0] sm:$0xff]  ;;  %v1004_v6 = vpack.c.bf16 %v91_v62, %v90_v61  ;;  %v1006_v8 = vpack.c.bf16 %v109_v3, %v108_v2 }
  0x1d   :  { %961 = vmatpush3.bf16.msra.mxu0 %v960_v33  ;;  %v141_v5 = vld [vmem:[%s1716_s1 + $0x3a8] sm:$0xff]  ;;  %v1036_v7 = vpack.c.bf16 %v123_v1, %v122_v63  ;;  %v92_v9 = vld [vmem:[%s1716_s1 + $0x220] sm:$0xff]  ;;  %v110_v15 = vld [vmem:[%s1716_s1 + $0x2b0] sm:$0xff] }
  0x1e   :  { %963 = vmatprep.subr.bf16.mxu0 %v962_v35  ;;  %v93_v11 = vld [vmem:[%s1716_s1 + $0x228] sm:$0xff]  ;;  %v124_v12 = vld [vmem:[%s1716_s1 + $0x320] sm:$0xff]  ;;  %v1038_v13 = vpack.c.bf16 %v141_v5, %v140_v4  ;;  %v111_v16 = vld [vmem:[%s1716_s1 + $0x2b8] sm:$0xff] }
  0x1f   :  { %993 = vmatpush3.bf16.msra.mxu1 %v992_v34  ;;  %v125_v14 = vld [vmem:[%s1716_s1 + $0x328] sm:$0xff]  ;;  %v142_v17 = vld [vmem:[%s1716_s1 + $0x3b0] sm:$0xff]  ;;  %v143_v18 = vld [vmem:[%s1716_s1 + $0x3b8] sm:$0xff]  ;;  %v1008_v19 = vpack.c.bf16 %v93_v11, %v92_v9  ;;  %v1010_v22 = vpack.c.bf16 %v111_v16, %v110_v15 }
  0x20   :  { %995 = vmatprep.subr.bf16.mxu1 %v994_v40  ;;  %v94_v20 = vld [vmem:[%s1716_s1 + $0x230] sm:$0xff]  ;;  %v1040_v21 = vpack.c.bf16 %v125_v14, %v124_v12  ;;  %v127_v25 = vld [vmem:[%s1716_s1 + $0x338] sm:$0xff]  ;;  %v1042_v26 = vpack.c.bf16 %v143_v18, %v142_v17  ;;  %v112_v27 = vld [vmem:[%s1716_s1 + $0x2c0] sm:$0xff] }
  0x21   :  { %965 = vmatpush3.bf16.msra.mxu0 %v964_v46  ;;  %v126_v24 = vld [vmem:[%s1716_s1 + $0x330] sm:$0xff]  ;;  %v113_v28 = vld [vmem:[%s1716_s1 + $0x2c8] sm:$0xff]  ;;  %v144_v30 = vld [vmem:[%s1716_s1 + $0x3c0] sm:$0xff] }
  0x22   :  { %999 = vmatprep.subr.bf16.mxu0 %v998_v48  ;;  %v22_v29 = vld [vmem:[%s1715_s0 + $0x8] sm:$0xff]  ;;  %v1044_v35 = vpack.c.bf16 %v127_v25, %v126_v24  ;;  %v1014_v36 = vpack.c.bf16 %v113_v28, %v112_v27  ;;  %v96_v37 = vld [vmem:[%s1716_s1 + $0x240] sm:$0xff]  ;;  %v114_v44 = vld [vmem:[%s1716_s1 + $0x2d0] sm:$0xff] }
  0x23   :  { %997 = vmatpush3.bf16.msra.mxu1 %v996_v47  ;;  %v145_v31 = vld [vmem:[%s1716_s1 + $0x3c8] sm:$0xff]  ;;  %v195_v33 = vcombine.high %v22_v29, %v22_v29  ;;  %v128_v39 = vld [vmem:[%s1716_s1 + $0x340] sm:$0xff]  ;;  %v115_v45 = vld [vmem:[%s1716_s1 + $0x2d8] sm:$0xff] }
  0x24   :  { %1031 = vmatprep.subr.bf16.mxu1 %v1030_v52  ;;  %293 = vmatmul.mubr.f32.vlgmr.msra.gmra.mrb[0].mxu0 %v185_v23  ;;  %v95_v23 = vld [vmem:[%s1716_s1 + $0x238] sm:$0xff]  ;;  %v97_v38 = vld [vmem:[%s1716_s1 + $0x248] sm:$0xff]  ;;  %v1046_v42 = vpack.c.bf16 %v145_v31, %v144_v30  ;;  %v146_v46 = vld [vmem:[%s1716_s1 + $0x3d0] sm:$0xff]  ;;  %v1018_v51 = vpack.c.bf16 %v115_v45, %v114_v44 }
  0x25   :  { %1001 = vmatpush3.bf16.msra.mxu0 %v1000_v58  ;;  %v1012_v34 = vpack.c.bf16 %v95_v23, %v94_v20  ;;  %v1501_v41 = vrot.slane %v195_v33, %v1320_v10  ;;  %v129_v43 = vld [vmem:[%s1716_s1 + $0x348] sm:$0xff]  ;;  %v1016_v48 = vpack.c.bf16 %v97_v38, %v96_v37  ;;  %v98_v49 = vld [vmem:[%s1716_s1 + $0x250] sm:$0xff]  ;;  %v99_v52 = vld [vmem:[%s1716_s1 + $0x258] sm:$0xff] }
  0x26   :  { %363 = vmatmul.mubr.f32.vlgmr.msra.gmra.mrb[0].mxu1 %v192_v32  ;;  %1003 = vmatprep.subr.bf16.mxu0 %v1002_v60  ;;  %v1487_v32 = vrot.slane %v22_v29, %v1320_v10  ;;  %v147_v10 = vld [vmem:[%s1716_s1 + $0x3d8] sm:$0xff]  ;;  %v1048_v50 = vpack.c.bf16 %v129_v43, %v128_v39  ;;  %v130_v53 = vld [vmem:[%s1716_s1 + $0x350] sm:$0xff] }
  0x27   :  { %1033 = vmatpush3.bf16.msra.mxu1 %v1032_v59  ;;  %v211_v47 = vcombine.high %v1501_v41, %v1501_v41 }
  0x28   :  { %1035 = vmatprep.subr.bf16.mxu1 %v1034_v0  ;;  %v210_v40 = vcombine.high %v1487_v32, %v1487_v32 }
  0x29   :  { %1005 = vmatpush3.bf16.msra.mxu0 %v1004_v6 }
  0x2a   :  { %1007 = vmatprep.subr.bf16.mxu0 %v1006_v8  ;;  %432 = vmatprep.mubr.f32.mxu0 %v210_v40 }
  0x2b   :  { %1037 = vmatpush3.bf16.msra.mxu1 %v1036_v7 }
  0x2c   :  { %1039 = vmatprep.subr.bf16.mxu1 %v1038_v13 }
  0x2d   :  { %1009 = vmatpush3.bf16.msra.mxu0 %v1008_v19 }
  0x2e   :  { %1011 = vmatprep.subr.bf16.mxu0 %v1010_v22 }
  0x2f   :  { %1041 = vmatpush3.bf16.msra.mxu1 %v1040_v21 }
  0x30   :  { %1043 = vmatprep.subr.bf16.mxu1 %v1042_v26 }
  0x31   :  { %1013 = vmatpush3.bf16.msra.mxu0 %v1012_v34 }
  0x32   :  { %1015 = vmatprep.subr.bf16.mxu0 %v1014_v36 }
  0x33   :  { %1045 = vmatpush3.bf16.msra.mxu1 %v1044_v35 }
  0x34   :  { %10 = vsyncpa [#allocation3], 0  ;;  %1047 = vmatprep.subr.bf16.mxu1 %v1046_v42  ;;  %v1050_v54 = vpack.c.bf16 %v147_v10, %v146_v46  ;;  %v131_v55 = vld [vmem:[%s1716_s1 + $0x358] sm:$0xff]  ;;  %v116_v56 = vld [vmem:[%s1716_s1 + $0x2e0] sm:$0xff]  ;;  %502 = vmatprep.mubr.f32.mxu1 %v211_v47  ;;  %v1020_v60 = vpack.c.bf16 %v99_v52, %v98_v49  ;;  %v1142_v22 = vmov 0.0|0.0   ;;  %vm1143_vm0 = vmmov 0  }
  0x35   :  { %v117_v57 = vld [vmem:[%s1716_s1 + $0x2e8] sm:$0xff]  ;;  %v148_v58 = vld [vmem:[%s1716_s1 + $0x3e0] sm:$0xff]  ;;  %1017 = vmatpush3.bf16.msra.mxu0 %v1016_v48  ;;  %v1052_v61 = vpack.c.bf16 %v131_v55, %v130_v53  ;;  %v118_v4 = vld [vmem:[%s1716_s1 + $0x2f0] sm:$0xff]  ;;  %v1144_v28 = vmov 0.0   ;;  %s1145_s18 = smov [#allocation2]  }
  0x36   :  { %v149_v59 = vld [vmem:[%s1716_s1 + $0x3e8] sm:$0xff]  ;;  %1019 = vmatprep.subr.bf16.mxu0 %v1018_v51  ;;  %v1022_v62 = vpack.c.bf16 %v117_v57, %v116_v56  ;;  %v100_v63 = vld [vmem:[%s1716_s1 + $0x260] sm:$0xff]  ;;  %v119_v5 = vld [vmem:[%s1716_s1 + $0x2f8] sm:$0xff] }
  0x37   :  { %1049 = vmatpush3.bf16.msra.mxu1 %v1048_v50  ;;  %v101_v0 = vld [vmem:[%s1716_s1 + $0x268] sm:$0xff]  ;;  %v132_v1 = vld [vmem:[%s1716_s1 + $0x360] sm:$0xff]  ;;  %v1054_v2 = vpack.c.bf16 %v149_v59, %v148_v58  ;;  %v150_v6 = vld [vmem:[%s1716_s1 + $0x3f0] sm:$0xff]  ;;  %v1026_v11 = vpack.c.bf16 %v119_v5, %v118_v4 }
  0x38   :  { %1051 = vmatprep.subr.bf16.mxu1 %v1050_v54  ;;  %v133_v3 = vld [vmem:[%s1716_s1 + $0x368] sm:$0xff]  ;;  %v151_v7 = vld [vmem:[%s1716_s1 + $0x3f8] sm:$0xff]  ;;  %v1024_v8 = vpack.c.bf16 %v101_v0, %v100_v63  ;;  %v102_v12 = vld [vmem:[%s1716_s1 + $0x270] sm:$0xff] }
  0x39   :  { %1021 = vmatpush3.bf16.msra.mxu0 %v1020_v60  ;;  %v1056_v9 = vpack.c.bf16 %v133_v3, %v132_v1  ;;  %v103_v13 = vld [vmem:[%s1716_s1 + $0x278] sm:$0xff]  ;;  %v1058_v14 = vpack.c.bf16 %v151_v7, %v150_v6  ;;  %v134_v15 = vld [vmem:[%s1716_s1 + $0x370] sm:$0xff]  ;;  %v152_v19 = vld [vmem:[%s1716_s1 + $0x400] sm:$0xff] }
  0x3a   :  { %1023 = vmatprep.subr.bf16.mxu0 %v1022_v62  ;;  %v135_v16 = vld [vmem:[%s1716_s1 + $0x378] sm:$0xff]  ;;  %v1028_v17 = vpack.c.bf16 %v103_v13, %v102_v12  ;;  %v153_v20 = vld [vmem:[%s1716_s1 + $0x408] sm:$0xff]  ;;  %v154_v23 = vld [vmem:[%s1716_s1 + $0x410] sm:$0xff] }
  0x3b   :  { %1053 = vmatpush3.bf16.msra.mxu1 %v1052_v61  ;;  %v1060_v18 = vpack.c.bf16 %v135_v16, %v134_v15  ;;  %v1063_v21 = vpack.c.bf16 %v153_v20, %v152_v19  ;;  %v155_v24 = vld [vmem:[%s1716_s1 + $0x418] sm:$0xff]  ;;  %v156_v26 = vld [vmem:[%s1716_s1 + $0x420] sm:$0xff]  ;;  %v157_v27 = vld [vmem:[%s1716_s1 + $0x428] sm:$0xff] }
  0x3c   :  { %1055 = vmatprep.subr.bf16.mxu1 %v1054_v2  ;;  %v1066_v25 = vpack.c.bf16 %v155_v24, %v154_v23  ;;  %v1069_v29 = vpack.c.bf16 %v157_v27, %v156_v26  ;;  %v158_v30 = vld [vmem:[%s1716_s1 + $0x430] sm:$0xff]  ;;  %v159_v31 = vld [vmem:[%s1716_s1 + $0x438] sm:$0xff]  ;;  %v160_v33 = vld [vmem:[%s1716_s1 + $0x440] sm:$0xff] }
  0x3d   :  { %1025 = vmatpush3.bf16.msra.mxu0 %v1024_v8  ;;  %v161_v34 = vld [vmem:[%s1716_s1 + $0x448] sm:$0xff]  ;;  %v162_v36 = vld [vmem:[%s1716_s1 + $0x450] sm:$0xff]  ;;  %v163_v37 = vld [vmem:[%s1716_s1 + $0x458] sm:$0xff] }
  0x3e   :  { %1027 = vmatprep.subr.bf16.mxu0 %v1026_v11  ;;  %v1075_v35 = vpack.c.bf16 %v161_v34, %v160_v33  ;;  %v1078_v38 = vpack.c.bf16 %v163_v37, %v162_v36  ;;  %v164_v39 = vld [vmem:[%s1716_s1 + $0x460] sm:$0xff]  ;;  %v165_v40 = vld [vmem:[%s1716_s1 + $0x468] sm:$0xff]  ;;  %v166_v42 = vld [vmem:[%s1716_s1 + $0x470] sm:$0xff] }
  0x3f   :  { %1057 = vmatpush3.bf16.msra.mxu1 %v1056_v9  ;;  %v167_v43 = vld [vmem:[%s1716_s1 + $0x478] sm:$0xff]  ;;  %v688_v45 = vld.sshfl [vmem:[%s1715_s0 + $0x10] sm:$0x3 pattern:$0x76325410]  ;;  %v579_v46 = vld [vmem:[%s1718_s3] sm:$0xff] }
  0x40   :  { %1059 = vmatprep.subr.bf16.mxu1 %v1058_v14  ;;  %v1084_v44 = vpack.c.bf16 %v167_v43, %v166_v42  ;;  %v580_v10 = vld [vmem:[%s1718_s3 + $0x8] sm:$0xff]  ;;  %v581_v48 = vld [vmem:[%s1718_s3 + $0x10] sm:$0xff]  ;;  %v582_v49 = vld [vmem:[%s1718_s3 + $0x18] sm:$0xff]  ;;  %s679_s0 = sshll.u32 %s1145_s18, 4  ;;  %s680_s0 = int_to_ptr.vmem [resolvable:$true] %s679_s0 }
  0x41   :  { %1029 = vmatpush3.bf16.msra.mxu0 %v1028_v17  ;;  %v1087_v47 = vpack.c.bf16 %v580_v10, %v579_v46  ;;  %v1090_v50 = vpack.c.bf16 %v582_v49, %v581_v48  ;;  %v583_v51 = vld [vmem:[%s1718_s3 + $0x20] sm:$0xff]  ;;  %v584_v52 = vld [vmem:[%s1718_s3 + $0x28] sm:$0xff]  ;;  %v585_v54 = vld [vmem:[%s1718_s3 + $0x30] sm:$0xff]  ;;  %s1117_s19 = scalar_lea.vmem %s680_s0, 32  ;;  %p1122_p1 = scmp.lt.s32.totalorder %s680_s0, %s680_s0 }
  0x42   :  { %1062 = vmatprep.subr.bf16.mxu0 %v1142_v22  ;;  %v1093_v53 = vpack.c.bf16 %v584_v52, %v583_v51  ;;  %v586_v55 = vld [vmem:[%s1718_s3 + $0x38] sm:$0xff]  ;;  %v587_v57 = vld [vmem:[%s1718_s3 + $0x40] sm:$0xff]  ;;  %v588_v58 = vld [vmem:[%s1718_s3 + $0x48] sm:$0xff]  ;;  %p1118_p0 = scmp.ne.s32.totalorder %s680_s0, %s1117_s19  ;;  %p1123_p2 = scmp.lt.s32.totalorder %s1117_s19, %s1117_s19 }
  0x43   :  { %1061 = vmatpush3.bf16.msra.mxu1 %v1060_v18  ;;  %v1096_v56 = vpack.c.bf16 %v586_v55, %v585_v54  ;;  %v1099_v59 = vpack.c.bf16 %v588_v58, %v587_v57  ;;  %v589_v60 = vld [vmem:[%s1718_s3 + $0x50] sm:$0xff]  ;;  %v590_v61 = vld [vmem:[%s1718_s3 + $0x58] sm:$0xff]  ;;  %v591_v63 = vld [vmem:[%s1718_s3 + $0x60] sm:$0xff] }
  0x44   :  { %1086 = vmatprep.subr.bf16.mxu1 %v1142_v22  ;;  %433 = vmatmul.mubr.f32.vlgmr.msra.gmra.mrb[2].mxu0 %v1487_v32  ;;  %v1072_v32 = vpack.c.bf16 %v159_v31, %v158_v30  ;;  %v1102_v62 = vpack.c.bf16 %v590_v61, %v589_v60  ;;  %v592_v0 = vld [vmem:[%s1718_s3 + $0x68] sm:$0xff]  ;;  %v593_v2 = vld [vmem:[%s1718_s3 + $0x70] sm:$0xff]  ;;  %v594_v3 = vld [vmem:[%s1718_s3 + $0x78] sm:$0xff]  ;;  %p1124_p3 = por %p1123_p2, %p1122_p1 }
  0x45   :  { %1064 = vmatpush3.bf16.msra.mxu0 %v1063_v21  ;;  %896 = vmatprep.mubr.msk.f32.mxu0 %vm1143_vm0, %v1144_v28  ;;  %v1105_v1 = vpack.c.bf16 %v592_v0, %v591_v63  ;;  %v1108_v4 = vpack.c.bf16 %v594_v3, %v593_v2  ;;  %v687_v6 = vld [vmem:[%s1717_s2] ss:$0 sm:$0xff] }
  0x46   :  { %503 = vmatmul.mubr.f32.vlgmr.msra.gmra.mrb[2].mxu1 %v1501_v41  ;;  %1065 = vmatprep.subr.bf16.mxu0 %v1142_v22  ;;  %v1081_v41 = vpack.c.bf16 %v165_v40, %v164_v39  ;;  %v689_v27 = vld [vmem:[%s1719_s4] ss:$0 sm:$0xff]  ;;  %p1125_p4 = pnand %p1124_p3, %p1118_p0 }
  0x47   :  { %931 = vmatprep.mubr.msk.f32.mxu1 %vm1143_vm0, %v1144_v28  ;;  %1088 = vmatpush3.bf16.msra.mxu1 %v1087_v47 }
  0x48   :  { %1089 = vmatprep.subr.bf16.mxu1 %v1142_v22 }
  0x49   :  { %1067 = vmatpush3.bf16.msra.mxu0 %v1066_v25 }
  0x4a   :  { %1068 = vmatprep.subr.bf16.mxu0 %v1142_v22 }
  0x4b   :  { %1091 = vmatpush3.bf16.msra.mxu1 %v1090_v50 }
  0x4c   :  { %1092 = vmatprep.subr.bf16.mxu1 %v1142_v22 }
  0x4d   :  { %1070 = vmatpush3.bf16.msra.mxu0 %v1069_v29 }
  0x4e   :  { %1071 = vmatprep.subr.bf16.mxu0 %v1142_v22 }
  0x4f   :  { %1094 = vmatpush3.bf16.msra.mxu1 %v1093_v53 }
  0x50   :  { %1095 = vmatprep.subr.bf16.mxu1 %v1142_v22 }
  0x51   :  { %1073 = vmatpush3.bf16.msra.mxu0 %v1072_v32 }
  0x52   :  { %1074 = vmatprep.subr.bf16.mxu0 %v1142_v22 }
  0x53   :  { %1097 = vmatpush3.bf16.msra.mxu1 %v1096_v56 }
  0x54   :  { %1098 = vmatprep.subr.bf16.mxu1 %v1142_v22 }
  0x55   :  { %1076 = vmatpush3.bf16.msra.mxu0 %v1075_v35 }
  0x56   :  { %1077 = vmatprep.subr.bf16.mxu0 %v1142_v22 }
  0x57   :  { %1100 = vmatpush3.bf16.msra.mxu1 %v1099_v59 }
  0x58   :  { %1101 = vmatprep.subr.bf16.mxu1 %v1142_v22 }
  0x59   :  { %1079 = vmatpush3.bf16.msra.mxu0 %v1078_v38 }
  0x5a   :  { %1080 = vmatprep.subr.bf16.mxu0 %v1142_v22 }
  0x5b   :  { %1103 = vmatpush3.bf16.msra.mxu1 %v1102_v62 }
  0x5c   :  { %1104 = vmatprep.subr.bf16.mxu1 %v1142_v22 }
  0x5d   :  { %1082 = vmatpush3.bf16.msra.mxu0 %v1081_v41 }
  0x5e   :  { %1083 = vmatprep.subr.bf16.mxu0 %v1142_v22 }
  0x5f   :  { %1106 = vmatpush3.bf16.msra.mxu1 %v1105_v1 }
  0x60   :  { %1107 = vmatprep.subr.bf16.mxu1 %v1142_v22 }
  0x61   :  { %1085 = vmatpush3.bf16.msra.mxu0 %v1084_v44 }
  0x63   :  { %1109 = vmatpush3.bf16.msra.mxu1 %v1108_v4 }
  0x64   :  { %897 = vmatmul.mubr.f32.vlgmr.msra.gmra.mrb[4].mxu0 %v688_v45 }
  0xf7   :  { %v722_v5 = vpop.f32.mrb[0].mxu0 }
  0xf8   :  { %v723_v7 = vpop.f32.mrb[1].mxu0 }
  0xf9   :  { %v757_v8 = vpop.f32.mrb[0].mxu1  ;;  %v724_v9 = vadd.f32 %v723_v7, %v722_v5 }
  0xfa   :  { %v758_v11 = vpop.f32.mrb[1].mxu1 }
  0xfb   :  { %v759_v12 = vadd.f32 %v758_v11, %v757_v8  ;;  %v295_v13 = vadd.f32 %v724_v9, %v687_v6 }
  0xfd   :  { %v365_v14 = vadd.f32 %v759_v12, %v295_v13 }
 0x117   :  { %v792_v15 = vpop.f32.mrb[2].mxu0 }
 0x118   :  { %v793_v16 = vpop.f32.mrb[3].mxu0 }
 0x119   :  { %v827_v17 = vpop.f32.mrb[2].mxu1  ;;  %v794_v18 = vadd.f32 %v793_v16, %v792_v15 }
 0x11a   :  { %v828_v19 = vpop.f32.mrb[3].mxu1 }
 0x11b   :  { %v829_v20 = vadd.f32 %v828_v19, %v827_v17  ;;  %v435_v21 = vadd.f32 %v794_v18, %v365_v14 }
 0x11d   :  { %v505_v22 = vadd.f32 %v829_v20, %v435_v21 }
 0x137   :  { %v574_v23 = vpop.f32.mrb[4].mxu0 }
 0x138   :  { %v575_v24 = vadd.f32 %v574_v23, %v505_v22  ;;  %v898_v25 = vpop.f32.mrb[5].mxu0 }
 0x13a   :  { %v578_v26 = vmax.f32 %v575_v24, 0.0 }
 0x13c   :  { %932 = vmatmul.mubr.f32.vlgmr.msra.gmra.mrb[4].mxu1 %v578_v26 }
 0x20f   :  { %v668_v28 = vpop.f32.mrb[4].mxu1 }
 0x210   :  { %v669_v29 = vadd.f32 %v689_v27, %v668_v28  ;;  %v933_v30 = vpop.f32.mrb[5].mxu1 }
 0x212   :  { %672 = vst [vmem:[#allocation2] sm:$0x3] %v669_v29 }
 0x213   :  { %1128 = shalt.err (!%p1125_p4)
}
 0x214   :  { %s1129_s22 = scalar_lea.hbm %s1720_s5, 32 }
 0x215   :  { %p1130_p5 = scmp.ne.s32.totalorder %s1720_s5, %s1129_s22  ;;  %p1133_p6 = scmp.lt.u32.totalorder %s1129_s22, %s1720_s5 }
 0x217   :  { %p1135_p7 = pnand %p1133_p6, %p1130_p5 }
 0x219   :  { %1138 = shalt.err (!%p1135_p7)
}
 0x21a   :  { %682 = dma.vmem_to_hbm [thread:$0]  %s680_s0, 32, %s1720_s5, [#allocation3]  }
 0x21b   :  { %1139 = dma.done.wait [#allocation3], 32  }
 0x21c   :  { %1140 = vsyncadd [#allocation3], 4294967264 }
 0x21d   :  { %686 = vsyncpa [#allocation3], 1 }

// kernel: net_forward.6
= control target key start
LH: loop header
LB: loop body
LE: loop exit
PB: predicated region body
PF: predicated region fallthrough
CT: control target
= control target key end

     0   :  { %s2485_s12 = smov 0   ;;  %s3052_s0 = inlined_call_operand.vmem [shape: f32[2,72,128], index: 0, kind: input, shape index: {}]   ;;  %s3053_s1 = inlined_call_operand.vmem [shape: f32[9,128,128], index: 1, kind: input, shape index: {}]   ;;  %s3054_s2 = inlined_call_operand.vmem [shape: f32[1,128], index: 2, kind: input, shape index: {}]   ;;  %s3055_s3 = inlined_call_operand.vmem [shape: f32[2,39,128], index: 3, kind: output, shape index: {}]  }
   0x1 LB: > { %s1390_s13 = sadd.s32 4294967295, %s2463_s12   ;;  %p1394_p0 = scmp.ge.s32.totalorder %s2463_s12, 1  ;;  %s2463_s12 = sphi %s2485_s12, %s13_s12  }
   0x2   : > { %p137_p1 = scmp.lt.s32.totalorder %s2463_s12, 3 }
   0x4   : > { %p138_p2 = pnand %p1394_p0, %p137_p1 }
   0x5   : > { %v1397_v0 = vld [vmem:[%s3053_s1 + $0x80] sm:$0xff] (!%p138_p2)  ;;  %v1398_v1 = vld [vmem:[%s3053_s1 + $0x88] sm:$0xff] (!%p138_p2)  ;;  %p161_p3 = scmp.lt.s32.totalorder (!%p138_p2), %s1390_s13, 1  ;;  %v1399_v5 = vld [vmem:[%s3053_s1 + $0x90] sm:$0xff] (!%p138_p2)  ;;  %vm1298_vm0 = vcmask (!%p138_p2), 1046528  }
   0x6   : > { %141 = sbr.rel (%p138_p2) target bundleno = 399 (0x18f), region = 32  ;;  %v1445_v2 = vld [vmem:[%s3053_s1 + $0x200] sm:$0xff] (!%p138_p2)  ;;  %v2095_v3 = vpack.c.bf16 (!%p138_p2), %v1398_v1, %v1397_v0  ;;  %v1446_v4 = vld [vmem:[%s3053_s1 + $0x208] sm:$0xff] (!%p138_p2)  ;;  %v1400_v6 = vld [vmem:[%s3053_s1 + $0x98] sm:$0xff] (!%p138_p2) }
   0x7   : > { %v2223_v7 = vpack.c.bf16 (!%p138_p2), %v1446_v4, %v1445_v2  ;;  %v2099_v8 = vpack.c.bf16 (!%p138_p2), %v1400_v6, %v1399_v5  ;;  %v1447_v9 = vld [vmem:[%s3053_s1 + $0x210] sm:$0xff] (!%p138_p2)  ;;  %v1448_v10 = vld [vmem:[%s3053_s1 + $0x218] sm:$0xff] (!%p138_p2)  ;;  %v1401_v11 = vld [vmem:[%s3053_s1 + $0xa0] sm:$0xff] (!%p138_p2) }
   0x8   : > { %2096 = vmatprep.subr.bf16.mxu1 (!%p138_p2), %v2095_v3  ;;  %v2227_v12 = vpack.c.bf16 (!%p138_p2), %v1448_v10, %v1447_v9  ;;  %v1402_v13 = vld [vmem:[%s3053_s1 + $0xa8] sm:$0xff] (!%p138_p2)  ;;  %v1449_v14 = vld [vmem:[%s3053_s1 + $0x220] sm:$0xff] (!%p138_p2)  ;;  %v1403_v18 = vld [vmem:[%s3053_s1 + $0xb0] sm:$0xff] (!%p138_p2) }
   0x9   : > { %v1450_v15 = vld [vmem:[%s3053_s1 + $0x228] sm:$0xff] (!%p138_p2)  ;;  %2224 = vmatprep.subr.bf16.mxu0 (!%p138_p2), %v2223_v7  ;;  %2098 = vmatpush3.bf16.msra.mxu1 (!%p138_p2), %v2095_v3  ;;  %v2103_v16 = vpack.c.bf16 (!%p138_p2), %v1402_v13, %v1401_v11  ;;  %v1404_v19 = vld [vmem:[%s3053_s1 + $0xb8] sm:$0xff] (!%p138_p2)  ;;  %v1451_v20 = vld [vmem:[%s3053_s1 + $0x230] sm:$0xff] (!%p138_p2) }
   0xa   : > { %2226 = vmatpush3.bf16.msra.mxu0 (!%p138_p2), %v2223_v7  ;;  %2100 = vmatprep.subr.bf16.mxu1 (!%p138_p2), %v2099_v8  ;;  %v2231_v17 = vpack.c.bf16 (!%p138_p2), %v1450_v15, %v1449_v14  ;;  %v1452_v21 = vld [vmem:[%s3053_s1 + $0x238] sm:$0xff] (!%p138_p2)  ;;  %v2107_v22 = vpack.c.bf16 (!%p138_p2), %v1404_v19, %v1403_v18  ;;  %v1405_v24 = vld [vmem:[%s3053_s1 + $0xc0] sm:$0xff] (!%p138_p2)  ;;  %v1406_v25 = vld [vmem:[%s3053_s1 + $0xc8] sm:$0xff] (!%p138_p2) }
   0xb   : > { %2228 = vmatprep.subr.bf16.mxu0 (!%p138_p2), %v2227_v12  ;;  %v2235_v23 = vpack.c.bf16 (!%p138_p2), %v1452_v21, %v1451_v20  ;;  %v1453_v27 = vld [vmem:[%s3053_s1 + $0x240] sm:$0xff] (!%p138_p2)  ;;  %v1454_v28 = vld [vmem:[%s3053_s1 + $0x248] sm:$0xff] (!%p138_p2)  ;;  %v2111_v30 = vpack.c.bf16 (!%p138_p2), %v1406_v25, %v1405_v24  ;;  %v1407_v32 = vld [vmem:[%s3053_s1 + $0xd0] sm:$0xff] (!%p138_p2) }
   0xc   : > { %v2239_v31 = vpack.c.bf16 (!%p138_p2), %v1454_v28, %v1453_v27  ;;  %v1408_v33 = vld [vmem:[%s3053_s1 + $0xd8] sm:$0xff] (!%p138_p2)  ;;  %v1455_v34 = vld [vmem:[%s3053_s1 + $0x250] sm:$0xff] (!%p138_p2)  ;;  %v1409_v38 = vld [vmem:[%s3053_s1 + $0xe0] sm:$0xff] (!%p138_p2) }
   0xd   : > { %s3057_s13 = smov (!%p161_p3, %s1390_s13), 1  ;;  %2102 = vmatpush3.bf16.msra.mxu1 %v2099_v8  ;;  %v1456_v35 = vld [vmem:[%s3053_s1 + $0x258] sm:$0xff]  ;;  %v2115_v36 = vpack.c.bf16 %v1408_v33, %v1407_v32  ;;  %v1410_v39 = vld [vmem:[%s3053_s1 + $0xe8] sm:$0xff]  ;;  %v1457_v40 = vld [vmem:[%s3053_s1 + $0x260] sm:$0xff] }
   0xe   : > { %s2447_s11 = smul.u32 72, %s3057_s13  ;;  %2230 = vmatpush3.bf16.msra.mxu0 %v2227_v12  ;;  %2104 = vmatprep.subr.bf16.mxu1 %v2103_v16  ;;  %v2243_v37 = vpack.c.bf16 %v1456_v35, %v1455_v34  ;;  %v1458_v41 = vld [vmem:[%s3053_s1 + $0x268] sm:$0xff]  ;;  %v2119_v42 = vpack.c.bf16 %v1410_v39, %v1409_v38  ;;  %v1411_v44 = vld [vmem:[%s3053_s1 + $0xf0] sm:$0xff]  ;;  %v1412_v45 = vld [vmem:[%s3053_s1 + $0xf8] sm:$0xff] }
   0xf   : > { %2232 = vmatprep.subr.bf16.mxu0 %v2231_v17  ;;  %v2247_v43 = vpack.c.bf16 %v1458_v41, %v1457_v40  ;;  %v1459_v46 = vld [vmem:[%s3053_s1 + $0x270] sm:$0xff]  ;;  %v1460_v47 = vld [vmem:[%s3053_s1 + $0x278] sm:$0xff]  ;;  %v2123_v48 = vpack.c.bf16 %v1412_v45, %v1411_v44  ;;  %v177_v50 = vld [vmem:[%s3053_s1] sm:$0xff] }
  0x10   : > { %s2547_s24 = scalar_lea.vmem %s3052_s0, %s2447_s11  ;;  %v2251_v49 = vpack.c.bf16 %v1460_v47, %v1459_v46  ;;  %v178_v51 = vld [vmem:[%s3053_s1 + $0x8] sm:$0xff]  ;;  %v1461_v52 = vld [vmem:[%s3053_s1 + $0x280] sm:$0xff]  ;;  %v179_v56 = vld [vmem:[%s3053_s1 + $0x10] sm:$0xff] }
  0x11   : > { %v193_v26 = vld [vmem:[%s2547_s24 + $0x1] sm:$0xff]  ;;  %v654_v29 = vld [vmem:[%s2547_s24 + $0x9] sm:$0xff]  ;;  %2106 = vmatpush3.bf16.msra.mxu1 %v2103_v16  ;;  %v2127_v54 = vpack.c.bf16 %v178_v51, %v177_v50  ;;  %v180_v57 = vld [vmem:[%s3053_s1 + $0x18] sm:$0xff] }
  0x12   : > { %1758 = vmatprep.mubr.f32.mxu1 %v193_v26  ;;  %1922 = vmatprep.mubr.f32.mxu0 %v654_v29  ;;  %v1462_v53 = vld [vmem:[%s3053_s1 + $0x288] sm:$0xff]  ;;  %v1463_v58 = vld [vmem:[%s3053_s1 + $0x290] sm:$0xff]  ;;  %v1464_v59 = vld [vmem:[%s3053_s1 + $0x298] sm:$0xff]  ;;  %v2131_v61 = vpack.c.bf16 %v180_v57, %v179_v56 }
  0x13   : > { %2234 = vmatpush3.bf16.msra.mxu0 %v2231_v17  ;;  %2108 = vmatprep.subr.bf16.mxu1 %v2107_v22  ;;  %v2255_v55 = vpack.c.bf16 %v1462_v53, %v1461_v52  ;;  %v2624_v60 = vld [vmem:[%s2547_s24 + $0x11] sm:$0xff]  ;;  %v2259_v62 = vpack.c.bf16 %v1464_v59, %v1463_v58  ;;  %v181_v63 = vld [vmem:[%s3053_s1 + $0x20] sm:$0xff]  ;;  %v182_v0 = vld [vmem:[%s3053_s1 + $0x28] sm:$0xff] }
  0x14   : > { %2236 = vmatprep.subr.bf16.mxu0 %v2235_v23  ;;  %v1465_v1 = vld [vmem:[%s3053_s1 + $0x2a0] sm:$0xff]  ;;  %v1466_v2 = vld [vmem:[%s3053_s1 + $0x2a8] sm:$0xff]  ;;  %v2135_v4 = vpack.c.bf16 %v182_v0, %v181_v63  ;;  %v183_v7 = vld [vmem:[%s3053_s1 + $0x30] sm:$0xff] }
  0x15   : > { %2110 = vmatpush3.bf16.msra.mxu1 %v2107_v22  ;;  %v2640_v3 = vld [vmem:[%s2547_s24 + $0x19] sm:$0xff]  ;;  %v2643_v5 = vld [vmem:[%s2547_s24 + $0x21] sm:$0xff]  ;;  %v2263_v6 = vpack.c.bf16 %v1466_v2, %v1465_v1  ;;  %v1467_v9 = vld [vmem:[%s3053_s1 + $0x2b0] sm:$0xff] }
  0x16   : > { %2112 = vmatprep.subr.bf16.mxu1 %v2111_v30  ;;  %v184_v8 = vld [vmem:[%s3053_s1 + $0x38] sm:$0xff]  ;;  %v2662_v11 = vld [vmem:[%s2547_s24 + $0x29] sm:$0xff]  ;;  %v185_v15 = vld [vmem:[%s3053_s1 + $0x40] sm:$0xff] }
  0x17   : > { %2238 = vmatpush3.bf16.msra.mxu0 %v2235_v23  ;;  %v1468_v10 = vld [vmem:[%s3053_s1 + $0x2b8] sm:$0xff]  ;;  %v2139_v12 = vpack.c.bf16 %v184_v8, %v183_v7  ;;  %v186_v16 = vld [vmem:[%s3053_s1 + $0x48] sm:$0xff]  ;;  %v1469_v17 = vld [vmem:[%s3053_s1 + $0x2c0] sm:$0xff] }
  0x18   : > { %2240 = vmatprep.subr.bf16.mxu0 %v2239_v31  ;;  %v2665_v13 = vld [vmem:[%s2547_s24 + $0x31] sm:$0xff]  ;;  %v2267_v14 = vpack.c.bf16 %v1468_v10, %v1467_v9  ;;  %v1470_v18 = vld [vmem:[%s3053_s1 + $0x2c8] sm:$0xff]  ;;  %v171_v19 = vld [vmem:[%s2547_s24] sm:$0xff]  ;;  %v2143_v21 = vpack.c.bf16 %v186_v16, %v185_v15 }
  0x19   : > { %2114 = vmatpush3.bf16.msra.mxu1 %v2111_v30  ;;  %v2685_v20 = vld [vmem:[%s2547_s24 + $0xa] sm:$0xff]  ;;  %v2271_v22 = vpack.c.bf16 %v1470_v18, %v1469_v17  ;;  %v188_v24 = vld [vmem:[%s3053_s1 + $0x58] sm:$0xff]  ;;  %v1413_v41 = vld [vmem:[%s3053_s1 + $0x100] sm:$0xff] }
  0x1a   : > { %2116 = vmatprep.subr.bf16.mxu1 %v2115_v36  ;;  %v187_v23 = vld [vmem:[%s3053_s1 + $0x50] sm:$0xff]  ;;  %v1472_v26 = vld [vmem:[%s3053_s1 + $0x2d8] sm:$0xff]  ;;  %v190_v30 = vld [vmem:[%s3053_s1 + $0x68] sm:$0xff] }
  0x1b   : > { %2242 = vmatpush3.bf16.msra.mxu0 %v2239_v31  ;;  %v1471_v25 = vld [vmem:[%s3053_s1 + $0x2d0] sm:$0xff]  ;;  %v2147_v27 = vpack.c.bf16 %v188_v24, %v187_v23  ;;  %v1473_v31 = vld [vmem:[%s3053_s1 + $0x2e0] sm:$0xff]  ;;  %v1474_v32 = vld [vmem:[%s3053_s1 + $0x2e8] sm:$0xff] }
  0x1c   : > { %2244 = vmatprep.subr.bf16.mxu0 %v2243_v37  ;;  %v2275_v28 = vpack.c.bf16 %v1472_v26, %v1471_v25  ;;  %v2279_v34 = vpack.c.bf16 %v1474_v32, %v1473_v31  ;;  %v191_v35 = vld [vmem:[%s3053_s1 + $0x70] sm:$0xff]  ;;  %v1476_v38 = vld [vmem:[%s3053_s1 + $0x2f8] sm:$0xff]  ;;  %v1478_v44 = vld [vmem:[%s3053_s1 + $0x308] sm:$0xff] }
  0x1d   : > { %2118 = vmatpush3.bf16.msra.mxu1 %v2115_v36  ;;  %v192_v36 = vld [vmem:[%s3053_s1 + $0x78] sm:$0xff]  ;;  %v1415_v47 = vld [vmem:[%s3053_s1 + $0x110] sm:$0xff]  ;;  %v2749_v51 = vld [vmem:[%s2547_s24 + $0x8] sm:$0xff] }
  0x1e   : > { %2120 = vmatprep.subr.bf16.mxu1 %v2119_v42  ;;  %v2155_v39 = vpack.c.bf16 %v192_v36, %v191_v35  ;;  %v1480_v50 = vld [vmem:[%s3053_s1 + $0x318] sm:$0xff]  ;;  %v1418_v56 = vld [vmem:[%s3053_s1 + $0x128] sm:$0xff]  ;;  %v1481_v57 = vld [vmem:[%s3053_s1 + $0x320] sm:$0xff] }
  0x1f   : > { %2246 = vmatpush3.bf16.msra.mxu0 %v2243_v37  ;;  %v1475_v37 = vld [vmem:[%s3053_s1 + $0x2f0] sm:$0xff]  ;;  %v1482_v58 = vld [vmem:[%s3053_s1 + $0x328] sm:$0xff]  ;;  %v1484_v7 = vld [vmem:[%s3053_s1 + $0x338] sm:$0xff] }
  0x20   : > { %2248 = vmatprep.subr.bf16.mxu0 %v2247_v43  ;;  %v2283_v40 = vpack.c.bf16 %v1476_v38, %v1475_v37  ;;  %v2752_v52 = vld [vmem:[%s2547_s24 + $0x12] sm:$0xff]  ;;  %v2778_v0 = vld [vmem:[%s2547_s24 + $0x22] sm:$0xff]  ;;  %v2295_v1 = vpack.c.bf16 %v1482_v58, %v1481_v57  ;;  %v2800_v9 = vld [vmem:[%s2547_s24 + $0x2a] sm:$0xff] }
  0x21   : > { %2122 = vmatpush3.bf16.msra.mxu1 %v2119_v42  ;;  %v1414_v42 = vld [vmem:[%s3053_s1 + $0x108] sm:$0xff]  ;;  %v2768_v59 = vld [vmem:[%s2547_s24 + $0x10] sm:$0xff]  ;;  %v2796_v8 = vld [vmem:[%s2547_s24 + $0x20] sm:$0xff] }
  0x22   : > { %2124 = vmatprep.subr.bf16.mxu1 %v2123_v48  ;;  %v2159_v45 = vpack.c.bf16 %v1414_v42, %v1413_v41  ;;  %v1419_v2 = vld [vmem:[%s3053_s1 + $0x130] sm:$0xff]  ;;  %v2803_v10 = vld [vmem:[%s2547_s24 + $0x28] sm:$0xff]  ;;  %v1421_v16 = vld [vmem:[%s3053_s1 + $0x140] sm:$0xff] }
  0x23   : > { %2250 = vmatpush3.bf16.msra.mxu0 %v2247_v43  ;;  %v1477_v43 = vld [vmem:[%s3053_s1 + $0x300] sm:$0xff]  ;;  %v1422_v17 = vld [vmem:[%s3053_s1 + $0x148] sm:$0xff]  ;;  %v1423_v24 = vld [vmem:[%s3053_s1 + $0x150] sm:$0xff] }
  0x24   : > { %2252 = vmatprep.subr.bf16.mxu0 %v2251_v49  ;;  %v2287_v46 = vpack.c.bf16 %v1478_v44, %v1477_v43  ;;  %v1485_v18 = vld [vmem:[%s3053_s1 + $0x340] sm:$0xff]  ;;  %v1424_v25 = vld [vmem:[%s3053_s1 + $0x158] sm:$0xff]  ;;  %v1487_v26 = vld [vmem:[%s3053_s1 + $0x350] sm:$0xff] }
  0x25   : > { %2126 = vmatpush3.bf16.msra.mxu1 %v2123_v48  ;;  %v1416_v48 = vld [vmem:[%s3053_s1 + $0x118] sm:$0xff]  ;;  %v1426_v31 = vld [vmem:[%s3053_s1 + $0x168] sm:$0xff]  ;;  %v1489_v32 = vld [vmem:[%s3053_s1 + $0x360] sm:$0xff] }
  0x26   : > { %2128 = vmatprep.subr.bf16.mxu1 %v2127_v54  ;;  %v2163_v53 = vpack.c.bf16 %v1416_v48, %v1415_v47  ;;  %v1427_v36 = vld [vmem:[%s3053_s1 + $0x170] sm:$0xff]  ;;  %v1428_v37 = vld [vmem:[%s3053_s1 + $0x178] sm:$0xff]  ;;  %v1429_v42 = vld [vmem:[%s3053_s1 + $0x180] sm:$0xff] }
  0x27   : > { %2254 = vmatpush3.bf16.msra.mxu0 %v2251_v49  ;;  %v1479_v49 = vld [vmem:[%s3053_s1 + $0x310] sm:$0xff]  ;;  %v1430_v43 = vld [vmem:[%s3053_s1 + $0x188] sm:$0xff]  ;;  %v1493_v44 = vld [vmem:[%s3053_s1 + $0x380] sm:$0xff] }
  0x28   : > { %2256 = vmatprep.subr.bf16.mxu0 %v2255_v55  ;;  %1759 = vmatmul.mubr.f32.vlgmr.msra.gmra.mrb[0].mxu1 %v654_v29  ;;  %v189_v29 = vld [vmem:[%s3053_s1 + $0x60] sm:$0xff]  ;;  %v1491_v38 = vld [vmem:[%s3053_s1 + $0x370] sm:$0xff]  ;;  %v1434_v57 = vld [vmem:[%s3053_s1 + $0x1a8] sm:$0xff] }
  0x29   : > { %2130 = vmatpush3.bf16.msra.mxu1 %v2127_v54  ;;  %1761 = vmatprep.mubr.f32.mxu1 %v2624_v60  ;;  %v2151_v33 = vpack.c.bf16 %v190_v30, %v189_v29  ;;  %v2291_v54 = vpack.c.bf16 %v1480_v50, %v1479_v49  ;;  %v1425_v30 = vld [vmem:[%s3053_s1 + $0x160] sm:$0xff]  ;;  %v1431_v48 = vld [vmem:[%s3053_s1 + $0x190] sm:$0xff]  ;;  %v1432_v49 = vld [vmem:[%s3053_s1 + $0x198] sm:$0xff] }
  0x2a   : > { %1923 = vmatmul.mubr.f32.vlgmr.msra.gmra.mrb[0].mxu0 %v2624_v60  ;;  %2132 = vmatprep.subr.bf16.mxu1 %v2131_v61  ;;  %v1495_v50 = vld [vmem:[%s3053_s1 + $0x390] sm:$0xff]  ;;  %v1497_v58 = vld [vmem:[%s3053_s1 + $0x3a0] sm:$0xff] }
  0x2b   : > { %2258 = vmatpush3.bf16.msra.mxu0 %v2255_v55  ;;  %1925 = vmatprep.mubr.f32.mxu0 %v2640_v3  ;;  %v1417_v55 = vld [vmem:[%s3053_s1 + $0x120] sm:$0xff] }
  0x2c   : > { %2260 = vmatprep.subr.bf16.mxu0 %v2259_v62  ;;  %1762 = vmatmul.mubr.f32.gmra.mrb[2].mxu1 %v2640_v3  ;;  %v2167_v63 = vpack.c.bf16 %v1418_v56, %v1417_v55  ;;  %v1433_v56 = vld [vmem:[%s3053_s1 + $0x1a0] sm:$0xff] }
  0x2d   : > { %2134 = vmatpush3.bf16.msra.mxu1 %v2131_v61  ;;  %1764 = vmatprep.mubr.f32.mxu1 %v2643_v5  ;;  %v2772_v61 = vld [vmem:[%s2547_s24 + $0x1a] sm:$0xff] }
  0x2e   : > { %1926 = vmatmul.mubr.f32.gmra.mrb[2].mxu0 %v2643_v5  ;;  %2136 = vmatprep.subr.bf16.mxu1 %v2135_v4 }
  0x2f   : > { %2262 = vmatpush3.bf16.msra.mxu0 %v2259_v62  ;;  %1928 = vmatprep.mubr.f32.mxu0 %v2662_v11  ;;  %v2775_v62 = vld [vmem:[%s2547_s24 + $0x18] sm:$0xff] }
  0x30   : > { %2264 = vmatprep.subr.bf16.mxu0 %v2263_v6  ;;  %1765 = vmatmul.mubr.f32.gmra.mrb[4].mxu1 %v2662_v11 }
  0x31   : > { %2138 = vmatpush3.bf16.msra.mxu1 %v2135_v4  ;;  %1799 = vmatprep.mubr.f32.mxu1 %v171_v19  ;;  %v1420_v4 = vld [vmem:[%s3053_s1 + $0x138] sm:$0xff]  ;;  %v1486_v19 = vld [vmem:[%s3053_s1 + $0x348] sm:$0xff] }
  0x32   : > { %1929 = vmatmul.mubr.f32.gmra.mrb[4].mxu0 %v2665_v13  ;;  %2140 = vmatprep.subr.bf16.mxu1 %v2139_v12  ;;  %v2303_v23 = vpack.c.bf16 %v1486_v19, %v1485_v18  ;;  %v1437_v18 = vld [vmem:[%s3053_s1 + $0x1c0] sm:$0xff]  ;;  %v1438_v19 = vld [vmem:[%s3053_s1 + $0x1c8] sm:$0xff] }
  0x33   : > { %2266 = vmatpush3.bf16.msra.mxu0 %v2263_v6  ;;  %1963 = vmatprep.mubr.f32.mxu0 %v2685_v20  ;;  %v1483_v6 = vld [vmem:[%s3053_s1 + $0x330] sm:$0xff] }
  0x34   : > { %2268 = vmatprep.subr.bf16.mxu0 %v2267_v14  ;;  %v2299_v15 = vpack.c.bf16 %v1484_v7, %v1483_v6  ;;  %v1499_v6 = vld [vmem:[%s3053_s1 + $0x3b0] sm:$0xff]  ;;  %v1500_v7 = vld [vmem:[%s3053_s1 + $0x3b8] sm:$0xff] }
  0x35   : > { %2142 = vmatpush3.bf16.msra.mxu1 %v2139_v12  ;;  %v2171_v12 = vpack.c.bf16 %v1420_v4, %v1419_v2  ;;  %v1436_v4 = vld [vmem:[%s3053_s1 + $0x1b8] sm:$0xff] }
  0x36   : > { %2144 = vmatprep.subr.bf16.mxu1 %v2143_v21 }
  0x37   : > { %2270 = vmatpush3.bf16.msra.mxu0 %v2267_v14  ;;  %v2806_v14 = vld [vmem:[%s2547_s24 + $0x32] sm:$0xff] }
  0x38   : > { %2272 = vmatprep.subr.bf16.mxu0 %v2271_v22 }
  0x39   : > { %2146 = vmatpush3.bf16.msra.mxu1 %v2143_v21  ;;  %v406_v21 = vld [vmem:[%s2547_s24 + $0x2] sm:$0xff] }
  0x3a   : > { %2148 = vmatprep.subr.bf16.mxu1 %v2147_v27 }
  0x3b   : > { %2274 = vmatpush3.bf16.msra.mxu0 %v2271_v22  ;;  %v2175_v22 = vpack.c.bf16 %v1422_v17, %v1421_v16  ;;  %v907_v16 = vld [vmem:[%s2547_s24 + $0x38] sm:$0xff]  ;;  %v2331_v17 = vpack.c.bf16 %v1500_v7, %v1499_v6 }
  0x3c   : > { %2276 = vmatprep.subr.bf16.mxu0 %v2275_v28 }
  0x3d   : > { %2150 = vmatpush3.bf16.msra.mxu1 %v2147_v27  ;;  %v1488_v27 = vld [vmem:[%s3053_s1 + $0x358] sm:$0xff] }
  0x3e   : > { %2152 = vmatprep.subr.bf16.mxu1 %v2151_v33  ;;  %v2307_v29 = vpack.c.bf16 %v1488_v27, %v1487_v26  ;;  %v1440_v26 = vld [vmem:[%s3053_s1 + $0x1d8] sm:$0xff]  ;;  %v1503_v27 = vld [vmem:[%s3053_s1 + $0x3d0] sm:$0xff] }
  0x3f   : > { %2278 = vmatpush3.bf16.msra.mxu0 %v2275_v28  ;;  %v2179_v28 = vpack.c.bf16 %v1424_v25, %v1423_v24  ;;  %v1439_v25 = vld [vmem:[%s3053_s1 + $0x1d0] sm:$0xff] }
  0x40   : > { %2280 = vmatprep.subr.bf16.mxu0 %v2279_v34 }
  0x41   : > { %2154 = vmatpush3.bf16.msra.mxu1 %v2151_v33  ;;  %v1490_v33 = vld [vmem:[%s3053_s1 + $0x368] sm:$0xff] }
  0x42   : > { %2156 = vmatprep.subr.bf16.mxu1 %v2155_v39  ;;  %v2311_v35 = vpack.c.bf16 %v1490_v33, %v1489_v32  ;;  %v1505_v32 = vld [vmem:[%s3053_s1 + $0x3e0] sm:$0xff] }
  0x43   : > { %2282 = vmatpush3.bf16.msra.mxu0 %v2279_v34  ;;  %v2183_v34 = vpack.c.bf16 %v1426_v31, %v1425_v30  ;;  %v1442_v31 = vld [vmem:[%s3053_s1 + $0x1e8] sm:$0xff] }
  0x44   : > { %2284 = vmatprep.subr.bf16.mxu0 %v2283_v40 }
  0x45   : > { %2158 = vmatpush3.bf16.msra.mxu1 %v2155_v39  ;;  %v1492_v39 = vld [vmem:[%s3053_s1 + $0x378] sm:$0xff] }
  0x46   : > { %2160 = vmatprep.subr.bf16.mxu1 %v2159_v45  ;;  %v2315_v41 = vpack.c.bf16 %v1492_v39, %v1491_v38  ;;  %v1508_v38 = vld [vmem:[%s3053_s1 + $0x3f8] sm:$0xff] }
  0x47   : > { %2286 = vmatpush3.bf16.msra.mxu0 %v2283_v40  ;;  %v2187_v40 = vpack.c.bf16 %v1428_v37, %v1427_v36  ;;  %v1444_v36 = vld [vmem:[%s3053_s1 + $0x1f8] sm:$0xff]  ;;  %v1507_v37 = vld [vmem:[%s3053_s1 + $0x3f0] sm:$0xff] }
  0x48   : > { %2288 = vmatprep.subr.bf16.mxu0 %v2287_v46  ;;  %1800 = vmatmul.mubr.f32.vlgmr.msra.gmra.mrb[0].mxu1 %v2749_v51 }
  0x49   : > { %2162 = vmatpush3.bf16.msra.mxu1 %v2159_v45  ;;  %1802 = vmatprep.mubr.f32.mxu1 %v2768_v59  ;;  %v1494_v45 = vld [vmem:[%s3053_s1 + $0x388] sm:$0xff] }
  0x4a   : > { %1964 = vmatmul.mubr.f32.vlgmr.msra.gmra.mrb[0].mxu0 %v2752_v52  ;;  %2164 = vmatprep.subr.bf16.mxu1 %v2163_v53  ;;  %v2319_v47 = vpack.c.bf16 %v1494_v45, %v1493_v44  ;;  %v1511_v44 = vld [vmem:[%s3053_s1 + $0x410] sm:$0xff]  ;;  %v1512_v45 = vld [vmem:[%s3053_s1 + $0x418] sm:$0xff] }
  0x4b   : > { %2290 = vmatpush3.bf16.msra.mxu0 %v2287_v46  ;;  %1966 = vmatprep.mubr.f32.mxu0 %v2772_v61  ;;  %v2191_v46 = vpack.c.bf16 %v1430_v43, %v1429_v42  ;;  %v1510_v42 = vld [vmem:[%s3053_s1 + $0x408] sm:$0xff] }
  0x4c   : > { %2292 = vmatprep.subr.bf16.mxu0 %v2291_v54  ;;  %1803 = vmatmul.mubr.f32.gmra.mrb[2].mxu1 %v2775_v62 }
  0x4d   : > { %2166 = vmatpush3.bf16.msra.mxu1 %v2163_v53  ;;  %1805 = vmatprep.mubr.f32.mxu1 %v2796_v8  ;;  %v1496_v53 = vld [vmem:[%s3053_s1 + $0x398] sm:$0xff] }
  0x4e   : > { %1967 = vmatmul.mubr.f32.gmra.mrb[2].mxu0 %v2778_v0  ;;  %2168 = vmatprep.subr.bf16.mxu1 %v2167_v63  ;;  %v2323_v55 = vpack.c.bf16 %v1496_v53, %v1495_v50  ;;  %v1516_v50 = vld [vmem:[%s3053_s1 + $0x438] sm:$0xff] }
  0x4f   : > { %2294 = vmatpush3.bf16.msra.mxu0 %v2291_v54  ;;  %1969 = vmatprep.mubr.f32.mxu0 %v2800_v9  ;;  %v2195_v54 = vpack.c.bf16 %v1432_v49, %v1431_v48  ;;  %v1514_v48 = vld [vmem:[%s3053_s1 + $0x428] sm:$0xff] }
  0x50   : > { %2296 = vmatprep.subr.bf16.mxu0 %v2295_v1  ;;  %1806 = vmatmul.mubr.f32.gmra.mrb[4].mxu1 %v2803_v10 }
  0x51   : > { %2170 = vmatpush3.bf16.msra.mxu1 %v2167_v63  ;;  %1840 = vmatprep.mubr.f32.mxu1 %v406_v21  ;;  %v1498_v63 = vld [vmem:[%s3053_s1 + $0x3a8] sm:$0xff]  ;;  %v1501_v21 = vld [vmem:[%s3053_s1 + $0x3c0] sm:$0xff] }
  0x52   : > { %1970 = vmatmul.mubr.f32.gmra.mrb[4].mxu0 %v2806_v14  ;;  %2172 = vmatprep.subr.bf16.mxu1 %v2171_v12  ;;  %v2327_v2 = vpack.c.bf16 %v1498_v63, %v1497_v58  ;;  %v1155_v58 = vld [vmem:[%s2547_s24 + $0x3a] sm:$0xff] }
  0x53   : > { %2298 = vmatpush3.bf16.msra.mxu0 %v2295_v1  ;;  %2004 = vmatprep.mubr.f32.mxu0 %v2768_v59  ;;  %v2199_v1 = vpack.c.bf16 %v1434_v57, %v1433_v56 }
  0x54   : > { %2300 = vmatprep.subr.bf16.mxu0 %v2299_v15 }
  0x55   : > { %2174 = vmatpush3.bf16.msra.mxu1 %v2171_v12  ;;  %v2917_v12 = vld [vmem:[%s2547_s24 + $0x30] sm:$0xff] }
  0x56   : > { %2176 = vmatprep.subr.bf16.mxu1 %v2175_v22 }
  0x57   : > { %2302 = vmatpush3.bf16.msra.mxu0 %v2299_v15 }
  0x58   : > { %2304 = vmatprep.subr.bf16.mxu0 %v2303_v23 }
  0x59   : > { %2178 = vmatpush3.bf16.msra.mxu1 %v2175_v22  ;;  %v1502_v22 = vld [vmem:[%s3053_s1 + $0x3c8] sm:$0xff] }
  0x5a   : > { %2180 = vmatprep.subr.bf16.mxu1 %v2179_v28  ;;  %v2335_v24 = vpack.c.bf16 %v1502_v22, %v1501_v21 }
  0x5b   : > { %2306 = vmatpush3.bf16.msra.mxu0 %v2303_v23  ;;  %v2207_v23 = vpack.c.bf16 %v1438_v19, %v1437_v18 }
  0x5c   : > { %2308 = vmatprep.subr.bf16.mxu0 %v2307_v29 }
  0x5d   : > { %2182 = vmatpush3.bf16.msra.mxu1 %v2179_v28  ;;  %v1504_v28 = vld [vmem:[%s3053_s1 + $0x3d8] sm:$0xff] }
  0x5e   : > { %2184 = vmatprep.subr.bf16.mxu1 %v2183_v34  ;;  %v2339_v30 = vpack.c.bf16 %v1504_v28, %v1503_v27 }
  0x5f   : > { %2310 = vmatpush3.bf16.msra.mxu0 %v2307_v29  ;;  %v2211_v29 = vpack.c.bf16 %v1440_v26, %v1439_v25 }
  0x60   : > { %2312 = vmatprep.subr.bf16.mxu0 %v2311_v35 }
  0x61   : > { %2186 = vmatpush3.bf16.msra.mxu1 %v2183_v34 }
  0x62   : > { %2188 = vmatprep.subr.bf16.mxu1 %v2187_v40 }
  0x63   : > { %2314 = vmatpush3.bf16.msra.mxu0 %v2311_v35  ;;  %v1443_v35 = vld [vmem:[%s3053_s1 + $0x1f0] sm:$0xff] }
  0x64   : > { %2316 = vmatprep.subr.bf16.mxu0 %v2315_v41  ;;  %v2219_v39 = vpack.c.bf16 %v1444_v36, %v1443_v35 }
  0x65   : > { %2190 = vmatpush3.bf16.msra.mxu1 %v2187_v40  ;;  %v2347_v40 = vpack.c.bf16 %v1508_v38, %v1507_v37 }
  0x66   : > { %2192 = vmatprep.subr.bf16.mxu1 %v2191_v46 }
  0x67   : > { %2318 = vmatpush3.bf16.msra.mxu0 %v2315_v41  ;;  %v1509_v41 = vld [vmem:[%s3053_s1 + $0x400] sm:$0xff] }
  0x68   : > { %2320 = vmatprep.subr.bf16.mxu0 %v2319_v47  ;;  %1841 = vmatmul.mubr.f32.vlgmr.msra.gmra.mrb[0].mxu1 %v2685_v20  ;;  %v1435_v20 = vld [vmem:[%s3053_s1 + $0x1b0] sm:$0xff]  ;;  %v2351_v43 = vpack.c.bf16 %v1510_v42, %v1509_v41 }
  0x69   : > { %2194 = vmatpush3.bf16.msra.mxu1 %v2191_v46  ;;  %1843 = vmatprep.mubr.f32.mxu1 %v2752_v52  ;;  %v2203_v15 = vpack.c.bf16 %v1436_v4, %v1435_v20  ;;  %v2355_v46 = vpack.c.bf16 %v1512_v45, %v1511_v44 }
  0x6a   : > { %2005 = vmatmul.mubr.f32.vlgmr.msra.gmra.mrb[0].mxu0 %v2775_v62  ;;  %2196 = vmatprep.subr.bf16.mxu1 %v2195_v54 }
  0x6b   : > { %2322 = vmatpush3.bf16.msra.mxu0 %v2319_v47  ;;  %2007 = vmatprep.mubr.f32.mxu0 %v2796_v8  ;;  %v1513_v47 = vld [vmem:[%s3053_s1 + $0x420] sm:$0xff] }
  0x6c   : > { %2324 = vmatprep.subr.bf16.mxu0 %v2323_v55  ;;  %1844 = vmatmul.mubr.f32.gmra.mrb[2].mxu1 %v2772_v61  ;;  %v2359_v49 = vpack.c.bf16 %v1514_v48, %v1513_v47 }
  0x6d   : > { %2198 = vmatpush3.bf16.msra.mxu1 %v2195_v54  ;;  %1846 = vmatprep.mubr.f32.mxu1 %v2778_v0  ;;  %v1521_v54 = vld [vmem:[%s3053_s1 + $0x460] sm:$0xff] }
  0x6e   : > { %2008 = vmatmul.mubr.f32.gmra.mrb[2].mxu0 %v2803_v10  ;;  %2200 = vmatprep.subr.bf16.mxu1 %v2199_v1 }
  0x6f   : > { %2326 = vmatpush3.bf16.msra.mxu0 %v2323_v55  ;;  %2010 = vmatprep.mubr.f32.mxu0 %v2917_v12  ;;  %v1522_v55 = vld [vmem:[%s3053_s1 + $0x468] sm:$0xff] }
  0x70   : > { %2328 = vmatprep.subr.bf16.mxu0 %v2327_v2  ;;  %1847 = vmatmul.mubr.f32.gmra.mrb[4].mxu1 %v2800_v9  ;;  %v2375_v56 = vpack.c.bf16 %v1522_v55, %v1521_v54 }
  0x71   : > { %2202 = vmatpush3.bf16.msra.mxu1 %v2199_v1  ;;  %1881 = vmatprep.mubr.f32.mxu1 %v2749_v51  ;;  %v1441_v51 = vld [vmem:[%s3053_s1 + $0x1e0] sm:$0xff] }
  0x72   : > { %2011 = vmatmul.mubr.f32.gmra.mrb[4].mxu0 %v907_v16  ;;  %2204 = vmatprep.subr.bf16.mxu1 %v2203_v15  ;;  %v2215_v33 = vpack.c.bf16 %v1442_v31, %v1441_v51 }
  0x73   : > { %2330 = vmatpush3.bf16.msra.mxu0 %v2327_v2  ;;  %2045 = vmatprep.mubr.f32.mxu0 %v2624_v60  ;;  %v1506_v60 = vld [vmem:[%s3053_s1 + $0x3e8] sm:$0xff] }
  0x74   : > { %2332 = vmatprep.subr.bf16.mxu0 %v2331_v17  ;;  %v2343_v34 = vpack.c.bf16 %v1506_v60, %v1505_v32 }
  0x75   : > { %2206 = vmatpush3.bf16.msra.mxu1 %v2203_v15 }
  0x76   : > { %2208 = vmatprep.subr.bf16.mxu1 %v2207_v23 }
  0x77   : > { %2334 = vmatpush3.bf16.msra.mxu0 %v2331_v17 }
  0x78   : > { %2336 = vmatprep.subr.bf16.mxu0 %v2335_v24 }
  0x79   : > { %2210 = vmatpush3.bf16.msra.mxu1 %v2207_v23 }
  0x7a   : > { %2212 = vmatprep.subr.bf16.mxu1 %v2211_v29 }
  0x7b   : > { %2338 = vmatpush3.bf16.msra.mxu0 %v2335_v24 }
  0x7c   : > { %2340 = vmatprep.subr.bf16.mxu0 %v2339_v30 }
  0x7d   : > { %2214 = vmatpush3.bf16.msra.mxu1 %v2211_v29 }
  0x7e   : > { %2216 = vmatprep.subr.bf16.mxu1 %v2215_v33 }
  0x7f   : > { %2342 = vmatpush3.bf16.msra.mxu0 %v2339_v30 }
  0x80   : > { %2344 = vmatprep.subr.bf16.mxu0 %v2343_v34 }
  0x81   : > { %2218 = vmatpush3.bf16.msra.mxu1 %v2215_v33 }
  0x82   : > { %2220 = vmatprep.subr.bf16.mxu1 %v2219_v39 }
  0x83   : > { %2346 = vmatpush3.bf16.msra.mxu0 %v2343_v34 }
  0x84   : > { %2348 = vmatprep.subr.bf16.mxu0 %v2347_v40 }
  0x85   : > { %2222 = vmatpush3.bf16.msra.mxu1 %v2219_v39 }
  0x86   : > { %2383 = vmatprep.subr.bf16.mxu1 %v2351_v43 }
  0x87   : > { %2350 = vmatpush3.bf16.msra.mxu0 %v2347_v40 }
  0x88   : > { %2352 = vmatprep.subr.bf16.mxu0 %v2351_v43  ;;  %1882 = vmatmul.mubr.f32.vlgmr.msra.gmra.mrb[0].mxu1 %v2768_v59  ;;  %v1515_v59 = vld [vmem:[%s3053_s1 + $0x430] sm:$0xff] }
  0x89   : > { %2391 = vmatpush3.bf16.msra.mxu1 %v2351_v43  ;;  %1884 = vmatprep.mubr.f32.mxu1 %v2775_v62  ;;  %v1517_v62 = vld [vmem:[%s3053_s1 + $0x440] sm:$0xff] }
  0x8a   : > { %2046 = vmatmul.mubr.f32.vlgmr.msra.gmra.mrb[0].mxu0 %v2640_v3  ;;  %2384 = vmatprep.subr.bf16.mxu1 %v2355_v46  ;;  %v1031_v3 = vld [vmem:[%s2547_s24 + $0x39] sm:$0xff]  ;;  %s2448_s24 = smul.u32 40, %s3057_s13 }
  0x8b   : > { %2354 = vmatpush3.bf16.msra.mxu0 %v2351_v43  ;;  %2048 = vmatprep.mubr.f32.mxu0 %v2643_v5  ;;  %v2363_v5 = vpack.c.bf16 %v1516_v50, %v1515_v59 }
  0x8c   : > { %2356 = vmatprep.subr.bf16.mxu0 %v2355_v46  ;;  %1885 = vmatmul.mubr.f32.gmra.mrb[2].mxu1 %v2796_v8  ;;  %v1518_v8 = vld [vmem:[%s3053_s1 + $0x448] sm:$0xff]  ;;  %s170_s20 = scalar_lea.vmem %s3055_s3, %s2448_s24 }
  0x8d   : > { %2392 = vmatpush3.bf16.msra.mxu1 %v2355_v46  ;;  %1887 = vmatprep.mubr.f32.mxu1 %v2803_v10  ;;  %v1520_v10 = vld [vmem:[%s3053_s1 + $0x458] sm:$0xff] }
  0x8e   : > { %2049 = vmatmul.mubr.f32.gmra.mrb[2].mxu0 %v2662_v11  ;;  %2385 = vmatprep.subr.bf16.mxu1 %v2359_v49  ;;  %v2367_v11 = vpack.c.bf16 %v1518_v8, %v1517_v62 }
  0x8f   : > { %2358 = vmatpush3.bf16.msra.mxu0 %v2355_v46  ;;  %2051 = vmatprep.mubr.f32.mxu0 %v2665_v13  ;;  %v1519_v13 = vld [vmem:[%s3053_s1 + $0x450] sm:$0xff] }
  0x90   : > { %2360 = vmatprep.subr.bf16.mxu0 %v2359_v49  ;;  %1888 = vmatmul.mubr.f32.gmra.mrb[4].mxu1 %v2917_v12  ;;  %v2371_v53 = vpack.c.bf16 %v1520_v10, %v1519_v13 }
  0x91   : > { %2393 = vmatpush3.bf16.msra.mxu1 %v2359_v49  ;;  %2089 = vmatprep.mubr.f32.mxu1 %v2778_v0  ;;  %v1524_v0 = vld [vmem:[%s3053_s1 + $0x478] sm:$0xff] }
  0x92   : > { %2052 = vmatmul.mubr.f32.gmra.mrb[4].mxu0 %v1031_v3  ;;  %2386 = vmatprep.subr.bf16.mxu1 %v2363_v5 }
  0x93   : > { %2362 = vmatpush3.bf16.msra.mxu0 %v2359_v49  ;;  %2086 = vmatprep.mubr.f32.mxu0 %v2752_v52  ;;  %v1523_v52 = vld [vmem:[%s3053_s1 + $0x470] sm:$0xff] }
  0x94   : > { %2364 = vmatprep.subr.bf16.mxu0 %v2363_v5  ;;  %v2379_v57 = vpack.c.bf16 %v1524_v0, %v1523_v52 }
  0x95   : > { %2394 = vmatpush3.bf16.msra.mxu1 %v2363_v5 }
  0x96   : > { %2387 = vmatprep.subr.bf16.mxu1 %v2367_v11 }
  0x97   : > { %2366 = vmatpush3.bf16.msra.mxu0 %v2363_v5 }
  0x98   : > { %2368 = vmatprep.subr.bf16.mxu0 %v2367_v11 }
  0x99   : > { %2395 = vmatpush3.bf16.msra.mxu1 %v2367_v11 }
  0x9a   : > { %2388 = vmatprep.subr.bf16.mxu1 %v2371_v53 }
  0x9b   : > { %2370 = vmatpush3.bf16.msra.mxu0 %v2367_v11 }
  0x9c   : > { %2372 = vmatprep.subr.bf16.mxu0 %v2371_v53 }
  0x9d   : > { %2396 = vmatpush3.bf16.msra.mxu1 %v2371_v53 }
  0x9e   : > { %2389 = vmatprep.subr.bf16.mxu1 %v2375_v56 }
  0x9f   : > { %2374 = vmatpush3.bf16.msra.mxu0 %v2371_v53 }
  0xa0   : > { %2376 = vmatprep.subr.bf16.mxu0 %v2375_v56 }
  0xa1   : > { %2397 = vmatpush3.bf16.msra.mxu1 %v2375_v56 }
  0xa2   : > { %2390 = vmatprep.subr.bf16.mxu1 %v2379_v57 }
  0xa3   : > { %2378 = vmatpush3.bf16.msra.mxu0 %v2375_v56 }
  0xa4   : > { %2380 = vmatprep.subr.bf16.mxu0 %v2379_v57 }
  0xa5   : > { %2398 = vmatpush3.bf16.msra.mxu1 %v2379_v57 }
  0xa7   : > { %2382 = vmatpush3.bf16.msra.mxu0 %v2379_v57 }
  0xa8   : > { %2090 = vmatmul.mubr.f32.vlgmr.msra.gmra.mrb[6].mxu1 %v2800_v9 }
  0xa9   : > { %2092 = vmatprep.mubr.f32.mxu1 %v2806_v14 }
  0xaa   : > { %2087 = vmatmul.mubr.f32.vlgmr.msra.gmra.mrb[0].mxu0 %v2772_v61  ;;  %v1525_v61 = vld [vmem:[%s3054_s2] ss:$0 sm:$0xff] }
  0xac   : > { %2093 = vmatmul.mubr.f32.gmra.mrb[8].mxu1 %v1155_v58 }
 0x15b   : > { %v1883_v63 = vpop.f32.mrb[0].mxu1 }
 0x15c   : > { %v619_v1 = vpop.f32.mrb[1].mxu1 }
 0x15f   : > { %v1886_v2 = vpop.f32.mrb[2].mxu1 }
 0x160   : > { %v629_v4 = vpop.f32.mrb[3].mxu1 }
 0x161   : > { %v2050_v20 = vpop.f32.mrb[2].mxu0 }
 0x162   : > { %v2401_v6 = vadd.f32 %v2050_v20, %v1886_v2  ;;  %v1125_v7 = vpop.f32.mrb[3].mxu0 }
 0x163   : > { %v2403_v12 = vadd.f32 %v1125_v7, %v629_v4  ;;  %v1889_v15 = vpop.f32.mrb[4].mxu1 }
 0x164   : > { %v639_v17 = vpop.f32.mrb[5].mxu1 }
 0x165   : > { %v2053_v16 = vpop.f32.mrb[4].mxu0 }
 0x166   : > { %v2405_v18 = vadd.f32 %v2053_v16, %v1889_v15  ;;  %v1135_v19 = vpop.f32.mrb[5].mxu0 }
 0x167   : > { %v2407_v9 = vadd.f32 %v1135_v19, %v639_v17 }
 0x17b   : > { %v2091_v14 = vpop.f32.mrb[6].mxu1 }
 0x17c   : > { %v2402_v22 = vadd.f32 %v2401_v6, %v2091_v14  ;;  %v1249_v23 = vpop.f32.mrb[7].mxu1 }
 0x17d   : > { %v2088_v21 = vpop.f32.mrb[0].mxu0  ;;  %v2404_v26 = vadd.f32 %v2403_v12, %v1249_v23 }
 0x17e   : > { %v2399_v24 = vadd.f32 %v2088_v21, %v1883_v63  ;;  %v1239_v25 = vpop.f32.mrb[1].mxu0  ;;  %v1284_v27 = vadd.f32 %v2402_v22, %v1525_v61 }
 0x17f   : > { %v2400_v28 = vadd.f32 %v1239_v25, %v619_v1  ;;  %v1283_v30 = vadd.f32 %v2404_v26, %v1525_v61  ;;  %v2094_v51 = vpop.f32.mrb[8].mxu1 }
 0x180   : > { %v1282_v29 = vadd.f32 %v2399_v24, %v1525_v61  ;;  %v1290_v31 = vmax.f32 %v1284_v27, 0.0  ;;  %v2406_v60 = vadd.f32 %v2405_v18, %v2094_v51  ;;  %v1259_v33 = vpop.f32.mrb[9].mxu1 }
 0x181   : > { %v1281_v32 = vadd.f32 %v2400_v28, %v1525_v61  ;;  %v1289_v35 = vmax.f32 %v1283_v30, 0.0  ;;  %v2408_v36 = vadd.f32 %v2407_v9, %v1259_v33 }
 0x182   : > { %v1288_v34 = vmax.f32 %v1282_v29, 0.0  ;;  %v1304_v37 = vrot.slane %v1290_v31, 1  ;;  %v1286_v39 = vadd.f32 %v2406_v60, %v1525_v61 }
 0x183   : > { %v1287_v38 = vmax.f32 %v1281_v32, 0.0  ;;  %v1302_v41 = vrot.slane %v1289_v35, 1  ;;  %v1285_v42 = vadd.f32 %v2408_v36, %v1525_v61 }
 0x184   : > { %v1300_v40 = vrot.slane %v1288_v34, 1  ;;  %v1292_v44 = vmax.f32 %v1286_v39, 0.0 }
 0x185   : > { %v1299_v43 = vrot.slane %v1287_v38, 1  ;;  %v1305_v46 = vsel %vm1298_vm0, %v1302_v41, %v1304_v37  ;;  %v1291_v47 = vmax.f32 %v1285_v42, 0.0 }
 0x186   : > { %v1303_v45 = vsel %vm1298_vm0, %v1300_v40, %v1302_v41  ;;  %v1315_v59 = vmax.f32 %v1289_v35, %v1305_v46  ;;  %v1319_v50 = vrot.slane %v1292_v44, 1 }
 0x187   : > { %v1301_v48 = vsel %vm1298_vm0, %v1299_v43, %v1300_v40  ;;  %v1314_v49 = vmax.f32 %v1288_v34, %v1303_v45  ;;  %v1306_v5 = vrot.slane %v1291_v47, 1 }
 0x188   : > { %v1313_v3 = vmax.f32 %v1287_v38, %v1301_v48  ;;  %v1324_v8 = vmax.f32 %v1292_v44, %v1319_v50 }
 0x189   : > { %v1326_v62 = vmax.f32 %v1314_v49, %v1315_v59  ;;  %v1307_v13 = vsel %vm1298_vm0, %v1304_v37, %v1306_v5  ;;  %v1317_v10 = vmax.f32 %v1291_v47, %v1306_v5  ;;  %v1320_v53 = vsel %vm1298_vm0, %v1306_v5, %v1319_v50 }
 0x18a   : > { %v1325_v11 = vmax.f32 %v1313_v3, %v1314_v49  ;;  %v1316_v54 = vmax.f32 %v1290_v31, %v1307_v13  ;;  %v1323_v55 = vmax.f32 %v1291_v47, %v1320_v53 }
 0x18b   : > { %1331 = vst [vmem:[%s170_s20 + $0x8] sm:$0xff] %v1326_v62  ;;  %v1329_v56 = vmax.f32 %v1317_v10, %v1324_v8 }
 0x18c   : > { %1330 = vst [vmem:[%s170_s20] sm:$0xff] %v1325_v11  ;;  %v1327_v52 = vmax.f32 %v1315_v59, %v1316_v54  ;;  %v1328_v0 = vmax.f32 %v1316_v54, %v1323_v55 }
 0x18d   : > { %1334 = vst [vmem:[%s170_s20 + $0x20] sm:$0x7f] %v1329_v56 }
 0x18e   : > { %1332 = vst [vmem:[%s170_s20 + $0x10] sm:$0xff] %v1327_v52  ;;  %1333 = vst [vmem:[%s170_s20 + $0x18] sm:$0xff] %v1328_v0 }
 0x18f PF: > { %s13_s12 = sadd.s32 1, %s2463_s12  }
 0x190   : > { %p10_p4 = scmp.ge.s32.totalorder %s13_s12, 4  }
 0x192   :  { %12 = sbr.rel (!%p10_p4) target bundleno = 1 (0x1), region = 70 }

// kernel: net_forward.5
= control target key start
LH: loop header
LB: loop body
LE: loop exit
PB: predicated region body
PF: predicated region fallthrough
CT: control target
= control target key end

     0   :  { %s4292_s12 = smov 0   ;;  %s5382_s0 = inlined_call_operand.vmem [shape: f32[2,240,128], index: 0, kind: input, shape index: {}]   ;;  %s5383_s1 = inlined_call_operand.vmem [shape: f32[9,128,128], index: 1, kind: input, shape index: {}]   ;;  %s5384_s2 = inlined_call_operand.vmem [shape: f32[1,128], index: 2, kind: input, shape index: {}]   ;;  %s5385_s3 = inlined_call_operand.vmem [shape: f32[2,175,128], index: 3, kind: output, shape index: {}]  }
   0x1 LB: > { %s2648_s13 = sadd.s32 4294967295, %s4270_s12   ;;  %p2652_p0 = scmp.ge.s32.totalorder %s4270_s12, 1  ;;  %s4270_s12 = sphi %s4292_s12, %s13_s12  }
   0x2   : > { %p137_p1 = scmp.lt.s32.totalorder %s4270_s12, 3 }
   0x4   : > { %p138_p2 = pnand %p2652_p0, %p137_p1 }
   0x6   : > { %141 = sbr.rel (%p138_p2) target bundleno = 502 (0x1f6), region = 32 }
   0xd   : > { %v2655_v0 = vld [vmem:[%s5383_s1 + $0x80] sm:$0xff]  ;;  %v2656_v1 = vld [vmem:[%s5383_s1 + $0x88] sm:$0xff]  ;;  %p161_p3 = scmp.lt.s32.totalorder %s2648_s13, 1  ;;  %v2657_v5 = vld [vmem:[%s5383_s1 + $0x90] sm:$0xff]  ;;  %vm2449_vm0 = vcmask 1046528  }
   0xe   : > { %v2703_v2 = vld [vmem:[%s5383_s1 + $0x200] sm:$0xff]  ;;  %v3758_v3 = vpack.c.bf16 %v2656_v1, %v2655_v0  ;;  %v2704_v4 = vld [vmem:[%s5383_s1 + $0x208] sm:$0xff]  ;;  %v2658_v6 = vld [vmem:[%s5383_s1 + $0x98] sm:$0xff] }
   0xf   : > { %v3886_v7 = vpack.c.bf16 %v2704_v4, %v2703_v2  ;;  %v3762_v8 = vpack.c.bf16 %v2658_v6, %v2657_v5  ;;  %v2705_v9 = vld [vmem:[%s5383_s1 + $0x210] sm:$0xff]  ;;  %v2706_v10 = vld [vmem:[%s5383_s1 + $0x218] sm:$0xff]  ;;  %v2659_v11 = vld [vmem:[%s5383_s1 + $0xa0] sm:$0xff]  ;;  %s5435_s13 = smov (!%p161_p3, %s2648_s13), 1 }
  0x10   : > { %3759 = vmatprep.subr.bf16.mxu1 %v3758_v3  ;;  %v3890_v12 = vpack.c.bf16 %v2706_v10, %v2705_v9  ;;  %v2660_v13 = vld [vmem:[%s5383_s1 + $0xa8] sm:$0xff]  ;;  %v2707_v14 = vld [vmem:[%s5383_s1 + $0x220] sm:$0xff]  ;;  %s4254_s11 = smul.u32 240, %s5435_s13  ;;  %v2661_v18 = vld [vmem:[%s5383_s1 + $0xb0] sm:$0xff] }
  0x11   : > { %v2708_v15 = vld [vmem:[%s5383_s1 + $0x228] sm:$0xff]  ;;  %3887 = vmatprep.subr.bf16.mxu0 %v3886_v7  ;;  %3761 = vmatpush3.bf16.msra.mxu1 %v3758_v3  ;;  %v3766_v16 = vpack.c.bf16 %v2660_v13, %v2659_v11  ;;  %v2662_v19 = vld [vmem:[%s5383_s1 + $0xb8] sm:$0xff]  ;;  %v2709_v20 = vld [vmem:[%s5383_s1 + $0x230] sm:$0xff]  ;;  %s4255_s17 = smul.u32 176, %s5435_s13 }
  0x12   : > { %3889 = vmatpush3.bf16.msra.mxu0 %v3886_v7  ;;  %3763 = vmatprep.subr.bf16.mxu1 %v3762_v8  ;;  %v3894_v17 = vpack.c.bf16 %v2708_v15, %v2707_v14  ;;  %v2710_v21 = vld [vmem:[%s5383_s1 + $0x238] sm:$0xff]  ;;  %s4354_s24 = scalar_lea.vmem %s5382_s0, %s4254_s11  ;;  %v3770_v22 = vpack.c.bf16 %v2662_v19, %v2661_v18  ;;  %v2663_v24 = vld [vmem:[%s5383_s1 + $0xc0] sm:$0xff]  ;;  %v2664_v25 = vld [vmem:[%s5383_s1 + $0xc8] sm:$0xff] }
  0x13   : > { %3891 = vmatprep.subr.bf16.mxu0 %v3890_v12  ;;  %v3898_v23 = vpack.c.bf16 %v2710_v21, %v2709_v20  ;;  %v211_v26 = vld [vmem:[%s4354_s24 + $0x1] sm:$0xff]  ;;  %v4370_v29 = vld [vmem:[%s4354_s24 + $0x11] sm:$0xff]  ;;  %v3774_v30 = vpack.c.bf16 %v2664_v25, %v2663_v24  ;;  %v212_v58 = vld [vmem:[%s4354_s24 + $0x9] sm:$0xff]  ;;  %s5264_s19 = scalar_lea.vmem %s5385_s3, %s4255_s17 }
  0x14   : > { %v2711_v27 = vld [vmem:[%s5383_s1 + $0x240] sm:$0xff]  ;;  %v2712_v28 = vld [vmem:[%s5383_s1 + $0x248] sm:$0xff]  ;;  %3178 = vmatprep.mubr.f32.mxu1 %v211_v26  ;;  %3450 = vmatprep.mubr.f32.mxu0 %v4370_v29  ;;  %v2665_v32 = vld [vmem:[%s5383_s1 + $0xd0] sm:$0xff] }
  0x15   : > { %3765 = vmatpush3.bf16.msra.mxu1 %v3762_v8  ;;  %v3902_v31 = vpack.c.bf16 %v2712_v28, %v2711_v27  ;;  %v2666_v33 = vld [vmem:[%s5383_s1 + $0xd8] sm:$0xff]  ;;  %v2713_v34 = vld [vmem:[%s5383_s1 + $0x250] sm:$0xff]  ;;  %v2667_v38 = vld [vmem:[%s5383_s1 + $0xe0] sm:$0xff] }
  0x16   : > { %3893 = vmatpush3.bf16.msra.mxu0 %v3890_v12  ;;  %3767 = vmatprep.subr.bf16.mxu1 %v3766_v16  ;;  %v2714_v35 = vld [vmem:[%s5383_s1 + $0x258] sm:$0xff]  ;;  %v3778_v36 = vpack.c.bf16 %v2666_v33, %v2665_v32  ;;  %v2668_v39 = vld [vmem:[%s5383_s1 + $0xe8] sm:$0xff]  ;;  %v2715_v40 = vld [vmem:[%s5383_s1 + $0x260] sm:$0xff] }
  0x17   : > { %3895 = vmatprep.subr.bf16.mxu0 %v3894_v17  ;;  %v3906_v37 = vpack.c.bf16 %v2714_v35, %v2713_v34  ;;  %v2716_v41 = vld [vmem:[%s5383_s1 + $0x268] sm:$0xff]  ;;  %v3782_v42 = vpack.c.bf16 %v2668_v39, %v2667_v38  ;;  %v2669_v44 = vld [vmem:[%s5383_s1 + $0xf0] sm:$0xff]  ;;  %v2670_v45 = vld [vmem:[%s5383_s1 + $0xf8] sm:$0xff] }
  0x18   : > { %v3910_v43 = vpack.c.bf16 %v2716_v41, %v2715_v40  ;;  %v2717_v46 = vld [vmem:[%s5383_s1 + $0x270] sm:$0xff]  ;;  %v2718_v47 = vld [vmem:[%s5383_s1 + $0x278] sm:$0xff]  ;;  %v3786_v48 = vpack.c.bf16 %v2670_v45, %v2669_v44  ;;  %v195_v50 = vld [vmem:[%s5383_s1] sm:$0xff] }
  0x19   : > { %3769 = vmatpush3.bf16.msra.mxu1 %v3766_v16  ;;  %v3914_v49 = vpack.c.bf16 %v2718_v47, %v2717_v46  ;;  %v196_v51 = vld [vmem:[%s5383_s1 + $0x8] sm:$0xff]  ;;  %v2719_v52 = vld [vmem:[%s5383_s1 + $0x280] sm:$0xff]  ;;  %v197_v56 = vld [vmem:[%s5383_s1 + $0x10] sm:$0xff] }
  0x1a   : > { %3897 = vmatpush3.bf16.msra.mxu0 %v3894_v17  ;;  %3771 = vmatprep.subr.bf16.mxu1 %v3770_v22  ;;  %v2720_v53 = vld [vmem:[%s5383_s1 + $0x288] sm:$0xff]  ;;  %v3790_v54 = vpack.c.bf16 %v196_v51, %v195_v50  ;;  %v198_v57 = vld [vmem:[%s5383_s1 + $0x18] sm:$0xff]  ;;  %v2721_v59 = vld [vmem:[%s5383_s1 + $0x290] sm:$0xff] }
  0x1b   : > { %3899 = vmatprep.subr.bf16.mxu0 %v3898_v23  ;;  %v3918_v55 = vpack.c.bf16 %v2720_v53, %v2719_v52  ;;  %v2722_v60 = vld [vmem:[%s5383_s1 + $0x298] sm:$0xff]  ;;  %v3794_v62 = vpack.c.bf16 %v198_v57, %v197_v56  ;;  %v4436_v63 = vld [vmem:[%s4354_s24 + $0x21] sm:$0xff]  ;;  %v4452_v5 = vld [vmem:[%s4354_s24 + $0x29] sm:$0xff] }
  0x1c   : > { %v1123_v61 = vld [vmem:[%s4354_s24 + $0x19] sm:$0xff]  ;;  %v3922_v0 = vpack.c.bf16 %v2722_v60, %v2721_v59  ;;  %v200_v2 = vld [vmem:[%s5383_s1 + $0x28] sm:$0xff]  ;;  %v4456_v6 = vld [vmem:[%s4354_s24 + $0x31] sm:$0xff] }
  0x1d   : > { %3773 = vmatpush3.bf16.msra.mxu1 %v3770_v22  ;;  %v199_v1 = vld [vmem:[%s5383_s1 + $0x20] sm:$0xff]  ;;  %v2724_v4 = vld [vmem:[%s5383_s1 + $0x2a8] sm:$0xff]  ;;  %v201_v9 = vld [vmem:[%s5383_s1 + $0x30] sm:$0xff] }
  0x1e   : > { %3901 = vmatpush3.bf16.msra.mxu0 %v3898_v23  ;;  %3775 = vmatprep.subr.bf16.mxu1 %v3774_v30  ;;  %v2723_v3 = vld [vmem:[%s5383_s1 + $0x2a0] sm:$0xff]  ;;  %v3798_v7 = vpack.c.bf16 %v200_v2, %v199_v1  ;;  %v202_v10 = vld [vmem:[%s5383_s1 + $0x38] sm:$0xff]  ;;  %v2725_v11 = vld [vmem:[%s5383_s1 + $0x2b0] sm:$0xff] }
  0x1f   : > { %3903 = vmatprep.subr.bf16.mxu0 %v3902_v31  ;;  %v3926_v8 = vpack.c.bf16 %v2724_v4, %v2723_v3  ;;  %v2726_v12 = vld [vmem:[%s5383_s1 + $0x2b8] sm:$0xff]  ;;  %v4477_v14 = vld [vmem:[%s4354_s24 + $0x41] sm:$0xff]  ;;  %v3802_v15 = vpack.c.bf16 %v202_v10, %v201_v9  ;;  %v4496_v21 = vld [vmem:[%s4354_s24 + $0x49] sm:$0xff] }
  0x20   : > { %v4474_v13 = vld [vmem:[%s4354_s24 + $0x39] sm:$0xff]  ;;  %v3930_v16 = vpack.c.bf16 %v2726_v12, %v2725_v11  ;;  %v204_v18 = vld [vmem:[%s5383_s1 + $0x48] sm:$0xff]  ;;  %v4499_v22 = vld [vmem:[%s4354_s24 + $0x51] sm:$0xff] }
  0x21   : > { %3777 = vmatpush3.bf16.msra.mxu1 %v3774_v30  ;;  %v203_v17 = vld [vmem:[%s5383_s1 + $0x40] sm:$0xff]  ;;  %v2728_v20 = vld [vmem:[%s5383_s1 + $0x2c8] sm:$0xff]  ;;  %v205_v25 = vld [vmem:[%s5383_s1 + $0x50] sm:$0xff] }
  0x22   : > { %3905 = vmatpush3.bf16.msra.mxu0 %v3902_v31  ;;  %3779 = vmatprep.subr.bf16.mxu1 %v3778_v36  ;;  %v2727_v19 = vld [vmem:[%s5383_s1 + $0x2c0] sm:$0xff]  ;;  %v3806_v23 = vpack.c.bf16 %v204_v18, %v203_v17  ;;  %v206_v26 = vld [vmem:[%s5383_s1 + $0x58] sm:$0xff]  ;;  %v2729_v27 = vld [vmem:[%s5383_s1 + $0x2d0] sm:$0xff] }
  0x23   : > { %3907 = vmatprep.subr.bf16.mxu0 %v3906_v37  ;;  %v3934_v24 = vpack.c.bf16 %v2728_v20, %v2727_v19  ;;  %v2730_v28 = vld [vmem:[%s5383_s1 + $0x2d8] sm:$0xff]  ;;  %v4521_v30 = vld [vmem:[%s4354_s24 + $0x61] sm:$0xff]  ;;  %v3810_v31 = vpack.c.bf16 %v206_v26, %v205_v25  ;;  %v209_v41 = vld [vmem:[%s5383_s1 + $0x70] sm:$0xff] }
  0x24   : > { %5402 = vst [vmem:[#allocation2_spill] sm:$0xff] %v4521_v30  ;;  %v3938_v32 = vpack.c.bf16 %v2730_v28, %v2729_v27  ;;  %v207_v33 = vld [vmem:[%s5383_s1 + $0x60] sm:$0xff]  ;;  %v208_v34 = vld [vmem:[%s5383_s1 + $0x68] sm:$0xff]  ;;  %v4543_v38 = vld [vmem:[%s4354_s24 + $0x71] sm:$0xff] }
  0x25   : > { %3781 = vmatpush3.bf16.msra.mxu1 %v3778_v36  ;;  %v2731_v35 = vld [vmem:[%s5383_s1 + $0x2e0] sm:$0xff]  ;;  %v2732_v36 = vld [vmem:[%s5383_s1 + $0x2e8] sm:$0xff]  ;;  %5404 = vst [vmem:[#allocation4_spill] sm:$0xff] %v4543_v38  ;;  %v3814_v39 = vpack.c.bf16 %v208_v34, %v207_v33  ;;  %v2734_v44 = vld [vmem:[%s5383_s1 + $0x2f8] sm:$0xff] }
  0x26   : > { %3909 = vmatpush3.bf16.msra.mxu0 %v3906_v37  ;;  %3783 = vmatprep.subr.bf16.mxu1 %v3782_v42  ;;  %v4540_v37 = vld [vmem:[%s4354_s24 + $0x69] sm:$0xff]  ;;  %v3942_v40 = vpack.c.bf16 %v2732_v36, %v2731_v35  ;;  %v4562_v45 = vld [vmem:[%s4354_s24 + $0x79] sm:$0xff]  ;;  %v4565_v46 = vld [vmem:[%s4354_s24 + $0x81] sm:$0xff] }
  0x27   : > { %3911 = vmatprep.subr.bf16.mxu0 %v3910_v43  ;;  %5403 = vst [vmem:[#allocation3_spill] sm:$0xff] %v4540_v37  ;;  %5405 = vst [vmem:[#allocation5_spill] sm:$0xff] %v4562_v45  ;;  %v2672_v50 = vld [vmem:[%s5383_s1 + $0x108] sm:$0xff]  ;;  %v2735_v51 = vld [vmem:[%s5383_s1 + $0x300] sm:$0xff] }
  0x28   : > { %5406 = vst [vmem:[#allocation6_spill] sm:$0xff] %v4565_v46  ;;  %v2736_v52 = vld [vmem:[%s5383_s1 + $0x308] sm:$0xff]  ;;  %v4594_v57 = vld [vmem:[%s4354_s24 + $0x99] sm:$0xff]  ;;  %v4607_v60 = vld [vmem:[%s4354_s24 + $0xb1] sm:$0xff] }
  0x29   : > { %3785 = vmatpush3.bf16.msra.mxu1 %v3782_v42  ;;  %v210_v42 = vld [vmem:[%s5383_s1 + $0x78] sm:$0xff]  ;;  %v4584_v53 = vld [vmem:[%s4354_s24 + $0x89] sm:$0xff]  ;;  %v3950_v56 = vpack.c.bf16 %v2736_v52, %v2735_v51  ;;  %5409 = vst [vmem:[#allocation9_spill] sm:$0xff] %v4594_v57  ;;  %5412 = vst [vmem:[#allocation12_spill] sm:$0xff] %v4607_v60 }
  0x2a   : > { %3913 = vmatpush3.bf16.msra.mxu0 %v3910_v43  ;;  %3787 = vmatprep.subr.bf16.mxu1 %v3786_v48  ;;  %v2733_v43 = vld [vmem:[%s5383_s1 + $0x2f0] sm:$0xff]  ;;  %v3818_v47 = vpack.c.bf16 %v210_v42, %v209_v41  ;;  %5407 = vst [vmem:[#allocation7_spill] sm:$0xff] %v4584_v53  ;;  %v171_v1 = vld [vmem:[%s4354_s24] sm:$0xff]  ;;  %v2674_v4 = vld [vmem:[%s5383_s1 + $0x118] sm:$0xff] }
  0x2b   : > { %3915 = vmatprep.subr.bf16.mxu0 %v3914_v49  ;;  %v4604_v59 = vld [vmem:[%s4354_s24 + $0xa9] sm:$0xff]  ;;  %v4628_v2 = vld [vmem:[%s4354_s24 + $0x12] sm:$0xff]  ;;  %v4647_v10 = vld [vmem:[%s4354_s24 + $0x1a] sm:$0xff] }
  0x2c   : > { %5411 = vst [vmem:[#allocation11_spill] sm:$0xff] %v4604_v59  ;;  %v2673_v3 = vld [vmem:[%s5383_s1 + $0x110] sm:$0xff]  ;;  %v2738_v9 = vld [vmem:[%s5383_s1 + $0x318] sm:$0xff]  ;;  %v2675_v17 = vld [vmem:[%s5383_s1 + $0x120] sm:$0xff] }
  0x2d   : > { %3789 = vmatpush3.bf16.msra.mxu1 %v3786_v48  ;;  %v3946_v48 = vpack.c.bf16 %v2734_v44, %v2733_v43  ;;  %v4650_v11 = vld [vmem:[%s4354_s24 + $0x10] sm:$0xff]  ;;  %v3826_v12 = vpack.c.bf16 %v2674_v4, %v2673_v3  ;;  %v2676_v18 = vld [vmem:[%s5383_s1 + $0x128] sm:$0xff]  ;;  %v4663_v19 = vld [vmem:[%s4354_s24 + $0x18] sm:$0xff] }
  0x2e   : > { %3917 = vmatpush3.bf16.msra.mxu0 %v3914_v49  ;;  %3791 = vmatprep.subr.bf16.mxu1 %v3790_v54  ;;  %v2671_v49 = vld [vmem:[%s5383_s1 + $0x100] sm:$0xff]  ;;  %v4680_v26 = vld [vmem:[%s4354_s24 + $0x32] sm:$0xff]  ;;  %v3830_v27 = vpack.c.bf16 %v2676_v18, %v2675_v17  ;;  %v4692_v33 = vld [vmem:[%s4354_s24 + $0x28] sm:$0xff] }
  0x2f   : > { %3919 = vmatprep.subr.bf16.mxu0 %v3918_v55  ;;  %v2739_v20 = vld [vmem:[%s5383_s1 + $0x320] sm:$0xff]  ;;  %v2741_v34 = vld [vmem:[%s5383_s1 + $0x330] sm:$0xff]  ;;  %v2742_v35 = vld [vmem:[%s5383_s1 + $0x338] sm:$0xff] }
  0x30   : > { %3179 = vmatmul.mubr.f32.vlgmr.msra.gmra.mrb[0].mxu1 %v212_v58  ;;  %v4597_v58 = vld [vmem:[%s4354_s24 + $0xa1] sm:$0xff]  ;;  %v3962_v42 = vpack.c.bf16 %v2742_v35, %v2741_v34  ;;  %v4736_v52 = vld [vmem:[%s4354_s24 + $0x52] sm:$0xff] }
  0x31   : > { %3451 = vmatmul.mubr.f32.vlgmr.msra.gmra.mrb[0].mxu0 %v1123_v61  ;;  %3793 = vmatpush3.bf16.msra.mxu1 %v3790_v54  ;;  %v4587_v54 = vld [vmem:[%s4354_s24 + $0x91] sm:$0xff]  ;;  %5410 = vst [vmem:[#allocation10_spill] sm:$0xff] %v4597_v58  ;;  %v4676_v25 = vld [vmem:[%s4354_s24 + $0x20] sm:$0xff]  ;;  %v2680_v44 = vld [vmem:[%s5383_s1 + $0x148] sm:$0xff] }
  0x32   : > { %3921 = vmatpush3.bf16.msra.mxu0 %v3918_v55  ;;  %3181 = vmatprep.mubr.f32.mxu1 %v4370_v29  ;;  %v4518_v29 = vld [vmem:[%s4354_s24 + $0x59] sm:$0xff]  ;;  %5408 = vst [vmem:[#allocation8_spill] sm:$0xff] %v4587_v54  ;;  %v3822_v55 = vpack.c.bf16 %v2672_v50, %v2671_v49  ;;  %v2744_v49 = vld [vmem:[%s5383_s1 + $0x348] sm:$0xff] }
  0x33   : > { %3453 = vmatprep.mubr.f32.mxu0 %v4436_v63  ;;  %3795 = vmatprep.subr.bf16.mxu1 %v3794_v62  ;;  %v4702_v36 = vld [vmem:[%s4354_s24 + $0x3a] sm:$0xff]  ;;  %v4730_v50 = vld [vmem:[%s4354_s24 + $0x4a] sm:$0xff]  ;;  %v4792_v35 = vld [vmem:[%s4354_s24 + $0x72] sm:$0xff] }
  0x34   : > { %3182 = vmatmul.mubr.f32.gmra.mrb[2].mxu1 %v1123_v61  ;;  %3923 = vmatprep.subr.bf16.mxu0 %v3922_v0  ;;  %v4614_v61 = vld [vmem:[%s4354_s24 + $0xb9] sm:$0xff]  ;;  %v4748_v4 = vld [vmem:[%s4354_s24 + $0x48] sm:$0xff] }
  0x35   : > { %3454 = vmatmul.mubr.f32.gmra.mrb[2].mxu0 %v4452_v5  ;;  %3184 = vmatprep.mubr.f32.mxu1 %v4436_v63  ;;  %5413 = vst [vmem:[#allocation13_spill] sm:$0xff] %v4614_v61  ;;  %v2679_v43 = vld [vmem:[%s5383_s1 + $0x140] sm:$0xff]  ;;  %v2682_v3 = vld [vmem:[%s5383_s1 + $0x158] sm:$0xff] }
  0x36   : > { %3797 = vmatpush3.bf16.msra.mxu1 %v3794_v62  ;;  %3456 = vmatprep.mubr.f32.mxu0 %v4456_v6  ;;  %v4617_v62 = vld [vmem:[%s4354_s24 + $0xc1] sm:$0xff] }
  0x37   : > { %3925 = vmatpush3.bf16.msra.mxu0 %v3922_v0  ;;  %3799 = vmatprep.subr.bf16.mxu1 %v3798_v7  ;;  %5414 = vst [vmem:[#allocation14_spill] sm:$0xff] %v4617_v62  ;;  %v4624_v0 = vld [vmem:[%s4354_s24 + $0xc9] sm:$0xff]  ;;  %v4733_v51 = vld [vmem:[%s4354_s24 + $0x40] sm:$0xff] }
  0x38   : > { %3185 = vmatmul.mubr.f32.gmra.mrb[4].mxu1 %v4452_v5  ;;  %3927 = vmatprep.subr.bf16.mxu0 %v3926_v8  ;;  %5415 = vst [vmem:[#allocation15_spill] sm:$0xff] %v4624_v0  ;;  %v4789_v34 = vld [vmem:[%s4354_s24 + $0x60] sm:$0xff] }
  0x39   : > { %3457 = vmatmul.mubr.f32.gmra.mrb[4].mxu0 %v4474_v13  ;;  %3187 = vmatprep.mubr.f32.mxu1 %v4456_v6 }
  0x3a   : > { %3459 = vmatprep.mubr.f32.mxu0 %v4477_v14  ;;  %3801 = vmatpush3.bf16.msra.mxu1 %v3798_v7  ;;  %v172_v7 = vld [vmem:[%s4354_s24 + $0x8] sm:$0xff] }
  0x3b   : > { %3929 = vmatpush3.bf16.msra.mxu0 %v3926_v8  ;;  %3803 = vmatprep.subr.bf16.mxu1 %v3802_v15  ;;  %v2737_v8 = vld [vmem:[%s5383_s1 + $0x310] sm:$0xff] }
  0x3c   : > { %3188 = vmatmul.mubr.f32.gmra.mrb[6].mxu1 %v4474_v13  ;;  %3931 = vmatprep.subr.bf16.mxu0 %v3930_v16 }
  0x3d   : > { %3460 = vmatmul.mubr.f32.gmra.mrb[6].mxu0 %v4496_v21  ;;  %3190 = vmatprep.mubr.f32.mxu1 %v4477_v14 }
  0x3e   : > { %3462 = vmatprep.mubr.f32.mxu0 %v4499_v22  ;;  %3805 = vmatpush3.bf16.msra.mxu1 %v3802_v15  ;;  %v4653_v15 = vld [vmem:[%s4354_s24 + $0x22] sm:$0xff] }
  0x3f   : > { %3933 = vmatpush3.bf16.msra.mxu0 %v3930_v16  ;;  %3807 = vmatprep.subr.bf16.mxu1 %v3806_v23  ;;  %v3954_v16 = vpack.c.bf16 %v2738_v9, %v2737_v8  ;;  %v2746_v8 = vld [vmem:[%s5383_s1 + $0x358] sm:$0xff] }
  0x40   : > { %3191 = vmatmul.mubr.f32.gmra.mrb[8].mxu1 %v4496_v21  ;;  %3935 = vmatprep.subr.bf16.mxu0 %v3934_v24  ;;  %v4758_v9 = vld [vmem:[%s4354_s24 + $0x5a] sm:$0xff] }
  0x41   : > { %3463 = vmatmul.mubr.f32.gmra.mrb[8].mxu0 %v4518_v29  ;;  %3193 = vmatprep.mubr.f32.mxu1 %v4499_v22 }
  0x42   : > { %3465 = vmatprep.mubr.f32.mxu0 %v4521_v30  ;;  %3809 = vmatpush3.bf16.msra.mxu1 %v3806_v23  ;;  %v2740_v23 = vld [vmem:[%s5383_s1 + $0x328] sm:$0xff] }
  0x43   : > { %3937 = vmatpush3.bf16.msra.mxu0 %v3934_v24  ;;  %3811 = vmatprep.subr.bf16.mxu1 %v3810_v31  ;;  %v4673_v24 = vld [vmem:[%s4354_s24 + $0x2a] sm:$0xff]  ;;  %v3958_v28 = vpack.c.bf16 %v2740_v23, %v2739_v20  ;;  %v2683_v20 = vld [vmem:[%s5383_s1 + $0x160] sm:$0xff] }
  0x44   : > { %3194 = vmatmul.mubr.f32.gmra.mrb[10].mxu1 %v4518_v29  ;;  %3939 = vmatprep.subr.bf16.mxu0 %v3938_v32  ;;  %v2684_v23 = vld [vmem:[%s5383_s1 + $0x168] sm:$0xff] }
  0x45   : > { %3466 = vmatmul.mubr.f32.gmra.mrb[10].mxu0 %v4540_v37  ;;  %3196 = vmatprep.mubr.f32.mxu1 %v4521_v30  ;;  %v2691_v30 = vld [vmem:[%s5383_s1 + $0x1a0] sm:$0xff] }
  0x46   : > { %3468 = vmatprep.mubr.f32.mxu0 %v4543_v38  ;;  %3813 = vmatpush3.bf16.msra.mxu1 %v3810_v31  ;;  %v2677_v31 = vld [vmem:[%s5383_s1 + $0x130] sm:$0xff] }
  0x47   : > { %3941 = vmatpush3.bf16.msra.mxu0 %v3938_v32  ;;  %3815 = vmatprep.subr.bf16.mxu1 %v3814_v39  ;;  %v2678_v32 = vld [vmem:[%s5383_s1 + $0x138] sm:$0xff] }
  0x48   : > { %3197 = vmatmul.mubr.f32.gmra.mrb[12].mxu1 %v4540_v37  ;;  %3943 = vmatprep.subr.bf16.mxu0 %v3942_v40  ;;  %v3834_v41 = vpack.c.bf16 %v2678_v32, %v2677_v31  ;;  %v2748_v31 = vld [vmem:[%s5383_s1 + $0x368] sm:$0xff] }
  0x49   : > { %3469 = vmatmul.mubr.f32.gmra.mrb[12].mxu0 %v4562_v45  ;;  %3199 = vmatprep.mubr.f32.mxu1 %v4543_v38  ;;  %v4786_v32 = vld [vmem:[%s4354_s24 + $0x6a] sm:$0xff] }
  0x4a   : > { %3471 = vmatprep.mubr.f32.mxu0 %v4565_v46  ;;  %3817 = vmatpush3.bf16.msra.mxu1 %v3814_v39  ;;  %v4705_v39 = vld [vmem:[%s4354_s24 + $0x30] sm:$0xff] }
  0x4b   : > { %3945 = vmatpush3.bf16.msra.mxu0 %v3942_v40  ;;  %3819 = vmatprep.subr.bf16.mxu1 %v3818_v47  ;;  %v4708_v40 = vld [vmem:[%s4354_s24 + $0x42] sm:$0xff] }
  0x4c   : > { %3200 = vmatmul.mubr.f32.gmra.mrb[14].mxu1 %v4562_v45  ;;  %3947 = vmatprep.subr.bf16.mxu0 %v3946_v48  ;;  %v2754_v45 = vld [vmem:[%s5383_s1 + $0x398] sm:$0xff] }
  0x4d   : > { %3472 = vmatmul.mubr.f32.gmra.mrb[14].mxu0 %v4584_v53  ;;  %3202 = vmatprep.mubr.f32.mxu1 %v4565_v46  ;;  %v623_v46 = vld [vmem:[%s4354_s24 + $0xa] sm:$0xff] }
  0x4e   : > { %3474 = vmatprep.mubr.f32.mxu0 %v4587_v54  ;;  %3821 = vmatpush3.bf16.msra.mxu1 %v3818_v47  ;;  %v4720_v47 = vld [vmem:[%s4354_s24 + $0x38] sm:$0xff] }
  0x4f   : > { %3949 = vmatpush3.bf16.msra.mxu0 %v3946_v48  ;;  %3823 = vmatprep.subr.bf16.mxu1 %v3822_v55  ;;  %v2743_v48 = vld [vmem:[%s5383_s1 + $0x340] sm:$0xff] }
  0x50   : > { %3203 = vmatmul.mubr.f32.gmra.mrb[16].mxu1 %v4584_v53  ;;  %3951 = vmatprep.subr.bf16.mxu0 %v3950_v56  ;;  %v2690_v53 = vld [vmem:[%s5383_s1 + $0x198] sm:$0xff] }
  0x51   : > { %3475 = vmatmul.mubr.f32.gmra.mrb[16].mxu0 %v4594_v57  ;;  %3205 = vmatprep.mubr.f32.mxu1 %v4587_v54  ;;  %v2689_v54 = vld [vmem:[%s5383_s1 + $0x190] sm:$0xff] }
  0x52   : > { %3477 = vmatprep.mubr.f32.mxu0 %v4597_v58  ;;  %v3858_v38 = vpack.c.bf16 %v2690_v53, %v2689_v54  ;;  %v2693_v54 = vld [vmem:[%s5383_s1 + $0x1b0] sm:$0xff] }
  0x54   : > { %3206 = vmatmul.mubr.f32.gmra.mrb[18].mxu1 %v4594_v57  ;;  %v622_v57 = vld [vmem:[%s4354_s24 + $0x2] sm:$0xff] }
  0x55   : > { %3478 = vmatmul.mubr.f32.gmra.mrb[18].mxu0 %v4604_v59  ;;  %3208 = vmatprep.mubr.f32.mxu1 %v4597_v58  ;;  %v4906_v58 = vld [vmem:[%s4354_s24 + $0xca] sm:$0xff] }
  0x56   : > { %3480 = vmatprep.mubr.f32.mxu0 %v4607_v60  ;;  %5417 = vst [vmem:[#allocation17_spill] sm:$0xff] %v4906_v58 }
  0x58   : > { %3209 = vmatmul.mubr.f32.gmra.mrb[20].mxu1 %v4604_v59  ;;  %v4902_v59 = vld [vmem:[%s4354_s24 + $0xb8] sm:$0xff] }
  0x59   : > { %3481 = vmatmul.mubr.f32.gmra.mrb[20].mxu0 %v4614_v61  ;;  %3211 = vmatprep.mubr.f32.mxu1 %v4607_v60  ;;  %v4896_v60 = vld [vmem:[%s4354_s24 + $0xc2] sm:$0xff] }
  0x5a   : > { %3483 = vmatprep.mubr.f32.mxu0 %v4617_v62  ;;  %v4890_v62 = vld [vmem:[%s4354_s24 + $0xba] sm:$0xff]  ;;  %5416 = vst [vmem:[#allocation16_spill] sm:$0xff] %v4896_v60 }
  0x5c   : > { %3212 = vmatmul.mubr.f32.gmra.mrb[22].mxu1 %v4614_v61  ;;  %v4893_v61 = vld [vmem:[%s4354_s24 + $0xb0] sm:$0xff] }
  0x5d   : > { %3484 = vmatmul.mubr.f32.gmra.mrb[22].mxu0 %v4624_v0  ;;  %3246 = vmatprep.mubr.f32.mxu1 %v171_v1  ;;  %v2681_v1 = vld [vmem:[%s5383_s1 + $0x150] sm:$0xff]  ;;  %v4854_v0 = vld [vmem:[%s4354_s24 + $0x88] sm:$0xff] }
  0x5e   : > { %3518 = vmatprep.mubr.f32.mxu0 %v4628_v2  ;;  %v3842_v17 = vpack.c.bf16 %v2682_v3, %v2681_v1  ;;  %v4817_v1 = vld [vmem:[%s4354_s24 + $0x70] sm:$0xff]  ;;  %v4820_v3 = vld [vmem:[%s4354_s24 + $0x82] sm:$0xff] }
  0x60   : > { %3247 = vmatmul.mubr.f32.vlgmr.msra.gmra.mrb[0].mxu1 %v172_v7  ;;  %v2745_v7 = vld [vmem:[%s5383_s1 + $0x350] sm:$0xff] }
  0x61   : > { %3519 = vmatmul.mubr.f32.vlgmr.msra.gmra.mrb[0].mxu0 %v4647_v10  ;;  %3825 = vmatpush3.bf16.msra.mxu1 %v3822_v55  ;;  %v3838_v55 = vpack.c.bf16 %v2680_v44, %v2679_v43  ;;  %v3970_v18 = vpack.c.bf16 %v2746_v8, %v2745_v7  ;;  %v2685_v43 = vld [vmem:[%s5383_s1 + $0x170] sm:$0xff]  ;;  %v2686_v44 = vld [vmem:[%s5383_s1 + $0x178] sm:$0xff] }
  0x62   : > { %3953 = vmatpush3.bf16.msra.mxu0 %v3950_v56  ;;  %3249 = vmatprep.mubr.f32.mxu1 %v4650_v11  ;;  %v3966_v56 = vpack.c.bf16 %v2744_v49, %v2743_v48  ;;  %v4804_v48 = vld [vmem:[%s4354_s24 + $0x68] sm:$0xff]  ;;  %v2749_v49 = vld [vmem:[%s5383_s1 + $0x370] sm:$0xff]  ;;  %v3850_v7 = vpack.c.bf16 %v2686_v44, %v2685_v43  ;;  %v4845_v43 = vld [vmem:[%s4354_s24 + $0x80] sm:$0xff] }
  0x63   : > { %3521 = vmatprep.mubr.f32.mxu0 %v4653_v15  ;;  %3827 = vmatprep.subr.bf16.mxu1 %v3826_v12  ;;  %v4848_v44 = vld [vmem:[%s4354_s24 + $0x92] sm:$0xff] }
  0x64   : > { %3250 = vmatmul.mubr.f32.gmra.mrb[2].mxu1 %v4663_v19  ;;  %3955 = vmatprep.subr.bf16.mxu0 %v3954_v16 }
  0x65   : > { %3522 = vmatmul.mubr.f32.gmra.mrb[2].mxu0 %v4673_v24  ;;  %3252 = vmatprep.mubr.f32.mxu1 %v4676_v25 }
  0x66   : > { %3829 = vmatpush3.bf16.msra.mxu1 %v3826_v12  ;;  %3524 = vmatprep.mubr.f32.mxu0 %v4680_v26  ;;  %v4761_v12 = vld [vmem:[%s4354_s24 + $0x50] sm:$0xff] }
  0x67   : > { %3957 = vmatpush3.bf16.msra.mxu0 %v3954_v16  ;;  %3831 = vmatprep.subr.bf16.mxu1 %v3830_v27  ;;  %v4764_v16 = vld [vmem:[%s4354_s24 + $0x62] sm:$0xff] }
  0x68   : > { %3253 = vmatmul.mubr.f32.gmra.mrb[4].mxu1 %v4692_v33  ;;  %3959 = vmatprep.subr.bf16.mxu0 %v3958_v28 }
  0x69   : > { %3525 = vmatmul.mubr.f32.gmra.mrb[4].mxu0 %v4702_v36  ;;  %3255 = vmatprep.mubr.f32.mxu1 %v4705_v39 }
  0x6a   : > { %3527 = vmatprep.mubr.f32.mxu0 %v4708_v40  ;;  %3833 = vmatpush3.bf16.msra.mxu1 %v3830_v27  ;;  %v4776_v27 = vld [vmem:[%s4354_s24 + $0x58] sm:$0xff] }
  0x6b   : > { %3961 = vmatpush3.bf16.msra.mxu0 %v3958_v28  ;;  %3835 = vmatprep.subr.bf16.mxu1 %v3834_v41  ;;  %v2747_v28 = vld [vmem:[%s5383_s1 + $0x360] sm:$0xff] }
  0x6c   : > { %3256 = vmatmul.mubr.f32.gmra.mrb[6].mxu1 %v4720_v47  ;;  %3963 = vmatprep.subr.bf16.mxu0 %v3962_v42 }
  0x6d   : > { %3528 = vmatmul.mubr.f32.gmra.mrb[6].mxu0 %v4730_v50  ;;  %3258 = vmatprep.mubr.f32.mxu1 %v4733_v51 }
  0x6e   : > { %3530 = vmatprep.mubr.f32.mxu0 %v4736_v52  ;;  %3837 = vmatpush3.bf16.msra.mxu1 %v3834_v41  ;;  %v3846_v41 = vpack.c.bf16 %v2684_v23, %v2683_v20  ;;  %v2687_v20 = vld [vmem:[%s5383_s1 + $0x180] sm:$0xff] }
  0x6f   : > { %3965 = vmatpush3.bf16.msra.mxu0 %v3962_v42  ;;  %3839 = vmatprep.subr.bf16.mxu1 %v3838_v55  ;;  %v3974_v42 = vpack.c.bf16 %v2748_v31, %v2747_v28  ;;  %v2751_v23 = vld [vmem:[%s5383_s1 + $0x380] sm:$0xff]  ;;  %v2752_v28 = vld [vmem:[%s5383_s1 + $0x388] sm:$0xff] }
  0x70   : > { %3259 = vmatmul.mubr.f32.gmra.mrb[8].mxu1 %v4748_v4  ;;  %3967 = vmatprep.subr.bf16.mxu0 %v3966_v56  ;;  %v4842_v31 = vld [vmem:[%s4354_s24 + $0x8a] sm:$0xff] }
  0x71   : > { %3531 = vmatmul.mubr.f32.gmra.mrb[8].mxu0 %v4758_v9  ;;  %3261 = vmatprep.mubr.f32.mxu1 %v4761_v12 }
  0x72   : > { %3533 = vmatprep.mubr.f32.mxu0 %v4764_v16  ;;  %3841 = vmatpush3.bf16.msra.mxu1 %v3838_v55  ;;  %v2750_v55 = vld [vmem:[%s5383_s1 + $0x378] sm:$0xff] }
  0x73   : > { %3969 = vmatpush3.bf16.msra.mxu0 %v3966_v56  ;;  %3843 = vmatprep.subr.bf16.mxu1 %v3842_v17  ;;  %v4814_v56 = vld [vmem:[%s4354_s24 + $0x7a] sm:$0xff]  ;;  %v3978_v8 = vpack.c.bf16 %v2750_v55, %v2749_v49  ;;  %v3982_v55 = vpack.c.bf16 %v2752_v28, %v2751_v23  ;;  %v4880_v23 = vld [vmem:[%s4354_s24 + $0xb2] sm:$0xff]  ;;  %v4886_v28 = vld [vmem:[%s4354_s24 + $0xa8] sm:$0xff] }
  0x74   : > { %3262 = vmatmul.mubr.f32.gmra.mrb[10].mxu1 %v4776_v27  ;;  %3971 = vmatprep.subr.bf16.mxu0 %v3970_v18 }
  0x75   : > { %3534 = vmatmul.mubr.f32.gmra.mrb[10].mxu0 %v4786_v32  ;;  %3264 = vmatprep.mubr.f32.mxu1 %v4789_v34 }
  0x76   : > { %3536 = vmatprep.mubr.f32.mxu0 %v4792_v35  ;;  %3845 = vmatpush3.bf16.msra.mxu1 %v3842_v17  ;;  %v2688_v17 = vld [vmem:[%s5383_s1 + $0x188] sm:$0xff] }
  0x77   : > { %3973 = vmatpush3.bf16.msra.mxu0 %v3970_v18  ;;  %3847 = vmatprep.subr.bf16.mxu1 %v3846_v41  ;;  %v4832_v18 = vld [vmem:[%s4354_s24 + $0x78] sm:$0xff]  ;;  %v3854_v49 = vpack.c.bf16 %v2688_v17, %v2687_v20  ;;  %v4864_v20 = vld [vmem:[%s4354_s24 + $0xa2] sm:$0xff] }
  0x78   : > { %3265 = vmatmul.mubr.f32.gmra.mrb[12].mxu1 %v4804_v48  ;;  %3975 = vmatprep.subr.bf16.mxu0 %v3974_v42  ;;  %v4870_v17 = vld [vmem:[%s4354_s24 + $0x98] sm:$0xff] }
  0x79   : > { %3537 = vmatmul.mubr.f32.gmra.mrb[12].mxu0 %v4814_v56  ;;  %3267 = vmatprep.mubr.f32.mxu1 %v4817_v1 }
  0x7a   : > { %3539 = vmatprep.mubr.f32.mxu0 %v4820_v3  ;;  %3849 = vmatpush3.bf16.msra.mxu1 %v3846_v41  ;;  %v4858_v41 = vld [vmem:[%s4354_s24 + $0x9a] sm:$0xff] }
  0x7b   : > { %3977 = vmatpush3.bf16.msra.mxu0 %v3974_v42  ;;  %3851 = vmatprep.subr.bf16.mxu1 %v3850_v7  ;;  %v4861_v42 = vld [vmem:[%s4354_s24 + $0x90] sm:$0xff] }
  0x7c   : > { %3268 = vmatmul.mubr.f32.gmra.mrb[14].mxu1 %v4832_v18  ;;  %3979 = vmatprep.subr.bf16.mxu0 %v3978_v8 }
  0x7d   : > { %3540 = vmatmul.mubr.f32.gmra.mrb[14].mxu0 %v4842_v31  ;;  %3270 = vmatprep.mubr.f32.mxu1 %v4845_v43 }
  0x7e   : > { %3542 = vmatprep.mubr.f32.mxu0 %v4848_v44  ;;  %3853 = vmatpush3.bf16.msra.mxu1 %v3850_v7  ;;  %v4874_v7 = vld [vmem:[%s4354_s24 + $0xaa] sm:$0xff] }
  0x7f   : > { %3981 = vmatpush3.bf16.msra.mxu0 %v3978_v8  ;;  %3855 = vmatprep.subr.bf16.mxu1 %v3854_v49  ;;  %v4877_v8 = vld [vmem:[%s4354_s24 + $0xa0] sm:$0xff] }
  0x80   : > { %3271 = vmatmul.mubr.f32.gmra.mrb[16].mxu1 %v4854_v0  ;;  %3983 = vmatprep.subr.bf16.mxu0 %v3982_v55 }
  0x81   : > { %3543 = vmatmul.mubr.f32.gmra.mrb[16].mxu0 %v4858_v41  ;;  %3273 = vmatprep.mubr.f32.mxu1 %v4861_v42 }
  0x82   : > { %3545 = vmatprep.mubr.f32.mxu0 %v4864_v20 }
  0x84   : > { %3274 = vmatmul.mubr.f32.gmra.mrb[18].mxu1 %v4870_v17 }
  0x85   : > { %3546 = vmatmul.mubr.f32.gmra.mrb[18].mxu0 %v4874_v7  ;;  %3276 = vmatprep.mubr.f32.mxu1 %v4877_v8 }
  0x86   : > { %3548 = vmatprep.mubr.f32.mxu0 %v4880_v23 }
  0x88   : > { %3277 = vmatmul.mubr.f32.gmra.mrb[20].mxu1 %v4886_v28 }
  0x89   : > { %3549 = vmatmul.mubr.f32.gmra.mrb[20].mxu0 %v4890_v62  ;;  %3279 = vmatprep.mubr.f32.mxu1 %v4893_v61 }
  0x8a   : > { %3551 = vmatprep.mubr.f32.mxu0 %v4896_v60  ;;  %v2753_v60 = vld [vmem:[%s5383_s1 + $0x390] sm:$0xff] }
  0x8b   : > { %v3986_v37 = vpack.c.bf16 %v2754_v45, %v2753_v60  ;;  %v2694_v60 = vld [vmem:[%s5383_s1 + $0x1b8] sm:$0xff] }
  0x8c   : > { %3280 = vmatmul.mubr.f32.gmra.mrb[22].mxu1 %v4902_v59 }
  0x8d   : > { %3552 = vmatmul.mubr.f32.gmra.mrb[22].mxu0 %v4906_v58  ;;  %3314 = vmatprep.mubr.f32.mxu1 %v622_v57  ;;  %v2692_v57 = vld [vmem:[%s5383_s1 + $0x1a8] sm:$0xff]  ;;  %v2755_v58 = vld [vmem:[%s5383_s1 + $0x3a0] sm:$0xff] }
  0x8e   : > { %3586 = vmatprep.mubr.f32.mxu0 %v4676_v25  ;;  %v3862_v45 = vpack.c.bf16 %v2692_v57, %v2691_v30  ;;  %v2757_v30 = vld [vmem:[%s5383_s1 + $0x3b0] sm:$0xff] }
  0x90   : > { %3315 = vmatmul.mubr.f32.vlgmr.msra.gmra.mrb[0].mxu1 %v623_v46  ;;  %v2756_v46 = vld [vmem:[%s5383_s1 + $0x3a8] sm:$0xff] }
  0x91   : > { %3587 = vmatmul.mubr.f32.vlgmr.msra.gmra.mrb[0].mxu0 %v4692_v33  ;;  %3857 = vmatpush3.bf16.msra.mxu1 %v3854_v49  ;;  %v3990_v53 = vpack.c.bf16 %v2756_v46, %v2755_v58  ;;  %v2758_v58 = vld [vmem:[%s5383_s1 + $0x3b8] sm:$0xff]  ;;  %v2695_v49 = vld [vmem:[%s5383_s1 + $0x1c0] sm:$0xff] }
  0x92   : > { %3985 = vmatpush3.bf16.msra.mxu0 %v3982_v55  ;;  %3317 = vmatprep.mubr.f32.mxu1 %v4628_v2  ;;  %v3866_v2 = vpack.c.bf16 %v2694_v60, %v2693_v54  ;;  %v2696_v55 = vld [vmem:[%s5383_s1 + $0x1c8] sm:$0xff]  ;;  %v2697_v54 = vld [vmem:[%s5383_s1 + $0x1d0] sm:$0xff]  ;;  %v2698_v60 = vld [vmem:[%s5383_s1 + $0x1d8] sm:$0xff] }
  0x93   : > { %3589 = vmatprep.mubr.f32.mxu0 %v4705_v39  ;;  %3859 = vmatprep.subr.bf16.mxu1 %v3858_v38  ;;  %v3870_v57 = vpack.c.bf16 %v2696_v55, %v2695_v49  ;;  %v2699_v49 = vld [vmem:[%s5383_s1 + $0x1e0] sm:$0xff]  ;;  %v2700_v55 = vld [vmem:[%s5383_s1 + $0x1e8] sm:$0xff] }
  0x94   : > { %3318 = vmatmul.mubr.f32.gmra.mrb[2].mxu1 %v4647_v10  ;;  %3987 = vmatprep.subr.bf16.mxu0 %v3986_v37  ;;  %v3994_v10 = vpack.c.bf16 %v2758_v58, %v2757_v30  ;;  %v3874_v30 = vpack.c.bf16 %v2698_v60, %v2697_v54  ;;  %v2701_v54 = vld [vmem:[%s5383_s1 + $0x1f0] sm:$0xff]  ;;  %v2702_v60 = vld [vmem:[%s5383_s1 + $0x1f8] sm:$0xff] }
  0x95   : > { %3590 = vmatmul.mubr.f32.gmra.mrb[2].mxu0 %v4720_v47  ;;  %3320 = vmatprep.mubr.f32.mxu1 %v4653_v15 }
  0x96   : > { %3861 = vmatpush3.bf16.msra.mxu1 %v3858_v38  ;;  %3592 = vmatprep.mubr.f32.mxu0 %v4733_v51  ;;  %v2760_v38 = vld [vmem:[%s5383_s1 + $0x3c8] sm:$0xff] }
  0x97   : > { %3989 = vmatpush3.bf16.msra.mxu0 %v3986_v37  ;;  %3863 = vmatprep.subr.bf16.mxu1 %v3862_v45  ;;  %v2759_v37 = vld [vmem:[%s5383_s1 + $0x3c0] sm:$0xff] }
  0x98   : > { %3321 = vmatmul.mubr.f32.gmra.mrb[4].mxu1 %v4673_v24  ;;  %3991 = vmatprep.subr.bf16.mxu0 %v3990_v53  ;;  %v3998_v46 = vpack.c.bf16 %v2760_v38, %v2759_v37  ;;  %v3878_v37 = vpack.c.bf16 %v2700_v55, %v2699_v49  ;;  %v2767_v49 = vld [vmem:[%s5383_s1 + $0x400] sm:$0xff]  ;;  %v2768_v55 = vld [vmem:[%s5383_s1 + $0x408] sm:$0xff] }
  0x99   : > { %3593 = vmatmul.mubr.f32.gmra.mrb[4].mxu0 %v4748_v4  ;;  %3323 = vmatprep.mubr.f32.mxu1 %v4680_v26 }
  0x9a   : > { %3595 = vmatprep.mubr.f32.mxu0 %v4761_v12  ;;  %3865 = vmatpush3.bf16.msra.mxu1 %v3862_v45  ;;  %v2761_v45 = vld [vmem:[%s5383_s1 + $0x3d0] sm:$0xff] }
  0x9b   : > { %3993 = vmatpush3.bf16.msra.mxu0 %v3990_v53  ;;  %3867 = vmatprep.subr.bf16.mxu1 %v3866_v2  ;;  %v2762_v53 = vld [vmem:[%s5383_s1 + $0x3d8] sm:$0xff] }
  0x9c   : > { %3324 = vmatmul.mubr.f32.gmra.mrb[6].mxu1 %v4702_v36  ;;  %3995 = vmatprep.subr.bf16.mxu0 %v3994_v10  ;;  %v4002_v58 = vpack.c.bf16 %v2762_v53, %v2761_v45  ;;  %v3882_v45 = vpack.c.bf16 %v2702_v60, %v2701_v54  ;;  %v2770_v54 = vld [vmem:[%s5383_s1 + $0x418] sm:$0xff] }
  0x9d   : > { %3596 = vmatmul.mubr.f32.gmra.mrb[6].mxu0 %v4776_v27  ;;  %3326 = vmatprep.mubr.f32.mxu1 %v4708_v40 }
  0x9e   : > { %3598 = vmatprep.mubr.f32.mxu0 %v4789_v34  ;;  %3869 = vmatpush3.bf16.msra.mxu1 %v3866_v2  ;;  %v2763_v2 = vld [vmem:[%s5383_s1 + $0x3e0] sm:$0xff] }
  0x9f   : > { %3997 = vmatpush3.bf16.msra.mxu0 %v3994_v10  ;;  %3871 = vmatprep.subr.bf16.mxu1 %v3870_v57  ;;  %v2764_v10 = vld [vmem:[%s5383_s1 + $0x3e8] sm:$0xff] }
  0xa0   : > { %3327 = vmatmul.mubr.f32.gmra.mrb[8].mxu1 %v4730_v50  ;;  %3999 = vmatprep.subr.bf16.mxu0 %v3998_v46  ;;  %v4006_v38 = vpack.c.bf16 %v2764_v10, %v2763_v2  ;;  %v5046_v2 = vld [vmem:[%s4354_s24 + $0xc8] sm:$0xff]  ;;  %v1644_v10 = vld [vmem:[%s4354_s24 + $0xd0] sm:$0xff] }
  0xa1   : > { %3599 = vmatmul.mubr.f32.gmra.mrb[8].mxu0 %v4804_v48  ;;  %3329 = vmatprep.mubr.f32.mxu1 %v4736_v52 }
  0xa2   : > { %3601 = vmatprep.mubr.f32.mxu0 %v4817_v1  ;;  %3873 = vmatpush3.bf16.msra.mxu1 %v3870_v57  ;;  %v2765_v57 = vld [vmem:[%s5383_s1 + $0x3f0] sm:$0xff] }
  0xa3   : > { %4001 = vmatpush3.bf16.msra.mxu0 %v3998_v46  ;;  %3875 = vmatprep.subr.bf16.mxu1 %v3874_v30  ;;  %v2766_v46 = vld [vmem:[%s5383_s1 + $0x3f8] sm:$0xff] }
  0xa4   : > { %3330 = vmatmul.mubr.f32.gmra.mrb[10].mxu1 %v4758_v9  ;;  %4003 = vmatprep.subr.bf16.mxu0 %v4002_v58  ;;  %v4010_v53 = vpack.c.bf16 %v2766_v46, %v2765_v57  ;;  %v2771_v57 = vld [vmem:[%s5383_s1 + $0x420] sm:$0xff]  ;;  %v2772_v46 = vld [vmem:[%s5383_s1 + $0x428] sm:$0xff] }
  0xa5   : > { %3602 = vmatmul.mubr.f32.gmra.mrb[10].mxu0 %v4832_v18  ;;  %3332 = vmatprep.mubr.f32.mxu1 %v4764_v16 }
  0xa6   : > { %3604 = vmatprep.mubr.f32.mxu0 %v4845_v43  ;;  %3877 = vmatpush3.bf16.msra.mxu1 %v3874_v30  ;;  %v4014_v30 = vpack.c.bf16 %v2768_v55, %v2767_v49  ;;  %v5424_v49 = vld [vmem:[#allocation8_spill] sm:$0xff]  ;;  %v5426_v55 = vld [vmem:[#allocation10_spill] sm:$0xff] }
  0xa7   : > { %4005 = vmatpush3.bf16.msra.mxu0 %v4002_v58  ;;  %3879 = vmatprep.subr.bf16.mxu1 %v3878_v37  ;;  %v5039_v58 = vld [vmem:[%s4354_s24 + $0xc0] sm:$0xff] }
  0xa8   : > { %3333 = vmatmul.mubr.f32.gmra.mrb[12].mxu1 %v4786_v32  ;;  %4007 = vmatprep.subr.bf16.mxu0 %v4006_v38 }
  0xa9   : > { %3605 = vmatmul.mubr.f32.gmra.mrb[12].mxu0 %v4854_v0  ;;  %3335 = vmatprep.mubr.f32.mxu1 %v4792_v35 }
  0xaa   : > { %3607 = vmatprep.mubr.f32.mxu0 %v4861_v42  ;;  %3881 = vmatpush3.bf16.msra.mxu1 %v3878_v37  ;;  %v1645_v37 = vld [vmem:[%s4354_s24 + $0xd8] sm:$0xff] }
  0xab   : > { %4009 = vmatpush3.bf16.msra.mxu0 %v4006_v38  ;;  %3883 = vmatprep.subr.bf16.mxu1 %v3882_v45  ;;  %v2769_v38 = vld [vmem:[%s5383_s1 + $0x410] sm:$0xff] }
  0xac   : > { %3336 = vmatmul.mubr.f32.gmra.mrb[14].mxu1 %v4814_v56  ;;  %4011 = vmatprep.subr.bf16.mxu0 %v4010_v53  ;;  %v4018_v60 = vpack.c.bf16 %v2770_v54, %v2769_v38 }
  0xad   : > { %3608 = vmatmul.mubr.f32.gmra.mrb[14].mxu0 %v4870_v17  ;;  %3338 = vmatprep.mubr.f32.mxu1 %v4820_v3 }
  0xae   : > { %3610 = vmatprep.mubr.f32.mxu0 %v4877_v8  ;;  %3885 = vmatpush3.bf16.msra.mxu1 %v3882_v45  ;;  %v5421_v45 = vld [vmem:[#allocation5_spill] sm:$0xff] }
  0xaf   : > { %4013 = vmatpush3.bf16.msra.mxu0 %v4010_v53  ;;  %4046 = vmatprep.subr.bf16.mxu1 %v4014_v30 }
  0xb0   : > { %3339 = vmatmul.mubr.f32.gmra.mrb[16].mxu1 %v4842_v31  ;;  %4015 = vmatprep.subr.bf16.mxu0 %v4014_v30 }
  0xb1   : > { %3611 = vmatmul.mubr.f32.gmra.mrb[16].mxu0 %v4886_v28  ;;  %3341 = vmatprep.mubr.f32.mxu1 %v4848_v44 }
  0xb2   : > { %3613 = vmatprep.mubr.f32.mxu0 %v4893_v61 }
  0xb4   : > { %3342 = vmatmul.mubr.f32.gmra.mrb[18].mxu1 %v4858_v41 }
  0xb5   : > { %3614 = vmatmul.mubr.f32.gmra.mrb[18].mxu0 %v4902_v59  ;;  %3344 = vmatprep.mubr.f32.mxu1 %v4864_v20 }
  0xb6   : > { %3616 = vmatprep.mubr.f32.mxu0 %v5039_v58 }
  0xb8   : > { %3345 = vmatmul.mubr.f32.gmra.mrb[20].mxu1 %v4874_v7 }
  0xb9   : > { %3617 = vmatmul.mubr.f32.gmra.mrb[20].mxu0 %v5046_v2  ;;  %3347 = vmatprep.mubr.f32.mxu1 %v4880_v23 }
  0xba   : > { %3619 = vmatprep.mubr.f32.mxu0 %v1644_v10  ;;  %v5431_v10 = vld [vmem:[#allocation15_spill] sm:$0xff] }
  0xbc   : > { %3348 = vmatmul.mubr.f32.gmra.mrb[22].mxu1 %v4890_v62 }
  0xbd   : > { %3620 = vmatmul.mubr.f32.gmra.mrb[22].mxu0 %v1645_v37  ;;  %3382 = vmatprep.mubr.f32.mxu1 %v4650_v11  ;;  %v2773_v11 = vld [vmem:[%s5383_s1 + $0x430] sm:$0xff] }
  0xbe   : > { %3654 = vmatprep.mubr.f32.mxu0 %v4436_v63  ;;  %v4022_v63 = vpack.c.bf16 %v2772_v46, %v2771_v57 }
  0xc0   : > { %3383 = vmatmul.mubr.f32.vlgmr.msra.gmra.mrb[0].mxu1 %v4663_v19  ;;  %v2774_v19 = vld [vmem:[%s5383_s1 + $0x438] sm:$0xff] }
  0xc1   : > { %3655 = vmatmul.mubr.f32.vlgmr.msra.gmra.mrb[0].mxu0 %v4452_v5  ;;  %4054 = vmatpush3.bf16.msra.mxu1 %v4014_v30  ;;  %v4026_v5 = vpack.c.bf16 %v2774_v19, %v2773_v11 }
  0xc2   : > { %4017 = vmatpush3.bf16.msra.mxu0 %v4014_v30  ;;  %3385 = vmatprep.mubr.f32.mxu1 %v4676_v25  ;;  %v2776_v25 = vld [vmem:[%s5383_s1 + $0x448] sm:$0xff]  ;;  %v1894_v30 = vld [vmem:[%s4354_s24 + $0xd1] sm:$0xff] }
  0xc3   : > { %3657 = vmatprep.mubr.f32.mxu0 %v4456_v6  ;;  %4019 = vmatprep.subr.bf16.mxu0 %v4018_v60  ;;  %v2775_v6 = vld [vmem:[%s5383_s1 + $0x440] sm:$0xff] }
  0xc4   : > { %3386 = vmatmul.mubr.f32.gmra.mrb[2].mxu1 %v4692_v33  ;;  %4047 = vmatprep.subr.bf16.mxu1 %v4018_v60  ;;  %v2778_v33 = vld [vmem:[%s5383_s1 + $0x458] sm:$0xff] }
  0xc5   : > { %3658 = vmatmul.mubr.f32.gmra.mrb[2].mxu0 %v4474_v13  ;;  %3388 = vmatprep.mubr.f32.mxu1 %v4705_v39  ;;  %v4030_v13 = vpack.c.bf16 %v2776_v25, %v2775_v6  ;;  %v2779_v39 = vld [vmem:[%s5383_s1 + $0x460] sm:$0xff] }
  0xc6   : > { %3660 = vmatprep.mubr.f32.mxu0 %v4477_v14  ;;  %4021 = vmatpush3.bf16.msra.mxu0 %v4018_v60  ;;  %v2777_v14 = vld [vmem:[%s5383_s1 + $0x450] sm:$0xff] }
  0xc7   : > { %4055 = vmatpush3.bf16.msra.mxu1 %v4018_v60  ;;  %4023 = vmatprep.subr.bf16.mxu0 %v4022_v63 }
  0xc8   : > { %3389 = vmatmul.mubr.f32.gmra.mrb[4].mxu1 %v4720_v47  ;;  %4048 = vmatprep.subr.bf16.mxu1 %v4022_v63  ;;  %v2780_v47 = vld [vmem:[%s5383_s1 + $0x468] sm:$0xff] }
  0xc9   : > { %3661 = vmatmul.mubr.f32.gmra.mrb[4].mxu0 %v4496_v21  ;;  %3391 = vmatprep.mubr.f32.mxu1 %v4733_v51  ;;  %v5418_v21 = vld [vmem:[#allocation2_spill] sm:$0xff]  ;;  %v5420_v51 = vld [vmem:[#allocation4_spill] sm:$0xff] }
  0xca   : > { %3663 = vmatprep.mubr.f32.mxu0 %v4499_v22  ;;  %4025 = vmatpush3.bf16.msra.mxu0 %v4022_v63  ;;  %v4034_v22 = vpack.c.bf16 %v2778_v33, %v2777_v14 }
  0xcb   : > { %4056 = vmatpush3.bf16.msra.mxu1 %v4022_v63  ;;  %4027 = vmatprep.subr.bf16.mxu0 %v4026_v5 }
  0xcc   : > { %3392 = vmatmul.mubr.f32.gmra.mrb[6].mxu1 %v4748_v4  ;;  %4049 = vmatprep.subr.bf16.mxu1 %v4026_v5  ;;  %v4038_v4 = vpack.c.bf16 %v2780_v47, %v2779_v39 }
  0xcd   : > { %3664 = vmatmul.mubr.f32.gmra.mrb[6].mxu0 %v4518_v29  ;;  %3394 = vmatprep.mubr.f32.mxu1 %v4761_v12  ;;  %v5419_v29 = vld [vmem:[#allocation3_spill] sm:$0xff]  ;;  %v2781_v12 = vld [vmem:[%s5383_s1 + $0x470] sm:$0xff] }
  0xce   : > { %3666 = vmatprep.mubr.f32.mxu0 %v5418_v21  ;;  %4029 = vmatpush3.bf16.msra.mxu0 %v4026_v5 }
  0xcf   : > { %4057 = vmatpush3.bf16.msra.mxu1 %v4026_v5  ;;  %4031 = vmatprep.subr.bf16.mxu0 %v4030_v13 }
  0xd0   : > { %3395 = vmatmul.mubr.f32.gmra.mrb[8].mxu1 %v4776_v27  ;;  %4050 = vmatprep.subr.bf16.mxu1 %v4030_v13  ;;  %v2782_v27 = vld [vmem:[%s5383_s1 + $0x478] sm:$0xff] }
  0xd1   : > { %3667 = vmatmul.mubr.f32.gmra.mrb[8].mxu0 %v5419_v29  ;;  %3397 = vmatprep.mubr.f32.mxu1 %v4789_v34  ;;  %v5422_v34 = vld [vmem:[#allocation6_spill] sm:$0xff]  ;;  %v4042_v53 = vpack.c.bf16 %v2782_v27, %v2781_v12 }
  0xd2   : > { %3669 = vmatprep.mubr.f32.mxu0 %v5420_v51  ;;  %4033 = vmatpush3.bf16.msra.mxu0 %v4030_v13 }
  0xd3   : > { %4058 = vmatpush3.bf16.msra.mxu1 %v4030_v13  ;;  %4035 = vmatprep.subr.bf16.mxu0 %v4034_v22 }
  0xd4   : > { %3398 = vmatmul.mubr.f32.gmra.mrb[10].mxu1 %v4804_v48  ;;  %4051 = vmatprep.subr.bf16.mxu1 %v4034_v22  ;;  %v5423_v48 = vld [vmem:[#allocation7_spill] sm:$0xff] }
  0xd5   : > { %3670 = vmatmul.mubr.f32.gmra.mrb[10].mxu0 %v5421_v45  ;;  %3400 = vmatprep.mubr.f32.mxu1 %v4817_v1  ;;  %v5425_v1 = vld [vmem:[#allocation9_spill] sm:$0xff] }
  0xd6   : > { %3672 = vmatprep.mubr.f32.mxu0 %v5422_v34  ;;  %4037 = vmatpush3.bf16.msra.mxu0 %v4034_v22 }
  0xd7   : > { %4059 = vmatpush3.bf16.msra.mxu1 %v4034_v22  ;;  %4039 = vmatprep.subr.bf16.mxu0 %v4038_v4 }
  0xd8   : > { %3401 = vmatmul.mubr.f32.gmra.mrb[12].mxu1 %v4832_v18  ;;  %4052 = vmatprep.subr.bf16.mxu1 %v4038_v4  ;;  %v5427_v18 = vld [vmem:[#allocation11_spill] sm:$0xff] }
  0xd9   : > { %3673 = vmatmul.mubr.f32.gmra.mrb[12].mxu0 %v5423_v48  ;;  %3403 = vmatprep.mubr.f32.mxu1 %v4845_v43  ;;  %v5428_v43 = vld [vmem:[#allocation12_spill] sm:$0xff] }
  0xda   : > { %3675 = vmatprep.mubr.f32.mxu0 %v5424_v49  ;;  %4041 = vmatpush3.bf16.msra.mxu0 %v4038_v4 }
  0xdb   : > { %4060 = vmatpush3.bf16.msra.mxu1 %v4038_v4  ;;  %4043 = vmatprep.subr.bf16.mxu0 %v4042_v53 }
  0xdc   : > { %3404 = vmatmul.mubr.f32.gmra.mrb[14].mxu1 %v4854_v0  ;;  %4053 = vmatprep.subr.bf16.mxu1 %v4042_v53  ;;  %v5429_v0 = vld [vmem:[#allocation13_spill] sm:$0xff] }
  0xdd   : > { %3676 = vmatmul.mubr.f32.gmra.mrb[14].mxu0 %v5425_v1  ;;  %3406 = vmatprep.mubr.f32.mxu1 %v4861_v42  ;;  %v5430_v42 = vld [vmem:[#allocation14_spill] sm:$0xff] }
  0xde   : > { %3678 = vmatprep.mubr.f32.mxu0 %v5426_v55  ;;  %4045 = vmatpush3.bf16.msra.mxu0 %v4042_v53 }
  0xdf   : > { %4061 = vmatpush3.bf16.msra.mxu1 %v4042_v53  ;;  %v5205_v53 = vld [vmem:[%s5384_s2] ss:$0 sm:$0xff] }
  0xe0   : > { %3407 = vmatmul.mubr.f32.gmra.mrb[16].mxu1 %v4870_v17  ;;  %v1895_v17 = vld [vmem:[%s4354_s24 + $0xd9] sm:$0xff] }
  0xe1   : > { %3679 = vmatmul.mubr.f32.gmra.mrb[16].mxu0 %v5427_v18  ;;  %3409 = vmatprep.mubr.f32.mxu1 %v4877_v8 }
  0xe2   : > { %3681 = vmatprep.mubr.f32.mxu0 %v5428_v43 }
  0xe4   : > { %3410 = vmatmul.mubr.f32.gmra.mrb[18].mxu1 %v4886_v28 }
  0xe5   : > { %3682 = vmatmul.mubr.f32.gmra.mrb[18].mxu0 %v5429_v0  ;;  %3412 = vmatprep.mubr.f32.mxu1 %v4893_v61  ;;  %v2144_v61 = vld [vmem:[%s4354_s24 + $0xd2] sm:$0xff] }
  0xe6   : > { %3684 = vmatprep.mubr.f32.mxu0 %v5430_v42 }
  0xe8   : > { %3413 = vmatmul.mubr.f32.gmra.mrb[20].mxu1 %v4902_v59  ;;  %v5432_v59 = vld [vmem:[#allocation16_spill] sm:$0xff] }
  0xe9   : > { %3685 = vmatmul.mubr.f32.gmra.mrb[20].mxu0 %v5431_v10  ;;  %3415 = vmatprep.mubr.f32.mxu1 %v5039_v58 }
  0xea   : > { %3687 = vmatprep.mubr.f32.mxu0 %v1894_v30 }
  0xec   : > { %3416 = vmatmul.mubr.f32.gmra.mrb[22].mxu1 %v5046_v2 }
  0xed   : > { %3688 = vmatmul.mubr.f32.gmra.mrb[22].mxu0 %v1895_v17  ;;  %3740 = vmatprep.mubr.f32.mxu1 %v4820_v3 }
  0xee   : > { %3722 = vmatprep.mubr.f32.mxu0 %v4653_v15  ;;  %v5433_v15 = vld [vmem:[#allocation17_spill] sm:$0xff] }
  0xf0   : > { %3741 = vmatmul.mubr.f32.vlgmr.msra.gmra.mrb[24].mxu1 %v4842_v31 }
  0xf1   : > { %3723 = vmatmul.mubr.f32.vlgmr.msra.gmra.mrb[0].mxu0 %v4673_v24  ;;  %3743 = vmatprep.mubr.f32.mxu1 %v4848_v44  ;;  %v2145_v24 = vld [vmem:[%s4354_s24 + $0xda] sm:$0xff] }
  0xf2   : > { %3725 = vmatprep.mubr.f32.mxu0 %v4680_v26 }
  0xf4   : > { %3744 = vmatmul.mubr.f32.gmra.mrb[26].mxu1 %v4858_v41 }
  0xf5   : > { %3726 = vmatmul.mubr.f32.gmra.mrb[2].mxu0 %v4702_v36  ;;  %3746 = vmatprep.mubr.f32.mxu1 %v4864_v20 }
  0xf6   : > { %3728 = vmatprep.mubr.f32.mxu0 %v4708_v40 }
  0xf8   : > { %3747 = vmatmul.mubr.f32.gmra.mrb[28].mxu1 %v4874_v7 }
  0xf9   : > { %3729 = vmatmul.mubr.f32.gmra.mrb[4].mxu0 %v4730_v50  ;;  %3749 = vmatprep.mubr.f32.mxu1 %v4880_v23 }
  0xfa   : > { %3731 = vmatprep.mubr.f32.mxu0 %v4736_v52 }
  0xfc   : > { %3750 = vmatmul.mubr.f32.gmra.mrb[30].mxu1 %v4890_v62 }
  0xfd   : > { %3732 = vmatmul.mubr.f32.gmra.mrb[6].mxu0 %v4758_v9  ;;  %3752 = vmatprep.mubr.f32.mxu1 %v5432_v59 }
  0xfe   : > { %3734 = vmatprep.mubr.f32.mxu0 %v4764_v16 }
 0x100   : > { %3753 = vmatmul.mubr.f32.gmra.mrb[32].mxu1 %v5433_v15 }
 0x101   : > { %3735 = vmatmul.mubr.f32.gmra.mrb[8].mxu0 %v4786_v32  ;;  %3755 = vmatprep.mubr.f32.mxu1 %v2144_v61 }
 0x102   : > { %3737 = vmatprep.mubr.f32.mxu0 %v4792_v35 }
 0x104   : > { %3756 = vmatmul.mubr.f32.gmra.mrb[34].mxu1 %v2145_v24 }
 0x105   : > { %3738 = vmatmul.mubr.f32.gmra.mrb[10].mxu0 %v4814_v56 }
 0x193   : > { %v3384_v26 = vpop.f32.mrb[0].mxu1 }
 0x194   : > { %v979_v62 = vpop.f32.mrb[1].mxu1 }
 0x197   : > { %v5168_v36 = vpop.f32.mrb[2].mxu1 }
 0x198   : > { %v5170_v40 = vpop.f32.mrb[3].mxu1 }
 0x19b   : > { %v5172_v50 = vpop.f32.mrb[4].mxu1 }
 0x19c   : > { %v5174_v52 = vpop.f32.mrb[5].mxu1 }
 0x19f   : > { %v5176_v9 = vpop.f32.mrb[6].mxu1 }
 0x1a0   : > { %v5178_v16 = vpop.f32.mrb[7].mxu1 }
 0x1a3   : > { %v5180_v32 = vpop.f32.mrb[8].mxu1 }
 0x1a4   : > { %v5182_v35 = vpop.f32.mrb[9].mxu1 }
 0x1a7   : > { %v5184_v3 = vpop.f32.mrb[10].mxu1 }
 0x1a8   : > { %v5186_v56 = vpop.f32.mrb[11].mxu1 }
 0x1ab   : > { %v3402_v31 = vpop.f32.mrb[12].mxu1 }
 0x1ac   : > { %v3674_v44 = vpop.f32.mrb[12].mxu0  ;;  %v1039_v41 = vpop.f32.mrb[13].mxu1 }
 0x1ad   : > { %v4074_v20 = vadd.f32 %v3674_v44, %v3402_v31  ;;  %v2039_v7 = vpop.f32.mrb[13].mxu0 }
 0x1ae   : > { %v4076_v8 = vadd.f32 %v2039_v7, %v1039_v41 }
 0x1af   : > { %v3405_v23 = vpop.f32.mrb[14].mxu1 }
 0x1b0   : > { %v3677_v28 = vpop.f32.mrb[14].mxu0  ;;  %v1049_v58 = vpop.f32.mrb[15].mxu1 }
 0x1b1   : > { %v4078_v2 = vadd.f32 %v3677_v28, %v3405_v23  ;;  %v2049_v37 = vpop.f32.mrb[15].mxu0 }
 0x1b2   : > { %v4080_v38 = vadd.f32 %v2049_v37, %v1049_v58 }
 0x1b3   : > { %v3408_v54 = vpop.f32.mrb[16].mxu1 }
 0x1b4   : > { %v3680_v60 = vpop.f32.mrb[16].mxu0  ;;  %v1059_v57 = vpop.f32.mrb[17].mxu1 }
 0x1b5   : > { %v4082_v46 = vadd.f32 %v3680_v60, %v3408_v54  ;;  %v2059_v63 = vpop.f32.mrb[17].mxu0 }
 0x1b6   : > { %v5188_v11 = vadd.f32 %v2059_v63, %v1059_v57 }
 0x1b7   : > { %v3411_v19 = vpop.f32.mrb[18].mxu1 }
 0x1b8   : > { %v3683_v5 = vpop.f32.mrb[18].mxu0  ;;  %v1069_v6 = vpop.f32.mrb[19].mxu1 }
 0x1b9   : > { %v5190_v25 = vadd.f32 %v3683_v5, %v3411_v19  ;;  %v2069_v13 = vpop.f32.mrb[19].mxu0 }
 0x1ba   : > { %v5192_v14 = vadd.f32 %v2069_v13, %v1069_v6 }
 0x1bb   : > { %v3414_v33 = vpop.f32.mrb[20].mxu1 }
 0x1bc   : > { %v3686_v21 = vpop.f32.mrb[20].mxu0  ;;  %v1079_v22 = vpop.f32.mrb[21].mxu1 }
 0x1bd   : > { %v5194_v39 = vadd.f32 %v3686_v21, %v3414_v33  ;;  %v2079_v47 = vpop.f32.mrb[21].mxu0 }
 0x1be   : > { %v5196_v29 = vadd.f32 %v2079_v47, %v1079_v22 }
 0x1bf   : > { %v3417_v51 = vpop.f32.mrb[22].mxu1 }
 0x1c0   : > { %v3689_v4 = vpop.f32.mrb[22].mxu0  ;;  %v1089_v12 = vpop.f32.mrb[23].mxu1 }
 0x1c1   : > { %v5198_v27 = vadd.f32 %v3689_v4, %v3417_v51  ;;  %v2089_v45 = vpop.f32.mrb[23].mxu0 }
 0x1c2   : > { %v5200_v34 = vadd.f32 %v2089_v45, %v1089_v12 }
 0x1c3   : > { %v3742_v48 = vpop.f32.mrb[24].mxu1 }
 0x1c4   : > { %v3724_v49 = vpop.f32.mrb[0].mxu0  ;;  %v4075_v1 = vadd.f32 %v4074_v20, %v3742_v48  ;;  %v2289_v55 = vpop.f32.mrb[25].mxu1 }
 0x1c5   : > { %v4062_v18 = vadd.f32 %v3724_v49, %v3384_v26  ;;  %v2229_v43 = vpop.f32.mrb[1].mxu0  ;;  %v4077_v0 = vadd.f32 %v4076_v8, %v2289_v55 }
 0x1c6   : > { %v5208_v42 = vadd.f32 %v4075_v1, %v5205_v53  ;;  %v4063_v30 = vadd.f32 %v2229_v43, %v979_v62 }
 0x1c7   : > { %v2380_v10 = vadd.f32 %v4062_v18, %v5205_v53  ;;  %v2391_v17 = vadd.f32 %v4077_v0, %v5205_v53  ;;  %v3745_v59 = vpop.f32.mrb[26].mxu1 }
 0x1c8   : > { %v2416_v61 = vmax.f32 %v5208_v42, 0.0  ;;  %v2379_v15 = vadd.f32 %v4063_v30, %v5205_v53  ;;  %v3727_v24 = vpop.f32.mrb[2].mxu0  ;;  %v4079_v31 = vadd.f32 %v4078_v2, %v3745_v59  ;;  %v2299_v44 = vpop.f32.mrb[27].mxu1 }
 0x1c9   : > { %v2404_v26 = vmax.f32 %v2380_v10, 0.0  ;;  %v2415_v41 = vmax.f32 %v2391_v17, 0.0  ;;  %v4064_v20 = vadd.f32 %v3727_v24, %v5168_v36  ;;  %v2239_v7 = vpop.f32.mrb[3].mxu0  ;;  %v4081_v8 = vadd.f32 %v4080_v38, %v2299_v44 }
 0x1ca   : > { %v2475_v62 = vrot.slane %v2416_v61, 1  ;;  %v2403_v23 = vmax.f32 %v2379_v15, 0.0  ;;  %v5218_v28 = vadd.f32 %v4079_v31, %v5205_v53  ;;  %v4065_v58 = vadd.f32 %v2239_v7, %v5170_v40 }
 0x1cb   : > { %v2451_v37 = vrot.slane %v2404_v26, 1  ;;  %v5221_v54 = vrot.slane %v2415_v41, 1  ;;  %v5224_v2 = vadd.f32 %v4064_v20, %v5205_v53  ;;  %v2393_v60 = vadd.f32 %v4081_v8, %v5205_v53  ;;  %v3748_v36 = vpop.f32.mrb[28].mxu1 }
 0x1cc   : > { %v2450_v57 = vrot.slane %v2403_v23, 1  ;;  %v2418_v38 = vmax.f32 %v5218_v28, 0.0  ;;  %v2381_v63 = vadd.f32 %v4065_v58, %v5205_v53  ;;  %v3730_v19 = vpop.f32.mrb[4].mxu0  ;;  %v4083_v5 = vadd.f32 %v4082_v46, %v3748_v36  ;;  %v2309_v6 = vpop.f32.mrb[29].mxu1 }
 0x1cd   : > { %v2476_v40 = vsel %vm2449_vm0, %v5221_v54, %v2475_v62  ;;  %v2406_v13 = vmax.f32 %v5224_v2, 0.0  ;;  %v2417_v33 = vmax.f32 %v2393_v60, 0.0  ;;  %v4066_v21 = vadd.f32 %v3730_v19, %v5172_v50  ;;  %v2249_v22 = vpop.f32.mrb[5].mxu0 }
 0x1ce   : > { %v2452_v47 = vsel %vm2449_vm0, %v2450_v57, %v2451_v37  ;;  %v5234_v51 = vmax.f32 %v2415_v41, %v2476_v40  ;;  %v5238_v4 = vrot.slane %v2418_v38, 1  ;;  %v2405_v12 = vmax.f32 %v2381_v63, 0.0 }
 0x1cf   : > { %v2515_v46 = vmax.f32 %v2403_v23, %v2452_v47  ;;  %v2455_v45 = vrot.slane %v2406_v13, 1  ;;  %v2477_v48 = vrot.slane %v2417_v33, 1  ;;  %v5244_v49 = vadd.f32 %v4066_v21, %v5205_v53  ;;  %v3751_v50 = vpop.f32.mrb[30].mxu1 }
 0x1d0   : > { %v2453_v1 = vrot.slane %v2405_v12, 1  ;;  %v5247_v55 = vadd.f32 %v4083_v5, %v5205_v53  ;;  %v4067_v18 = vadd.f32 %v2249_v22, %v5174_v52  ;;  %v4085_v43 = vadd.f32 %v5188_v11, %v2309_v6  ;;  %v3733_v0 = vpop.f32.mrb[6].mxu0  ;;  %v2319_v30 = vpop.f32.mrb[31].mxu1 }
 0x1d1   : > { %v5252_v10 = vsel %vm2449_vm0, %v2475_v62, %v2477_v48  ;;  %v2480_v17 = vsel %vm2449_vm0, %v2477_v48, %v5238_v4  ;;  %v2408_v59 = vmax.f32 %v5244_v49, 0.0  ;;  %v4068_v15 = vadd.f32 %v3733_v0, %v5176_v9  ;;  %v2259_v24 = vpop.f32.mrb[7].mxu0 }
 0x1d2   : > { %v2454_v31 = vsel %vm2449_vm0, %v2451_v37, %v2453_v1  ;;  %v2456_v44 = vsel %vm2449_vm0, %v2453_v1, %v2455_v45  ;;  %v2529_v52 = vmax.f32 %v2417_v33, %v2480_v17  ;;  %v2420_v11 = vmax.f32 %v5247_v55, 0.0 }
 0x1d3   : > { %v2516_v41 = vmax.f32 %v2404_v26, %v2454_v31  ;;  %v2517_v20 = vmax.f32 %v2405_v12, %v2456_v44  ;;  %v2459_v7 = vrot.slane %v2408_v59, 1  ;;  %v2383_v9 = vadd.f32 %v4067_v18, %v5205_v53  ;;  %v3754_v8 = vpop.f32.mrb[32].mxu1 }
 0x1d4   : > { %v2561_v62 = vmax.f32 %v5234_v51, %v2529_v52  ;;  %v2483_v23 = vrot.slane %v2420_v11, 1  ;;  %v2395_v58 = vadd.f32 %v4085_v43, %v5205_v53  ;;  %v5274_v37 = vadd.f32 %v4068_v15, %v5205_v53  ;;  %v3736_v26 = vpop.f32.mrb[8].mxu0  ;;  %v2329_v60 = vpop.f32.mrb[33].mxu1 }
 0x1d5   : > { %v2549_v36 = vmax.f32 %v2515_v46, %v2517_v20  ;;  %v2407_v57 = vmax.f32 %v2383_v9, 0.0  ;;  %v4087_v63 = vadd.f32 %v5190_v25, %v3751_v50  ;;  %v4069_v19 = vadd.f32 %v2259_v24, %v5178_v16  ;;  %v2269_v5 = vpop.f32.mrb[9].mxu0 }
 0x1d6   : > { %2583 = vst [vmem:[%s5264_s19 + $0x60] sm:$0xff] %v2561_v62  ;;  %v2419_v6 = vmax.f32 %v2395_v58, 0.0  ;;  %v2410_v40 = vmax.f32 %v5274_v37, 0.0  ;;  %v4089_v33 = vadd.f32 %v5192_v14, %v2319_v30  ;;  %v4070_v21 = vadd.f32 %v3736_v26, %v5180_v32 }
 0x1d7   : > { %2571 = vst [vmem:[%s5264_s19] sm:$0xff] %v2549_v36  ;;  %v2457_v22 = vrot.slane %v2407_v57, 1  ;;  %v5284_v47 = vadd.f32 %v4087_v63, %v5205_v53  ;;  %v2385_v12 = vadd.f32 %v4069_v19, %v5205_v53  ;;  %v4091_v25 = vadd.f32 %v5194_v39, %v3754_v8  ;;  %v3757_v46 = vpop.f32.mrb[34].mxu1 }
 0x1d8   : > { %v2481_v16 = vrot.slane %v2419_v6, 1  ;;  %v5290_v48 = vrot.slane %v2410_v40, 1  ;;  %v2397_v50 = vadd.f32 %v4089_v33, %v5205_v53  ;;  %v5294_v14 = vadd.f32 %v4070_v21, %v5205_v53  ;;  %v3739_v32 = vpop.f32.mrb[10].mxu0  ;;  %v2339_v1 = vpop.f32.mrb[35].mxu1 }
 0x1d9   : > { %v2458_v18 = vsel %vm2449_vm0, %v2455_v45, %v2457_v22  ;;  %v2460_v43 = vsel %vm2449_vm0, %v2457_v22, %v2459_v7  ;;  %v2422_v0 = vmax.f32 %v5284_v47, 0.0  ;;  %v2409_v39 = vmax.f32 %v2385_v12, 0.0  ;;  %v2279_v30 = vpop.f32.mrb[11].mxu0 }
 0x1da   : > { %v2518_v17 = vmax.f32 %v2406_v13, %v2458_v18  ;;  %v2519_v15 = vmax.f32 %v2407_v57, %v2460_v43  ;;  %v2482_v24 = vsel %vm2449_vm0, %v5238_v4, %v2481_v16  ;;  %v2484_v31 = vsel %vm2449_vm0, %v2481_v16, %v2483_v23 }
 0x1db   : > { %v2530_v45 = vmax.f32 %v2418_v38, %v2482_v24  ;;  %v2531_v44 = vmax.f32 %v2419_v6, %v2484_v31  ;;  %v2461_v9 = vrot.slane %v2409_v39, 1  ;;  %v2487_v2 = vrot.slane %v2422_v0, 1 }
 0x1dc   : > { %v2550_v8 = vmax.f32 %v2516_v41, %v2518_v17  ;;  %v2551_v62 = vmax.f32 %v2517_v20, %v2519_v15  ;;  %v2421_v58 = vmax.f32 %v2397_v50, 0.0  ;;  %v2400_v36 = vadd.f32 %v4091_v25, %v5205_v53 }
 0x1dd   : > { %v2563_v13 = vmax.f32 %v2529_v52, %v2531_v44  ;;  %v2462_v26 = vsel %vm2449_vm0, %v2459_v7, %v2461_v9  ;;  %v2464_v4 = vsel %vm2449_vm0, %v2461_v9, %v5290_v48  ;;  %v2412_v20 = vmax.f32 %v5294_v14, 0.0 }
 0x1de   : > { %2572 = vst [vmem:[%s5264_s19 + $0x8] sm:$0xff] %v2550_v8  ;;  %2573 = vst [vmem:[%s5264_s19 + $0x10] sm:$0xff] %v2551_v62  ;;  %v2520_v28 = vmax.f32 %v2408_v59, %v2462_v26  ;;  %v2521_v38 = vmax.f32 %v2409_v39, %v2464_v4  ;;  %v2485_v41 = vrot.slane %v2421_v58, 1  ;;  %v5318_v52 = vmax.f32 %v2400_v36, 0.0 }
 0x1df   : > { %2585 = vst [vmem:[%s5264_s19 + $0x70] sm:$0xff] %v2563_v13  ;;  %v4071_v7 = vadd.f32 %v2269_v5, %v5182_v35  ;;  %v4093_v57 = vadd.f32 %v5196_v29, %v2329_v60  ;;  %v4072_v63 = vadd.f32 %v3739_v32, %v5184_v3  ;;  %v2528_v29 = vmax.f32 %v2416_v61, %v5252_v10 }
 0x1e0   : > { %v2552_v19 = vmax.f32 %v2518_v17, %v2520_v28  ;;  %v2553_v6 = vmax.f32 %v2519_v15, %v2521_v38  ;;  %v2486_v49 = vsel %vm2449_vm0, %v2483_v23, %v2485_v41  ;;  %v2488_v59 = vsel %vm2449_vm0, %v2485_v41, %v2487_v2 }
 0x1e1   : > { %v2532_v33 = vmax.f32 %v2420_v11, %v2486_v49  ;;  %v2533_v21 = vmax.f32 %v2421_v58, %v2488_v59  ;;  %v2491_v22 = vrot.slane %v5318_v52, 1  ;;  %v2387_v12 = vadd.f32 %v4071_v7, %v5205_v53 }
 0x1e2   : > { %2574 = vst [vmem:[%s5264_s19 + $0x18] sm:$0xff] %v2552_v19  ;;  %2575 = vst [vmem:[%s5264_s19 + $0x20] sm:$0xff] %v2553_v6  ;;  %v2399_v35 = vadd.f32 %v4093_v57, %v5205_v53  ;;  %v2390_v3 = vadd.f32 %v4072_v63, %v5205_v53  ;;  %v4095_v55 = vadd.f32 %v5198_v27, %v3757_v46  ;;  %v2467_v60 = vrot.slane %v2412_v20, 1 }
 0x1e3   : > { %v2564_v11 = vmax.f32 %v2530_v45, %v2532_v33  ;;  %v2565_v23 = vmax.f32 %v2531_v44, %v2533_v21  ;;  %v2411_v5 = vmax.f32 %v2387_v12, 0.0  ;;  %v2562_v50 = vmax.f32 %v2528_v29, %v2530_v45 }
 0x1e4   : > { %v2423_v25 = vmax.f32 %v2399_v35, 0.0  ;;  %v2414_v16 = vmax.f32 %v2390_v3, 0.0  ;;  %v2402_v32 = vadd.f32 %v4095_v55, %v5205_v53  ;;  %v4073_v42 = vadd.f32 %v2279_v30, %v5186_v56 }
 0x1e5   : > { %2586 = vst [vmem:[%s5264_s19 + $0x78] sm:$0xff] %v2564_v11  ;;  %2587 = vst [vmem:[%s5264_s19 + $0x80] sm:$0xff] %v2565_v23  ;;  %v2465_v18 = vrot.slane %v2411_v5, 1  ;;  %v4097_v61 = vadd.f32 %v5200_v34, %v2339_v1  ;;  %v2536_v27 = vmax.f32 %v5318_v52, %v2491_v22 }
 0x1e6   : > { %v2489_v10 = vrot.slane %v2423_v25, 1  ;;  %v2471_v46 = vrot.slane %v2414_v16, 1  ;;  %2584 = vst [vmem:[%s5264_s19 + $0x68] sm:$0xff] %v2562_v50  ;;  %v2426_v43 = vmax.f32 %v2402_v32, 0.0  ;;  %v2389_v15 = vadd.f32 %v4073_v42, %v5205_v53 }
 0x1e7   : > { %v2466_v39 = vsel %vm2449_vm0, %v5290_v48, %v2465_v18  ;;  %v2468_v17 = vsel %vm2449_vm0, %v2465_v18, %v2467_v60  ;;  %v2401_v24 = vadd.f32 %v4097_v61, %v5205_v53 }
 0x1e8   : > { %v2522_v56 = vmax.f32 %v2410_v40, %v2466_v39  ;;  %v2523_v34 = vmax.f32 %v2411_v5, %v2468_v17  ;;  %v2490_v1 = vsel %vm2449_vm0, %v2487_v2, %v2489_v10  ;;  %v2492_v30 = vsel %vm2449_vm0, %v2489_v10, %v2491_v22 }
 0x1e9   : > { %v2534_v31 = vmax.f32 %v2422_v0, %v2490_v1  ;;  %v2535_v48 = vmax.f32 %v2423_v25, %v2492_v30  ;;  %v2474_v45 = vsel %vm2449_vm0, %v2471_v46, %v5221_v54  ;;  %v2541_v53 = vrot.slane %v2426_v43, 1 }
 0x1ea   : > { %v2554_v44 = vmax.f32 %v2520_v28, %v2522_v56  ;;  %v2555_v37 = vmax.f32 %v2521_v38, %v2523_v34  ;;  %v2526_v40 = vmax.f32 %v2414_v16, %v2474_v45  ;;  %v2413_v9 = vmax.f32 %v2389_v15, 0.0 }
 0x1eb   : > { %v2566_v8 = vmax.f32 %v2532_v33, %v2534_v31  ;;  %v2567_v62 = vmax.f32 %v2533_v21, %v2535_v48  ;;  %v2548_v2 = vmax.f32 %v2426_v43, %v2541_v53  ;;  %v2425_v58 = vmax.f32 %v2401_v24, 0.0 }
 0x1ec   : > { %2576 = vst [vmem:[%s5264_s19 + $0x28] sm:$0xff] %v2554_v44  ;;  %2577 = vst [vmem:[%s5264_s19 + $0x30] sm:$0xff] %v2555_v37  ;;  %v2560_v47 = vmax.f32 %v2526_v40, %v2528_v29  ;;  %v2469_v0 = vrot.slane %v2413_v9, 1 }
 0x1ed   : > { %2588 = vst [vmem:[%s5264_s19 + $0x88] sm:$0xff] %v2566_v8  ;;  %2589 = vst [vmem:[%s5264_s19 + $0x90] sm:$0xff] %v2567_v62  ;;  %v2570_v13 = vmax.f32 %v2536_v27, %v2548_v2  ;;  %v2539_v26 = vrot.slane %v2425_v58, 1 }
 0x1ee   : > { %2582 = vst [vmem:[%s5264_s19 + $0x58] sm:$0xff] %v2560_v47  ;;  %v2470_v54 = vsel %vm2449_vm0, %v2467_v60, %v2469_v0  ;;  %v2472_v4 = vsel %vm2449_vm0, %v2469_v0, %v2471_v46 }
 0x1ef   : > { %2592 = vst [vmem:[%s5264_s19 + $0xa8] sm:$0x7f] %v2570_v13  ;;  %v2524_v36 = vmax.f32 %v2412_v20, %v2470_v54  ;;  %v2525_v28 = vmax.f32 %v2413_v9, %v2472_v4  ;;  %v2540_v38 = vsel %vm2449_vm0, %v2491_v22, %v2539_v26  ;;  %v2542_v41 = vsel %vm2449_vm0, %v2539_v26, %v2541_v53 }
 0x1f0   : > { %v2546_v7 = vmax.f32 %v5318_v52, %v2540_v38  ;;  %v2547_v57 = vmax.f32 %v2425_v58, %v2542_v41 }
 0x1f1   : > { %v2556_v63 = vmax.f32 %v2522_v56, %v2524_v36  ;;  %v2557_v19 = vmax.f32 %v2523_v34, %v2525_v28  ;;  %v2558_v6 = vmax.f32 %v2524_v36, %v2526_v40  ;;  %v2559_v49 = vmax.f32 %v2525_v28, %v5234_v51 }
 0x1f2   : > { %v2568_v59 = vmax.f32 %v2534_v31, %v2546_v7  ;;  %v2569_v33 = vmax.f32 %v2535_v48, %v2547_v57 }
 0x1f3   : > { %2578 = vst [vmem:[%s5264_s19 + $0x38] sm:$0xff] %v2556_v63  ;;  %2579 = vst [vmem:[%s5264_s19 + $0x40] sm:$0xff] %v2557_v19 }
 0x1f4   : > { %2580 = vst [vmem:[%s5264_s19 + $0x48] sm:$0xff] %v2558_v6  ;;  %2581 = vst [vmem:[%s5264_s19 + $0x50] sm:$0xff] %v2559_v49 }
 0x1f5   : > { %2590 = vst [vmem:[%s5264_s19 + $0x98] sm:$0xff] %v2568_v59  ;;  %2591 = vst [vmem:[%s5264_s19 + $0xa0] sm:$0xff] %v2569_v33 }
 0x1f6 PF: > { %s13_s12 = sadd.s32 1, %s4270_s12  }
 0x1f7   : > { %p10_p4 = scmp.ge.s32.totalorder %s13_s12, 4  }
 0x1f9   :  { %12 = sbr.rel (!%p10_p4) target bundleno = 1 (0x1), region = 70 }

// kernel: net_forward.4
= control target key start
LH: loop header
LB: loop body
LE: loop exit
PB: predicated region body
PF: predicated region fallthrough
CT: control target
= control target key end

     0   :  { %s14058_s12 = smov 0   ;;  %s16682_s0 = inlined_call_operand.vmem [shape: f32[2,864,3], index: 0, kind: input, shape index: {}]   ;;  %s16683_s1 = inlined_call_operand.vmem [shape: f32[9,3,128], index: 1, kind: input, shape index: {}]   ;;  %s16684_s2 = inlined_call_operand.vmem [shape: f32[1,128], index: 2, kind: input, shape index: {}]   ;;  %s16685_s3 = inlined_call_operand.vmem [shape: f32[2,735,128], index: 3, kind: output, shape index: {}]  }
   0x1 LB: > { %s10170_s13 = sadd.s32 4294967295, %s14036_s12   ;;  %p10174_p0 = scmp.ge.s32.totalorder %s14036_s12, 1  ;;  %s14036_s12 = sphi %s14058_s12, %s13_s12  }
   0x2   : > { %p137_p1 = scmp.lt.s32.totalorder %s14036_s12, 3 }
   0x4   : > { %p138_p2 = pnand %p10174_p0, %p137_p1 }
   0x6   : > { %141 = sbr.rel (%p138_p2) target bundleno = 1109 (0x455), region = 32 }
   0xd   : > { %v10177_v0 = vld [vmem:[%s16683_s1 + $0x4] sm:$0x7]  ;;  %vm655_vm0 = vcmask 1042432   ;;  %v10568_v1 = vld [vmem:[%s16683_s1 + $0x10] sm:$0x7]  ;;  %p161_p3 = scmp.lt.s32.totalorder %s10170_s13, 1 }
   0xe   : > { %11934 = vmatprep.subr.msk.mxu1 %vm655_vm0, %v10177_v0  ;;  %12518 = vmatprep.subr.msk.mxu0 %vm655_vm0, %v10568_v1  ;;  %v267_v2 = vld [vmem:[%s16683_s1] sm:$0x7]  ;;  %v10666_v3 = vld [vmem:[%s16683_s1 + $0x14] sm:$0x7]  ;;  %vm366_vm1 = vcmask 23552   ;;  %vm9541_vm2 = vcmask 1046528  }
   0xf   : > { %11935 = vmatpush3.msk.msra.mxu1 %vm655_vm0, %v10177_v0  ;;  %12519 = vmatpush3.msk.msra.mxu0 %vm655_vm0, %v10568_v1  ;;  %s16693_s13 = smov (!%p161_p3, %s10170_s13), 1  ;;  %v14105_v10 = vld [vmem:[%s16683_s1 + $0x18] sm:$0x7]  ;;  %v14208_v43 = vld [vmem:[%s16683_s1 + $0x8] sm:$0x7] }
  0x10   : > { %12080 = vmatprep.subr.msk.mxu1 %vm655_vm0, %v267_v2  ;;  %12664 = vmatprep.subr.msk.mxu0 %vm655_vm0, %v10666_v3  ;;  %s14018_s22 = smul.u32 864, %s16693_s13 }
  0x11   : > { %s14019_s15 = smul.u32 736, %s16693_s13 }
  0x12   : > { %s14090_s25 = scalar_lea.vmem %s16682_s0, %s14018_s22 }
  0x13   : > { %v268_v4 = vld [vmem:[%s14090_s25 + $0x1] sm:$0xff]  ;;  %v269_v6 = vld [vmem:[%s14090_s25 + $0x9] sm:$0xff]  ;;  %v270_v8 = vld [vmem:[%s14090_s25 + $0x11] sm:$0xff]  ;;  %s16365_s17 = scalar_lea.vmem %s16685_s3, %s14019_s15 }
  0x14   : > { %v4100_v5 = vld [vmem:[%s14090_s25 + $0x21] sm:$0xff]  ;;  %11936 = vmatprep.mubr.msk.f32.mxu1 %vm366_vm1, %v268_v4  ;;  %v4101_v7 = vld [vmem:[%s14090_s25 + $0x29] sm:$0xff]  ;;  %v4102_v9 = vld [vmem:[%s14090_s25 + $0x31] sm:$0xff] }
  0x15   : > { %12520 = vmatprep.mubr.msk.f32.mxu0 %vm366_vm1, %v4100_v5  ;;  %11937 = vmatmul.mubr.msk.f32.vlgmr.msra.gmra.mrb[0].mxu1 %vm366_vm1, %v269_v6  ;;  %v271_v11 = vld [vmem:[%s14090_s25 + $0x19] sm:$0xff]  ;;  %v4104_v13 = vld [vmem:[%s14090_s25 + $0x41] sm:$0xff]  ;;  %v4105_v14 = vld [vmem:[%s14090_s25 + $0x49] sm:$0xff] }
  0x16   : > { %12521 = vmatmul.mubr.msk.f32.vlgmr.msra.gmra.mrb[0].mxu0 %vm366_vm1, %v4101_v7  ;;  %12081 = vmatpush3.msk.msra.mxu1 %vm655_vm0, %v267_v2  ;;  %v4103_v12 = vld [vmem:[%s14090_s25 + $0x39] sm:$0xff]  ;;  %v4106_v15 = vld [vmem:[%s14090_s25 + $0x51] sm:$0xff]  ;;  %v4108_v17 = vld [vmem:[%s14090_s25 + $0x61] sm:$0xff] }
  0x17   : > { %12665 = vmatpush3.msk.msra.mxu0 %vm655_vm0, %v10666_v3  ;;  %11939 = vmatprep.mubr.msk.f32.mxu1 %vm366_vm1, %v270_v8  ;;  %v4107_v16 = vld [vmem:[%s14090_s25 + $0x59] sm:$0xff]  ;;  %v4109_v18 = vld [vmem:[%s14090_s25 + $0x69] sm:$0xff]  ;;  %v4110_v19 = vld [vmem:[%s14090_s25 + $0x71] sm:$0xff] }
  0x18   : > { %12523 = vmatprep.mubr.msk.f32.mxu0 %vm366_vm1, %v4102_v9  ;;  %12810 = vmatprep.subr.msk.mxu0 %vm655_vm0, %v14105_v10  ;;  %v4111_v20 = vld [vmem:[%s14090_s25 + $0x79] sm:$0xff]  ;;  %v4112_v21 = vld [vmem:[%s14090_s25 + $0x81] sm:$0xff]  ;;  %v4113_v22 = vld [vmem:[%s14090_s25 + $0x89] sm:$0xff] }
  0x19   : > { %11940 = vmatmul.mubr.msk.f32.gmra.mrb[2].mxu1 %vm366_vm1, %v271_v11  ;;  %v4114_v23 = vld [vmem:[%s14090_s25 + $0x91] sm:$0xff]  ;;  %v4115_v24 = vld [vmem:[%s14090_s25 + $0x99] sm:$0xff]  ;;  %v4116_v25 = vld [vmem:[%s14090_s25 + $0xa1] sm:$0xff]  ;;  %12226 = vmatprep.subr.msk.mxu1 %vm655_vm0, %v14208_v43 }
  0x1a   : > { %12524 = vmatmul.mubr.msk.f32.gmra.mrb[2].mxu0 %vm366_vm1, %v4103_v12  ;;  %11942 = vmatprep.mubr.msk.f32.mxu1 %vm366_vm1, %v4100_v5  ;;  %v4117_v26 = vld [vmem:[%s14090_s25 + $0xa9] sm:$0xff]  ;;  %v4118_v27 = vld [vmem:[%s14090_s25 + $0xb1] sm:$0xff]  ;;  %v4119_v28 = vld [vmem:[%s14090_s25 + $0xb9] sm:$0xff] }
  0x1b   : > { %12526 = vmatprep.mubr.msk.f32.mxu0 %vm366_vm1, %v4104_v13  ;;  %v4120_v29 = vld [vmem:[%s14090_s25 + $0xc1] sm:$0xff]  ;;  %v4121_v30 = vld [vmem:[%s14090_s25 + $0xc9] sm:$0xff]  ;;  %v4122_v31 = vld [vmem:[%s14090_s25 + $0xd1] sm:$0xff] }
  0x1c   : > { %v4123_v32 = vld [vmem:[%s14090_s25 + $0xd9] sm:$0xff]  ;;  %v4124_v33 = vld [vmem:[%s14090_s25 + $0xe1] sm:$0xff]  ;;  %v4125_v34 = vld [vmem:[%s14090_s25 + $0xe9] sm:$0xff] }
  0x1d   : > { %11943 = vmatmul.mubr.msk.f32.gmra.mrb[4].mxu1 %vm366_vm1, %v4101_v7  ;;  %v4126_v35 = vld [vmem:[%s14090_s25 + $0xf1] sm:$0xff]  ;;  %v4127_v36 = vld [vmem:[%s14090_s25 + $0xf9] sm:$0xff]  ;;  %v4128_v37 = vld [vmem:[%s14090_s25 + $0x101] sm:$0xff] }
  0x1e   : > { %12527 = vmatmul.mubr.msk.f32.gmra.mrb[4].mxu0 %vm366_vm1, %v4105_v14  ;;  %11945 = vmatprep.mubr.msk.f32.mxu1 %vm366_vm1, %v4102_v9  ;;  %v4129_v38 = vld [vmem:[%s14090_s25 + $0x109] sm:$0xff]  ;;  %v4130_v39 = vld [vmem:[%s14090_s25 + $0x111] sm:$0xff]  ;;  %v4131_v40 = vld [vmem:[%s14090_s25 + $0x119] sm:$0xff] }
  0x1f   : > { %12529 = vmatprep.mubr.msk.f32.mxu0 %vm366_vm1, %v4106_v15  ;;  %v4132_v41 = vld [vmem:[%s14090_s25 + $0x121] sm:$0xff]  ;;  %v4133_v42 = vld [vmem:[%s14090_s25 + $0x129] sm:$0xff]  ;;  %v4134_v44 = vld [vmem:[%s14090_s25 + $0x131] sm:$0xff] }
  0x20   : > { %v4135_v45 = vld [vmem:[%s14090_s25 + $0x139] sm:$0xff]  ;;  %v4136_v46 = vld [vmem:[%s14090_s25 + $0x141] sm:$0xff]  ;;  %v4137_v47 = vld [vmem:[%s14090_s25 + $0x149] sm:$0xff] }
  0x21   : > { %11946 = vmatmul.mubr.msk.f32.gmra.mrb[6].mxu1 %vm366_vm1, %v4103_v12  ;;  %v4138_v48 = vld [vmem:[%s14090_s25 + $0x151] sm:$0xff]  ;;  %v4139_v49 = vld [vmem:[%s14090_s25 + $0x159] sm:$0xff]  ;;  %v4140_v50 = vld [vmem:[%s14090_s25 + $0x161] sm:$0xff] }
  0x22   : > { %12530 = vmatmul.mubr.msk.f32.gmra.mrb[6].mxu0 %vm366_vm1, %v4107_v16  ;;  %11948 = vmatprep.mubr.msk.f32.mxu1 %vm366_vm1, %v4104_v13  ;;  %v4141_v51 = vld [vmem:[%s14090_s25 + $0x169] sm:$0xff]  ;;  %v4142_v52 = vld [vmem:[%s14090_s25 + $0x171] sm:$0xff]  ;;  %v4143_v53 = vld [vmem:[%s14090_s25 + $0x179] sm:$0xff] }
  0x23   : > { %12532 = vmatprep.mubr.msk.f32.mxu0 %vm366_vm1, %v4108_v17  ;;  %v4144_v54 = vld [vmem:[%s14090_s25 + $0x181] sm:$0xff]  ;;  %v4145_v55 = vld [vmem:[%s14090_s25 + $0x189] sm:$0xff]  ;;  %v4146_v56 = vld [vmem:[%s14090_s25 + $0x191] sm:$0xff] }
  0x24   : > { %v4147_v57 = vld [vmem:[%s14090_s25 + $0x199] sm:$0xff]  ;;  %v5130_v58 = vld [vmem:[%s14090_s25 + $0x22] sm:$0xff]  ;;  %v5131_v59 = vld [vmem:[%s14090_s25 + $0x2a] sm:$0xff] }
  0x25   : > { %11949 = vmatmul.mubr.msk.f32.gmra.mrb[8].mxu1 %vm366_vm1, %v4105_v14  ;;  %v5132_v60 = vld [vmem:[%s14090_s25 + $0x32] sm:$0xff]  ;;  %v5133_v61 = vld [vmem:[%s14090_s25 + $0x3a] sm:$0xff]  ;;  %v5134_v63 = vld [vmem:[%s14090_s25 + $0x42] sm:$0xff] }
  0x26   : > { %12533 = vmatmul.mubr.msk.f32.gmra.mrb[8].mxu0 %vm366_vm1, %v4109_v18  ;;  %11951 = vmatprep.mubr.msk.f32.mxu1 %vm366_vm1, %v4106_v15  ;;  %v320_v62 = vld [vmem:[%s14090_s25 + $0x1a1] sm:$0xff]  ;;  %v321_v0 = vld [vmem:[%s14090_s25 + $0x1a9] sm:$0xff]  ;;  %v322_v2 = vld [vmem:[%s14090_s25 + $0x1b1] sm:$0xff] }
  0x27   : > { %12535 = vmatprep.mubr.msk.f32.mxu0 %vm366_vm1, %v4110_v19  ;;  %v5135_v1 = vld [vmem:[%s14090_s25 + $0x4a] sm:$0xff]  ;;  %v5136_v3 = vld [vmem:[%s14090_s25 + $0x52] sm:$0xff]  ;;  %v5137_v5 = vld [vmem:[%s14090_s25 + $0x5a] sm:$0xff] }
  0x28   : > { %v323_v4 = vld [vmem:[%s14090_s25 + $0x1b9] sm:$0xff]  ;;  %v324_v6 = vld [vmem:[%s14090_s25 + $0x1c1] sm:$0xff]  ;;  %v325_v8 = vld [vmem:[%s14090_s25 + $0x1c9] sm:$0xff] }
  0x29   : > { %11952 = vmatmul.mubr.msk.f32.gmra.mrb[10].mxu1 %vm366_vm1, %v4107_v16  ;;  %v5138_v7 = vld [vmem:[%s14090_s25 + $0x62] sm:$0xff]  ;;  %v5139_v9 = vld [vmem:[%s14090_s25 + $0x6a] sm:$0xff]  ;;  %v5140_v11 = vld [vmem:[%s14090_s25 + $0x72] sm:$0xff] }
  0x2a   : > { %12536 = vmatmul.mubr.msk.f32.gmra.mrb[10].mxu0 %vm366_vm1, %v4111_v20  ;;  %11954 = vmatprep.mubr.msk.f32.mxu1 %vm366_vm1, %v4108_v17  ;;  %v327_v12 = vld [vmem:[%s14090_s25 + $0x1d9] sm:$0xff]  ;;  %v328_v14 = vld [vmem:[%s14090_s25 + $0x1e1] sm:$0xff]  ;;  %v329_v16 = vld [vmem:[%s14090_s25 + $0x1e9] sm:$0xff] }
  0x2b   : > { %12538 = vmatprep.mubr.msk.f32.mxu0 %vm366_vm1, %v4112_v21  ;;  %v5141_v13 = vld [vmem:[%s14090_s25 + $0x7a] sm:$0xff]  ;;  %v5142_v15 = vld [vmem:[%s14090_s25 + $0x82] sm:$0xff]  ;;  %v5143_v17 = vld [vmem:[%s14090_s25 + $0x8a] sm:$0xff] }
  0x2d   : > { %11955 = vmatmul.mubr.msk.f32.gmra.mrb[12].mxu1 %vm366_vm1, %v4109_v18  ;;  %v330_v18 = vld [vmem:[%s14090_s25 + $0x1f1] sm:$0xff] }
  0x2e   : > { %12539 = vmatmul.mubr.msk.f32.gmra.mrb[12].mxu0 %vm366_vm1, %v4113_v22  ;;  %11957 = vmatprep.mubr.msk.f32.mxu1 %vm366_vm1, %v4110_v19  ;;  %v5144_v19 = vld [vmem:[%s14090_s25 + $0x92] sm:$0xff] }
  0x2f   : > { %12541 = vmatprep.mubr.msk.f32.mxu0 %vm366_vm1, %v4114_v23 }
  0x31   : > { %11958 = vmatmul.mubr.msk.f32.gmra.mrb[14].mxu1 %vm366_vm1, %v4111_v20  ;;  %v331_v20 = vld [vmem:[%s14090_s25 + $0x1f9] sm:$0xff] }
  0x32   : > { %12542 = vmatmul.mubr.msk.f32.gmra.mrb[14].mxu0 %vm366_vm1, %v4115_v24  ;;  %11960 = vmatprep.mubr.msk.f32.mxu1 %vm366_vm1, %v4112_v21  ;;  %v5145_v21 = vld [vmem:[%s14090_s25 + $0x9a] sm:$0xff] }
  0x33   : > { %12544 = vmatprep.mubr.msk.f32.mxu0 %vm366_vm1, %v4116_v25 }
  0x35   : > { %11961 = vmatmul.mubr.msk.f32.gmra.mrb[16].mxu1 %vm366_vm1, %v4113_v22  ;;  %v332_v22 = vld [vmem:[%s14090_s25 + $0x201] sm:$0xff] }
  0x36   : > { %12545 = vmatmul.mubr.msk.f32.gmra.mrb[16].mxu0 %vm366_vm1, %v4117_v26  ;;  %11963 = vmatprep.mubr.msk.f32.mxu1 %vm366_vm1, %v4114_v23  ;;  %v5146_v23 = vld [vmem:[%s14090_s25 + $0xa2] sm:$0xff] }
  0x37   : > { %12547 = vmatprep.mubr.msk.f32.mxu0 %vm366_vm1, %v4118_v27 }
  0x39   : > { %11964 = vmatmul.mubr.msk.f32.gmra.mrb[18].mxu1 %vm366_vm1, %v4115_v24  ;;  %v333_v24 = vld [vmem:[%s14090_s25 + $0x209] sm:$0xff] }
  0x3a   : > { %12548 = vmatmul.mubr.msk.f32.gmra.mrb[18].mxu0 %vm366_vm1, %v4119_v28  ;;  %11966 = vmatprep.mubr.msk.f32.mxu1 %vm366_vm1, %v4116_v25  ;;  %v5147_v25 = vld [vmem:[%s14090_s25 + $0xaa] sm:$0xff] }
  0x3b   : > { %12550 = vmatprep.mubr.msk.f32.mxu0 %vm366_vm1, %v4120_v29 }
  0x3d   : > { %11967 = vmatmul.mubr.msk.f32.gmra.mrb[20].mxu1 %vm366_vm1, %v4117_v26  ;;  %v334_v26 = vld [vmem:[%s14090_s25 + $0x211] sm:$0xff] }
  0x3e   : > { %12551 = vmatmul.mubr.msk.f32.gmra.mrb[20].mxu0 %vm366_vm1, %v4121_v30  ;;  %11969 = vmatprep.mubr.msk.f32.mxu1 %vm366_vm1, %v4118_v27  ;;  %v5148_v27 = vld [vmem:[%s14090_s25 + $0xb2] sm:$0xff] }
  0x3f   : > { %12553 = vmatprep.mubr.msk.f32.mxu0 %vm366_vm1, %v4122_v31 }
  0x41   : > { %11970 = vmatmul.mubr.msk.f32.gmra.mrb[22].mxu1 %vm366_vm1, %v4119_v28  ;;  %v335_v28 = vld [vmem:[%s14090_s25 + $0x219] sm:$0xff] }
  0x42   : > { %12554 = vmatmul.mubr.msk.f32.gmra.mrb[22].mxu0 %vm366_vm1, %v4123_v32  ;;  %11972 = vmatprep.mubr.msk.f32.mxu1 %vm366_vm1, %v4120_v29  ;;  %v5149_v29 = vld [vmem:[%s14090_s25 + $0xba] sm:$0xff] }
  0x43   : > { %12556 = vmatprep.mubr.msk.f32.mxu0 %vm366_vm1, %v4124_v33 }
  0x45   : > { %11973 = vmatmul.mubr.msk.f32.gmra.mrb[24].mxu1 %vm366_vm1, %v4121_v30  ;;  %v336_v30 = vld [vmem:[%s14090_s25 + $0x221] sm:$0xff] }
  0x46   : > { %12557 = vmatmul.mubr.msk.f32.gmra.mrb[24].mxu0 %vm366_vm1, %v4125_v34  ;;  %11975 = vmatprep.mubr.msk.f32.mxu1 %vm366_vm1, %v4122_v31  ;;  %v5150_v31 = vld [vmem:[%s14090_s25 + $0xc2] sm:$0xff] }
  0x47   : > { %12559 = vmatprep.mubr.msk.f32.mxu0 %vm366_vm1, %v4126_v35 }
  0x49   : > { %11976 = vmatmul.mubr.msk.f32.gmra.mrb[26].mxu1 %vm366_vm1, %v4123_v32  ;;  %v337_v32 = vld [vmem:[%s14090_s25 + $0x229] sm:$0xff] }
  0x4a   : > { %12560 = vmatmul.mubr.msk.f32.gmra.mrb[26].mxu0 %vm366_vm1, %v4127_v36  ;;  %11978 = vmatprep.mubr.msk.f32.mxu1 %vm366_vm1, %v4124_v33  ;;  %v5151_v33 = vld [vmem:[%s14090_s25 + $0xca] sm:$0xff] }
  0x4b   : > { %12562 = vmatprep.mubr.msk.f32.mxu0 %vm366_vm1, %v4128_v37 }
  0x4d   : > { %11979 = vmatmul.mubr.msk.f32.gmra.mrb[28].mxu1 %vm366_vm1, %v4125_v34  ;;  %v338_v34 = vld [vmem:[%s14090_s25 + $0x231] sm:$0xff] }
  0x4e   : > { %12563 = vmatmul.mubr.msk.f32.gmra.mrb[28].mxu0 %vm366_vm1, %v4129_v38  ;;  %11981 = vmatprep.mubr.msk.f32.mxu1 %vm366_vm1, %v4126_v35  ;;  %v5152_v35 = vld [vmem:[%s14090_s25 + $0xd2] sm:$0xff] }
  0x4f   : > { %12565 = vmatprep.mubr.msk.f32.mxu0 %vm366_vm1, %v4130_v39 }
  0x51   : > { %11982 = vmatmul.mubr.msk.f32.gmra.mrb[30].mxu1 %vm366_vm1, %v4127_v36  ;;  %v339_v36 = vld [vmem:[%s14090_s25 + $0x239] sm:$0xff] }
  0x52   : > { %12566 = vmatmul.mubr.msk.f32.gmra.mrb[30].mxu0 %vm366_vm1, %v4131_v40  ;;  %11984 = vmatprep.mubr.msk.f32.mxu1 %vm366_vm1, %v4128_v37  ;;  %v5153_v37 = vld [vmem:[%s14090_s25 + $0xda] sm:$0xff] }
  0x53   : > { %12568 = vmatprep.mubr.msk.f32.mxu0 %vm366_vm1, %v4132_v41 }
  0x55   : > { %11985 = vmatmul.mubr.msk.f32.gmra.mrb[32].mxu1 %vm366_vm1, %v4129_v38  ;;  %v340_v38 = vld [vmem:[%s14090_s25 + $0x241] sm:$0xff] }
  0x56   : > { %12569 = vmatmul.mubr.msk.f32.gmra.mrb[32].mxu0 %vm366_vm1, %v4133_v42  ;;  %11987 = vmatprep.mubr.msk.f32.mxu1 %vm366_vm1, %v4130_v39  ;;  %v5154_v39 = vld [vmem:[%s14090_s25 + $0xe2] sm:$0xff] }
  0x57   : > { %12571 = vmatprep.mubr.msk.f32.mxu0 %vm366_vm1, %v4134_v44 }
  0x59   : > { %11988 = vmatmul.mubr.msk.f32.gmra.mrb[34].mxu1 %vm366_vm1, %v4131_v40  ;;  %v341_v40 = vld [vmem:[%s14090_s25 + $0x249] sm:$0xff] }
  0x5a   : > { %12572 = vmatmul.mubr.msk.f32.gmra.mrb[34].mxu0 %vm366_vm1, %v4135_v45  ;;  %11990 = vmatprep.mubr.msk.f32.mxu1 %vm366_vm1, %v4132_v41  ;;  %v5155_v41 = vld [vmem:[%s14090_s25 + $0xea] sm:$0xff] }
  0x5b   : > { %12574 = vmatprep.mubr.msk.f32.mxu0 %vm366_vm1, %v4136_v46 }
  0x5d   : > { %11991 = vmatmul.mubr.msk.f32.gmra.mrb[36].mxu1 %vm366_vm1, %v4133_v42  ;;  %v342_v42 = vld [vmem:[%s14090_s25 + $0x251] sm:$0xff] }
  0x5e   : > { %12575 = vmatmul.mubr.msk.f32.gmra.mrb[36].mxu0 %vm366_vm1, %v4137_v47  ;;  %11993 = vmatprep.mubr.msk.f32.mxu1 %vm366_vm1, %v4134_v44  ;;  %v5156_v44 = vld [vmem:[%s14090_s25 + $0xf2] sm:$0xff] }
  0x5f   : > { %12577 = vmatprep.mubr.msk.f32.mxu0 %vm366_vm1, %v4138_v48 }
  0x61   : > { %11994 = vmatmul.mubr.msk.f32.gmra.mrb[38].mxu1 %vm366_vm1, %v4135_v45  ;;  %v343_v45 = vld [vmem:[%s14090_s25 + $0x259] sm:$0xff] }
  0x62   : > { %12578 = vmatmul.mubr.msk.f32.gmra.mrb[38].mxu0 %vm366_vm1, %v4139_v49  ;;  %11996 = vmatprep.mubr.msk.f32.mxu1 %vm366_vm1, %v4136_v46  ;;  %v5157_v46 = vld [vmem:[%s14090_s25 + $0xfa] sm:$0xff] }
  0x63   : > { %12580 = vmatprep.mubr.msk.f32.mxu0 %vm366_vm1, %v4140_v50 }
  0x65   : > { %11997 = vmatmul.mubr.msk.f32.gmra.mrb[40].mxu1 %vm366_vm1, %v4137_v47  ;;  %v344_v47 = vld [vmem:[%s14090_s25 + $0x261] sm:$0xff] }
  0x66   : > { %12581 = vmatmul.mubr.msk.f32.gmra.mrb[40].mxu0 %vm366_vm1, %v4141_v51  ;;  %11999 = vmatprep.mubr.msk.f32.mxu1 %vm366_vm1, %v4138_v48  ;;  %v5158_v48 = vld [vmem:[%s14090_s25 + $0x102] sm:$0xff] }
  0x67   : > { %12583 = vmatprep.mubr.msk.f32.mxu0 %vm366_vm1, %v4142_v52 }
  0x69   : > { %12000 = vmatmul.mubr.msk.f32.gmra.mrb[42].mxu1 %vm366_vm1, %v4139_v49  ;;  %v345_v49 = vld [vmem:[%s14090_s25 + $0x269] sm:$0xff] }
  0x6a   : > { %12584 = vmatmul.mubr.msk.f32.gmra.mrb[42].mxu0 %vm366_vm1, %v4143_v53  ;;  %12002 = vmatprep.mubr.msk.f32.mxu1 %vm366_vm1, %v4140_v50  ;;  %v5159_v50 = vld [vmem:[%s14090_s25 + $0x10a] sm:$0xff] }
  0x6b   : > { %12586 = vmatprep.mubr.msk.f32.mxu0 %vm366_vm1, %v4144_v54 }
  0x6d   : > { %12003 = vmatmul.mubr.msk.f32.gmra.mrb[44].mxu1 %vm366_vm1, %v4141_v51  ;;  %v346_v51 = vld [vmem:[%s14090_s25 + $0x271] sm:$0xff] }
  0x6e   : > { %12587 = vmatmul.mubr.msk.f32.gmra.mrb[44].mxu0 %vm366_vm1, %v4145_v55  ;;  %12005 = vmatprep.mubr.msk.f32.mxu1 %vm366_vm1, %v4142_v52  ;;  %v5160_v52 = vld [vmem:[%s14090_s25 + $0x112] sm:$0xff] }
  0x6f   : > { %12589 = vmatprep.mubr.msk.f32.mxu0 %vm366_vm1, %v4146_v56 }
  0x71   : > { %12006 = vmatmul.mubr.msk.f32.gmra.mrb[46].mxu1 %vm366_vm1, %v4143_v53  ;;  %v347_v53 = vld [vmem:[%s14090_s25 + $0x279] sm:$0xff] }
  0x72   : > { %12590 = vmatmul.mubr.msk.f32.gmra.mrb[46].mxu0 %vm366_vm1, %v4147_v57  ;;  %12008 = vmatprep.mubr.msk.f32.mxu1 %vm366_vm1, %v4144_v54  ;;  %v5161_v54 = vld [vmem:[%s14090_s25 + $0x11a] sm:$0xff] }
  0x73   : > { %12666 = vmatprep.mubr.msk.f32.mxu0 %vm366_vm1, %v5130_v58  ;;  %v5163_v58 = vld [vmem:[%s14090_s25 + $0x12a] sm:$0xff] }
  0x75   : > { %12009 = vmatmul.mubr.msk.f32.gmra.mrb[48].mxu1 %vm366_vm1, %v4145_v55  ;;  %v348_v55 = vld [vmem:[%s14090_s25 + $0x281] sm:$0xff] }
  0x76   : > { %12667 = vmatmul.mubr.msk.f32.vlgmr.msra.gmra.mrb[0].mxu0 %vm366_vm1, %v5131_v59  ;;  %12011 = vmatprep.mubr.msk.f32.mxu1 %vm366_vm1, %v4146_v56  ;;  %v5162_v56 = vld [vmem:[%s14090_s25 + $0x122] sm:$0xff]  ;;  %v14391_v59 = vld [vmem:[%s16683_s1 + $0x1c] sm:$0x7] }
  0x77   : > { %12811 = vmatpush3.msk.msra.mxu0 %vm655_vm0, %v14105_v10  ;;  %12669 = vmatprep.mubr.msk.f32.mxu0 %vm366_vm1, %v5132_v60  ;;  %v326_v10 = vld [vmem:[%s14090_s25 + $0x1d1] sm:$0xff] }
  0x78   : > { %v350_v60 = vld [vmem:[%s14090_s25 + $0x291] sm:$0xff]  ;;  %12956 = vmatprep.subr.msk.mxu0 %vm655_vm0, %v14391_v59 }
  0x79   : > { %12012 = vmatmul.mubr.msk.f32.gmra.mrb[50].mxu1 %vm366_vm1, %v4147_v57  ;;  %v349_v57 = vld [vmem:[%s14090_s25 + $0x289] sm:$0xff] }
  0x7a   : > { %12670 = vmatmul.mubr.msk.f32.gmra.mrb[2].mxu0 %vm366_vm1, %v5133_v61  ;;  %12014 = vmatprep.mubr.msk.f32.mxu1 %vm366_vm1, %v320_v62  ;;  %v5164_v61 = vld [vmem:[%s14090_s25 + $0x132] sm:$0xff] }
  0x7b   : > { %12672 = vmatprep.mubr.msk.f32.mxu0 %vm366_vm1, %v5134_v63  ;;  %v351_v62 = vld [vmem:[%s14090_s25 + $0x299] sm:$0xff] }
  0x7c   : > { %v5165_v63 = vld [vmem:[%s14090_s25 + $0x13a] sm:$0xff] }
  0x7d   : > { %12015 = vmatmul.mubr.msk.f32.gmra.mrb[52].mxu1 %vm366_vm1, %v321_v0  ;;  %v352_v0 = vld [vmem:[%s14090_s25 + $0x2a1] sm:$0xff] }
  0x7e   : > { %12673 = vmatmul.mubr.msk.f32.gmra.mrb[4].mxu0 %vm366_vm1, %v5135_v1  ;;  %12017 = vmatprep.mubr.msk.f32.mxu1 %vm366_vm1, %v322_v2  ;;  %v5166_v1 = vld [vmem:[%s14090_s25 + $0x142] sm:$0xff] }
  0x7f   : > { %12675 = vmatprep.mubr.msk.f32.mxu0 %vm366_vm1, %v5136_v3  ;;  %v353_v2 = vld [vmem:[%s14090_s25 + $0x2a9] sm:$0xff] }
  0x80   : > { %v5167_v3 = vld [vmem:[%s14090_s25 + $0x14a] sm:$0xff] }
  0x81   : > { %12018 = vmatmul.mubr.msk.f32.gmra.mrb[54].mxu1 %vm366_vm1, %v323_v4  ;;  %v354_v4 = vld [vmem:[%s14090_s25 + $0x2b1] sm:$0xff] }
  0x82   : > { %12676 = vmatmul.mubr.msk.f32.gmra.mrb[6].mxu0 %vm366_vm1, %v5137_v5  ;;  %12020 = vmatprep.mubr.msk.f32.mxu1 %vm366_vm1, %v324_v6  ;;  %v5168_v5 = vld [vmem:[%s14090_s25 + $0x152] sm:$0xff] }
  0x83   : > { %12678 = vmatprep.mubr.msk.f32.mxu0 %vm366_vm1, %v5138_v7  ;;  %v355_v6 = vld [vmem:[%s14090_s25 + $0x2b9] sm:$0xff] }
  0x84   : > { %v5169_v7 = vld [vmem:[%s14090_s25 + $0x15a] sm:$0xff] }
  0x85   : > { %12021 = vmatmul.mubr.msk.f32.gmra.mrb[56].mxu1 %vm366_vm1, %v325_v8  ;;  %v356_v8 = vld [vmem:[%s14090_s25 + $0x2c1] sm:$0xff] }
  0x86   : > { %12679 = vmatmul.mubr.msk.f32.gmra.mrb[8].mxu0 %vm366_vm1, %v5139_v9  ;;  %12023 = vmatprep.mubr.msk.f32.mxu1 %vm366_vm1, %v326_v10  ;;  %v5170_v9 = vld [vmem:[%s14090_s25 + $0x162] sm:$0xff] }
  0x87   : > { %12681 = vmatprep.mubr.msk.f32.mxu0 %vm366_vm1, %v5140_v11  ;;  %v357_v10 = vld [vmem:[%s14090_s25 + $0x2c9] sm:$0xff] }
  0x88   : > { %v5171_v11 = vld [vmem:[%s14090_s25 + $0x16a] sm:$0xff] }
  0x89   : > { %12024 = vmatmul.mubr.msk.f32.gmra.mrb[58].mxu1 %vm366_vm1, %v327_v12  ;;  %v358_v12 = vld [vmem:[%s14090_s25 + $0x2d1] sm:$0xff] }
  0x8a   : > { %12682 = vmatmul.mubr.msk.f32.gmra.mrb[10].mxu0 %vm366_vm1, %v5141_v13  ;;  %12026 = vmatprep.mubr.msk.f32.mxu1 %vm366_vm1, %v328_v14  ;;  %v5172_v13 = vld [vmem:[%s14090_s25 + $0x172] sm:$0xff] }
  0x8b   : > { %12684 = vmatprep.mubr.msk.f32.mxu0 %vm366_vm1, %v5142_v15  ;;  %v359_v14 = vld [vmem:[%s14090_s25 + $0x2d9] sm:$0xff] }
  0x8c   : > { %v5173_v15 = vld [vmem:[%s14090_s25 + $0x17a] sm:$0xff] }
  0x8d   : > { %12027 = vmatmul.mubr.msk.f32.gmra.mrb[60].mxu1 %vm366_vm1, %v329_v16  ;;  %v360_v16 = vld [vmem:[%s14090_s25 + $0x2e1] sm:$0xff] }
  0x8e   : > { %12685 = vmatmul.mubr.msk.f32.gmra.mrb[12].mxu0 %vm366_vm1, %v5143_v17  ;;  %12029 = vmatprep.mubr.msk.f32.mxu1 %vm366_vm1, %v330_v18  ;;  %v5174_v17 = vld [vmem:[%s14090_s25 + $0x182] sm:$0xff] }
  0x8f   : > { %12687 = vmatprep.mubr.msk.f32.mxu0 %vm366_vm1, %v5144_v19  ;;  %v361_v18 = vld [vmem:[%s14090_s25 + $0x2e9] sm:$0xff] }
  0x90   : > { %v5175_v19 = vld [vmem:[%s14090_s25 + $0x18a] sm:$0xff] }
  0x91   : > { %12030 = vmatmul.mubr.msk.f32.gmra.mrb[62].mxu1 %vm366_vm1, %v331_v20  ;;  %v362_v20 = vld [vmem:[%s14090_s25 + $0x2f1] sm:$0xff] }
  0x92   : > { %12688 = vmatmul.mubr.msk.f32.gmra.mrb[14].mxu0 %vm366_vm1, %v5145_v21  ;;  %12032 = vmatprep.mubr.msk.f32.mxu1 %vm366_vm1, %v332_v22  ;;  %v5176_v21 = vld [vmem:[%s14090_s25 + $0x192] sm:$0xff] }
  0x93   : > { %12690 = vmatprep.mubr.msk.f32.mxu0 %vm366_vm1, %v5146_v23  ;;  %v363_v22 = vld [vmem:[%s14090_s25 + $0x2f9] sm:$0xff] }
  0x94   : > { %v5177_v23 = vld [vmem:[%s14090_s25 + $0x19a] sm:$0xff] }
  0x95   : > { %12033 = vmatmul.mubr.msk.f32.gmra.mrb[64].mxu1 %vm366_vm1, %v333_v24  ;;  %v171_v24 = vld [vmem:[%s14090_s25] sm:$0xff] }
  0x96   : > { %12691 = vmatmul.mubr.msk.f32.gmra.mrb[16].mxu0 %vm366_vm1, %v5147_v25  ;;  %12035 = vmatprep.mubr.msk.f32.mxu1 %vm366_vm1, %v334_v26  ;;  %v5178_v25 = vld [vmem:[%s14090_s25 + $0x1a2] sm:$0xff] }
  0x97   : > { %12693 = vmatprep.mubr.msk.f32.mxu0 %vm366_vm1, %v5148_v27  ;;  %v172_v26 = vld [vmem:[%s14090_s25 + $0x8] sm:$0xff] }
  0x98   : > { %v5179_v27 = vld [vmem:[%s14090_s25 + $0x1aa] sm:$0xff] }
  0x99   : > { %12036 = vmatmul.mubr.msk.f32.gmra.mrb[66].mxu1 %vm366_vm1, %v335_v28  ;;  %v173_v28 = vld [vmem:[%s14090_s25 + $0x10] sm:$0xff] }
  0x9a   : > { %12694 = vmatmul.mubr.msk.f32.gmra.mrb[18].mxu0 %vm366_vm1, %v5149_v29  ;;  %12038 = vmatprep.mubr.msk.f32.mxu1 %vm366_vm1, %v336_v30  ;;  %v5180_v29 = vld [vmem:[%s14090_s25 + $0x1b2] sm:$0xff] }
  0x9b   : > { %12696 = vmatprep.mubr.msk.f32.mxu0 %vm366_vm1, %v5150_v31  ;;  %v174_v30 = vld [vmem:[%s14090_s25 + $0x18] sm:$0xff] }
  0x9c   : > { %v5181_v31 = vld [vmem:[%s14090_s25 + $0x1ba] sm:$0xff] }
  0x9d   : > { %12039 = vmatmul.mubr.msk.f32.gmra.mrb[68].mxu1 %vm366_vm1, %v337_v32  ;;  %v175_v32 = vld [vmem:[%s14090_s25 + $0x20] sm:$0xff] }
  0x9e   : > { %12697 = vmatmul.mubr.msk.f32.gmra.mrb[20].mxu0 %vm366_vm1, %v5151_v33  ;;  %12041 = vmatprep.mubr.msk.f32.mxu1 %vm366_vm1, %v338_v34  ;;  %v5182_v33 = vld [vmem:[%s14090_s25 + $0x1c2] sm:$0xff]  ;;  %v5183_v34 = vld [vmem:[%s14090_s25 + $0x1ca] sm:$0xff] }
  0x9f   : > { %12699 = vmatprep.mubr.msk.f32.mxu0 %vm366_vm1, %v5152_v35  ;;  %v177_v35 = vld [vmem:[%s14090_s25 + $0x30] sm:$0xff] }
  0xa1   : > { %12042 = vmatmul.mubr.msk.f32.gmra.mrb[70].mxu1 %vm366_vm1, %v339_v36  ;;  %v5184_v36 = vld [vmem:[%s14090_s25 + $0x1d2] sm:$0xff] }
  0xa2   : > { %12700 = vmatmul.mubr.msk.f32.gmra.mrb[22].mxu0 %vm366_vm1, %v5153_v37  ;;  %12044 = vmatprep.mubr.msk.f32.mxu1 %vm366_vm1, %v340_v38  ;;  %v178_v37 = vld [vmem:[%s14090_s25 + $0x38] sm:$0xff] }
  0xa3   : > { %12702 = vmatprep.mubr.msk.f32.mxu0 %vm366_vm1, %v5154_v39  ;;  %v5185_v38 = vld [vmem:[%s14090_s25 + $0x1da] sm:$0xff] }
  0xa4   : > { %v14486_v39 = vld [vmem:[%s14090_s25 + $0x40] sm:$0xff] }
  0xa5   : > { %12045 = vmatmul.mubr.msk.f32.gmra.mrb[72].mxu1 %vm366_vm1, %v341_v40  ;;  %v5186_v40 = vld [vmem:[%s14090_s25 + $0x1e2] sm:$0xff] }
  0xa6   : > { %12703 = vmatmul.mubr.msk.f32.gmra.mrb[24].mxu0 %vm366_vm1, %v5155_v41  ;;  %12047 = vmatprep.mubr.msk.f32.mxu1 %vm366_vm1, %v342_v42  ;;  %v14495_v41 = vld [vmem:[%s14090_s25 + $0x48] sm:$0xff] }
  0xa7   : > { %12705 = vmatprep.mubr.msk.f32.mxu0 %vm366_vm1, %v5156_v44  ;;  %v5187_v42 = vld [vmem:[%s14090_s25 + $0x1ea] sm:$0xff] }
  0xa8   : > { %v14499_v44 = vld [vmem:[%s14090_s25 + $0x50] sm:$0xff] }
  0xa9   : > { %12048 = vmatmul.mubr.msk.f32.gmra.mrb[74].mxu1 %vm366_vm1, %v343_v45  ;;  %v5188_v45 = vld [vmem:[%s14090_s25 + $0x1f2] sm:$0xff] }
  0xaa   : > { %12706 = vmatmul.mubr.msk.f32.gmra.mrb[26].mxu0 %vm366_vm1, %v5157_v46  ;;  %12050 = vmatprep.mubr.msk.f32.mxu1 %vm366_vm1, %v344_v47  ;;  %v14509_v46 = vld [vmem:[%s14090_s25 + $0x58] sm:$0xff] }
  0xab   : > { %12708 = vmatprep.mubr.msk.f32.mxu0 %vm366_vm1, %v5158_v48  ;;  %v5189_v47 = vld [vmem:[%s14090_s25 + $0x1fa] sm:$0xff] }
  0xac   : > { %v14513_v48 = vld [vmem:[%s14090_s25 + $0x60] sm:$0xff] }
  0xad   : > { %12051 = vmatmul.mubr.msk.f32.gmra.mrb[76].mxu1 %vm366_vm1, %v345_v49  ;;  %v5190_v49 = vld [vmem:[%s14090_s25 + $0x202] sm:$0xff] }
  0xae   : > { %12709 = vmatmul.mubr.msk.f32.gmra.mrb[28].mxu0 %vm366_vm1, %v5159_v50  ;;  %12053 = vmatprep.mubr.msk.f32.mxu1 %vm366_vm1, %v346_v51  ;;  %v14523_v50 = vld [vmem:[%s14090_s25 + $0x68] sm:$0xff] }
  0xaf   : > { %12711 = vmatprep.mubr.msk.f32.mxu0 %vm366_vm1, %v5160_v52  ;;  %v5191_v51 = vld [vmem:[%s14090_s25 + $0x20a] sm:$0xff] }
  0xb0   : > { %v14527_v52 = vld [vmem:[%s14090_s25 + $0x70] sm:$0xff] }
  0xb1   : > { %12054 = vmatmul.mubr.msk.f32.gmra.mrb[78].mxu1 %vm366_vm1, %v347_v53  ;;  %v5192_v53 = vld [vmem:[%s14090_s25 + $0x212] sm:$0xff] }
  0xb2   : > { %12712 = vmatmul.mubr.msk.f32.gmra.mrb[30].mxu0 %vm366_vm1, %v5161_v54  ;;  %12056 = vmatprep.mubr.msk.f32.mxu1 %vm366_vm1, %v348_v55  ;;  %v14537_v54 = vld [vmem:[%s14090_s25 + $0x78] sm:$0xff] }
  0xb3   : > { %12714 = vmatprep.mubr.msk.f32.mxu0 %vm366_vm1, %v5162_v56  ;;  %v5193_v55 = vld [vmem:[%s14090_s25 + $0x21a] sm:$0xff] }
  0xb4   : > { %v14541_v56 = vld [vmem:[%s14090_s25 + $0x80] sm:$0xff] }
  0xb5   : > { %12057 = vmatmul.mubr.msk.f32.gmra.mrb[80].mxu1 %vm366_vm1, %v349_v57  ;;  %v5194_v57 = vld [vmem:[%s14090_s25 + $0x222] sm:$0xff] }
  0xb6   : > { %12715 = vmatmul.mubr.msk.f32.gmra.mrb[32].mxu0 %vm366_vm1, %v5163_v58  ;;  %12059 = vmatprep.mubr.msk.f32.mxu1 %vm366_vm1, %v350_v60  ;;  %v14551_v58 = vld [vmem:[%s14090_s25 + $0x88] sm:$0xff] }
  0xb7   : > { %12717 = vmatprep.mubr.msk.f32.mxu0 %vm366_vm1, %v5164_v61  ;;  %v5195_v60 = vld [vmem:[%s14090_s25 + $0x22a] sm:$0xff] }
  0xb8   : > { %v14555_v61 = vld [vmem:[%s14090_s25 + $0x90] sm:$0xff] }
  0xb9   : > { %12060 = vmatmul.mubr.msk.f32.gmra.mrb[82].mxu1 %vm366_vm1, %v351_v62  ;;  %v5196_v62 = vld [vmem:[%s14090_s25 + $0x232] sm:$0xff] }
  0xba   : > { %12718 = vmatmul.mubr.msk.f32.gmra.mrb[34].mxu0 %vm366_vm1, %v5165_v63  ;;  %12062 = vmatprep.mubr.msk.f32.mxu1 %vm366_vm1, %v352_v0  ;;  %v14565_v63 = vld [vmem:[%s14090_s25 + $0x98] sm:$0xff] }
  0xbb   : > { %12720 = vmatprep.mubr.msk.f32.mxu0 %vm366_vm1, %v5166_v1  ;;  %v5197_v0 = vld [vmem:[%s14090_s25 + $0x23a] sm:$0xff] }
  0xbc   : > { %v14569_v1 = vld [vmem:[%s14090_s25 + $0xa0] sm:$0xff] }
  0xbd   : > { %12063 = vmatmul.mubr.msk.f32.gmra.mrb[84].mxu1 %vm366_vm1, %v353_v2  ;;  %v5198_v2 = vld [vmem:[%s14090_s25 + $0x242] sm:$0xff] }
  0xbe   : > { %12721 = vmatmul.mubr.msk.f32.gmra.mrb[36].mxu0 %vm366_vm1, %v5167_v3  ;;  %12065 = vmatprep.mubr.msk.f32.mxu1 %vm366_vm1, %v354_v4  ;;  %v14579_v3 = vld [vmem:[%s14090_s25 + $0xa8] sm:$0xff] }
  0xbf   : > { %12723 = vmatprep.mubr.msk.f32.mxu0 %vm366_vm1, %v5168_v5  ;;  %v5199_v4 = vld [vmem:[%s14090_s25 + $0x24a] sm:$0xff] }
  0xc0   : > { %v14583_v5 = vld [vmem:[%s14090_s25 + $0xb0] sm:$0xff] }
  0xc1   : > { %12066 = vmatmul.mubr.msk.f32.gmra.mrb[86].mxu1 %vm366_vm1, %v355_v6  ;;  %v5200_v6 = vld [vmem:[%s14090_s25 + $0x252] sm:$0xff] }
  0xc2   : > { %12724 = vmatmul.mubr.msk.f32.gmra.mrb[38].mxu0 %vm366_vm1, %v5169_v7  ;;  %12068 = vmatprep.mubr.msk.f32.mxu1 %vm366_vm1, %v356_v8  ;;  %v14593_v7 = vld [vmem:[%s14090_s25 + $0xb8] sm:$0xff] }
  0xc3   : > { %12726 = vmatprep.mubr.msk.f32.mxu0 %vm366_vm1, %v5170_v9  ;;  %v5201_v8 = vld [vmem:[%s14090_s25 + $0x25a] sm:$0xff] }
  0xc4   : > { %v14597_v9 = vld [vmem:[%s14090_s25 + $0xc0] sm:$0xff] }
  0xc5   : > { %12069 = vmatmul.mubr.msk.f32.gmra.mrb[88].mxu1 %vm366_vm1, %v357_v10  ;;  %v5202_v10 = vld [vmem:[%s14090_s25 + $0x262] sm:$0xff] }
  0xc6   : > { %12727 = vmatmul.mubr.msk.f32.gmra.mrb[40].mxu0 %vm366_vm1, %v5171_v11  ;;  %12071 = vmatprep.mubr.msk.f32.mxu1 %vm366_vm1, %v358_v12  ;;  %v14607_v11 = vld [vmem:[%s14090_s25 + $0xc8] sm:$0xff] }
  0xc7   : > { %12729 = vmatprep.mubr.msk.f32.mxu0 %vm366_vm1, %v5172_v13  ;;  %v5203_v12 = vld [vmem:[%s14090_s25 + $0x26a] sm:$0xff] }
  0xc8   : > { %v14611_v13 = vld [vmem:[%s14090_s25 + $0xd0] sm:$0xff] }
  0xc9   : > { %12072 = vmatmul.mubr.msk.f32.gmra.mrb[90].mxu1 %vm366_vm1, %v359_v14  ;;  %v5204_v14 = vld [vmem:[%s14090_s25 + $0x272] sm:$0xff] }
  0xca   : > { %12730 = vmatmul.mubr.msk.f32.gmra.mrb[42].mxu0 %vm366_vm1, %v5173_v15  ;;  %12074 = vmatprep.mubr.msk.f32.mxu1 %vm366_vm1, %v360_v16  ;;  %v14621_v15 = vld [vmem:[%s14090_s25 + $0xd8] sm:$0xff] }
  0xcb   : > { %12732 = vmatprep.mubr.msk.f32.mxu0 %vm366_vm1, %v5174_v17  ;;  %v5205_v16 = vld [vmem:[%s14090_s25 + $0x27a] sm:$0xff] }
  0xcc   : > { %v14625_v17 = vld [vmem:[%s14090_s25 + $0xe0] sm:$0xff] }
  0xcd   : > { %12075 = vmatmul.mubr.msk.f32.gmra.mrb[92].mxu1 %vm366_vm1, %v361_v18  ;;  %v5206_v18 = vld [vmem:[%s14090_s25 + $0x282] sm:$0xff] }
  0xce   : > { %12733 = vmatmul.mubr.msk.f32.gmra.mrb[44].mxu0 %vm366_vm1, %v5175_v19  ;;  %12077 = vmatprep.mubr.msk.f32.mxu1 %vm366_vm1, %v362_v20  ;;  %v14635_v19 = vld [vmem:[%s14090_s25 + $0xe8] sm:$0xff] }
  0xcf   : > { %12735 = vmatprep.mubr.msk.f32.mxu0 %vm366_vm1, %v5176_v21  ;;  %v5207_v20 = vld [vmem:[%s14090_s25 + $0x28a] sm:$0xff] }
  0xd0   : > { %v14639_v21 = vld [vmem:[%s14090_s25 + $0xf0] sm:$0xff] }
  0xd1   : > { %12078 = vmatmul.mubr.msk.f32.gmra.mrb[94].mxu1 %vm366_vm1, %v363_v22  ;;  %v5208_v22 = vld [vmem:[%s14090_s25 + $0x292] sm:$0xff] }
  0xd2   : > { %12736 = vmatmul.mubr.msk.f32.gmra.mrb[46].mxu0 %vm366_vm1, %v5177_v23  ;;  %12082 = vmatprep.mubr.msk.f32.mxu1 %vm366_vm1, %v171_v24  ;;  %v14649_v23 = vld [vmem:[%s14090_s25 + $0xf8] sm:$0xff] }
  0xd3   : > { %12738 = vmatprep.mubr.msk.f32.mxu0 %vm366_vm1, %v5178_v25  ;;  %v5209_v24 = vld [vmem:[%s14090_s25 + $0x29a] sm:$0xff] }
  0xd4   : > { %v14653_v25 = vld [vmem:[%s14090_s25 + $0x100] sm:$0xff] }
  0xd5   : > { %12083 = vmatmul.mubr.msk.f32.vlgmr.msra.gmra.mrb[0].mxu1 %vm366_vm1, %v172_v26  ;;  %v5210_v26 = vld [vmem:[%s14090_s25 + $0x2a2] sm:$0xff] }
  0xd6   : > { %12739 = vmatmul.mubr.msk.f32.gmra.mrb[48].mxu0 %vm366_vm1, %v5179_v27  ;;  %12227 = vmatpush3.msk.msra.mxu1 %vm655_vm0, %v14208_v43  ;;  %v176_v43 = vld [vmem:[%s14090_s25 + $0x28] sm:$0xff] }
  0xd7   : > { %12085 = vmatprep.mubr.msk.f32.mxu1 %vm366_vm1, %v173_v28  ;;  %12741 = vmatprep.mubr.msk.f32.mxu0 %vm366_vm1, %v5180_v29  ;;  %v14663_v27 = vld [vmem:[%s14090_s25 + $0x108] sm:$0xff] }
  0xd8   : > { %v5211_v28 = vld [vmem:[%s14090_s25 + $0x2aa] sm:$0xff] }
  0xd9   : > { %12086 = vmatmul.mubr.msk.f32.gmra.mrb[2].mxu1 %vm366_vm1, %v174_v30  ;;  %v14669_v29 = vld [vmem:[%s16683_s1 + $0xc] sm:$0x7]  ;;  %v14672_v30 = vld [vmem:[%s14090_s25 + $0x110] sm:$0xff] }
  0xda   : > { %12742 = vmatmul.mubr.msk.f32.gmra.mrb[50].mxu0 %vm366_vm1, %v5181_v31  ;;  %12088 = vmatprep.mubr.msk.f32.mxu1 %vm366_vm1, %v175_v32  ;;  %v5212_v31 = vld [vmem:[%s14090_s25 + $0x2b2] sm:$0xff] }
  0xdb   : > { %12744 = vmatprep.mubr.msk.f32.mxu0 %vm366_vm1, %v5182_v33  ;;  %12372 = vmatprep.subr.msk.mxu1 %vm655_vm0, %v14669_v29  ;;  %v14684_v32 = vld [vmem:[%s14090_s25 + $0x118] sm:$0xff] }
  0xdc   : > { %v5213_v33 = vld [vmem:[%s14090_s25 + $0x2ba] sm:$0xff] }
  0xdd   : > { %12089 = vmatmul.mubr.msk.f32.gmra.mrb[4].mxu1 %vm366_vm1, %v176_v43  ;;  %v14688_v43 = vld [vmem:[%s14090_s25 + $0x120] sm:$0xff] }
  0xde   : > { %12745 = vmatmul.mubr.msk.f32.gmra.mrb[52].mxu0 %vm366_vm1, %v5183_v34  ;;  %12091 = vmatprep.mubr.msk.f32.mxu1 %vm366_vm1, %v177_v35  ;;  %v5214_v34 = vld [vmem:[%s14090_s25 + $0x2c2] sm:$0xff] }
  0xdf   : > { %12747 = vmatprep.mubr.msk.f32.mxu0 %vm366_vm1, %v5184_v36  ;;  %v14698_v35 = vld [vmem:[%s14090_s25 + $0x128] sm:$0xff] }
  0xe0   : > { %v5215_v36 = vld [vmem:[%s14090_s25 + $0x2ca] sm:$0xff] }
  0xe1   : > { %12092 = vmatmul.mubr.msk.f32.gmra.mrb[6].mxu1 %vm366_vm1, %v178_v37  ;;  %v14702_v37 = vld [vmem:[%s14090_s25 + $0x130] sm:$0xff] }
  0xe2   : > { %12748 = vmatmul.mubr.msk.f32.gmra.mrb[54].mxu0 %vm366_vm1, %v5185_v38  ;;  %12094 = vmatprep.mubr.msk.f32.mxu1 %vm366_vm1, %v14486_v39  ;;  %v5216_v38 = vld [vmem:[%s14090_s25 + $0x2d2] sm:$0xff] }
  0xe3   : > { %12750 = vmatprep.mubr.msk.f32.mxu0 %vm366_vm1, %v5186_v40  ;;  %v14712_v40 = vld [vmem:[%s14090_s25 + $0x138] sm:$0xff] }
  0xe5   : > { %12095 = vmatmul.mubr.msk.f32.gmra.mrb[8].mxu1 %vm366_vm1, %v14495_v41 }
  0xe6   : > { %12751 = vmatmul.mubr.msk.f32.gmra.mrb[56].mxu0 %vm366_vm1, %v5187_v42  ;;  %12097 = vmatprep.mubr.msk.f32.mxu1 %vm366_vm1, %v14499_v44  ;;  %v5217_v42 = vld [vmem:[%s14090_s25 + $0x2da] sm:$0xff] }
  0xe7   : > { %12753 = vmatprep.mubr.msk.f32.mxu0 %vm366_vm1, %v5188_v45  ;;  %v14716_v45 = vld [vmem:[%s14090_s25 + $0x140] sm:$0xff] }
  0xe9   : > { %12098 = vmatmul.mubr.msk.f32.gmra.mrb[10].mxu1 %vm366_vm1, %v14509_v46 }
  0xea   : > { %12754 = vmatmul.mubr.msk.f32.gmra.mrb[58].mxu0 %vm366_vm1, %v5189_v47  ;;  %12100 = vmatprep.mubr.msk.f32.mxu1 %vm366_vm1, %v14513_v48  ;;  %v5218_v47 = vld [vmem:[%s14090_s25 + $0x2e2] sm:$0xff] }
  0xeb   : > { %12756 = vmatprep.mubr.msk.f32.mxu0 %vm366_vm1, %v5190_v49  ;;  %v14726_v49 = vld [vmem:[%s14090_s25 + $0x148] sm:$0xff] }
  0xed   : > { %12101 = vmatmul.mubr.msk.f32.gmra.mrb[12].mxu1 %vm366_vm1, %v14523_v50 }
  0xee   : > { %12757 = vmatmul.mubr.msk.f32.gmra.mrb[60].mxu0 %vm366_vm1, %v5191_v51  ;;  %12103 = vmatprep.mubr.msk.f32.mxu1 %vm366_vm1, %v14527_v52  ;;  %v5219_v51 = vld [vmem:[%s14090_s25 + $0x2ea] sm:$0xff] }
  0xef   : > { %12759 = vmatprep.mubr.msk.f32.mxu0 %vm366_vm1, %v5192_v53  ;;  %v14730_v53 = vld [vmem:[%s14090_s25 + $0x150] sm:$0xff] }
  0xf1   : > { %12104 = vmatmul.mubr.msk.f32.gmra.mrb[14].mxu1 %vm366_vm1, %v14537_v54 }
  0xf2   : > { %12760 = vmatmul.mubr.msk.f32.gmra.mrb[62].mxu0 %vm366_vm1, %v5193_v55  ;;  %12106 = vmatprep.mubr.msk.f32.mxu1 %vm366_vm1, %v14541_v56  ;;  %v5220_v55 = vld [vmem:[%s14090_s25 + $0x2f2] sm:$0xff] }
  0xf3   : > { %12762 = vmatprep.mubr.msk.f32.mxu0 %vm366_vm1, %v5194_v57  ;;  %v14740_v57 = vld [vmem:[%s14090_s25 + $0x158] sm:$0xff] }
  0xf5   : > { %12107 = vmatmul.mubr.msk.f32.gmra.mrb[16].mxu1 %vm366_vm1, %v14551_v58 }
  0xf6   : > { %12763 = vmatmul.mubr.msk.f32.gmra.mrb[64].mxu0 %vm366_vm1, %v5195_v60  ;;  %12109 = vmatprep.mubr.msk.f32.mxu1 %vm366_vm1, %v14555_v61  ;;  %v5221_v60 = vld [vmem:[%s14090_s25 + $0x2fa] sm:$0xff] }
  0xf7   : > { %12765 = vmatprep.mubr.msk.f32.mxu0 %vm366_vm1, %v5196_v62  ;;  %v14744_v62 = vld [vmem:[%s14090_s25 + $0x160] sm:$0xff] }
  0xf9   : > { %12110 = vmatmul.mubr.msk.f32.gmra.mrb[18].mxu1 %vm366_vm1, %v14565_v63 }
  0xfa   : > { %12766 = vmatmul.mubr.msk.f32.gmra.mrb[66].mxu0 %vm366_vm1, %v5197_v0  ;;  %12112 = vmatprep.mubr.msk.f32.mxu1 %vm366_vm1, %v14569_v1  ;;  %v5222_v0 = vld [vmem:[%s14090_s25 + $0x302] sm:$0xff] }
  0xfb   : > { %12768 = vmatprep.mubr.msk.f32.mxu0 %vm366_vm1, %v5198_v2  ;;  %v14754_v2 = vld [vmem:[%s14090_s25 + $0x168] sm:$0xff] }
  0xfd   : > { %12113 = vmatmul.mubr.msk.f32.gmra.mrb[20].mxu1 %vm366_vm1, %v14579_v3 }
  0xfe   : > { %12769 = vmatmul.mubr.msk.f32.gmra.mrb[68].mxu0 %vm366_vm1, %v5199_v4  ;;  %12115 = vmatprep.mubr.msk.f32.mxu1 %vm366_vm1, %v14583_v5  ;;  %v5223_v4 = vld [vmem:[%s14090_s25 + $0x30a] sm:$0xff] }
  0xff   : > { %12771 = vmatprep.mubr.msk.f32.mxu0 %vm366_vm1, %v5200_v6  ;;  %v14758_v6 = vld [vmem:[%s14090_s25 + $0x170] sm:$0xff] }
 0x101   : > { %12116 = vmatmul.mubr.msk.f32.gmra.mrb[22].mxu1 %vm366_vm1, %v14593_v7 }
 0x102   : > { %12772 = vmatmul.mubr.msk.f32.gmra.mrb[70].mxu0 %vm366_vm1, %v5201_v8  ;;  %12118 = vmatprep.mubr.msk.f32.mxu1 %vm366_vm1, %v14597_v9  ;;  %v5224_v8 = vld [vmem:[%s14090_s25 + $0x312] sm:$0xff] }
 0x103   : > { %12774 = vmatprep.mubr.msk.f32.mxu0 %vm366_vm1, %v5202_v10  ;;  %v14768_v10 = vld [vmem:[%s14090_s25 + $0x178] sm:$0xff] }
 0x105   : > { %12119 = vmatmul.mubr.msk.f32.gmra.mrb[24].mxu1 %vm366_vm1, %v14607_v11 }
 0x106   : > { %12775 = vmatmul.mubr.msk.f32.gmra.mrb[72].mxu0 %vm366_vm1, %v5203_v12  ;;  %12121 = vmatprep.mubr.msk.f32.mxu1 %vm366_vm1, %v14611_v13  ;;  %v5225_v12 = vld [vmem:[%s14090_s25 + $0x31a] sm:$0xff] }
 0x107   : > { %12777 = vmatprep.mubr.msk.f32.mxu0 %vm366_vm1, %v5204_v14  ;;  %v14772_v14 = vld [vmem:[%s14090_s25 + $0x180] sm:$0xff] }
 0x109   : > { %12122 = vmatmul.mubr.msk.f32.gmra.mrb[26].mxu1 %vm366_vm1, %v14621_v15 }
 0x10a   : > { %12778 = vmatmul.mubr.msk.f32.gmra.mrb[74].mxu0 %vm366_vm1, %v5205_v16  ;;  %12124 = vmatprep.mubr.msk.f32.mxu1 %vm366_vm1, %v14625_v17  ;;  %v14782_v16 = vld [vmem:[%s14090_s25 + $0x188] sm:$0xff] }
 0x10b   : > { %12780 = vmatprep.mubr.msk.f32.mxu0 %vm366_vm1, %v5206_v18  ;;  %v14785_v18 = vld [vmem:[%s14090_s25 + $0x190] sm:$0xff] }
 0x10d   : > { %12125 = vmatmul.mubr.msk.f32.gmra.mrb[28].mxu1 %vm366_vm1, %v14635_v19 }
 0x10e   : > { %12781 = vmatmul.mubr.msk.f32.gmra.mrb[76].mxu0 %vm366_vm1, %v5207_v20  ;;  %12127 = vmatprep.mubr.msk.f32.mxu1 %vm366_vm1, %v14639_v21  ;;  %v14796_v20 = vld [vmem:[%s14090_s25 + $0x198] sm:$0xff] }
 0x10f   : > { %12783 = vmatprep.mubr.msk.f32.mxu0 %vm366_vm1, %v5208_v22  ;;  %v14969_v22 = vld [vmem:[%s14090_s25 + $0x260] sm:$0xff] }
 0x111   : > { %12128 = vmatmul.mubr.msk.f32.gmra.mrb[30].mxu1 %vm366_vm1, %v14649_v23 }
 0x112   : > { %12784 = vmatmul.mubr.msk.f32.gmra.mrb[78].mxu0 %vm366_vm1, %v5209_v24  ;;  %12130 = vmatprep.mubr.msk.f32.mxu1 %vm366_vm1, %v14653_v25  ;;  %v14983_v24 = vld [vmem:[%s14090_s25 + $0x270] sm:$0xff] }
 0x113   : > { %12786 = vmatprep.mubr.msk.f32.mxu0 %vm366_vm1, %v5210_v26  ;;  %v14997_v26 = vld [vmem:[%s14090_s25 + $0x280] sm:$0xff] }
 0x115   : > { %12131 = vmatmul.mubr.msk.f32.gmra.mrb[32].mxu1 %vm366_vm1, %v14663_v27 }
 0x116   : > { %12787 = vmatmul.mubr.msk.f32.gmra.mrb[80].mxu0 %vm366_vm1, %v5211_v28  ;;  %12133 = vmatprep.mubr.msk.f32.mxu1 %vm366_vm1, %v14672_v30  ;;  %v15013_v28 = vld [vmem:[%s16683_s1 + $0x20] sm:$0x7] }
 0x117   : > { %12789 = vmatprep.mubr.msk.f32.mxu0 %vm366_vm1, %v5212_v31  ;;  %v15029_v31 = vld [vmem:[%s14090_s25 + $0x298] sm:$0xff] }
 0x119   : > { %12134 = vmatmul.mubr.msk.f32.gmra.mrb[34].mxu1 %vm366_vm1, %v14684_v32 }
 0x11a   : > { %12790 = vmatmul.mubr.msk.f32.gmra.mrb[82].mxu0 %vm366_vm1, %v5213_v33  ;;  %12136 = vmatprep.mubr.msk.f32.mxu1 %vm366_vm1, %v14688_v43  ;;  %v15043_v33 = vld [vmem:[%s14090_s25 + $0x2a8] sm:$0xff] }
 0x11b   : > { %12792 = vmatprep.mubr.msk.f32.mxu0 %vm366_vm1, %v5214_v34  ;;  %v15057_v34 = vld [vmem:[%s14090_s25 + $0x2b8] sm:$0xff] }
 0x11d   : > { %12137 = vmatmul.mubr.msk.f32.gmra.mrb[36].mxu1 %vm366_vm1, %v14698_v35 }
 0x11e   : > { %12793 = vmatmul.mubr.msk.f32.gmra.mrb[84].mxu0 %vm366_vm1, %v5215_v36  ;;  %12139 = vmatprep.mubr.msk.f32.mxu1 %vm366_vm1, %v14702_v37  ;;  %v15071_v36 = vld [vmem:[%s14090_s25 + $0x2c8] sm:$0xff] }
 0x11f   : > { %12795 = vmatprep.mubr.msk.f32.mxu0 %vm366_vm1, %v5216_v38  ;;  %v15085_v38 = vld [vmem:[%s14090_s25 + $0x2d8] sm:$0xff] }
 0x121   : > { %12140 = vmatmul.mubr.msk.f32.gmra.mrb[38].mxu1 %vm366_vm1, %v14712_v40 }
 0x122   : > { %12796 = vmatmul.mubr.msk.f32.gmra.mrb[86].mxu0 %vm366_vm1, %v5217_v42  ;;  %12142 = vmatprep.mubr.msk.f32.mxu1 %vm366_vm1, %v14716_v45  ;;  %v15099_v42 = vld [vmem:[%s14090_s25 + $0x2e8] sm:$0xff] }
 0x123   : > { %12798 = vmatprep.mubr.msk.f32.mxu0 %vm366_vm1, %v5218_v47  ;;  %v15113_v47 = vld [vmem:[%s14090_s25 + $0x2f8] sm:$0xff] }
 0x125   : > { %12143 = vmatmul.mubr.msk.f32.gmra.mrb[40].mxu1 %vm366_vm1, %v14726_v49 }
 0x126   : > { %12799 = vmatmul.mubr.msk.f32.gmra.mrb[88].mxu0 %vm366_vm1, %v5219_v51  ;;  %12145 = vmatprep.mubr.msk.f32.mxu1 %vm366_vm1, %v14730_v53  ;;  %v2041_v51 = vld [vmem:[%s14090_s25 + $0xa] sm:$0xff] }
 0x127   : > { %12801 = vmatprep.mubr.msk.f32.mxu0 %vm366_vm1, %v5220_v55  ;;  %v2043_v55 = vld [vmem:[%s14090_s25 + $0x1a] sm:$0xff] }
 0x129   : > { %12146 = vmatmul.mubr.msk.f32.gmra.mrb[42].mxu1 %vm366_vm1, %v14740_v57 }
 0x12a   : > { %12802 = vmatmul.mubr.msk.f32.gmra.mrb[90].mxu0 %vm366_vm1, %v5221_v60  ;;  %12148 = vmatprep.mubr.msk.f32.mxu1 %vm366_vm1, %v14744_v62  ;;  %v15138_v60 = vld [vmem:[%s16683_s1 + $0x10] sm:$0x7] }
 0x12b   : > { %12804 = vmatprep.mubr.msk.f32.mxu0 %vm366_vm1, %v5222_v0  ;;  %v2047_v0 = vld [vmem:[%s14090_s25 + $0x3a] sm:$0xff] }
 0x12d   : > { %12149 = vmatmul.mubr.msk.f32.gmra.mrb[44].mxu1 %vm366_vm1, %v14754_v2 }
 0x12e   : > { %12805 = vmatmul.mubr.msk.f32.gmra.mrb[92].mxu0 %vm366_vm1, %v5223_v4  ;;  %12151 = vmatprep.mubr.msk.f32.mxu1 %vm366_vm1, %v14758_v6  ;;  %v2049_v4 = vld [vmem:[%s14090_s25 + $0x4a] sm:$0xff] }
 0x12f   : > { %12807 = vmatprep.mubr.msk.f32.mxu0 %vm366_vm1, %v5224_v8  ;;  %v2051_v8 = vld [vmem:[%s14090_s25 + $0x5a] sm:$0xff] }
 0x131   : > { %12152 = vmatmul.mubr.msk.f32.gmra.mrb[46].mxu1 %vm366_vm1, %v14768_v10 }
 0x132   : > { %12808 = vmatmul.mubr.msk.f32.gmra.mrb[94].mxu0 %vm366_vm1, %v5225_v12  ;;  %12154 = vmatprep.mubr.msk.f32.mxu1 %vm366_vm1, %v14772_v14  ;;  %v2053_v12 = vld [vmem:[%s14090_s25 + $0x6a] sm:$0xff] }
 0x133   : > { %12812 = vmatprep.mubr.msk.f32.mxu0 %vm366_vm1, %v14486_v39  ;;  %v14801_v39 = vld [vmem:[%s14090_s25 + $0x1a0] sm:$0xff] }
 0x135   : > { %12155 = vmatmul.mubr.msk.f32.gmra.mrb[48].mxu1 %vm366_vm1, %v14782_v16 }
 0x136   : > { %12813 = vmatmul.mubr.msk.f32.vlgmr.msra.gmra.mrb[0].mxu0 %vm366_vm1, %v14495_v41  ;;  %12157 = vmatprep.mubr.msk.f32.mxu1 %vm366_vm1, %v14785_v18  ;;  %v14815_v41 = vld [vmem:[%s14090_s25 + $0x1b0] sm:$0xff] }
 0x137   : > { %12957 = vmatpush3.msk.msra.mxu0 %vm655_vm0, %v14391_v59  ;;  %12815 = vmatprep.mubr.msk.f32.mxu0 %vm366_vm1, %v14499_v44  ;;  %v14812_v59 = vld [vmem:[%s14090_s25 + $0x1a8] sm:$0xff]  ;;  %v14826_v44 = vld [vmem:[%s14090_s25 + $0x1b8] sm:$0xff] }
 0x138   : > { %13102 = vmatprep.subr.msk.mxu0 %vm655_vm0, %v15013_v28 }
 0x139   : > { %12158 = vmatmul.mubr.msk.f32.gmra.mrb[50].mxu1 %vm366_vm1, %v14796_v20 }
 0x13a   : > { %12816 = vmatmul.mubr.msk.f32.gmra.mrb[2].mxu0 %vm366_vm1, %v14509_v46  ;;  %12160 = vmatprep.mubr.msk.f32.mxu1 %vm366_vm1, %v14801_v39  ;;  %v14829_v46 = vld [vmem:[%s14090_s25 + $0x1c0] sm:$0xff] }
 0x13b   : > { %12818 = vmatprep.mubr.msk.f32.mxu0 %vm366_vm1, %v14513_v48  ;;  %v14840_v48 = vld [vmem:[%s14090_s25 + $0x1c8] sm:$0xff] }
 0x13d   : > { %12161 = vmatmul.mubr.msk.f32.gmra.mrb[52].mxu1 %vm366_vm1, %v14812_v59 }
 0x13e   : > { %12819 = vmatmul.mubr.msk.f32.gmra.mrb[4].mxu0 %vm366_vm1, %v14523_v50  ;;  %12163 = vmatprep.mubr.msk.f32.mxu1 %vm366_vm1, %v14815_v41  ;;  %v14843_v50 = vld [vmem:[%s14090_s25 + $0x1d0] sm:$0xff] }
 0x13f   : > { %12821 = vmatprep.mubr.msk.f32.mxu0 %vm366_vm1, %v14527_v52  ;;  %v14854_v52 = vld [vmem:[%s14090_s25 + $0x1d8] sm:$0xff] }
 0x141   : > { %12164 = vmatmul.mubr.msk.f32.gmra.mrb[54].mxu1 %vm366_vm1, %v14826_v44 }
 0x142   : > { %12822 = vmatmul.mubr.msk.f32.gmra.mrb[6].mxu0 %vm366_vm1, %v14537_v54  ;;  %12166 = vmatprep.mubr.msk.f32.mxu1 %vm366_vm1, %v14829_v46  ;;  %v14857_v54 = vld [vmem:[%s14090_s25 + $0x1e0] sm:$0xff] }
 0x143   : > { %12824 = vmatprep.mubr.msk.f32.mxu0 %vm366_vm1, %v14541_v56  ;;  %v14868_v56 = vld [vmem:[%s14090_s25 + $0x1e8] sm:$0xff] }
 0x145   : > { %12167 = vmatmul.mubr.msk.f32.gmra.mrb[56].mxu1 %vm366_vm1, %v14840_v48 }
 0x146   : > { %12825 = vmatmul.mubr.msk.f32.gmra.mrb[8].mxu0 %vm366_vm1, %v14551_v58  ;;  %12169 = vmatprep.mubr.msk.f32.mxu1 %vm366_vm1, %v14843_v50  ;;  %v14871_v58 = vld [vmem:[%s14090_s25 + $0x1f0] sm:$0xff] }
 0x147   : > { %12827 = vmatprep.mubr.msk.f32.mxu0 %vm366_vm1, %v14555_v61  ;;  %v14882_v61 = vld [vmem:[%s14090_s25 + $0x1f8] sm:$0xff] }
 0x149   : > { %12170 = vmatmul.mubr.msk.f32.gmra.mrb[58].mxu1 %vm366_vm1, %v14854_v52 }
 0x14a   : > { %12828 = vmatmul.mubr.msk.f32.gmra.mrb[10].mxu0 %vm366_vm1, %v14565_v63  ;;  %12172 = vmatprep.mubr.msk.f32.mxu1 %vm366_vm1, %v14857_v54  ;;  %v14885_v63 = vld [vmem:[%s14090_s25 + $0x200] sm:$0xff] }
 0x14b   : > { %12830 = vmatprep.mubr.msk.f32.mxu0 %vm366_vm1, %v14569_v1  ;;  %v14896_v1 = vld [vmem:[%s14090_s25 + $0x208] sm:$0xff] }
 0x14d   : > { %12173 = vmatmul.mubr.msk.f32.gmra.mrb[60].mxu1 %vm366_vm1, %v14868_v56 }
 0x14e   : > { %12831 = vmatmul.mubr.msk.f32.gmra.mrb[12].mxu0 %vm366_vm1, %v14579_v3  ;;  %12175 = vmatprep.mubr.msk.f32.mxu1 %vm366_vm1, %v14871_v58  ;;  %v14899_v3 = vld [vmem:[%s14090_s25 + $0x210] sm:$0xff] }
 0x14f   : > { %12833 = vmatprep.mubr.msk.f32.mxu0 %vm366_vm1, %v14583_v5  ;;  %v14910_v5 = vld [vmem:[%s14090_s25 + $0x218] sm:$0xff] }
 0x151   : > { %12176 = vmatmul.mubr.msk.f32.gmra.mrb[62].mxu1 %vm366_vm1, %v14882_v61 }
 0x152   : > { %12834 = vmatmul.mubr.msk.f32.gmra.mrb[14].mxu0 %vm366_vm1, %v14593_v7  ;;  %12178 = vmatprep.mubr.msk.f32.mxu1 %vm366_vm1, %v14885_v63  ;;  %v14913_v7 = vld [vmem:[%s14090_s25 + $0x220] sm:$0xff] }
 0x153   : > { %12836 = vmatprep.mubr.msk.f32.mxu0 %vm366_vm1, %v14597_v9  ;;  %v14924_v9 = vld [vmem:[%s14090_s25 + $0x228] sm:$0xff] }
 0x155   : > { %12179 = vmatmul.mubr.msk.f32.gmra.mrb[64].mxu1 %vm366_vm1, %v14896_v1 }
 0x156   : > { %12837 = vmatmul.mubr.msk.f32.gmra.mrb[16].mxu0 %vm366_vm1, %v14607_v11  ;;  %12181 = vmatprep.mubr.msk.f32.mxu1 %vm366_vm1, %v14899_v3  ;;  %v14927_v11 = vld [vmem:[%s14090_s25 + $0x230] sm:$0xff] }
 0x157   : > { %12839 = vmatprep.mubr.msk.f32.mxu0 %vm366_vm1, %v14611_v13  ;;  %v14938_v13 = vld [vmem:[%s14090_s25 + $0x238] sm:$0xff] }
 0x159   : > { %12182 = vmatmul.mubr.msk.f32.gmra.mrb[66].mxu1 %vm366_vm1, %v14910_v5 }
 0x15a   : > { %12840 = vmatmul.mubr.msk.f32.gmra.mrb[18].mxu0 %vm366_vm1, %v14621_v15  ;;  %12184 = vmatprep.mubr.msk.f32.mxu1 %vm366_vm1, %v14913_v7  ;;  %v14941_v15 = vld [vmem:[%s14090_s25 + $0x240] sm:$0xff] }
 0x15b   : > { %12842 = vmatprep.mubr.msk.f32.mxu0 %vm366_vm1, %v14625_v17  ;;  %v14952_v17 = vld [vmem:[%s14090_s25 + $0x248] sm:$0xff] }
 0x15d   : > { %12185 = vmatmul.mubr.msk.f32.gmra.mrb[68].mxu1 %vm366_vm1, %v14924_v9 }
 0x15e   : > { %12843 = vmatmul.mubr.msk.f32.gmra.mrb[20].mxu0 %vm366_vm1, %v14635_v19  ;;  %12187 = vmatprep.mubr.msk.f32.mxu1 %vm366_vm1, %v14927_v11  ;;  %v14955_v19 = vld [vmem:[%s14090_s25 + $0x250] sm:$0xff] }
 0x15f   : > { %12845 = vmatprep.mubr.msk.f32.mxu0 %vm366_vm1, %v14639_v21  ;;  %v14966_v21 = vld [vmem:[%s14090_s25 + $0x258] sm:$0xff] }
 0x161   : > { %12188 = vmatmul.mubr.msk.f32.gmra.mrb[70].mxu1 %vm366_vm1, %v14938_v13 }
 0x162   : > { %12846 = vmatmul.mubr.msk.f32.gmra.mrb[22].mxu0 %vm366_vm1, %v14649_v23  ;;  %12190 = vmatprep.mubr.msk.f32.mxu1 %vm366_vm1, %v14941_v15  ;;  %v14980_v23 = vld [vmem:[%s14090_s25 + $0x268] sm:$0xff] }
 0x163   : > { %12848 = vmatprep.mubr.msk.f32.mxu0 %vm366_vm1, %v14653_v25  ;;  %v14994_v25 = vld [vmem:[%s14090_s25 + $0x278] sm:$0xff] }
 0x165   : > { %12191 = vmatmul.mubr.msk.f32.gmra.mrb[72].mxu1 %vm366_vm1, %v14952_v17 }
 0x166   : > { %12849 = vmatmul.mubr.msk.f32.gmra.mrb[24].mxu0 %vm366_vm1, %v14663_v27  ;;  %12193 = vmatprep.mubr.msk.f32.mxu1 %vm366_vm1, %v14955_v19  ;;  %v15008_v27 = vld [vmem:[%s14090_s25 + $0x288] sm:$0xff] }
 0x167   : > { %12851 = vmatprep.mubr.msk.f32.mxu0 %vm366_vm1, %v14672_v30  ;;  %v15016_v30 = vld [vmem:[%s14090_s25 + $0x290] sm:$0xff] }
 0x169   : > { %12194 = vmatmul.mubr.msk.f32.gmra.mrb[74].mxu1 %vm366_vm1, %v14966_v21 }
 0x16a   : > { %12852 = vmatmul.mubr.msk.f32.gmra.mrb[26].mxu0 %vm366_vm1, %v14684_v32  ;;  %12196 = vmatprep.mubr.msk.f32.mxu1 %vm366_vm1, %v14969_v22  ;;  %v15032_v32 = vld [vmem:[%s14090_s25 + $0x2a0] sm:$0xff] }
 0x16b   : > { %12854 = vmatprep.mubr.msk.f32.mxu0 %vm366_vm1, %v14688_v43  ;;  %v15046_v43 = vld [vmem:[%s14090_s25 + $0x2b0] sm:$0xff] }
 0x16d   : > { %12197 = vmatmul.mubr.msk.f32.gmra.mrb[76].mxu1 %vm366_vm1, %v14980_v23 }
 0x16e   : > { %12855 = vmatmul.mubr.msk.f32.gmra.mrb[28].mxu0 %vm366_vm1, %v14698_v35  ;;  %12199 = vmatprep.mubr.msk.f32.mxu1 %vm366_vm1, %v14983_v24  ;;  %v15060_v35 = vld [vmem:[%s14090_s25 + $0x2c0] sm:$0xff] }
 0x16f   : > { %12857 = vmatprep.mubr.msk.f32.mxu0 %vm366_vm1, %v14702_v37  ;;  %v15074_v37 = vld [vmem:[%s14090_s25 + $0x2d0] sm:$0xff] }
 0x171   : > { %12200 = vmatmul.mubr.msk.f32.gmra.mrb[78].mxu1 %vm366_vm1, %v14994_v25 }
 0x172   : > { %12858 = vmatmul.mubr.msk.f32.gmra.mrb[30].mxu0 %vm366_vm1, %v14712_v40  ;;  %12202 = vmatprep.mubr.msk.f32.mxu1 %vm366_vm1, %v14997_v26  ;;  %v15088_v40 = vld [vmem:[%s14090_s25 + $0x2e0] sm:$0xff] }
 0x173   : > { %12860 = vmatprep.mubr.msk.f32.mxu0 %vm366_vm1, %v14716_v45  ;;  %v15102_v45 = vld [vmem:[%s14090_s25 + $0x2f0] sm:$0xff] }
 0x175   : > { %12203 = vmatmul.mubr.msk.f32.gmra.mrb[80].mxu1 %vm366_vm1, %v15008_v27 }
 0x176   : > { %12861 = vmatmul.mubr.msk.f32.gmra.mrb[32].mxu0 %vm366_vm1, %v14726_v49  ;;  %12205 = vmatprep.mubr.msk.f32.mxu1 %vm366_vm1, %v15016_v30  ;;  %v2040_v49 = vld [vmem:[%s14090_s25 + $0x2] sm:$0xff] }
 0x177   : > { %12863 = vmatprep.mubr.msk.f32.mxu0 %vm366_vm1, %v14730_v53  ;;  %v2042_v53 = vld [vmem:[%s14090_s25 + $0x12] sm:$0xff] }
 0x179   : > { %12206 = vmatmul.mubr.msk.f32.gmra.mrb[82].mxu1 %vm366_vm1, %v15029_v31 }
 0x17a   : > { %12864 = vmatmul.mubr.msk.f32.gmra.mrb[34].mxu0 %vm366_vm1, %v14740_v57  ;;  %12208 = vmatprep.mubr.msk.f32.mxu1 %vm366_vm1, %v15032_v32  ;;  %v2044_v57 = vld [vmem:[%s14090_s25 + $0x22] sm:$0xff] }
 0x17b   : > { %12866 = vmatprep.mubr.msk.f32.mxu0 %vm366_vm1, %v14744_v62  ;;  %v2046_v62 = vld [vmem:[%s14090_s25 + $0x32] sm:$0xff] }
 0x17d   : > { %12209 = vmatmul.mubr.msk.f32.gmra.mrb[84].mxu1 %vm366_vm1, %v15043_v33 }
 0x17e   : > { %12867 = vmatmul.mubr.msk.f32.gmra.mrb[36].mxu0 %vm366_vm1, %v14754_v2  ;;  %12211 = vmatprep.mubr.msk.f32.mxu1 %vm366_vm1, %v15046_v43  ;;  %v2048_v2 = vld [vmem:[%s14090_s25 + $0x42] sm:$0xff] }
 0x17f   : > { %12869 = vmatprep.mubr.msk.f32.mxu0 %vm366_vm1, %v14758_v6  ;;  %v2050_v6 = vld [vmem:[%s14090_s25 + $0x52] sm:$0xff] }
 0x181   : > { %12212 = vmatmul.mubr.msk.f32.gmra.mrb[86].mxu1 %vm366_vm1, %v15057_v34 }
 0x182   : > { %12870 = vmatmul.mubr.msk.f32.gmra.mrb[38].mxu0 %vm366_vm1, %v14768_v10  ;;  %12214 = vmatprep.mubr.msk.f32.mxu1 %vm366_vm1, %v15060_v35  ;;  %v2052_v10 = vld [vmem:[%s14090_s25 + $0x62] sm:$0xff] }
 0x183   : > { %12872 = vmatprep.mubr.msk.f32.mxu0 %vm366_vm1, %v14772_v14  ;;  %v2054_v14 = vld [vmem:[%s14090_s25 + $0x72] sm:$0xff] }
 0x185   : > { %12215 = vmatmul.mubr.msk.f32.gmra.mrb[88].mxu1 %vm366_vm1, %v15071_v36 }
 0x186   : > { %12873 = vmatmul.mubr.msk.f32.gmra.mrb[40].mxu0 %vm366_vm1, %v14782_v16  ;;  %12217 = vmatprep.mubr.msk.f32.mxu1 %vm366_vm1, %v15074_v37  ;;  %v2055_v16 = vld [vmem:[%s14090_s25 + $0x7a] sm:$0xff] }
 0x187   : > { %12875 = vmatprep.mubr.msk.f32.mxu0 %vm366_vm1, %v14785_v18  ;;  %v2056_v18 = vld [vmem:[%s14090_s25 + $0x82] sm:$0xff] }
 0x189   : > { %12218 = vmatmul.mubr.msk.f32.gmra.mrb[90].mxu1 %vm366_vm1, %v15085_v38 }
 0x18a   : > { %12876 = vmatmul.mubr.msk.f32.gmra.mrb[42].mxu0 %vm366_vm1, %v14796_v20  ;;  %12220 = vmatprep.mubr.msk.f32.mxu1 %vm366_vm1, %v15088_v40  ;;  %v2057_v20 = vld [vmem:[%s14090_s25 + $0x8a] sm:$0xff] }
 0x18b   : > { %12878 = vmatprep.mubr.msk.f32.mxu0 %vm366_vm1, %v14801_v39  ;;  %v2058_v39 = vld [vmem:[%s14090_s25 + $0x92] sm:$0xff] }
 0x18d   : > { %12221 = vmatmul.mubr.msk.f32.gmra.mrb[92].mxu1 %vm366_vm1, %v15099_v42 }
 0x18e   : > { %12879 = vmatmul.mubr.msk.f32.gmra.mrb[44].mxu0 %vm366_vm1, %v14812_v59  ;;  %12223 = vmatprep.mubr.msk.f32.mxu1 %vm366_vm1, %v15102_v45  ;;  %v2059_v59 = vld [vmem:[%s14090_s25 + $0x9a] sm:$0xff] }
 0x18f   : > { %12881 = vmatprep.mubr.msk.f32.mxu0 %vm366_vm1, %v14815_v41  ;;  %v2060_v41 = vld [vmem:[%s14090_s25 + $0xa2] sm:$0xff] }
 0x191   : > { %12224 = vmatmul.mubr.msk.f32.gmra.mrb[94].mxu1 %vm366_vm1, %v15113_v47 }
 0x192   : > { %12882 = vmatmul.mubr.msk.f32.gmra.mrb[46].mxu0 %vm366_vm1, %v14826_v44  ;;  %12228 = vmatprep.mubr.msk.f32.mxu1 %vm366_vm1, %v2040_v49  ;;  %v2061_v44 = vld [vmem:[%s14090_s25 + $0xaa] sm:$0xff]  ;;  %v2091_v49 = vld [vmem:[%s14090_s25 + $0x19a] sm:$0xff] }
 0x193   : > { %12884 = vmatprep.mubr.msk.f32.mxu0 %vm366_vm1, %v14829_v46  ;;  %v2062_v46 = vld [vmem:[%s14090_s25 + $0xb2] sm:$0xff] }
 0x195   : > { %12229 = vmatmul.mubr.msk.f32.vlgmr.msra.gmra.mrb[0].mxu1 %vm366_vm1, %v2041_v51  ;;  %v7193_v51 = vld [vmem:[%s14090_s25 + $0x59] sm:$0xff] }
 0x196   : > { %12885 = vmatmul.mubr.msk.f32.gmra.mrb[48].mxu0 %vm366_vm1, %v14840_v48  ;;  %12373 = vmatpush3.msk.msra.mxu1 %vm655_vm0, %v14669_v29  ;;  %v2045_v29 = vld [vmem:[%s14090_s25 + $0x2a] sm:$0xff]  ;;  %v2063_v48 = vld [vmem:[%s14090_s25 + $0xba] sm:$0xff] }
 0x197   : > { %12231 = vmatprep.mubr.msk.f32.mxu1 %vm366_vm1, %v2042_v53  ;;  %12887 = vmatprep.mubr.msk.f32.mxu0 %vm366_vm1, %v14843_v50  ;;  %v2064_v50 = vld [vmem:[%s14090_s25 + $0xc2] sm:$0xff] }
 0x198   : > { %13248 = vmatprep.subr.msk.mxu1 %vm655_vm0, %v15138_v60  ;;  %v2092_v53 = vld [vmem:[%s14090_s25 + $0x1a2] sm:$0xff] }
 0x199   : > { %12232 = vmatmul.mubr.msk.f32.gmra.mrb[2].mxu1 %vm366_vm1, %v2043_v55  ;;  %v7194_v55 = vld [vmem:[%s14090_s25 + $0x61] sm:$0xff] }
 0x19a   : > { %12888 = vmatmul.mubr.msk.f32.gmra.mrb[50].mxu0 %vm366_vm1, %v14854_v52  ;;  %12234 = vmatprep.mubr.msk.f32.mxu1 %vm366_vm1, %v2044_v57  ;;  %v2065_v52 = vld [vmem:[%s14090_s25 + $0xca] sm:$0xff] }
 0x19b   : > { %12890 = vmatprep.mubr.msk.f32.mxu0 %vm366_vm1, %v14857_v54  ;;  %v2066_v54 = vld [vmem:[%s14090_s25 + $0xd2] sm:$0xff]  ;;  %v7195_v57 = vld [vmem:[%s14090_s25 + $0x69] sm:$0xff] }
 0x19d   : > { %12235 = vmatmul.mubr.msk.f32.gmra.mrb[4].mxu1 %vm366_vm1, %v2045_v29  ;;  %v2094_v29 = vld [vmem:[%s14090_s25 + $0x1b2] sm:$0xff] }
 0x19e   : > { %12891 = vmatmul.mubr.msk.f32.gmra.mrb[52].mxu0 %vm366_vm1, %v14868_v56  ;;  %12237 = vmatprep.mubr.msk.f32.mxu1 %vm366_vm1, %v2046_v62  ;;  %v2067_v56 = vld [vmem:[%s14090_s25 + $0xda] sm:$0xff]  ;;  %v7196_v62 = vld [vmem:[%s14090_s25 + $0x71] sm:$0xff] }
 0x19f   : > { %12893 = vmatprep.mubr.msk.f32.mxu0 %vm366_vm1, %v14871_v58  ;;  %v2068_v58 = vld [vmem:[%s14090_s25 + $0xe2] sm:$0xff] }
 0x1a1   : > { %12238 = vmatmul.mubr.msk.f32.gmra.mrb[6].mxu1 %vm366_vm1, %v2047_v0  ;;  %v2095_v0 = vld [vmem:[%s14090_s25 + $0x1ba] sm:$0xff] }
 0x1a2   : > { %12894 = vmatmul.mubr.msk.f32.gmra.mrb[54].mxu0 %vm366_vm1, %v14882_v61  ;;  %12240 = vmatprep.mubr.msk.f32.mxu1 %vm366_vm1, %v2048_v2  ;;  %v2069_v61 = vld [vmem:[%s14090_s25 + $0xea] sm:$0xff]  ;;  %v7197_v2 = vld [vmem:[%s14090_s25 + $0x79] sm:$0xff] }
 0x1a3   : > { %12896 = vmatprep.mubr.msk.f32.mxu0 %vm366_vm1, %v14885_v63  ;;  %v2070_v63 = vld [vmem:[%s14090_s25 + $0xf2] sm:$0xff] }
 0x1a5   : > { %12241 = vmatmul.mubr.msk.f32.gmra.mrb[8].mxu1 %vm366_vm1, %v2049_v4  ;;  %v2096_v4 = vld [vmem:[%s14090_s25 + $0x1c2] sm:$0xff] }
 0x1a6   : > { %12897 = vmatmul.mubr.msk.f32.gmra.mrb[56].mxu0 %vm366_vm1, %v14896_v1  ;;  %12243 = vmatprep.mubr.msk.f32.mxu1 %vm366_vm1, %v2050_v6  ;;  %v2071_v1 = vld [vmem:[%s14090_s25 + $0xfa] sm:$0xff] }
 0x1a7   : > { %12899 = vmatprep.mubr.msk.f32.mxu0 %vm366_vm1, %v14899_v3  ;;  %v2072_v3 = vld [vmem:[%s14090_s25 + $0x102] sm:$0xff] }
 0x1a8   : > { %v7198_v6 = vld [vmem:[%s14090_s25 + $0x81] sm:$0xff] }
 0x1a9   : > { %12244 = vmatmul.mubr.msk.f32.gmra.mrb[10].mxu1 %vm366_vm1, %v2051_v8  ;;  %v2097_v8 = vld [vmem:[%s14090_s25 + $0x1ca] sm:$0xff] }
 0x1aa   : > { %12900 = vmatmul.mubr.msk.f32.gmra.mrb[58].mxu0 %vm366_vm1, %v14910_v5  ;;  %12246 = vmatprep.mubr.msk.f32.mxu1 %vm366_vm1, %v2052_v10  ;;  %v2073_v5 = vld [vmem:[%s14090_s25 + $0x10a] sm:$0xff] }
 0x1ab   : > { %12902 = vmatprep.mubr.msk.f32.mxu0 %vm366_vm1, %v14913_v7  ;;  %v2074_v7 = vld [vmem:[%s14090_s25 + $0x112] sm:$0xff]  ;;  %v7199_v10 = vld [vmem:[%s14090_s25 + $0x89] sm:$0xff] }
 0x1ad   : > { %12247 = vmatmul.mubr.msk.f32.gmra.mrb[12].mxu1 %vm366_vm1, %v2053_v12  ;;  %v2098_v12 = vld [vmem:[%s14090_s25 + $0x1d2] sm:$0xff] }
 0x1ae   : > { %12903 = vmatmul.mubr.msk.f32.gmra.mrb[60].mxu0 %vm366_vm1, %v14924_v9  ;;  %12249 = vmatprep.mubr.msk.f32.mxu1 %vm366_vm1, %v2054_v14  ;;  %v2075_v9 = vld [vmem:[%s14090_s25 + $0x11a] sm:$0xff]  ;;  %v7200_v14 = vld [vmem:[%s14090_s25 + $0x91] sm:$0xff] }
 0x1af   : > { %12905 = vmatprep.mubr.msk.f32.mxu0 %vm366_vm1, %v14927_v11  ;;  %v2076_v11 = vld [vmem:[%s14090_s25 + $0x122] sm:$0xff] }
 0x1b1   : > { %12250 = vmatmul.mubr.msk.f32.gmra.mrb[14].mxu1 %vm366_vm1, %v2055_v16  ;;  %v2099_v16 = vld [vmem:[%s14090_s25 + $0x1da] sm:$0xff] }
 0x1b2   : > { %12906 = vmatmul.mubr.msk.f32.gmra.mrb[62].mxu0 %vm366_vm1, %v14938_v13  ;;  %12252 = vmatprep.mubr.msk.f32.mxu1 %vm366_vm1, %v2056_v18  ;;  %v2077_v13 = vld [vmem:[%s14090_s25 + $0x12a] sm:$0xff]  ;;  %v7201_v18 = vld [vmem:[%s14090_s25 + $0x99] sm:$0xff] }
 0x1b3   : > { %12908 = vmatprep.mubr.msk.f32.mxu0 %vm366_vm1, %v14941_v15  ;;  %v2078_v15 = vld [vmem:[%s14090_s25 + $0x132] sm:$0xff] }
 0x1b5   : > { %12253 = vmatmul.mubr.msk.f32.gmra.mrb[16].mxu1 %vm366_vm1, %v2057_v20  ;;  %v2100_v20 = vld [vmem:[%s14090_s25 + $0x1e2] sm:$0xff] }
 0x1b6   : > { %12909 = vmatmul.mubr.msk.f32.gmra.mrb[64].mxu0 %vm366_vm1, %v14952_v17  ;;  %12255 = vmatprep.mubr.msk.f32.mxu1 %vm366_vm1, %v2058_v39  ;;  %v2079_v17 = vld [vmem:[%s14090_s25 + $0x13a] sm:$0xff] }
 0x1b7   : > { %12911 = vmatprep.mubr.msk.f32.mxu0 %vm366_vm1, %v14955_v19  ;;  %v2080_v19 = vld [vmem:[%s14090_s25 + $0x142] sm:$0xff] }
 0x1b8   : > { %v7202_v39 = vld [vmem:[%s14090_s25 + $0xa1] sm:$0xff] }
 0x1b9   : > { %12256 = vmatmul.mubr.msk.f32.gmra.mrb[18].mxu1 %vm366_vm1, %v2059_v59  ;;  %v2101_v59 = vld [vmem:[%s14090_s25 + $0x1ea] sm:$0xff] }
 0x1ba   : > { %12912 = vmatmul.mubr.msk.f32.gmra.mrb[66].mxu0 %vm366_vm1, %v14966_v21  ;;  %12258 = vmatprep.mubr.msk.f32.mxu1 %vm366_vm1, %v2060_v41  ;;  %v6248_v21 = vld [vmem:[%s14090_s25 + $0x300] sm:$0xff]  ;;  %v7203_v41 = vld [vmem:[%s14090_s25 + $0xa9] sm:$0xff] }
 0x1bb   : > { %12914 = vmatprep.mubr.msk.f32.mxu0 %vm366_vm1, %v14969_v22  ;;  %v2081_v22 = vld [vmem:[%s14090_s25 + $0x14a] sm:$0xff] }
 0x1bd   : > { %12259 = vmatmul.mubr.msk.f32.gmra.mrb[20].mxu1 %vm366_vm1, %v2061_v44  ;;  %v2102_v44 = vld [vmem:[%s14090_s25 + $0x1f2] sm:$0xff] }
 0x1be   : > { %12915 = vmatmul.mubr.msk.f32.gmra.mrb[68].mxu0 %vm366_vm1, %v14980_v23  ;;  %12261 = vmatprep.mubr.msk.f32.mxu1 %vm366_vm1, %v2062_v46  ;;  %v6249_v23 = vld [vmem:[%s14090_s25 + $0x308] sm:$0xff]  ;;  %v7204_v46 = vld [vmem:[%s14090_s25 + $0xb1] sm:$0xff] }
 0x1bf   : > { %12917 = vmatprep.mubr.msk.f32.mxu0 %vm366_vm1, %v14983_v24  ;;  %v2082_v24 = vld [vmem:[%s14090_s25 + $0x152] sm:$0xff] }
 0x1c1   : > { %12262 = vmatmul.mubr.msk.f32.gmra.mrb[22].mxu1 %vm366_vm1, %v2063_v48  ;;  %v2103_v48 = vld [vmem:[%s14090_s25 + $0x1fa] sm:$0xff] }
 0x1c2   : > { %12918 = vmatmul.mubr.msk.f32.gmra.mrb[70].mxu0 %vm366_vm1, %v14994_v25  ;;  %12264 = vmatprep.mubr.msk.f32.mxu1 %vm366_vm1, %v2064_v50  ;;  %v6250_v25 = vld [vmem:[%s14090_s25 + $0x310] sm:$0xff]  ;;  %v7205_v50 = vld [vmem:[%s14090_s25 + $0xb9] sm:$0xff] }
 0x1c3   : > { %12920 = vmatprep.mubr.msk.f32.mxu0 %vm366_vm1, %v14997_v26  ;;  %v2083_v26 = vld [vmem:[%s14090_s25 + $0x15a] sm:$0xff] }
 0x1c5   : > { %12265 = vmatmul.mubr.msk.f32.gmra.mrb[24].mxu1 %vm366_vm1, %v2065_v52  ;;  %v2104_v52 = vld [vmem:[%s14090_s25 + $0x202] sm:$0xff] }
 0x1c6   : > { %12921 = vmatmul.mubr.msk.f32.gmra.mrb[72].mxu0 %vm366_vm1, %v15008_v27  ;;  %12267 = vmatprep.mubr.msk.f32.mxu1 %vm366_vm1, %v2066_v54  ;;  %v6251_v27 = vld [vmem:[%s14090_s25 + $0x318] sm:$0xff]  ;;  %v7206_v54 = vld [vmem:[%s14090_s25 + $0xc1] sm:$0xff] }
 0x1c7   : > { %12923 = vmatprep.mubr.msk.f32.mxu0 %vm366_vm1, %v15016_v30  ;;  %v2084_v30 = vld [vmem:[%s14090_s25 + $0x162] sm:$0xff] }
 0x1c9   : > { %12268 = vmatmul.mubr.msk.f32.gmra.mrb[26].mxu1 %vm366_vm1, %v2067_v56  ;;  %v2105_v56 = vld [vmem:[%s14090_s25 + $0x20a] sm:$0xff] }
 0x1ca   : > { %12924 = vmatmul.mubr.msk.f32.gmra.mrb[74].mxu0 %vm366_vm1, %v15029_v31  ;;  %12270 = vmatprep.mubr.msk.f32.mxu1 %vm366_vm1, %v2068_v58  ;;  %v6252_v31 = vld [vmem:[%s14090_s25 + $0x320] sm:$0xff]  ;;  %v7207_v58 = vld [vmem:[%s14090_s25 + $0xc9] sm:$0xff] }
 0x1cb   : > { %12926 = vmatprep.mubr.msk.f32.mxu0 %vm366_vm1, %v15032_v32  ;;  %v2085_v32 = vld [vmem:[%s14090_s25 + $0x16a] sm:$0xff] }
 0x1cd   : > { %12271 = vmatmul.mubr.msk.f32.gmra.mrb[28].mxu1 %vm366_vm1, %v2069_v61  ;;  %v2106_v61 = vld [vmem:[%s14090_s25 + $0x212] sm:$0xff] }
 0x1ce   : > { %12927 = vmatmul.mubr.msk.f32.gmra.mrb[76].mxu0 %vm366_vm1, %v15043_v33  ;;  %12273 = vmatprep.mubr.msk.f32.mxu1 %vm366_vm1, %v2070_v63  ;;  %v6253_v33 = vld [vmem:[%s14090_s25 + $0x328] sm:$0xff]  ;;  %v7208_v63 = vld [vmem:[%s14090_s25 + $0xd1] sm:$0xff] }
 0x1cf   : > { %12929 = vmatprep.mubr.msk.f32.mxu0 %vm366_vm1, %v15046_v43  ;;  %v2086_v43 = vld [vmem:[%s14090_s25 + $0x172] sm:$0xff] }
 0x1d1   : > { %12274 = vmatmul.mubr.msk.f32.gmra.mrb[30].mxu1 %vm366_vm1, %v2071_v1  ;;  %v2107_v1 = vld [vmem:[%s14090_s25 + $0x21a] sm:$0xff] }
 0x1d2   : > { %12930 = vmatmul.mubr.msk.f32.gmra.mrb[78].mxu0 %vm366_vm1, %v15057_v34  ;;  %12276 = vmatprep.mubr.msk.f32.mxu1 %vm366_vm1, %v2072_v3  ;;  %v6254_v34 = vld [vmem:[%s14090_s25 + $0x330] sm:$0xff]  ;;  %v7209_v3 = vld [vmem:[%s14090_s25 + $0xd9] sm:$0xff] }
 0x1d3   : > { %12932 = vmatprep.mubr.msk.f32.mxu0 %vm366_vm1, %v15060_v35  ;;  %v2087_v35 = vld [vmem:[%s14090_s25 + $0x17a] sm:$0xff] }
 0x1d5   : > { %12277 = vmatmul.mubr.msk.f32.gmra.mrb[32].mxu1 %vm366_vm1, %v2073_v5  ;;  %v2108_v5 = vld [vmem:[%s14090_s25 + $0x222] sm:$0xff] }
 0x1d6   : > { %12933 = vmatmul.mubr.msk.f32.gmra.mrb[80].mxu0 %vm366_vm1, %v15071_v36  ;;  %12279 = vmatprep.mubr.msk.f32.mxu1 %vm366_vm1, %v2074_v7  ;;  %v6255_v36 = vld [vmem:[%s14090_s25 + $0x338] sm:$0xff]  ;;  %v7210_v7 = vld [vmem:[%s14090_s25 + $0xe1] sm:$0xff] }
 0x1d7   : > { %12935 = vmatprep.mubr.msk.f32.mxu0 %vm366_vm1, %v15074_v37  ;;  %v2088_v37 = vld [vmem:[%s14090_s25 + $0x182] sm:$0xff] }
 0x1d9   : > { %12280 = vmatmul.mubr.msk.f32.gmra.mrb[34].mxu1 %vm366_vm1, %v2075_v9  ;;  %v2109_v9 = vld [vmem:[%s14090_s25 + $0x22a] sm:$0xff] }
 0x1da   : > { %12936 = vmatmul.mubr.msk.f32.gmra.mrb[82].mxu0 %vm366_vm1, %v15085_v38  ;;  %12282 = vmatprep.mubr.msk.f32.mxu1 %vm366_vm1, %v2076_v11  ;;  %v7190_v38 = vld [vmem:[%s14090_s25 + $0x41] sm:$0xff]  ;;  %v7211_v11 = vld [vmem:[%s14090_s25 + $0xe9] sm:$0xff] }
 0x1db   : > { %12938 = vmatprep.mubr.msk.f32.mxu0 %vm366_vm1, %v15088_v40  ;;  %v2089_v40 = vld [vmem:[%s14090_s25 + $0x18a] sm:$0xff] }
 0x1dd   : > { %12283 = vmatmul.mubr.msk.f32.gmra.mrb[36].mxu1 %vm366_vm1, %v2077_v13  ;;  %v2110_v13 = vld [vmem:[%s14090_s25 + $0x232] sm:$0xff] }
 0x1de   : > { %12939 = vmatmul.mubr.msk.f32.gmra.mrb[84].mxu0 %vm366_vm1, %v15099_v42  ;;  %12285 = vmatprep.mubr.msk.f32.mxu1 %vm366_vm1, %v2078_v15  ;;  %v7191_v42 = vld [vmem:[%s14090_s25 + $0x49] sm:$0xff]  ;;  %v7212_v15 = vld [vmem:[%s14090_s25 + $0xf1] sm:$0xff] }
 0x1df   : > { %12941 = vmatprep.mubr.msk.f32.mxu0 %vm366_vm1, %v15102_v45  ;;  %v2090_v45 = vld [vmem:[%s14090_s25 + $0x192] sm:$0xff] }
 0x1e1   : > { %12286 = vmatmul.mubr.msk.f32.gmra.mrb[38].mxu1 %vm366_vm1, %v2079_v17  ;;  %v2111_v17 = vld [vmem:[%s14090_s25 + $0x23a] sm:$0xff] }
 0x1e2   : > { %12942 = vmatmul.mubr.msk.f32.gmra.mrb[86].mxu0 %vm366_vm1, %v15113_v47  ;;  %12288 = vmatprep.mubr.msk.f32.mxu1 %vm366_vm1, %v2080_v19  ;;  %v7192_v47 = vld [vmem:[%s14090_s25 + $0x51] sm:$0xff]  ;;  %v7213_v19 = vld [vmem:[%s14090_s25 + $0xf9] sm:$0xff] }
 0x1e3   : > { %12944 = vmatprep.mubr.msk.f32.mxu0 %vm366_vm1, %v6248_v21  ;;  %v2112_v21 = vld [vmem:[%s14090_s25 + $0x242] sm:$0xff] }
 0x1e5   : > { %12289 = vmatmul.mubr.msk.f32.gmra.mrb[40].mxu1 %vm366_vm1, %v2081_v22  ;;  %v7214_v22 = vld [vmem:[%s14090_s25 + $0x101] sm:$0xff] }
 0x1e6   : > { %12945 = vmatmul.mubr.msk.f32.gmra.mrb[88].mxu0 %vm366_vm1, %v6249_v23  ;;  %12291 = vmatprep.mubr.msk.f32.mxu1 %vm366_vm1, %v2082_v24  ;;  %v2113_v23 = vld [vmem:[%s14090_s25 + $0x24a] sm:$0xff] }
 0x1e7   : > { %12947 = vmatprep.mubr.msk.f32.mxu0 %vm366_vm1, %v6250_v25  ;;  %v7215_v24 = vld [vmem:[%s14090_s25 + $0x109] sm:$0xff]  ;;  %v2114_v25 = vld [vmem:[%s14090_s25 + $0x252] sm:$0xff] }
 0x1e9   : > { %12292 = vmatmul.mubr.msk.f32.gmra.mrb[42].mxu1 %vm366_vm1, %v2083_v26  ;;  %v7216_v26 = vld [vmem:[%s14090_s25 + $0x111] sm:$0xff] }
 0x1ea   : > { %12948 = vmatmul.mubr.msk.f32.gmra.mrb[90].mxu0 %vm366_vm1, %v6251_v27  ;;  %12294 = vmatprep.mubr.msk.f32.mxu1 %vm366_vm1, %v2084_v30  ;;  %v2115_v27 = vld [vmem:[%s14090_s25 + $0x25a] sm:$0xff] }
 0x1eb   : > { %12950 = vmatprep.mubr.msk.f32.mxu0 %vm366_vm1, %v6252_v31  ;;  %v7217_v30 = vld [vmem:[%s14090_s25 + $0x119] sm:$0xff]  ;;  %v2116_v31 = vld [vmem:[%s14090_s25 + $0x262] sm:$0xff] }
 0x1ed   : > { %12295 = vmatmul.mubr.msk.f32.gmra.mrb[44].mxu1 %vm366_vm1, %v2085_v32  ;;  %v7218_v32 = vld [vmem:[%s14090_s25 + $0x121] sm:$0xff] }
 0x1ee   : > { %12951 = vmatmul.mubr.msk.f32.gmra.mrb[92].mxu0 %vm366_vm1, %v6253_v33  ;;  %12297 = vmatprep.mubr.msk.f32.mxu1 %vm366_vm1, %v2086_v43  ;;  %v2117_v33 = vld [vmem:[%s14090_s25 + $0x26a] sm:$0xff] }
 0x1ef   : > { %12953 = vmatprep.mubr.msk.f32.mxu0 %vm366_vm1, %v6254_v34  ;;  %v7219_v43 = vld [vmem:[%s14090_s25 + $0x129] sm:$0xff]  ;;  %v2118_v34 = vld [vmem:[%s14090_s25 + $0x272] sm:$0xff] }
 0x1f1   : > { %12298 = vmatmul.mubr.msk.f32.gmra.mrb[46].mxu1 %vm366_vm1, %v2087_v35  ;;  %v7220_v35 = vld [vmem:[%s14090_s25 + $0x131] sm:$0xff] }
 0x1f2   : > { %12954 = vmatmul.mubr.msk.f32.gmra.mrb[94].mxu0 %vm366_vm1, %v6255_v36  ;;  %12300 = vmatprep.mubr.msk.f32.mxu1 %vm366_vm1, %v2088_v37  ;;  %v2119_v36 = vld [vmem:[%s14090_s25 + $0x27a] sm:$0xff] }
 0x1f3   : > { %12958 = vmatprep.mubr.msk.f32.mxu0 %vm366_vm1, %v7190_v38  ;;  %v7221_v37 = vld [vmem:[%s14090_s25 + $0x139] sm:$0xff]  ;;  %v2120_v38 = vld [vmem:[%s14090_s25 + $0x282] sm:$0xff] }
 0x1f5   : > { %12301 = vmatmul.mubr.msk.f32.gmra.mrb[48].mxu1 %vm366_vm1, %v2089_v40  ;;  %v7222_v40 = vld [vmem:[%s14090_s25 + $0x141] sm:$0xff] }
 0x1f6   : > { %12959 = vmatmul.mubr.msk.f32.vlgmr.msra.gmra.mrb[0].mxu0 %vm366_vm1, %v7191_v42  ;;  %12303 = vmatprep.mubr.msk.f32.mxu1 %vm366_vm1, %v2090_v45  ;;  %v2121_v42 = vld [vmem:[%s14090_s25 + $0x28a] sm:$0xff] }
 0x1f7   : > { %13103 = vmatpush3.msk.msra.mxu0 %vm655_vm0, %v15013_v28  ;;  %12961 = vmatprep.mubr.msk.f32.mxu0 %vm366_vm1, %v7192_v47  ;;  %v2093_v28 = vld [vmem:[%s14090_s25 + $0x1aa] sm:$0xff]  ;;  %v2122_v47 = vld [vmem:[%s14090_s25 + $0x292] sm:$0xff] }
 0x1f8   : > { %v7223_v45 = vld [vmem:[%s14090_s25 + $0x149] sm:$0xff] }
 0x1f9   : > { %12304 = vmatmul.mubr.msk.f32.gmra.mrb[50].mxu1 %vm366_vm1, %v2091_v49  ;;  %v7224_v49 = vld [vmem:[%s14090_s25 + $0x151] sm:$0xff] }
 0x1fa   : > { %12962 = vmatmul.mubr.msk.f32.gmra.mrb[2].mxu0 %vm366_vm1, %v7193_v51  ;;  %12306 = vmatprep.mubr.msk.f32.mxu1 %vm366_vm1, %v2092_v53  ;;  %v2123_v51 = vld [vmem:[%s14090_s25 + $0x29a] sm:$0xff] }
 0x1fb   : > { %12964 = vmatprep.mubr.msk.f32.mxu0 %vm366_vm1, %v7194_v55  ;;  %v7225_v53 = vld [vmem:[%s14090_s25 + $0x159] sm:$0xff]  ;;  %v2124_v55 = vld [vmem:[%s14090_s25 + $0x2a2] sm:$0xff] }
 0x1fd   : > { %12307 = vmatmul.mubr.msk.f32.gmra.mrb[52].mxu1 %vm366_vm1, %v2093_v28  ;;  %v7226_v28 = vld [vmem:[%s14090_s25 + $0x161] sm:$0xff] }
 0x1fe   : > { %12965 = vmatmul.mubr.msk.f32.gmra.mrb[4].mxu0 %vm366_vm1, %v7195_v57  ;;  %12309 = vmatprep.mubr.msk.f32.mxu1 %vm366_vm1, %v2094_v29  ;;  %v2125_v57 = vld [vmem:[%s14090_s25 + $0x2aa] sm:$0xff] }
 0x1ff   : > { %12967 = vmatprep.mubr.msk.f32.mxu0 %vm366_vm1, %v7196_v62  ;;  %v7227_v29 = vld [vmem:[%s14090_s25 + $0x169] sm:$0xff]  ;;  %v2126_v62 = vld [vmem:[%s14090_s25 + $0x2b2] sm:$0xff] }
 0x201   : > { %12310 = vmatmul.mubr.msk.f32.gmra.mrb[54].mxu1 %vm366_vm1, %v2095_v0  ;;  %v7228_v0 = vld [vmem:[%s14090_s25 + $0x171] sm:$0xff] }
 0x202   : > { %12968 = vmatmul.mubr.msk.f32.gmra.mrb[6].mxu0 %vm366_vm1, %v7197_v2  ;;  %12312 = vmatprep.mubr.msk.f32.mxu1 %vm366_vm1, %v2096_v4  ;;  %v2127_v2 = vld [vmem:[%s14090_s25 + $0x2ba] sm:$0xff] }
 0x203   : > { %12970 = vmatprep.mubr.msk.f32.mxu0 %vm366_vm1, %v7198_v6  ;;  %v7229_v4 = vld [vmem:[%s14090_s25 + $0x179] sm:$0xff]  ;;  %v2128_v6 = vld [vmem:[%s14090_s25 + $0x2c2] sm:$0xff] }
 0x205   : > { %12313 = vmatmul.mubr.msk.f32.gmra.mrb[56].mxu1 %vm366_vm1, %v2097_v8  ;;  %v7230_v8 = vld [vmem:[%s14090_s25 + $0x181] sm:$0xff] }
 0x206   : > { %12971 = vmatmul.mubr.msk.f32.gmra.mrb[8].mxu0 %vm366_vm1, %v7199_v10  ;;  %12315 = vmatprep.mubr.msk.f32.mxu1 %vm366_vm1, %v2098_v12  ;;  %v2129_v10 = vld [vmem:[%s14090_s25 + $0x2ca] sm:$0xff] }
 0x207   : > { %12973 = vmatprep.mubr.msk.f32.mxu0 %vm366_vm1, %v7200_v14  ;;  %v7231_v12 = vld [vmem:[%s14090_s25 + $0x189] sm:$0xff]  ;;  %v2130_v14 = vld [vmem:[%s14090_s25 + $0x2d2] sm:$0xff] }
 0x209   : > { %12316 = vmatmul.mubr.msk.f32.gmra.mrb[58].mxu1 %vm366_vm1, %v2099_v16  ;;  %v7232_v16 = vld [vmem:[%s14090_s25 + $0x191] sm:$0xff] }
 0x20a   : > { %12974 = vmatmul.mubr.msk.f32.gmra.mrb[10].mxu0 %vm366_vm1, %v7201_v18  ;;  %12318 = vmatprep.mubr.msk.f32.mxu1 %vm366_vm1, %v2100_v20  ;;  %v2131_v18 = vld [vmem:[%s14090_s25 + $0x2da] sm:$0xff] }
 0x20b   : > { %12976 = vmatprep.mubr.msk.f32.mxu0 %vm366_vm1, %v7202_v39  ;;  %v7233_v20 = vld [vmem:[%s14090_s25 + $0x199] sm:$0xff]  ;;  %v2132_v39 = vld [vmem:[%s14090_s25 + $0x2e2] sm:$0xff] }
 0x20d   : > { %12319 = vmatmul.mubr.msk.f32.gmra.mrb[60].mxu1 %vm366_vm1, %v2101_v59  ;;  %v15498_v59 = vld [vmem:[%s14090_s25 + $0x1a1] sm:$0xff] }
 0x20e   : > { %12977 = vmatmul.mubr.msk.f32.gmra.mrb[12].mxu0 %vm366_vm1, %v7203_v41  ;;  %12321 = vmatprep.mubr.msk.f32.mxu1 %vm366_vm1, %v2102_v44  ;;  %v2133_v41 = vld [vmem:[%s14090_s25 + $0x2ea] sm:$0xff] }
 0x20f   : > { %12979 = vmatprep.mubr.msk.f32.mxu0 %vm366_vm1, %v7204_v46  ;;  %v15507_v44 = vld [vmem:[%s14090_s25 + $0x1a9] sm:$0xff]  ;;  %v2134_v46 = vld [vmem:[%s14090_s25 + $0x2f2] sm:$0xff] }
 0x211   : > { %12322 = vmatmul.mubr.msk.f32.gmra.mrb[62].mxu1 %vm366_vm1, %v2103_v48  ;;  %v15511_v48 = vld [vmem:[%s14090_s25 + $0x1b1] sm:$0xff] }
 0x212   : > { %12980 = vmatmul.mubr.msk.f32.gmra.mrb[14].mxu0 %vm366_vm1, %v7205_v50  ;;  %12324 = vmatprep.mubr.msk.f32.mxu1 %vm366_vm1, %v2104_v52  ;;  %v2135_v50 = vld [vmem:[%s14090_s25 + $0x2fa] sm:$0xff] }
 0x213   : > { %12982 = vmatprep.mubr.msk.f32.mxu0 %vm366_vm1, %v7206_v54  ;;  %v15521_v52 = vld [vmem:[%s14090_s25 + $0x1b9] sm:$0xff] }
 0x214   : > { %v3070_v54 = vld [vmem:[%s14090_s25 + $0x20] sm:$0xff] }
 0x215   : > { %12325 = vmatmul.mubr.msk.f32.gmra.mrb[64].mxu1 %vm366_vm1, %v2105_v56  ;;  %v15525_v56 = vld [vmem:[%s14090_s25 + $0x1c1] sm:$0xff] }
 0x216   : > { %12983 = vmatmul.mubr.msk.f32.gmra.mrb[16].mxu0 %vm366_vm1, %v7207_v58  ;;  %12327 = vmatprep.mubr.msk.f32.mxu1 %vm366_vm1, %v2106_v61  ;;  %v3071_v58 = vld [vmem:[%s14090_s25 + $0x28] sm:$0xff] }
 0x217   : > { %12985 = vmatprep.mubr.msk.f32.mxu0 %vm366_vm1, %v7208_v63  ;;  %v15535_v61 = vld [vmem:[%s14090_s25 + $0x1c9] sm:$0xff] }
 0x218   : > { %v3072_v63 = vld [vmem:[%s14090_s25 + $0x30] sm:$0xff] }
 0x219   : > { %12328 = vmatmul.mubr.msk.f32.gmra.mrb[66].mxu1 %vm366_vm1, %v2107_v1  ;;  %v15539_v1 = vld [vmem:[%s14090_s25 + $0x1d1] sm:$0xff] }
 0x21a   : > { %12986 = vmatmul.mubr.msk.f32.gmra.mrb[18].mxu0 %vm366_vm1, %v7209_v3  ;;  %12330 = vmatprep.mubr.msk.f32.mxu1 %vm366_vm1, %v2108_v5  ;;  %v3073_v3 = vld [vmem:[%s14090_s25 + $0x38] sm:$0xff] }
 0x21b   : > { %12988 = vmatprep.mubr.msk.f32.mxu0 %vm366_vm1, %v7210_v7  ;;  %v15549_v5 = vld [vmem:[%s14090_s25 + $0x1d9] sm:$0xff] }
 0x21c   : > { %v3074_v7 = vld [vmem:[%s14090_s25 + $0x40] sm:$0xff] }
 0x21d   : > { %12331 = vmatmul.mubr.msk.f32.gmra.mrb[68].mxu1 %vm366_vm1, %v2109_v9  ;;  %v15555_v9 = vld [vmem:[%s14090_s25 + $0x1e1] sm:$0xff] }
 0x21e   : > { %12989 = vmatmul.mubr.msk.f32.gmra.mrb[20].mxu0 %vm366_vm1, %v7211_v11  ;;  %12333 = vmatprep.mubr.msk.f32.mxu1 %vm366_vm1, %v2110_v13  ;;  %v15565_v11 = vld [vmem:[%s14090_s25 + $0x1e9] sm:$0xff] }
 0x21f   : > { %12991 = vmatprep.mubr.msk.f32.mxu0 %vm366_vm1, %v7212_v15  ;;  %v3076_v13 = vld [vmem:[%s14090_s25 + $0x50] sm:$0xff] }
 0x220   : > { %v15569_v15 = vld [vmem:[%s14090_s25 + $0x1f1] sm:$0xff] }
 0x221   : > { %12334 = vmatmul.mubr.msk.f32.gmra.mrb[70].mxu1 %vm366_vm1, %v2111_v17  ;;  %v3077_v17 = vld [vmem:[%s14090_s25 + $0x58] sm:$0xff] }
 0x222   : > { %12992 = vmatmul.mubr.msk.f32.gmra.mrb[22].mxu0 %vm366_vm1, %v7213_v19  ;;  %12336 = vmatprep.mubr.msk.f32.mxu1 %vm366_vm1, %v2112_v21  ;;  %v15579_v19 = vld [vmem:[%s14090_s25 + $0x1f9] sm:$0xff] }
 0x223   : > { %12994 = vmatprep.mubr.msk.f32.mxu0 %vm366_vm1, %v7214_v22  ;;  %v3078_v21 = vld [vmem:[%s14090_s25 + $0x60] sm:$0xff] }
 0x224   : > { %v15583_v22 = vld [vmem:[%s14090_s25 + $0x201] sm:$0xff] }
 0x225   : > { %12337 = vmatmul.mubr.msk.f32.gmra.mrb[72].mxu1 %vm366_vm1, %v2113_v23  ;;  %v3079_v23 = vld [vmem:[%s14090_s25 + $0x68] sm:$0xff] }
 0x226   : > { %12995 = vmatmul.mubr.msk.f32.gmra.mrb[24].mxu0 %vm366_vm1, %v7215_v24  ;;  %12339 = vmatprep.mubr.msk.f32.mxu1 %vm366_vm1, %v2114_v25  ;;  %v15593_v24 = vld [vmem:[%s14090_s25 + $0x209] sm:$0xff] }
 0x227   : > { %12997 = vmatprep.mubr.msk.f32.mxu0 %vm366_vm1, %v7216_v26  ;;  %v3080_v25 = vld [vmem:[%s14090_s25 + $0x70] sm:$0xff] }
 0x228   : > { %v15597_v26 = vld [vmem:[%s14090_s25 + $0x211] sm:$0xff] }
 0x229   : > { %12340 = vmatmul.mubr.msk.f32.gmra.mrb[74].mxu1 %vm366_vm1, %v2115_v27  ;;  %v3081_v27 = vld [vmem:[%s14090_s25 + $0x78] sm:$0xff] }
 0x22a   : > { %12998 = vmatmul.mubr.msk.f32.gmra.mrb[26].mxu0 %vm366_vm1, %v7217_v30  ;;  %12342 = vmatprep.mubr.msk.f32.mxu1 %vm366_vm1, %v2116_v31  ;;  %v15607_v30 = vld [vmem:[%s14090_s25 + $0x219] sm:$0xff] }
 0x22b   : > { %13000 = vmatprep.mubr.msk.f32.mxu0 %vm366_vm1, %v7218_v32  ;;  %v3082_v31 = vld [vmem:[%s14090_s25 + $0x80] sm:$0xff] }
 0x22c   : > { %v15611_v32 = vld [vmem:[%s14090_s25 + $0x221] sm:$0xff] }
 0x22d   : > { %12343 = vmatmul.mubr.msk.f32.gmra.mrb[76].mxu1 %vm366_vm1, %v2117_v33  ;;  %v3083_v33 = vld [vmem:[%s14090_s25 + $0x88] sm:$0xff] }
 0x22e   : > { %13001 = vmatmul.mubr.msk.f32.gmra.mrb[28].mxu0 %vm366_vm1, %v7219_v43  ;;  %12345 = vmatprep.mubr.msk.f32.mxu1 %vm366_vm1, %v2118_v34  ;;  %v15621_v43 = vld [vmem:[%s14090_s25 + $0x229] sm:$0xff] }
 0x22f   : > { %13003 = vmatprep.mubr.msk.f32.mxu0 %vm366_vm1, %v7220_v35  ;;  %v3084_v34 = vld [vmem:[%s14090_s25 + $0x90] sm:$0xff] }
 0x230   : > { %v15625_v35 = vld [vmem:[%s14090_s25 + $0x231] sm:$0xff] }
 0x231   : > { %12346 = vmatmul.mubr.msk.f32.gmra.mrb[78].mxu1 %vm366_vm1, %v2119_v36  ;;  %v3085_v36 = vld [vmem:[%s14090_s25 + $0x98] sm:$0xff] }
 0x232   : > { %13004 = vmatmul.mubr.msk.f32.gmra.mrb[30].mxu0 %vm366_vm1, %v7221_v37  ;;  %12348 = vmatprep.mubr.msk.f32.mxu1 %vm366_vm1, %v2120_v38  ;;  %v15635_v37 = vld [vmem:[%s14090_s25 + $0x239] sm:$0xff] }
 0x233   : > { %13006 = vmatprep.mubr.msk.f32.mxu0 %vm366_vm1, %v7222_v40  ;;  %v3086_v38 = vld [vmem:[%s14090_s25 + $0xa0] sm:$0xff] }
 0x234   : > { %v15639_v40 = vld [vmem:[%s14090_s25 + $0x241] sm:$0xff] }
 0x235   : > { %12349 = vmatmul.mubr.msk.f32.gmra.mrb[80].mxu1 %vm366_vm1, %v2121_v42  ;;  %v3087_v42 = vld [vmem:[%s14090_s25 + $0xa8] sm:$0xff] }
 0x236   : > { %13007 = vmatmul.mubr.msk.f32.gmra.mrb[32].mxu0 %vm366_vm1, %v7223_v45  ;;  %12351 = vmatprep.mubr.msk.f32.mxu1 %vm366_vm1, %v2122_v47  ;;  %v15649_v45 = vld [vmem:[%s14090_s25 + $0x249] sm:$0xff] }
 0x237   : > { %13009 = vmatprep.mubr.msk.f32.mxu0 %vm366_vm1, %v7224_v49  ;;  %v3088_v47 = vld [vmem:[%s14090_s25 + $0xb0] sm:$0xff] }
 0x238   : > { %v15653_v49 = vld [vmem:[%s14090_s25 + $0x251] sm:$0xff] }
 0x239   : > { %12352 = vmatmul.mubr.msk.f32.gmra.mrb[82].mxu1 %vm366_vm1, %v2123_v51  ;;  %v3089_v51 = vld [vmem:[%s14090_s25 + $0xb8] sm:$0xff] }
 0x23a   : > { %13010 = vmatmul.mubr.msk.f32.gmra.mrb[34].mxu0 %vm366_vm1, %v7225_v53  ;;  %12354 = vmatprep.mubr.msk.f32.mxu1 %vm366_vm1, %v2124_v55  ;;  %v15663_v53 = vld [vmem:[%s14090_s25 + $0x259] sm:$0xff] }
 0x23b   : > { %13012 = vmatprep.mubr.msk.f32.mxu0 %vm366_vm1, %v7226_v28  ;;  %v3090_v55 = vld [vmem:[%s14090_s25 + $0xc0] sm:$0xff] }
 0x23c   : > { %v15667_v28 = vld [vmem:[%s14090_s25 + $0x261] sm:$0xff] }
 0x23d   : > { %12355 = vmatmul.mubr.msk.f32.gmra.mrb[84].mxu1 %vm366_vm1, %v2125_v57  ;;  %v3091_v57 = vld [vmem:[%s14090_s25 + $0xc8] sm:$0xff] }
 0x23e   : > { %13013 = vmatmul.mubr.msk.f32.gmra.mrb[36].mxu0 %vm366_vm1, %v7227_v29  ;;  %12357 = vmatprep.mubr.msk.f32.mxu1 %vm366_vm1, %v2126_v62  ;;  %v15677_v29 = vld [vmem:[%s14090_s25 + $0x269] sm:$0xff] }
 0x23f   : > { %13015 = vmatprep.mubr.msk.f32.mxu0 %vm366_vm1, %v7228_v0  ;;  %v3092_v62 = vld [vmem:[%s14090_s25 + $0xd0] sm:$0xff] }
 0x240   : > { %v15681_v0 = vld [vmem:[%s14090_s25 + $0x271] sm:$0xff] }
 0x241   : > { %12358 = vmatmul.mubr.msk.f32.gmra.mrb[86].mxu1 %vm366_vm1, %v2127_v2  ;;  %v3093_v2 = vld [vmem:[%s14090_s25 + $0xd8] sm:$0xff] }
 0x242   : > { %13016 = vmatmul.mubr.msk.f32.gmra.mrb[38].mxu0 %vm366_vm1, %v7229_v4  ;;  %12360 = vmatprep.mubr.msk.f32.mxu1 %vm366_vm1, %v2128_v6  ;;  %v15691_v4 = vld [vmem:[%s14090_s25 + $0x279] sm:$0xff] }
 0x243   : > { %13018 = vmatprep.mubr.msk.f32.mxu0 %vm366_vm1, %v7230_v8  ;;  %v3094_v6 = vld [vmem:[%s14090_s25 + $0xe0] sm:$0xff] }
 0x244   : > { %v15695_v8 = vld [vmem:[%s14090_s25 + $0x281] sm:$0xff] }
 0x245   : > { %12361 = vmatmul.mubr.msk.f32.gmra.mrb[88].mxu1 %vm366_vm1, %v2129_v10  ;;  %v3095_v10 = vld [vmem:[%s14090_s25 + $0xe8] sm:$0xff] }
 0x246   : > { %13019 = vmatmul.mubr.msk.f32.gmra.mrb[40].mxu0 %vm366_vm1, %v7231_v12  ;;  %12363 = vmatprep.mubr.msk.f32.mxu1 %vm366_vm1, %v2130_v14  ;;  %v15705_v12 = vld [vmem:[%s14090_s25 + $0x289] sm:$0xff] }
 0x247   : > { %13021 = vmatprep.mubr.msk.f32.mxu0 %vm366_vm1, %v7232_v16  ;;  %v3096_v14 = vld [vmem:[%s14090_s25 + $0xf0] sm:$0xff] }
 0x248   : > { %v15709_v16 = vld [vmem:[%s14090_s25 + $0x291] sm:$0xff] }
 0x249   : > { %12364 = vmatmul.mubr.msk.f32.gmra.mrb[90].mxu1 %vm366_vm1, %v2131_v18  ;;  %v3097_v18 = vld [vmem:[%s14090_s25 + $0xf8] sm:$0xff] }
 0x24a   : > { %13022 = vmatmul.mubr.msk.f32.gmra.mrb[42].mxu0 %vm366_vm1, %v7233_v20  ;;  %12366 = vmatprep.mubr.msk.f32.mxu1 %vm366_vm1, %v2132_v39  ;;  %v15719_v20 = vld [vmem:[%s14090_s25 + $0x299] sm:$0xff] }
 0x24b   : > { %13024 = vmatprep.mubr.msk.f32.mxu0 %vm366_vm1, %v15498_v59  ;;  %v3098_v39 = vld [vmem:[%s14090_s25 + $0x100] sm:$0xff] }
 0x24d   : > { %12367 = vmatmul.mubr.msk.f32.gmra.mrb[92].mxu1 %vm366_vm1, %v2133_v41  ;;  %v15723_v41 = vld [vmem:[%s14090_s25 + $0x2a1] sm:$0xff] }
 0x24e   : > { %13025 = vmatmul.mubr.msk.f32.gmra.mrb[44].mxu0 %vm366_vm1, %v15507_v44  ;;  %12369 = vmatprep.mubr.msk.f32.mxu1 %vm366_vm1, %v2134_v46  ;;  %v3099_v46 = vld [vmem:[%s14090_s25 + $0x108] sm:$0xff] }
 0x24f   : > { %13027 = vmatprep.mubr.msk.f32.mxu0 %vm366_vm1, %v15511_v48 }
 0x251   : > { %12370 = vmatmul.mubr.msk.f32.gmra.mrb[94].mxu1 %vm366_vm1, %v2135_v50  ;;  %v15733_v50 = vld [vmem:[%s14090_s25 + $0x2a9] sm:$0xff] }
 0x252   : > { %13028 = vmatmul.mubr.msk.f32.gmra.mrb[46].mxu0 %vm366_vm1, %v15521_v52  ;;  %12374 = vmatprep.mubr.msk.f32.mxu1 %vm366_vm1, %v3070_v54  ;;  %v3100_v54 = vld [vmem:[%s14090_s25 + $0x110] sm:$0xff] }
 0x253   : > { %13030 = vmatprep.mubr.msk.f32.mxu0 %vm366_vm1, %v15525_v56 }
 0x255   : > { %12375 = vmatmul.mubr.msk.f32.vlgmr.msra.gmra.mrb[0].mxu1 %vm366_vm1, %v3071_v58  ;;  %v15737_v58 = vld [vmem:[%s14090_s25 + $0x2b1] sm:$0xff] }
 0x256   : > { %13031 = vmatmul.mubr.msk.f32.gmra.mrb[48].mxu0 %vm366_vm1, %v15535_v61  ;;  %13249 = vmatpush3.msk.msra.mxu1 %vm655_vm0, %v15138_v60  ;;  %v3075_v60 = vld [vmem:[%s14090_s25 + $0x48] sm:$0xff] }
 0x257   : > { %12377 = vmatprep.mubr.msk.f32.mxu1 %vm366_vm1, %v3072_v63  ;;  %13033 = vmatprep.mubr.msk.f32.mxu0 %vm366_vm1, %v15539_v1  ;;  %v3101_v63 = vld [vmem:[%s14090_s25 + $0x118] sm:$0xff] }
 0x259   : > { %12378 = vmatmul.mubr.msk.f32.gmra.mrb[2].mxu1 %vm366_vm1, %v3073_v3  ;;  %v15747_v3 = vld [vmem:[%s14090_s25 + $0x2b9] sm:$0xff] }
 0x25a   : > { %13034 = vmatmul.mubr.msk.f32.gmra.mrb[50].mxu0 %vm366_vm1, %v15549_v5  ;;  %12380 = vmatprep.mubr.msk.f32.mxu1 %vm366_vm1, %v3074_v7  ;;  %v3102_v7 = vld [vmem:[%s14090_s25 + $0x120] sm:$0xff] }
 0x25b   : > { %13036 = vmatprep.mubr.msk.f32.mxu0 %vm366_vm1, %v15555_v9 }
 0x25d   : > { %12381 = vmatmul.mubr.msk.f32.gmra.mrb[4].mxu1 %vm366_vm1, %v3075_v60  ;;  %v15751_v60 = vld [vmem:[%s14090_s25 + $0x2c1] sm:$0xff] }
 0x25e   : > { %13037 = vmatmul.mubr.msk.f32.gmra.mrb[52].mxu0 %vm366_vm1, %v15565_v11  ;;  %12383 = vmatprep.mubr.msk.f32.mxu1 %vm366_vm1, %v3076_v13  ;;  %v3103_v13 = vld [vmem:[%s14090_s25 + $0x128] sm:$0xff] }
 0x25f   : > { %13039 = vmatprep.mubr.msk.f32.mxu0 %vm366_vm1, %v15569_v15 }
 0x261   : > { %12384 = vmatmul.mubr.msk.f32.gmra.mrb[6].mxu1 %vm366_vm1, %v3077_v17  ;;  %v15761_v17 = vld [vmem:[%s14090_s25 + $0x2c9] sm:$0xff] }
 0x262   : > { %13040 = vmatmul.mubr.msk.f32.gmra.mrb[54].mxu0 %vm366_vm1, %v15579_v19  ;;  %12386 = vmatprep.mubr.msk.f32.mxu1 %vm366_vm1, %v3078_v21  ;;  %v3104_v21 = vld [vmem:[%s14090_s25 + $0x130] sm:$0xff] }
 0x263   : > { %13042 = vmatprep.mubr.msk.f32.mxu0 %vm366_vm1, %v15583_v22 }
 0x265   : > { %12387 = vmatmul.mubr.msk.f32.gmra.mrb[8].mxu1 %vm366_vm1, %v3079_v23  ;;  %v15765_v23 = vld [vmem:[%s14090_s25 + $0x2d1] sm:$0xff] }
 0x266   : > { %13043 = vmatmul.mubr.msk.f32.gmra.mrb[56].mxu0 %vm366_vm1, %v15593_v24  ;;  %12389 = vmatprep.mubr.msk.f32.mxu1 %vm366_vm1, %v3080_v25  ;;  %v3105_v25 = vld [vmem:[%s14090_s25 + $0x138] sm:$0xff] }
 0x267   : > { %13045 = vmatprep.mubr.msk.f32.mxu0 %vm366_vm1, %v15597_v26 }
 0x269   : > { %12390 = vmatmul.mubr.msk.f32.gmra.mrb[10].mxu1 %vm366_vm1, %v3081_v27  ;;  %v15775_v27 = vld [vmem:[%s14090_s25 + $0x2d9] sm:$0xff] }
 0x26a   : > { %13046 = vmatmul.mubr.msk.f32.gmra.mrb[58].mxu0 %vm366_vm1, %v15607_v30  ;;  %12392 = vmatprep.mubr.msk.f32.mxu1 %vm366_vm1, %v3082_v31  ;;  %v3106_v31 = vld [vmem:[%s14090_s25 + $0x140] sm:$0xff] }
 0x26b   : > { %13048 = vmatprep.mubr.msk.f32.mxu0 %vm366_vm1, %v15611_v32 }
 0x26d   : > { %12393 = vmatmul.mubr.msk.f32.gmra.mrb[12].mxu1 %vm366_vm1, %v3083_v33  ;;  %v15779_v33 = vld [vmem:[%s14090_s25 + $0x2e1] sm:$0xff] }
 0x26e   : > { %13049 = vmatmul.mubr.msk.f32.gmra.mrb[60].mxu0 %vm366_vm1, %v15621_v43  ;;  %12395 = vmatprep.mubr.msk.f32.mxu1 %vm366_vm1, %v3084_v34  ;;  %v3107_v34 = vld [vmem:[%s14090_s25 + $0x148] sm:$0xff] }
 0x26f   : > { %13051 = vmatprep.mubr.msk.f32.mxu0 %vm366_vm1, %v15625_v35 }
 0x271   : > { %12396 = vmatmul.mubr.msk.f32.gmra.mrb[14].mxu1 %vm366_vm1, %v3085_v36  ;;  %v15789_v36 = vld [vmem:[%s14090_s25 + $0x2e9] sm:$0xff] }
 0x272   : > { %13052 = vmatmul.mubr.msk.f32.gmra.mrb[62].mxu0 %vm366_vm1, %v15635_v37  ;;  %12398 = vmatprep.mubr.msk.f32.mxu1 %vm366_vm1, %v3086_v38  ;;  %v3108_v38 = vld [vmem:[%s14090_s25 + $0x150] sm:$0xff] }
 0x273   : > { %13054 = vmatprep.mubr.msk.f32.mxu0 %vm366_vm1, %v15639_v40 }
 0x275   : > { %12399 = vmatmul.mubr.msk.f32.gmra.mrb[16].mxu1 %vm366_vm1, %v3087_v42  ;;  %v15793_v42 = vld [vmem:[%s14090_s25 + $0x2f1] sm:$0xff] }
 0x276   : > { %13055 = vmatmul.mubr.msk.f32.gmra.mrb[64].mxu0 %vm366_vm1, %v15649_v45  ;;  %12401 = vmatprep.mubr.msk.f32.mxu1 %vm366_vm1, %v3088_v47  ;;  %v3109_v47 = vld [vmem:[%s14090_s25 + $0x158] sm:$0xff] }
 0x277   : > { %13057 = vmatprep.mubr.msk.f32.mxu0 %vm366_vm1, %v15653_v49 }
 0x279   : > { %12402 = vmatmul.mubr.msk.f32.gmra.mrb[18].mxu1 %vm366_vm1, %v3089_v51  ;;  %v15803_v51 = vld [vmem:[%s14090_s25 + $0x2f9] sm:$0xff] }
 0x27a   : > { %13058 = vmatmul.mubr.msk.f32.gmra.mrb[66].mxu0 %vm366_vm1, %v15663_v53  ;;  %12404 = vmatprep.mubr.msk.f32.mxu1 %vm366_vm1, %v3090_v55  ;;  %v3110_v55 = vld [vmem:[%s14090_s25 + $0x160] sm:$0xff] }
 0x27b   : > { %13060 = vmatprep.mubr.msk.f32.mxu0 %vm366_vm1, %v15667_v28 }
 0x27d   : > { %12405 = vmatmul.mubr.msk.f32.gmra.mrb[20].mxu1 %vm366_vm1, %v3091_v57  ;;  %v15807_v57 = vld [vmem:[%s14090_s25 + $0x301] sm:$0xff] }
 0x27e   : > { %13061 = vmatmul.mubr.msk.f32.gmra.mrb[68].mxu0 %vm366_vm1, %v15677_v29  ;;  %12407 = vmatprep.mubr.msk.f32.mxu1 %vm366_vm1, %v3092_v62  ;;  %v3111_v62 = vld [vmem:[%s14090_s25 + $0x168] sm:$0xff] }
 0x27f   : > { %13063 = vmatprep.mubr.msk.f32.mxu0 %vm366_vm1, %v15681_v0 }
 0x281   : > { %12408 = vmatmul.mubr.msk.f32.gmra.mrb[22].mxu1 %vm366_vm1, %v3093_v2  ;;  %v15817_v2 = vld [vmem:[%s14090_s25 + $0x309] sm:$0xff] }
 0x282   : > { %13064 = vmatmul.mubr.msk.f32.gmra.mrb[70].mxu0 %vm366_vm1, %v15691_v4  ;;  %12410 = vmatprep.mubr.msk.f32.mxu1 %vm366_vm1, %v3094_v6  ;;  %v3112_v6 = vld [vmem:[%s14090_s25 + $0x170] sm:$0xff] }
 0x283   : > { %13066 = vmatprep.mubr.msk.f32.mxu0 %vm366_vm1, %v15695_v8 }
 0x285   : > { %12411 = vmatmul.mubr.msk.f32.gmra.mrb[24].mxu1 %vm366_vm1, %v3095_v10  ;;  %v15821_v10 = vld [vmem:[%s14090_s25 + $0x311] sm:$0xff] }
 0x286   : > { %13067 = vmatmul.mubr.msk.f32.gmra.mrb[72].mxu0 %vm366_vm1, %v15705_v12  ;;  %12413 = vmatprep.mubr.msk.f32.mxu1 %vm366_vm1, %v3096_v14  ;;  %v3113_v14 = vld [vmem:[%s14090_s25 + $0x178] sm:$0xff] }
 0x287   : > { %13069 = vmatprep.mubr.msk.f32.mxu0 %vm366_vm1, %v15709_v16 }
 0x289   : > { %12414 = vmatmul.mubr.msk.f32.gmra.mrb[26].mxu1 %vm366_vm1, %v3097_v18  ;;  %v15831_v18 = vld [vmem:[%s14090_s25 + $0x319] sm:$0xff] }
 0x28a   : > { %13070 = vmatmul.mubr.msk.f32.gmra.mrb[74].mxu0 %vm366_vm1, %v15719_v20  ;;  %12416 = vmatprep.mubr.msk.f32.mxu1 %vm366_vm1, %v3098_v39  ;;  %v3114_v39 = vld [vmem:[%s14090_s25 + $0x180] sm:$0xff] }
 0x28b   : > { %13072 = vmatprep.mubr.msk.f32.mxu0 %vm366_vm1, %v15723_v41 }
 0x28d   : > { %12417 = vmatmul.mubr.msk.f32.gmra.mrb[28].mxu1 %vm366_vm1, %v3099_v46  ;;  %v7282_v46 = vld [vmem:[%s14090_s25 + $0x321] sm:$0xff] }
 0x28e   : > { %13073 = vmatmul.mubr.msk.f32.gmra.mrb[76].mxu0 %vm366_vm1, %v15733_v50  ;;  %12419 = vmatprep.mubr.msk.f32.mxu1 %vm366_vm1, %v3100_v54  ;;  %v3115_v54 = vld [vmem:[%s14090_s25 + $0x188] sm:$0xff] }
 0x28f   : > { %13075 = vmatprep.mubr.msk.f32.mxu0 %vm366_vm1, %v15737_v58 }
 0x291   : > { %12420 = vmatmul.mubr.msk.f32.gmra.mrb[30].mxu1 %vm366_vm1, %v3101_v63  ;;  %v7283_v63 = vld [vmem:[%s14090_s25 + $0x329] sm:$0xff] }
 0x292   : > { %13076 = vmatmul.mubr.msk.f32.gmra.mrb[78].mxu0 %vm366_vm1, %v15747_v3  ;;  %12422 = vmatprep.mubr.msk.f32.mxu1 %vm366_vm1, %v3102_v7  ;;  %v3116_v7 = vld [vmem:[%s14090_s25 + $0x190] sm:$0xff] }
 0x293   : > { %13078 = vmatprep.mubr.msk.f32.mxu0 %vm366_vm1, %v15751_v60 }
 0x295   : > { %12423 = vmatmul.mubr.msk.f32.gmra.mrb[32].mxu1 %vm366_vm1, %v3103_v13  ;;  %v7284_v13 = vld [vmem:[%s14090_s25 + $0x331] sm:$0xff] }
 0x296   : > { %13079 = vmatmul.mubr.msk.f32.gmra.mrb[80].mxu0 %vm366_vm1, %v15761_v17  ;;  %12425 = vmatprep.mubr.msk.f32.mxu1 %vm366_vm1, %v3104_v21  ;;  %v3117_v21 = vld [vmem:[%s14090_s25 + $0x198] sm:$0xff] }
 0x297   : > { %13081 = vmatprep.mubr.msk.f32.mxu0 %vm366_vm1, %v15765_v23 }
 0x299   : > { %12426 = vmatmul.mubr.msk.f32.gmra.mrb[34].mxu1 %vm366_vm1, %v3105_v25  ;;  %v7285_v25 = vld [vmem:[%s14090_s25 + $0x339] sm:$0xff] }
 0x29a   : > { %13082 = vmatmul.mubr.msk.f32.gmra.mrb[82].mxu0 %vm366_vm1, %v15775_v27  ;;  %12428 = vmatprep.mubr.msk.f32.mxu1 %vm366_vm1, %v3106_v31  ;;  %v3118_v31 = vld [vmem:[%s14090_s25 + $0x1a0] sm:$0xff] }
 0x29b   : > { %13084 = vmatprep.mubr.msk.f32.mxu0 %vm366_vm1, %v15779_v33 }
 0x29d   : > { %12429 = vmatmul.mubr.msk.f32.gmra.mrb[36].mxu1 %vm366_vm1, %v3107_v34  ;;  %v8220_v34 = vld [vmem:[%s14090_s25 + $0x42] sm:$0xff] }
 0x29e   : > { %13085 = vmatmul.mubr.msk.f32.gmra.mrb[84].mxu0 %vm366_vm1, %v15789_v36  ;;  %12431 = vmatprep.mubr.msk.f32.mxu1 %vm366_vm1, %v3108_v38  ;;  %v3119_v38 = vld [vmem:[%s14090_s25 + $0x1a8] sm:$0xff] }
 0x29f   : > { %13087 = vmatprep.mubr.msk.f32.mxu0 %vm366_vm1, %v15793_v42 }
 0x2a1   : > { %12432 = vmatmul.mubr.msk.f32.gmra.mrb[38].mxu1 %vm366_vm1, %v3109_v47  ;;  %v8221_v47 = vld [vmem:[%s14090_s25 + $0x4a] sm:$0xff] }
 0x2a2   : > { %13088 = vmatmul.mubr.msk.f32.gmra.mrb[86].mxu0 %vm366_vm1, %v15803_v51  ;;  %12434 = vmatprep.mubr.msk.f32.mxu1 %vm366_vm1, %v3110_v55  ;;  %v3120_v55 = vld [vmem:[%s14090_s25 + $0x1b0] sm:$0xff] }
 0x2a3   : > { %13090 = vmatprep.mubr.msk.f32.mxu0 %vm366_vm1, %v15807_v57 }
 0x2a5   : > { %12435 = vmatmul.mubr.msk.f32.gmra.mrb[40].mxu1 %vm366_vm1, %v3111_v62  ;;  %v8222_v62 = vld [vmem:[%s14090_s25 + $0x52] sm:$0xff] }
 0x2a6   : > { %13091 = vmatmul.mubr.msk.f32.gmra.mrb[88].mxu0 %vm366_vm1, %v15817_v2  ;;  %12437 = vmatprep.mubr.msk.f32.mxu1 %vm366_vm1, %v3112_v6  ;;  %v3121_v6 = vld [vmem:[%s14090_s25 + $0x1b8] sm:$0xff] }
 0x2a7   : > { %13093 = vmatprep.mubr.msk.f32.mxu0 %vm366_vm1, %v15821_v10 }
 0x2a9   : > { %12438 = vmatmul.mubr.msk.f32.gmra.mrb[42].mxu1 %vm366_vm1, %v3113_v14  ;;  %v8223_v14 = vld [vmem:[%s14090_s25 + $0x5a] sm:$0xff] }
 0x2aa   : > { %13094 = vmatmul.mubr.msk.f32.gmra.mrb[90].mxu0 %vm366_vm1, %v15831_v18  ;;  %12440 = vmatprep.mubr.msk.f32.mxu1 %vm366_vm1, %v3114_v39  ;;  %v3122_v39 = vld [vmem:[%s14090_s25 + $0x1c0] sm:$0xff] }
 0x2ab   : > { %13096 = vmatprep.mubr.msk.f32.mxu0 %vm366_vm1, %v7282_v46  ;;  %v8224_v46 = vld [vmem:[%s14090_s25 + $0x62] sm:$0xff] }
 0x2ad   : > { %12441 = vmatmul.mubr.msk.f32.gmra.mrb[44].mxu1 %vm366_vm1, %v3115_v54  ;;  %v3123_v54 = vld [vmem:[%s14090_s25 + $0x1c8] sm:$0xff] }
 0x2ae   : > { %13097 = vmatmul.mubr.msk.f32.gmra.mrb[92].mxu0 %vm366_vm1, %v7283_v63  ;;  %12443 = vmatprep.mubr.msk.f32.mxu1 %vm366_vm1, %v3116_v7  ;;  %v8225_v63 = vld [vmem:[%s14090_s25 + $0x6a] sm:$0xff] }
 0x2af   : > { %13099 = vmatprep.mubr.msk.f32.mxu0 %vm366_vm1, %v7284_v13  ;;  %v3124_v7 = vld [vmem:[%s14090_s25 + $0x1d0] sm:$0xff] }
 0x2b0   : > { %v8226_v13 = vld [vmem:[%s14090_s25 + $0x72] sm:$0xff] }
 0x2b1   : > { %12444 = vmatmul.mubr.msk.f32.gmra.mrb[46].mxu1 %vm366_vm1, %v3117_v21  ;;  %v3125_v21 = vld [vmem:[%s14090_s25 + $0x1d8] sm:$0xff] }
 0x2b2   : > { %13100 = vmatmul.mubr.msk.f32.gmra.mrb[94].mxu0 %vm366_vm1, %v7285_v25  ;;  %12446 = vmatprep.mubr.msk.f32.mxu1 %vm366_vm1, %v3118_v31  ;;  %v8227_v25 = vld [vmem:[%s14090_s25 + $0x7a] sm:$0xff] }
 0x2b3   : > { %13104 = vmatprep.mubr.msk.f32.mxu0 %vm366_vm1, %v8220_v34  ;;  %v3126_v31 = vld [vmem:[%s14090_s25 + $0x1e0] sm:$0xff] }
 0x2b4   : > { %v8228_v34 = vld [vmem:[%s14090_s25 + $0x82] sm:$0xff] }
 0x2b5   : > { %12447 = vmatmul.mubr.msk.f32.gmra.mrb[48].mxu1 %vm366_vm1, %v3119_v38  ;;  %v3127_v38 = vld [vmem:[%s14090_s25 + $0x1e8] sm:$0xff] }
 0x2b6   : > { %13105 = vmatmul.mubr.msk.f32.vlgmr.msra.gmra.mrb[0].mxu0 %vm366_vm1, %v8221_v47  ;;  %12449 = vmatprep.mubr.msk.f32.mxu1 %vm366_vm1, %v3120_v55  ;;  %v8229_v47 = vld [vmem:[%s14090_s25 + $0x8a] sm:$0xff] }
 0x2b7   : > { %13107 = vmatprep.mubr.msk.f32.mxu0 %vm366_vm1, %v8222_v62  ;;  %v3128_v55 = vld [vmem:[%s14090_s25 + $0x1f0] sm:$0xff] }
 0x2b8   : > { %v8230_v62 = vld [vmem:[%s14090_s25 + $0x92] sm:$0xff] }
 0x2b9   : > { %12450 = vmatmul.mubr.msk.f32.gmra.mrb[50].mxu1 %vm366_vm1, %v3121_v6  ;;  %v3129_v6 = vld [vmem:[%s14090_s25 + $0x1f8] sm:$0xff] }
 0x2ba   : > { %13108 = vmatmul.mubr.msk.f32.gmra.mrb[2].mxu0 %vm366_vm1, %v8223_v14  ;;  %12452 = vmatprep.mubr.msk.f32.mxu1 %vm366_vm1, %v3122_v39  ;;  %v8231_v14 = vld [vmem:[%s14090_s25 + $0x9a] sm:$0xff] }
 0x2bb   : > { %13110 = vmatprep.mubr.msk.f32.mxu0 %vm366_vm1, %v8224_v46  ;;  %v3130_v39 = vld [vmem:[%s14090_s25 + $0x200] sm:$0xff] }
 0x2bc   : > { %v8232_v46 = vld [vmem:[%s14090_s25 + $0xa2] sm:$0xff] }
 0x2bd   : > { %12453 = vmatmul.mubr.msk.f32.gmra.mrb[52].mxu1 %vm366_vm1, %v3123_v54  ;;  %v3131_v54 = vld [vmem:[%s14090_s25 + $0x208] sm:$0xff] }
 0x2be   : > { %13111 = vmatmul.mubr.msk.f32.gmra.mrb[4].mxu0 %vm366_vm1, %v8225_v63  ;;  %12455 = vmatprep.mubr.msk.f32.mxu1 %vm366_vm1, %v3124_v7  ;;  %v8233_v63 = vld [vmem:[%s14090_s25 + $0xaa] sm:$0xff] }
 0x2bf   : > { %13113 = vmatprep.mubr.msk.f32.mxu0 %vm366_vm1, %v8226_v13  ;;  %v3132_v7 = vld [vmem:[%s14090_s25 + $0x210] sm:$0xff] }
 0x2c0   : > { %v8234_v13 = vld [vmem:[%s14090_s25 + $0xb2] sm:$0xff] }
 0x2c1   : > { %12456 = vmatmul.mubr.msk.f32.gmra.mrb[54].mxu1 %vm366_vm1, %v3125_v21  ;;  %v3133_v21 = vld [vmem:[%s14090_s25 + $0x218] sm:$0xff] }
 0x2c2   : > { %13114 = vmatmul.mubr.msk.f32.gmra.mrb[6].mxu0 %vm366_vm1, %v8227_v25  ;;  %12458 = vmatprep.mubr.msk.f32.mxu1 %vm366_vm1, %v3126_v31  ;;  %v8235_v25 = vld [vmem:[%s14090_s25 + $0xba] sm:$0xff] }
 0x2c3   : > { %13116 = vmatprep.mubr.msk.f32.mxu0 %vm366_vm1, %v8228_v34  ;;  %v3134_v31 = vld [vmem:[%s14090_s25 + $0x220] sm:$0xff] }
 0x2c4   : > { %v8236_v34 = vld [vmem:[%s14090_s25 + $0xc2] sm:$0xff] }
 0x2c5   : > { %12459 = vmatmul.mubr.msk.f32.gmra.mrb[56].mxu1 %vm366_vm1, %v3127_v38  ;;  %v3135_v38 = vld [vmem:[%s14090_s25 + $0x228] sm:$0xff] }
 0x2c6   : > { %13117 = vmatmul.mubr.msk.f32.gmra.mrb[8].mxu0 %vm366_vm1, %v8229_v47  ;;  %12461 = vmatprep.mubr.msk.f32.mxu1 %vm366_vm1, %v3128_v55  ;;  %v8237_v47 = vld [vmem:[%s14090_s25 + $0xca] sm:$0xff] }
 0x2c7   : > { %13119 = vmatprep.mubr.msk.f32.mxu0 %vm366_vm1, %v8230_v62  ;;  %v3136_v55 = vld [vmem:[%s14090_s25 + $0x230] sm:$0xff] }
 0x2c8   : > { %v8238_v62 = vld [vmem:[%s14090_s25 + $0xd2] sm:$0xff] }
 0x2c9   : > { %12462 = vmatmul.mubr.msk.f32.gmra.mrb[58].mxu1 %vm366_vm1, %v3129_v6  ;;  %v3137_v6 = vld [vmem:[%s14090_s25 + $0x238] sm:$0xff] }
 0x2ca   : > { %13120 = vmatmul.mubr.msk.f32.gmra.mrb[10].mxu0 %vm366_vm1, %v8231_v14  ;;  %12464 = vmatprep.mubr.msk.f32.mxu1 %vm366_vm1, %v3130_v39  ;;  %v8239_v14 = vld [vmem:[%s14090_s25 + $0xda] sm:$0xff] }
 0x2cb   : > { %13122 = vmatprep.mubr.msk.f32.mxu0 %vm366_vm1, %v8232_v46  ;;  %v3138_v39 = vld [vmem:[%s14090_s25 + $0x240] sm:$0xff] }
 0x2cc   : > { %v8240_v46 = vld [vmem:[%s14090_s25 + $0xe2] sm:$0xff] }
 0x2cd   : > { %12465 = vmatmul.mubr.msk.f32.gmra.mrb[60].mxu1 %vm366_vm1, %v3131_v54  ;;  %v3139_v54 = vld [vmem:[%s14090_s25 + $0x248] sm:$0xff] }
 0x2ce   : > { %13123 = vmatmul.mubr.msk.f32.gmra.mrb[12].mxu0 %vm366_vm1, %v8233_v63  ;;  %12467 = vmatprep.mubr.msk.f32.mxu1 %vm366_vm1, %v3132_v7  ;;  %v8241_v63 = vld [vmem:[%s14090_s25 + $0xea] sm:$0xff] }
 0x2cf   : > { %13125 = vmatprep.mubr.msk.f32.mxu0 %vm366_vm1, %v8234_v13  ;;  %v3140_v7 = vld [vmem:[%s14090_s25 + $0x250] sm:$0xff] }
 0x2d0   : > { %v8242_v13 = vld [vmem:[%s14090_s25 + $0xf2] sm:$0xff] }
 0x2d1   : > { %12468 = vmatmul.mubr.msk.f32.gmra.mrb[62].mxu1 %vm366_vm1, %v3133_v21  ;;  %v3141_v21 = vld [vmem:[%s14090_s25 + $0x258] sm:$0xff] }
 0x2d2   : > { %13126 = vmatmul.mubr.msk.f32.gmra.mrb[14].mxu0 %vm366_vm1, %v8235_v25  ;;  %12470 = vmatprep.mubr.msk.f32.mxu1 %vm366_vm1, %v3134_v31  ;;  %v8243_v25 = vld [vmem:[%s14090_s25 + $0xfa] sm:$0xff] }
 0x2d3   : > { %13128 = vmatprep.mubr.msk.f32.mxu0 %vm366_vm1, %v8236_v34  ;;  %v3142_v31 = vld [vmem:[%s14090_s25 + $0x260] sm:$0xff] }
 0x2d4   : > { %v8244_v34 = vld [vmem:[%s14090_s25 + $0x102] sm:$0xff] }
 0x2d5   : > { %12471 = vmatmul.mubr.msk.f32.gmra.mrb[64].mxu1 %vm366_vm1, %v3135_v38  ;;  %v3143_v38 = vld [vmem:[%s14090_s25 + $0x268] sm:$0xff] }
 0x2d6   : > { %13129 = vmatmul.mubr.msk.f32.gmra.mrb[16].mxu0 %vm366_vm1, %v8237_v47  ;;  %12473 = vmatprep.mubr.msk.f32.mxu1 %vm366_vm1, %v3136_v55  ;;  %v8245_v47 = vld [vmem:[%s14090_s25 + $0x10a] sm:$0xff] }
 0x2d7   : > { %13131 = vmatprep.mubr.msk.f32.mxu0 %vm366_vm1, %v8238_v62  ;;  %v3144_v55 = vld [vmem:[%s14090_s25 + $0x270] sm:$0xff] }
 0x2d8   : > { %v8246_v62 = vld [vmem:[%s14090_s25 + $0x112] sm:$0xff] }
 0x2d9   : > { %12474 = vmatmul.mubr.msk.f32.gmra.mrb[66].mxu1 %vm366_vm1, %v3137_v6  ;;  %v3145_v6 = vld [vmem:[%s14090_s25 + $0x278] sm:$0xff] }
 0x2da   : > { %13132 = vmatmul.mubr.msk.f32.gmra.mrb[18].mxu0 %vm366_vm1, %v8239_v14  ;;  %12476 = vmatprep.mubr.msk.f32.mxu1 %vm366_vm1, %v3138_v39  ;;  %v8247_v14 = vld [vmem:[%s14090_s25 + $0x11a] sm:$0xff] }
 0x2db   : > { %13134 = vmatprep.mubr.msk.f32.mxu0 %vm366_vm1, %v8240_v46  ;;  %v3146_v39 = vld [vmem:[%s14090_s25 + $0x280] sm:$0xff] }
 0x2dc   : > { %v8248_v46 = vld [vmem:[%s14090_s25 + $0x122] sm:$0xff] }
 0x2dd   : > { %12477 = vmatmul.mubr.msk.f32.gmra.mrb[68].mxu1 %vm366_vm1, %v3139_v54  ;;  %v3147_v54 = vld [vmem:[%s14090_s25 + $0x288] sm:$0xff] }
 0x2de   : > { %13135 = vmatmul.mubr.msk.f32.gmra.mrb[20].mxu0 %vm366_vm1, %v8241_v63  ;;  %12479 = vmatprep.mubr.msk.f32.mxu1 %vm366_vm1, %v3140_v7  ;;  %v8249_v63 = vld [vmem:[%s14090_s25 + $0x12a] sm:$0xff] }
 0x2df   : > { %13137 = vmatprep.mubr.msk.f32.mxu0 %vm366_vm1, %v8242_v13  ;;  %v3148_v7 = vld [vmem:[%s14090_s25 + $0x290] sm:$0xff] }
 0x2e0   : > { %v8250_v13 = vld [vmem:[%s14090_s25 + $0x132] sm:$0xff] }
 0x2e1   : > { %12480 = vmatmul.mubr.msk.f32.gmra.mrb[70].mxu1 %vm366_vm1, %v3141_v21  ;;  %v3149_v21 = vld [vmem:[%s14090_s25 + $0x298] sm:$0xff] }
 0x2e2   : > { %13138 = vmatmul.mubr.msk.f32.gmra.mrb[22].mxu0 %vm366_vm1, %v8243_v25  ;;  %12482 = vmatprep.mubr.msk.f32.mxu1 %vm366_vm1, %v3142_v31  ;;  %v8251_v25 = vld [vmem:[%s14090_s25 + $0x13a] sm:$0xff] }
 0x2e3   : > { %13140 = vmatprep.mubr.msk.f32.mxu0 %vm366_vm1, %v8244_v34  ;;  %v3150_v31 = vld [vmem:[%s14090_s25 + $0x2a0] sm:$0xff] }
 0x2e4   : > { %v8252_v34 = vld [vmem:[%s14090_s25 + $0x142] sm:$0xff] }
 0x2e5   : > { %12483 = vmatmul.mubr.msk.f32.gmra.mrb[72].mxu1 %vm366_vm1, %v3143_v38  ;;  %v3151_v38 = vld [vmem:[%s14090_s25 + $0x2a8] sm:$0xff] }
 0x2e6   : > { %13141 = vmatmul.mubr.msk.f32.gmra.mrb[24].mxu0 %vm366_vm1, %v8245_v47  ;;  %12485 = vmatprep.mubr.msk.f32.mxu1 %vm366_vm1, %v3144_v55  ;;  %v8253_v47 = vld [vmem:[%s14090_s25 + $0x14a] sm:$0xff] }
 0x2e7   : > { %13143 = vmatprep.mubr.msk.f32.mxu0 %vm366_vm1, %v8246_v62  ;;  %v3152_v55 = vld [vmem:[%s14090_s25 + $0x2b0] sm:$0xff] }
 0x2e8   : > { %v8254_v62 = vld [vmem:[%s14090_s25 + $0x152] sm:$0xff] }
 0x2e9   : > { %12486 = vmatmul.mubr.msk.f32.gmra.mrb[74].mxu1 %vm366_vm1, %v3145_v6  ;;  %v3153_v6 = vld [vmem:[%s14090_s25 + $0x2b8] sm:$0xff] }
 0x2ea   : > { %13144 = vmatmul.mubr.msk.f32.gmra.mrb[26].mxu0 %vm366_vm1, %v8247_v14  ;;  %12488 = vmatprep.mubr.msk.f32.mxu1 %vm366_vm1, %v3146_v39  ;;  %v8255_v14 = vld [vmem:[%s14090_s25 + $0x15a] sm:$0xff] }
 0x2eb   : > { %13146 = vmatprep.mubr.msk.f32.mxu0 %vm366_vm1, %v8248_v46  ;;  %v3154_v39 = vld [vmem:[%s14090_s25 + $0x2c0] sm:$0xff] }
 0x2ec   : > { %v8256_v46 = vld [vmem:[%s14090_s25 + $0x162] sm:$0xff] }
 0x2ed   : > { %12489 = vmatmul.mubr.msk.f32.gmra.mrb[76].mxu1 %vm366_vm1, %v3147_v54  ;;  %v3155_v54 = vld [vmem:[%s14090_s25 + $0x2c8] sm:$0xff] }
 0x2ee   : > { %13147 = vmatmul.mubr.msk.f32.gmra.mrb[28].mxu0 %vm366_vm1, %v8249_v63  ;;  %12491 = vmatprep.mubr.msk.f32.mxu1 %vm366_vm1, %v3148_v7  ;;  %v8257_v63 = vld [vmem:[%s14090_s25 + $0x16a] sm:$0xff] }
 0x2ef   : > { %13149 = vmatprep.mubr.msk.f32.mxu0 %vm366_vm1, %v8250_v13  ;;  %v3156_v7 = vld [vmem:[%s14090_s25 + $0x2d0] sm:$0xff] }
 0x2f0   : > { %v8258_v13 = vld [vmem:[%s14090_s25 + $0x172] sm:$0xff] }
 0x2f1   : > { %12492 = vmatmul.mubr.msk.f32.gmra.mrb[78].mxu1 %vm366_vm1, %v3149_v21  ;;  %v3157_v21 = vld [vmem:[%s14090_s25 + $0x2d8] sm:$0xff] }
 0x2f2   : > { %13150 = vmatmul.mubr.msk.f32.gmra.mrb[30].mxu0 %vm366_vm1, %v8251_v25  ;;  %12494 = vmatprep.mubr.msk.f32.mxu1 %vm366_vm1, %v3150_v31  ;;  %v8259_v25 = vld [vmem:[%s14090_s25 + $0x17a] sm:$0xff] }
 0x2f3   : > { %13152 = vmatprep.mubr.msk.f32.mxu0 %vm366_vm1, %v8252_v34  ;;  %v3158_v31 = vld [vmem:[%s14090_s25 + $0x2e0] sm:$0xff] }
 0x2f4   : > { %v8260_v34 = vld [vmem:[%s14090_s25 + $0x182] sm:$0xff] }
 0x2f5   : > { %12495 = vmatmul.mubr.msk.f32.gmra.mrb[80].mxu1 %vm366_vm1, %v3151_v38  ;;  %v3159_v38 = vld [vmem:[%s14090_s25 + $0x2e8] sm:$0xff] }
 0x2f6   : > { %13153 = vmatmul.mubr.msk.f32.gmra.mrb[32].mxu0 %vm366_vm1, %v8253_v47  ;;  %12497 = vmatprep.mubr.msk.f32.mxu1 %vm366_vm1, %v3152_v55  ;;  %v8261_v47 = vld [vmem:[%s14090_s25 + $0x18a] sm:$0xff] }
 0x2f7   : > { %13155 = vmatprep.mubr.msk.f32.mxu0 %vm366_vm1, %v8254_v62  ;;  %v3160_v55 = vld [vmem:[%s14090_s25 + $0x2f0] sm:$0xff] }
 0x2f8   : > { %v8262_v62 = vld [vmem:[%s14090_s25 + $0x192] sm:$0xff] }
 0x2f9   : > { %12498 = vmatmul.mubr.msk.f32.gmra.mrb[82].mxu1 %vm366_vm1, %v3153_v6  ;;  %v3161_v6 = vld [vmem:[%s14090_s25 + $0x2f8] sm:$0xff] }
 0x2fa   : > { %13156 = vmatmul.mubr.msk.f32.gmra.mrb[34].mxu0 %vm366_vm1, %v8255_v14  ;;  %12500 = vmatprep.mubr.msk.f32.mxu1 %vm366_vm1, %v3154_v39  ;;  %v8263_v14 = vld [vmem:[%s14090_s25 + $0x19a] sm:$0xff] }
 0x2fb   : > { %13158 = vmatprep.mubr.msk.f32.mxu0 %vm366_vm1, %v8256_v46  ;;  %v3162_v39 = vld [vmem:[%s14090_s25 + $0x300] sm:$0xff] }
 0x2fc   : > { %v8264_v46 = vld [vmem:[%s14090_s25 + $0x1a2] sm:$0xff] }
 0x2fd   : > { %12501 = vmatmul.mubr.msk.f32.gmra.mrb[84].mxu1 %vm366_vm1, %v3155_v54  ;;  %v3163_v54 = vld [vmem:[%s14090_s25 + $0x308] sm:$0xff] }
 0x2fe   : > { %13159 = vmatmul.mubr.msk.f32.gmra.mrb[36].mxu0 %vm366_vm1, %v8257_v63  ;;  %12503 = vmatprep.mubr.msk.f32.mxu1 %vm366_vm1, %v3156_v7  ;;  %v8265_v63 = vld [vmem:[%s14090_s25 + $0x1aa] sm:$0xff] }
 0x2ff   : > { %13161 = vmatprep.mubr.msk.f32.mxu0 %vm366_vm1, %v8258_v13  ;;  %v3164_v7 = vld [vmem:[%s14090_s25 + $0x310] sm:$0xff] }
 0x300   : > { %v8266_v13 = vld [vmem:[%s14090_s25 + $0x1b2] sm:$0xff] }
 0x301   : > { %12504 = vmatmul.mubr.msk.f32.gmra.mrb[86].mxu1 %vm366_vm1, %v3157_v21  ;;  %v3165_v21 = vld [vmem:[%s14090_s25 + $0x318] sm:$0xff] }
 0x302   : > { %13162 = vmatmul.mubr.msk.f32.gmra.mrb[38].mxu0 %vm366_vm1, %v8259_v25  ;;  %12506 = vmatprep.mubr.msk.f32.mxu1 %vm366_vm1, %v3158_v31  ;;  %v8267_v25 = vld [vmem:[%s14090_s25 + $0x1ba] sm:$0xff]  ;;  %v8268_v31 = vld [vmem:[%s14090_s25 + $0x1c2] sm:$0xff] }
 0x303   : > { %13164 = vmatprep.mubr.msk.f32.mxu0 %vm366_vm1, %v8260_v34  ;;  %v8269_v34 = vld [vmem:[%s14090_s25 + $0x1ca] sm:$0xff] }
 0x305   : > { %12507 = vmatmul.mubr.msk.f32.gmra.mrb[88].mxu1 %vm366_vm1, %v3159_v38  ;;  %v8270_v38 = vld [vmem:[%s14090_s25 + $0x1d2] sm:$0xff] }
 0x306   : > { %13165 = vmatmul.mubr.msk.f32.gmra.mrb[40].mxu0 %vm366_vm1, %v8261_v47  ;;  %12509 = vmatprep.mubr.msk.f32.mxu1 %vm366_vm1, %v3160_v55  ;;  %v8271_v47 = vld [vmem:[%s14090_s25 + $0x1da] sm:$0xff]  ;;  %v8272_v55 = vld [vmem:[%s14090_s25 + $0x1e2] sm:$0xff] }
 0x307   : > { %13167 = vmatprep.mubr.msk.f32.mxu0 %vm366_vm1, %v8262_v62 }
 0x309   : > { %12510 = vmatmul.mubr.msk.f32.gmra.mrb[90].mxu1 %vm366_vm1, %v3161_v6 }
 0x30a   : > { %13168 = vmatmul.mubr.msk.f32.gmra.mrb[42].mxu0 %vm366_vm1, %v8263_v14  ;;  %12512 = vmatprep.mubr.msk.f32.mxu1 %vm366_vm1, %v3162_v39 }
 0x30b   : > { %13170 = vmatprep.mubr.msk.f32.mxu0 %vm366_vm1, %v8264_v46 }
 0x30d   : > { %12513 = vmatmul.mubr.msk.f32.gmra.mrb[92].mxu1 %vm366_vm1, %v3163_v54 }
 0x30e   : > { %13171 = vmatmul.mubr.msk.f32.gmra.mrb[44].mxu0 %vm366_vm1, %v8265_v63  ;;  %12515 = vmatprep.mubr.msk.f32.mxu1 %vm366_vm1, %v3164_v7 }
 0x30f   : > { %13173 = vmatprep.mubr.msk.f32.mxu0 %vm366_vm1, %v8266_v13 }
 0x311   : > { %12516 = vmatmul.mubr.msk.f32.gmra.mrb[94].mxu1 %vm366_vm1, %v3165_v21 }
 0x312   : > { %13174 = vmatmul.mubr.msk.f32.gmra.mrb[46].mxu0 %vm366_vm1, %v8267_v25  ;;  %12592 = vmatprep.mubr.msk.f32.mxu1 %vm366_vm1, %v15498_v59  ;;  %v8273_v59 = vld [vmem:[%s14090_s25 + $0x1ea] sm:$0xff] }
 0x313   : > { %13176 = vmatprep.mubr.msk.f32.mxu0 %vm366_vm1, %v8268_v31 }
 0x315   : > { %12593 = vmatmul.mubr.msk.f32.vlgmr.msra.gmra.mrb[48].mxu1 %vm366_vm1, %v15507_v44  ;;  %v8274_v44 = vld [vmem:[%s14090_s25 + $0x1f2] sm:$0xff] }
 0x316   : > { %13177 = vmatmul.mubr.msk.f32.gmra.mrb[48].mxu0 %vm366_vm1, %v8269_v34  ;;  %12595 = vmatprep.mubr.msk.f32.mxu1 %vm366_vm1, %v15511_v48  ;;  %v8275_v48 = vld [vmem:[%s14090_s25 + $0x1fa] sm:$0xff] }
 0x317   : > { %13179 = vmatprep.mubr.msk.f32.mxu0 %vm366_vm1, %v8270_v38 }
 0x319   : > { %12596 = vmatmul.mubr.msk.f32.gmra.mrb[50].mxu1 %vm366_vm1, %v15521_v52  ;;  %v8276_v52 = vld [vmem:[%s14090_s25 + $0x202] sm:$0xff] }
 0x31a   : > { %13180 = vmatmul.mubr.msk.f32.gmra.mrb[50].mxu0 %vm366_vm1, %v8271_v47  ;;  %12598 = vmatprep.mubr.msk.f32.mxu1 %vm366_vm1, %v15525_v56  ;;  %v8277_v56 = vld [vmem:[%s14090_s25 + $0x20a] sm:$0xff] }
 0x31b   : > { %13182 = vmatprep.mubr.msk.f32.mxu0 %vm366_vm1, %v8272_v55 }
 0x31d   : > { %12599 = vmatmul.mubr.msk.f32.gmra.mrb[52].mxu1 %vm366_vm1, %v15535_v61  ;;  %v8278_v61 = vld [vmem:[%s14090_s25 + $0x212] sm:$0xff] }
 0x31e   : > { %13183 = vmatmul.mubr.msk.f32.gmra.mrb[52].mxu0 %vm366_vm1, %v8273_v59  ;;  %12601 = vmatprep.mubr.msk.f32.mxu1 %vm366_vm1, %v15539_v1  ;;  %v8279_v1 = vld [vmem:[%s14090_s25 + $0x21a] sm:$0xff] }
 0x31f   : > { %13185 = vmatprep.mubr.msk.f32.mxu0 %vm366_vm1, %v8274_v44 }
 0x321   : > { %12602 = vmatmul.mubr.msk.f32.gmra.mrb[54].mxu1 %vm366_vm1, %v15549_v5  ;;  %v8280_v5 = vld [vmem:[%s14090_s25 + $0x222] sm:$0xff] }
 0x322   : > { %13186 = vmatmul.mubr.msk.f32.gmra.mrb[54].mxu0 %vm366_vm1, %v8275_v48  ;;  %12604 = vmatprep.mubr.msk.f32.mxu1 %vm366_vm1, %v15555_v9 }
 0x323   : > { %13188 = vmatprep.mubr.msk.f32.mxu0 %vm366_vm1, %v8276_v52 }
 0x325   : > { %12605 = vmatmul.mubr.msk.f32.gmra.mrb[56].mxu1 %vm366_vm1, %v15565_v11  ;;  %v8281_v11 = vld [vmem:[%s14090_s25 + $0x22a] sm:$0xff] }
 0x326   : > { %13189 = vmatmul.mubr.msk.f32.gmra.mrb[56].mxu0 %vm366_vm1, %v8277_v56  ;;  %12607 = vmatprep.mubr.msk.f32.mxu1 %vm366_vm1, %v15569_v15  ;;  %v8282_v15 = vld [vmem:[%s14090_s25 + $0x232] sm:$0xff] }
 0x327   : > { %13191 = vmatprep.mubr.msk.f32.mxu0 %vm366_vm1, %v8278_v61 }
 0x328   : > { %v16090_v9 = vpop.f32.mrb[0].mxu1 }
 0x329   : > { %v16092_v62 = vpop.f32.mrb[1].mxu1  ;;  %12608 = vmatmul.mubr.msk.f32.gmra.mrb[58].mxu1 %vm366_vm1, %v15579_v19  ;;  %v8283_v19 = vld [vmem:[%s14090_s25 + $0x23a] sm:$0xff] }
 0x32a   : > { %13192 = vmatmul.mubr.msk.f32.gmra.mrb[58].mxu0 %vm366_vm1, %v8279_v1  ;;  %12610 = vmatprep.mubr.msk.f32.mxu1 %vm366_vm1, %v15583_v22  ;;  %v8284_v22 = vld [vmem:[%s14090_s25 + $0x242] sm:$0xff] }
 0x32b   : > { %13194 = vmatprep.mubr.msk.f32.mxu0 %vm366_vm1, %v8280_v5 }
 0x32c   : > { %v16102_v6 = vpop.f32.mrb[2].mxu1 }
 0x32d   : > { %v16104_v14 = vpop.f32.mrb[3].mxu1  ;;  %12611 = vmatmul.mubr.msk.f32.gmra.mrb[60].mxu1 %vm366_vm1, %v15593_v24  ;;  %v8285_v24 = vld [vmem:[%s14090_s25 + $0x24a] sm:$0xff] }
 0x32e   : > { %13195 = vmatmul.mubr.msk.f32.gmra.mrb[60].mxu0 %vm366_vm1, %v8281_v11  ;;  %12613 = vmatprep.mubr.msk.f32.mxu1 %vm366_vm1, %v15597_v26  ;;  %v8286_v26 = vld [vmem:[%s14090_s25 + $0x252] sm:$0xff] }
 0x32f   : > { %13197 = vmatprep.mubr.msk.f32.mxu0 %vm366_vm1, %v8282_v15 }
 0x330   : > { %v16114_v39 = vpop.f32.mrb[4].mxu1 }
 0x331   : > { %v16116_v46 = vpop.f32.mrb[5].mxu1  ;;  %12614 = vmatmul.mubr.msk.f32.gmra.mrb[62].mxu1 %vm366_vm1, %v15607_v30  ;;  %v8287_v30 = vld [vmem:[%s14090_s25 + $0x25a] sm:$0xff] }
 0x332   : > { %13198 = vmatmul.mubr.msk.f32.gmra.mrb[62].mxu0 %vm366_vm1, %v8283_v19  ;;  %12616 = vmatprep.mubr.msk.f32.mxu1 %vm366_vm1, %v15611_v32  ;;  %v8288_v32 = vld [vmem:[%s14090_s25 + $0x262] sm:$0xff] }
 0x333   : > { %13200 = vmatprep.mubr.msk.f32.mxu0 %vm366_vm1, %v8284_v22 }
 0x334   : > { %v16126_v54 = vpop.f32.mrb[6].mxu1 }
 0x335   : > { %v16128_v63 = vpop.f32.mrb[7].mxu1  ;;  %12617 = vmatmul.mubr.msk.f32.gmra.mrb[64].mxu1 %vm366_vm1, %v15621_v43  ;;  %v8289_v43 = vld [vmem:[%s14090_s25 + $0x26a] sm:$0xff] }
 0x336   : > { %13201 = vmatmul.mubr.msk.f32.gmra.mrb[64].mxu0 %vm366_vm1, %v8285_v24  ;;  %12619 = vmatprep.mubr.msk.f32.mxu1 %vm366_vm1, %v15625_v35  ;;  %v8290_v35 = vld [vmem:[%s14090_s25 + $0x272] sm:$0xff] }
 0x337   : > { %13203 = vmatprep.mubr.msk.f32.mxu0 %vm366_vm1, %v8286_v26 }
 0x338   : > { %v16138_v7 = vpop.f32.mrb[8].mxu1 }
 0x339   : > { %v16140_v13 = vpop.f32.mrb[9].mxu1  ;;  %12620 = vmatmul.mubr.msk.f32.gmra.mrb[66].mxu1 %vm366_vm1, %v15635_v37  ;;  %v8291_v37 = vld [vmem:[%s14090_s25 + $0x27a] sm:$0xff] }
 0x33a   : > { %13204 = vmatmul.mubr.msk.f32.gmra.mrb[66].mxu0 %vm366_vm1, %v8287_v30  ;;  %12622 = vmatprep.mubr.msk.f32.mxu1 %vm366_vm1, %v15639_v40  ;;  %v8292_v40 = vld [vmem:[%s14090_s25 + $0x282] sm:$0xff] }
 0x33b   : > { %13206 = vmatprep.mubr.msk.f32.mxu0 %vm366_vm1, %v8288_v32 }
 0x33c   : > { %v16150_v21 = vpop.f32.mrb[10].mxu1 }
 0x33d   : > { %v16152_v25 = vpop.f32.mrb[11].mxu1  ;;  %12623 = vmatmul.mubr.msk.f32.gmra.mrb[68].mxu1 %vm366_vm1, %v15649_v45  ;;  %v8293_v45 = vld [vmem:[%s14090_s25 + $0x28a] sm:$0xff] }
 0x33e   : > { %13207 = vmatmul.mubr.msk.f32.gmra.mrb[68].mxu0 %vm366_vm1, %v8289_v43  ;;  %12625 = vmatprep.mubr.msk.f32.mxu1 %vm366_vm1, %v15653_v49  ;;  %v8294_v49 = vld [vmem:[%s14090_s25 + $0x292] sm:$0xff] }
 0x33f   : > { %13209 = vmatprep.mubr.msk.f32.mxu0 %vm366_vm1, %v8290_v35 }
 0x340   : > { %v16162_v31 = vpop.f32.mrb[12].mxu1 }
 0x341   : > { %v16164_v34 = vpop.f32.mrb[13].mxu1  ;;  %12626 = vmatmul.mubr.msk.f32.gmra.mrb[70].mxu1 %vm366_vm1, %v15663_v53  ;;  %v8295_v53 = vld [vmem:[%s14090_s25 + $0x29a] sm:$0xff] }
 0x342   : > { %13210 = vmatmul.mubr.msk.f32.gmra.mrb[70].mxu0 %vm366_vm1, %v8291_v37  ;;  %12628 = vmatprep.mubr.msk.f32.mxu1 %vm366_vm1, %v15667_v28  ;;  %v8296_v28 = vld [vmem:[%s14090_s25 + $0x2a2] sm:$0xff] }
 0x343   : > { %13212 = vmatprep.mubr.msk.f32.mxu0 %vm366_vm1, %v8292_v40 }
 0x344   : > { %v16174_v38 = vpop.f32.mrb[14].mxu1 }
 0x345   : > { %v16176_v47 = vpop.f32.mrb[15].mxu1  ;;  %12629 = vmatmul.mubr.msk.f32.gmra.mrb[72].mxu1 %vm366_vm1, %v15677_v29  ;;  %v8297_v29 = vld [vmem:[%s14090_s25 + $0x2aa] sm:$0xff] }
 0x346   : > { %13213 = vmatmul.mubr.msk.f32.gmra.mrb[72].mxu0 %vm366_vm1, %v8293_v45  ;;  %12631 = vmatprep.mubr.msk.f32.mxu1 %vm366_vm1, %v15681_v0  ;;  %v8298_v0 = vld [vmem:[%s14090_s25 + $0x2b2] sm:$0xff] }
 0x347   : > { %13215 = vmatprep.mubr.msk.f32.mxu0 %vm366_vm1, %v8294_v49 }
 0x348   : > { %v16186_v55 = vpop.f32.mrb[16].mxu1 }
 0x349   : > { %v16188_v59 = vpop.f32.mrb[17].mxu1  ;;  %12632 = vmatmul.mubr.msk.f32.gmra.mrb[74].mxu1 %vm366_vm1, %v15691_v4  ;;  %v8299_v4 = vld [vmem:[%s14090_s25 + $0x2ba] sm:$0xff] }
 0x34a   : > { %13216 = vmatmul.mubr.msk.f32.gmra.mrb[74].mxu0 %vm366_vm1, %v8295_v53  ;;  %12634 = vmatprep.mubr.msk.f32.mxu1 %vm366_vm1, %v15695_v8  ;;  %v8300_v8 = vld [vmem:[%s14090_s25 + $0x2c2] sm:$0xff] }
 0x34b   : > { %13218 = vmatprep.mubr.msk.f32.mxu0 %vm366_vm1, %v8296_v28 }
 0x34c   : > { %v16198_v44 = vpop.f32.mrb[18].mxu1 }
 0x34d   : > { %v16200_v48 = vpop.f32.mrb[19].mxu1  ;;  %12635 = vmatmul.mubr.msk.f32.gmra.mrb[76].mxu1 %vm366_vm1, %v15705_v12  ;;  %v8301_v12 = vld [vmem:[%s14090_s25 + $0x2ca] sm:$0xff] }
 0x34e   : > { %13219 = vmatmul.mubr.msk.f32.gmra.mrb[76].mxu0 %vm366_vm1, %v8297_v29  ;;  %12637 = vmatprep.mubr.msk.f32.mxu1 %vm366_vm1, %v15709_v16  ;;  %v8302_v16 = vld [vmem:[%s14090_s25 + $0x2d2] sm:$0xff] }
 0x34f   : > { %13221 = vmatprep.mubr.msk.f32.mxu0 %vm366_vm1, %v8298_v0 }
 0x350   : > { %v16210_v52 = vpop.f32.mrb[20].mxu1 }
 0x351   : > { %v16212_v56 = vpop.f32.mrb[21].mxu1  ;;  %12638 = vmatmul.mubr.msk.f32.gmra.mrb[78].mxu1 %vm366_vm1, %v15719_v20  ;;  %v8303_v20 = vld [vmem:[%s14090_s25 + $0x2da] sm:$0xff] }
 0x352   : > { %13222 = vmatmul.mubr.msk.f32.gmra.mrb[78].mxu0 %vm366_vm1, %v8299_v4  ;;  %12640 = vmatprep.mubr.msk.f32.mxu1 %vm366_vm1, %v15723_v41  ;;  %v8304_v41 = vld [vmem:[%s14090_s25 + $0x2e2] sm:$0xff] }
 0x353   : > { %13224 = vmatprep.mubr.msk.f32.mxu0 %vm366_vm1, %v8300_v8 }
 0x354   : > { %v16222_v61 = vpop.f32.mrb[22].mxu1 }
 0x355   : > { %v16224_v1 = vpop.f32.mrb[23].mxu1  ;;  %12641 = vmatmul.mubr.msk.f32.gmra.mrb[80].mxu1 %vm366_vm1, %v15733_v50  ;;  %v8305_v50 = vld [vmem:[%s14090_s25 + $0x2ea] sm:$0xff] }
 0x356   : > { %13225 = vmatmul.mubr.msk.f32.gmra.mrb[80].mxu0 %vm366_vm1, %v8301_v12  ;;  %12643 = vmatprep.mubr.msk.f32.mxu1 %vm366_vm1, %v15737_v58  ;;  %v8306_v58 = vld [vmem:[%s14090_s25 + $0x2f2] sm:$0xff]  ;;  %v16335_v12 = vld [vmem:[%s16684_s2] ss:$0 sm:$0xff] }
 0x357   : > { %13227 = vmatprep.mubr.msk.f32.mxu0 %vm366_vm1, %v8302_v16 }
 0x358   : > { %v16234_v5 = vpop.f32.mrb[24].mxu1 }
 0x359   : > { %v16236_v11 = vpop.f32.mrb[25].mxu1  ;;  %12644 = vmatmul.mubr.msk.f32.gmra.mrb[82].mxu1 %vm366_vm1, %v15747_v3  ;;  %v8307_v3 = vld [vmem:[%s14090_s25 + $0x2fa] sm:$0xff] }
 0x35a   : > { %13228 = vmatmul.mubr.msk.f32.gmra.mrb[82].mxu0 %vm366_vm1, %v8303_v20  ;;  %12646 = vmatprep.mubr.msk.f32.mxu1 %vm366_vm1, %v15751_v60  ;;  %v8308_v60 = vld [vmem:[%s14090_s25 + $0x302] sm:$0xff] }
 0x35b   : > { %13230 = vmatprep.mubr.msk.f32.mxu0 %vm366_vm1, %v8304_v41 }
 0x35c   : > { %v16246_v15 = vpop.f32.mrb[26].mxu1 }
 0x35d   : > { %v16248_v19 = vpop.f32.mrb[27].mxu1  ;;  %12647 = vmatmul.mubr.msk.f32.gmra.mrb[84].mxu1 %vm366_vm1, %v15761_v17  ;;  %v8309_v17 = vld [vmem:[%s14090_s25 + $0x30a] sm:$0xff] }
 0x35e   : > { %13231 = vmatmul.mubr.msk.f32.gmra.mrb[84].mxu0 %vm366_vm1, %v8305_v50  ;;  %12649 = vmatprep.mubr.msk.f32.mxu1 %vm366_vm1, %v15765_v23  ;;  %v8310_v23 = vld [vmem:[%s14090_s25 + $0x312] sm:$0xff] }
 0x35f   : > { %13233 = vmatprep.mubr.msk.f32.mxu0 %vm366_vm1, %v8306_v58 }
 0x360   : > { %v16258_v22 = vpop.f32.mrb[28].mxu1 }
 0x361   : > { %v16260_v24 = vpop.f32.mrb[29].mxu1  ;;  %12650 = vmatmul.mubr.msk.f32.gmra.mrb[86].mxu1 %vm366_vm1, %v15775_v27  ;;  %v8311_v27 = vld [vmem:[%s14090_s25 + $0x31a] sm:$0xff] }
 0x362   : > { %13234 = vmatmul.mubr.msk.f32.gmra.mrb[86].mxu0 %vm366_vm1, %v8307_v3  ;;  %12652 = vmatprep.mubr.msk.f32.mxu1 %vm366_vm1, %v15779_v33  ;;  %v8312_v33 = vld [vmem:[%s14090_s25 + $0x322] sm:$0xff] }
 0x363   : > { %13236 = vmatprep.mubr.msk.f32.mxu0 %vm366_vm1, %v8308_v60 }
 0x364   : > { %v16270_v26 = vpop.f32.mrb[30].mxu1 }
 0x365   : > { %v16272_v30 = vpop.f32.mrb[31].mxu1  ;;  %12653 = vmatmul.mubr.msk.f32.gmra.mrb[88].mxu1 %vm366_vm1, %v15789_v36  ;;  %v8313_v36 = vld [vmem:[%s14090_s25 + $0x32a] sm:$0xff] }
 0x366   : > { %13237 = vmatmul.mubr.msk.f32.gmra.mrb[88].mxu0 %vm366_vm1, %v8309_v17  ;;  %12655 = vmatprep.mubr.msk.f32.mxu1 %vm366_vm1, %v15793_v42  ;;  %v8314_v42 = vld [vmem:[%s14090_s25 + $0x332] sm:$0xff] }
 0x367   : > { %13239 = vmatprep.mubr.msk.f32.mxu0 %vm366_vm1, %v8310_v23 }
 0x368   : > { %v16282_v32 = vpop.f32.mrb[32].mxu1 }
 0x369   : > { %v16284_v43 = vpop.f32.mrb[33].mxu1  ;;  %12656 = vmatmul.mubr.msk.f32.gmra.mrb[90].mxu1 %vm366_vm1, %v15803_v51  ;;  %v8315_v51 = vld [vmem:[%s14090_s25 + $0x33a] sm:$0xff] }
 0x36a   : > { %13240 = vmatmul.mubr.msk.f32.gmra.mrb[90].mxu0 %vm366_vm1, %v8311_v27  ;;  %12658 = vmatprep.mubr.msk.f32.mxu1 %vm366_vm1, %v15807_v57 }
 0x36b   : > { %13242 = vmatprep.mubr.msk.f32.mxu0 %vm366_vm1, %v8312_v33 }
 0x36c   : > { %v16294_v35 = vpop.f32.mrb[34].mxu1 }
 0x36d   : > { %v16296_v37 = vpop.f32.mrb[35].mxu1  ;;  %12659 = vmatmul.mubr.msk.f32.gmra.mrb[92].mxu1 %vm366_vm1, %v15817_v2 }
 0x36e   : > { %13243 = vmatmul.mubr.msk.f32.gmra.mrb[92].mxu0 %vm366_vm1, %v8313_v36  ;;  %12661 = vmatprep.mubr.msk.f32.mxu1 %vm366_vm1, %v15821_v10 }
 0x36f   : > { %13245 = vmatprep.mubr.msk.f32.mxu0 %vm366_vm1, %v8314_v42 }
 0x370   : > { %v16305_v57 = vpop.f32.mrb[36].mxu1 }
 0x371   : > { %v16307_v40 = vpop.f32.mrb[37].mxu1  ;;  %12662 = vmatmul.mubr.msk.f32.gmra.mrb[94].mxu1 %vm366_vm1, %v15831_v18 }
 0x372   : > { %13246 = vmatmul.mubr.msk.f32.gmra.mrb[94].mxu0 %vm366_vm1, %v8315_v51 }
 0x374   : > { %v16312_v45 = vpop.f32.mrb[38].mxu1 }
 0x375   : > { %v16314_v2 = vpop.f32.mrb[39].mxu1 }
 0x378   : > { %v16316_v49 = vpop.f32.mrb[40].mxu1 }
 0x379   : > { %v16318_v53 = vpop.f32.mrb[41].mxu1 }
 0x37c   : > { %v16320_v10 = vpop.f32.mrb[42].mxu1 }
 0x37d   : > { %v16322_v28 = vpop.f32.mrb[43].mxu1 }
 0x380   : > { %v16324_v29 = vpop.f32.mrb[44].mxu1 }
 0x381   : > { %v16326_v0 = vpop.f32.mrb[45].mxu1 }
 0x382   : > { %16686 = vst [vmem:[#allocation2_spill] sm:$0xff] %v16326_v0 }
 0x384   : > { %v16328_v4 = vpop.f32.mrb[46].mxu1 }
 0x385   : > { %16687 = vst [vmem:[#allocation3_spill] sm:$0xff] %v16328_v4  ;;  %v16330_v18 = vpop.f32.mrb[47].mxu1 }
 0x386   : > { %16688 = vst [vmem:[#allocation4_spill] sm:$0xff] %v16330_v18 }
 0x389   : > { %v13106_v8 = vpop.f32.mrb[0].mxu0 }
 0x38a   : > { %v13250_v16 = vadd.f32 %v13106_v8, %v16090_v9  ;;  %v8675_v20 = vpop.f32.mrb[1].mxu0 }
 0x38b   : > { %v13251_v41 = vadd.f32 %v8675_v20, %v16092_v62 }
 0x38c   : > { %v9258_v50 = vadd.f32 %v13250_v16, %v16335_v12 }
 0x38d   : > { %v9257_v58 = vadd.f32 %v13251_v41, %v16335_v12  ;;  %v13109_v3 = vpop.f32.mrb[2].mxu0 }
 0x38e   : > { %v9354_v60 = vmax.f32 %v9258_v50, 0.0  ;;  %v13252_v17 = vadd.f32 %v13109_v3, %v16102_v6  ;;  %v8685_v23 = vpop.f32.mrb[3].mxu0 }
 0x38f   : > { %v9353_v27 = vmax.f32 %v9257_v58, 0.0  ;;  %v13253_v33 = vadd.f32 %v8685_v23, %v16104_v14 }
 0x390   : > { %v9543_v36 = vrot.slane %v9354_v60, 1  ;;  %v9260_v42 = vadd.f32 %v13252_v17, %v16335_v12 }
 0x391   : > { %v9542_v9 = vrot.slane %v9353_v27, 1  ;;  %v9259_v51 = vadd.f32 %v13253_v33, %v16335_v12  ;;  %v13112_v62 = vpop.f32.mrb[4].mxu0 }
 0x392   : > { %v9356_v8 = vmax.f32 %v9260_v42, 0.0  ;;  %v13254_v16 = vadd.f32 %v13112_v62, %v16114_v39  ;;  %v8695_v20 = vpop.f32.mrb[5].mxu0 }
 0x393   : > { %v9544_v41 = vsel %vm9541_vm2, %v9542_v9, %v9543_v36  ;;  %v9355_v50 = vmax.f32 %v9259_v51, 0.0  ;;  %v13255_v6 = vadd.f32 %v8695_v20, %v16116_v46 }
 0x394   : > { %v9817_v58 = vmax.f32 %v9353_v27, %v9544_v41  ;;  %v9547_v3 = vrot.slane %v9356_v8, 1  ;;  %v9262_v14 = vadd.f32 %v13254_v16, %v16335_v12 }
 0x395   : > { %v9545_v23 = vrot.slane %v9355_v50, 1  ;;  %v9261_v17 = vadd.f32 %v13255_v6, %v16335_v12  ;;  %v13115_v18 = vpop.f32.mrb[6].mxu0 }
 0x396   : > { %v9358_v33 = vmax.f32 %v9262_v14, 0.0  ;;  %v13256_v42 = vadd.f32 %v13115_v18, %v16126_v54  ;;  %v8705_v4 = vpop.f32.mrb[7].mxu0 }
 0x397   : > { %v9546_v39 = vsel %vm9541_vm2, %v9543_v36, %v9545_v23  ;;  %v9548_v9 = vsel %vm9541_vm2, %v9545_v23, %v9547_v3  ;;  %v9357_v51 = vmax.f32 %v9261_v17, 0.0  ;;  %v13257_v46 = vadd.f32 %v8705_v4, %v16128_v63 }
 0x398   : > { %v9818_v27 = vmax.f32 %v9354_v60, %v9546_v39  ;;  %v9819_v62 = vmax.f32 %v9355_v50, %v9548_v9  ;;  %v9551_v20 = vrot.slane %v9358_v33, 1  ;;  %v9264_v16 = vadd.f32 %v13256_v42, %v16335_v12 }
 0x399   : > { %v9549_v41 = vrot.slane %v9357_v51, 1  ;;  %v9263_v6 = vadd.f32 %v13257_v46, %v16335_v12  ;;  %v13118_v14 = vpop.f32.mrb[8].mxu0 }
 0x39a   : > { %v9360_v0 = vmax.f32 %v9264_v16, 0.0  ;;  %v13258_v54 = vadd.f32 %v13118_v14, %v16138_v7  ;;  %v8715_v18 = vpop.f32.mrb[9].mxu0 }
 0x39b   : > { %v9550_v36 = vsel %vm9541_vm2, %v9547_v3, %v9549_v41  ;;  %v9552_v23 = vsel %vm9541_vm2, %v9549_v41, %v9551_v20  ;;  %v9359_v17 = vmax.f32 %v9263_v6, 0.0  ;;  %v13259_v63 = vadd.f32 %v8715_v18, %v16140_v13 }
 0x39c   : > { %v9820_v4 = vmax.f32 %v9356_v8, %v9550_v36  ;;  %v9821_v60 = vmax.f32 %v9357_v51, %v9552_v23  ;;  %v9555_v50 = vrot.slane %v9360_v0, 1  ;;  %v9266_v42 = vadd.f32 %v13258_v54, %v16335_v12 }
 0x39d   : > { %v9553_v7 = vrot.slane %v9359_v17, 1  ;;  %v9265_v39 = vadd.f32 %v13259_v63, %v16335_v12  ;;  %v13121_v3 = vpop.f32.mrb[10].mxu0 }
 0x39e   : > { %v9931_v9 = vmax.f32 %v9817_v58, %v9821_v60  ;;  %v9362_v46 = vmax.f32 %v9266_v42, 0.0  ;;  %v13260_v16 = vadd.f32 %v13121_v3, %v16150_v21  ;;  %v8725_v13 = vpop.f32.mrb[11].mxu0 }
 0x39f   : > { %v9554_v8 = vsel %vm9541_vm2, %v9551_v20, %v9553_v7  ;;  %v9556_v51 = vsel %vm9541_vm2, %v9553_v7, %v9555_v50  ;;  %v9361_v41 = vmax.f32 %v9265_v39, 0.0  ;;  %v13261_v6 = vadd.f32 %v8725_v13, %v16152_v25 }
 0x3a0   : > { %10023 = vst [vmem:[%s16365_s17] sm:$0xff] %v9931_v9  ;;  %v9822_v14 = vmax.f32 %v9358_v33, %v9554_v8  ;;  %v9823_v54 = vmax.f32 %v9359_v17, %v9556_v51  ;;  %v9559_v18 = vrot.slane %v9362_v46, 1  ;;  %v9268_v36 = vadd.f32 %v13260_v16, %v16335_v12 }
 0x3a1   : > { %v9557_v58 = vrot.slane %v9361_v41, 1  ;;  %v9267_v23 = vadd.f32 %v13261_v6, %v16335_v12  ;;  %v13124_v21 = vpop.f32.mrb[12].mxu0 }
 0x3a2   : > { %v9932_v63 = vmax.f32 %v9818_v27, %v9822_v14  ;;  %v9933_v42 = vmax.f32 %v9819_v62, %v9823_v54  ;;  %v9364_v20 = vmax.f32 %v9268_v36, 0.0  ;;  %v13262_v7 = vadd.f32 %v13124_v21, %v16162_v31  ;;  %v8735_v39 = vpop.f32.mrb[13].mxu0 }
 0x3a3   : > { %v9558_v25 = vsel %vm9541_vm2, %v9555_v50, %v9557_v58  ;;  %v9560_v33 = vsel %vm9541_vm2, %v9557_v58, %v9559_v18  ;;  %v9363_v3 = vmax.f32 %v9267_v23, 0.0  ;;  %v13263_v17 = vadd.f32 %v8735_v39, %v16164_v34 }
 0x3a4   : > { %10024 = vst [vmem:[%s16365_s17 + $0x8] sm:$0xff] %v9932_v63  ;;  %10025 = vst [vmem:[%s16365_s17 + $0x10] sm:$0xff] %v9933_v42  ;;  %v9824_v9 = vmax.f32 %v9360_v0, %v9558_v25  ;;  %v9825_v16 = vmax.f32 %v9361_v41, %v9560_v33  ;;  %v9563_v13 = vrot.slane %v9364_v20, 1  ;;  %v9270_v27 = vadd.f32 %v13262_v7, %v16335_v12 }
 0x3a5   : > { %v9561_v62 = vrot.slane %v9363_v3, 1  ;;  %v9269_v31 = vadd.f32 %v13263_v17, %v16335_v12  ;;  %v13127_v8 = vpop.f32.mrb[14].mxu0 }
 0x3a6   : > { %v9934_v51 = vmax.f32 %v9820_v4, %v9824_v9  ;;  %v9935_v50 = vmax.f32 %v9821_v60, %v9825_v16  ;;  %v9366_v6 = vmax.f32 %v9270_v27, 0.0  ;;  %v13264_v36 = vadd.f32 %v13127_v8, %v16174_v38  ;;  %v8745_v58 = vpop.f32.mrb[15].mxu0 }
 0x3a7   : > { %v9562_v34 = vsel %vm9541_vm2, %v9559_v18, %v9561_v62  ;;  %v9564_v0 = vsel %vm9541_vm2, %v9561_v62, %v9563_v13  ;;  %v9365_v23 = vmax.f32 %v9269_v31, 0.0  ;;  %v13265_v41 = vadd.f32 %v8745_v58, %v16176_v47 }
 0x3a8   : > { %10026 = vst [vmem:[%s16365_s17 + $0x18] sm:$0xff] %v9934_v51  ;;  %10027 = vst [vmem:[%s16365_s17 + $0x20] sm:$0xff] %v9935_v50  ;;  %v9826_v21 = vmax.f32 %v9362_v46, %v9562_v34  ;;  %v9827_v63 = vmax.f32 %v9363_v3, %v9564_v0  ;;  %v9567_v42 = vrot.slane %v9366_v6, 1  ;;  %v9272_v4 = vadd.f32 %v13264_v36, %v16335_v12 }
 0x3a9   : > { %v9565_v60 = vrot.slane %v9365_v23, 1  ;;  %v9271_v38 = vadd.f32 %v13265_v41, %v16335_v12  ;;  %v13130_v7 = vpop.f32.mrb[16].mxu0 }
 0x3aa   : > { %v9936_v39 = vmax.f32 %v9822_v14, %v9826_v21  ;;  %v9937_v18 = vmax.f32 %v9823_v54, %v9827_v63  ;;  %v9368_v25 = vmax.f32 %v9272_v4, 0.0  ;;  %v13266_v33 = vadd.f32 %v13130_v7, %v16186_v55  ;;  %v8755_v17 = vpop.f32.mrb[17].mxu0 }
 0x3ab   : > { %v9566_v47 = vsel %vm9541_vm2, %v9563_v13, %v9565_v60  ;;  %v9568_v46 = vsel %vm9541_vm2, %v9565_v60, %v9567_v42  ;;  %v9367_v27 = vmax.f32 %v9271_v38, 0.0  ;;  %v13267_v3 = vadd.f32 %v8755_v17, %v16188_v59 }
 0x3ac   : > { %10028 = vst [vmem:[%s16365_s17 + $0x28] sm:$0xff] %v9936_v39  ;;  %10029 = vst [vmem:[%s16365_s17 + $0x30] sm:$0xff] %v9937_v18  ;;  %v9828_v62 = vmax.f32 %v9364_v20, %v9566_v47  ;;  %v9829_v31 = vmax.f32 %v9365_v23, %v9568_v46  ;;  %v9571_v8 = vrot.slane %v9368_v25, 1  ;;  %v9274_v14 = vadd.f32 %v13266_v33, %v16335_v12 }
 0x3ad   : > { %v9569_v54 = vrot.slane %v9367_v27, 1  ;;  %v9273_v55 = vadd.f32 %v13267_v3, %v16335_v12  ;;  %v13133_v51 = vpop.f32.mrb[18].mxu0 }
 0x3ae   : > { %v9938_v50 = vmax.f32 %v9824_v9, %v9828_v62  ;;  %v9939_v13 = vmax.f32 %v9825_v16, %v9829_v31  ;;  %v9370_v36 = vmax.f32 %v9274_v14, 0.0  ;;  %v13268_v58 = vadd.f32 %v13133_v51, %v16198_v44  ;;  %v8765_v34 = vpop.f32.mrb[19].mxu0 }
 0x3af   : > { %v9570_v59 = vsel %vm9541_vm2, %v9567_v42, %v9569_v54  ;;  %v9572_v20 = vsel %vm9541_vm2, %v9569_v54, %v9571_v8  ;;  %v9369_v0 = vmax.f32 %v9273_v55, 0.0  ;;  %v13269_v23 = vadd.f32 %v8765_v34, %v16200_v48 }
 0x3b0   : > { %10030 = vst [vmem:[%s16365_s17 + $0x38] sm:$0xff] %v9938_v50  ;;  %10031 = vst [vmem:[%s16365_s17 + $0x40] sm:$0xff] %v9939_v13  ;;  %v9830_v41 = vmax.f32 %v9366_v6, %v9570_v59  ;;  %v9831_v4 = vmax.f32 %v9367_v27, %v9572_v20  ;;  %v9575_v60 = vrot.slane %v9370_v36, 1  ;;  %v9276_v9 = vadd.f32 %v13268_v58, %v16335_v12 }
 0x3b1   : > { %v9573_v16 = vrot.slane %v9369_v0, 1  ;;  %v9275_v44 = vadd.f32 %v13269_v23, %v16335_v12  ;;  %v13136_v38 = vpop.f32.mrb[20].mxu0 }
 0x3b2   : > { %v9940_v7 = vmax.f32 %v9826_v21, %v9830_v41  ;;  %v9941_v42 = vmax.f32 %v9827_v63, %v9831_v4  ;;  %v9372_v39 = vmax.f32 %v9276_v9, 0.0  ;;  %v13270_v18 = vadd.f32 %v13136_v38, %v16210_v52  ;;  %v8775_v33 = vpop.f32.mrb[21].mxu0 }
 0x3b3   : > { %v9574_v48 = vsel %vm9541_vm2, %v9571_v8, %v9573_v16  ;;  %v9576_v6 = vsel %vm9541_vm2, %v9573_v16, %v9575_v60  ;;  %v9371_v17 = vmax.f32 %v9275_v44, 0.0  ;;  %v13271_v47 = vadd.f32 %v8775_v33, %v16212_v56 }
 0x3b4   : > { %10032 = vst [vmem:[%s16365_s17 + $0x48] sm:$0xff] %v9940_v7  ;;  %10033 = vst [vmem:[%s16365_s17 + $0x50] sm:$0xff] %v9941_v42  ;;  %v9832_v46 = vmax.f32 %v9368_v25, %v9574_v48  ;;  %v9833_v27 = vmax.f32 %v9369_v0, %v9576_v6  ;;  %v9579_v3 = vrot.slane %v9372_v39, 1  ;;  %v9278_v21 = vadd.f32 %v13270_v18, %v16335_v12 }
 0x3b5   : > { %v9577_v63 = vrot.slane %v9371_v17, 1  ;;  %v9277_v52 = vadd.f32 %v13271_v47, %v16335_v12  ;;  %v13139_v14 = vpop.f32.mrb[22].mxu0 }
 0x3b6   : > { %v9942_v54 = vmax.f32 %v9828_v62, %v9832_v46  ;;  %v9943_v8 = vmax.f32 %v9829_v31, %v9833_v27  ;;  %v9374_v55 = vmax.f32 %v9278_v21, 0.0  ;;  %v13272_v51 = vadd.f32 %v13139_v14, %v16222_v61  ;;  %v8785_v50 = vpop.f32.mrb[23].mxu0 }
 0x3b7   : > { %v9578_v56 = vsel %vm9541_vm2, %v9575_v60, %v9577_v63  ;;  %v9580_v25 = vsel %vm9541_vm2, %v9577_v63, %v9579_v3  ;;  %v9373_v13 = vmax.f32 %v9277_v52, 0.0  ;;  %v13273_v58 = vadd.f32 %v8785_v50, %v16224_v1 }
 0x3b8   : > { %10034 = vst [vmem:[%s16365_s17 + $0x58] sm:$0xff] %v9942_v54  ;;  %10035 = vst [vmem:[%s16365_s17 + $0x60] sm:$0xff] %v9943_v8  ;;  %v9834_v34 = vmax.f32 %v9370_v36, %v9578_v56  ;;  %v9835_v59 = vmax.f32 %v9371_v17, %v9580_v25  ;;  %v9583_v20 = vrot.slane %v9374_v55, 1  ;;  %v9280_v62 = vadd.f32 %v13272_v51, %v16335_v12 }
 0x3b9   : > { %v9581_v31 = vrot.slane %v9373_v13, 1  ;;  %v9279_v61 = vadd.f32 %v13273_v58, %v16335_v12  ;;  %v13142_v0 = vpop.f32.mrb[24].mxu0 }
 0x3ba   : > { %v9944_v23 = vmax.f32 %v9830_v41, %v9834_v34  ;;  %v9945_v60 = vmax.f32 %v9831_v4, %v9835_v59  ;;  %v9376_v9 = vmax.f32 %v9280_v62, 0.0  ;;  %v13274_v16 = vadd.f32 %v13142_v0, %v16234_v5  ;;  %v8795_v44 = vpop.f32.mrb[25].mxu0 }
 0x3bb   : > { %v9582_v1 = vsel %vm9541_vm2, %v9579_v3, %v9581_v31  ;;  %v9584_v36 = vsel %vm9541_vm2, %v9581_v31, %v9583_v20  ;;  %v9375_v38 = vmax.f32 %v9279_v61, 0.0  ;;  %v13275_v7 = vadd.f32 %v8795_v44, %v16236_v11 }
 0x3bc   : > { %10036 = vst [vmem:[%s16365_s17 + $0x68] sm:$0xff] %v9944_v23  ;;  %10037 = vst [vmem:[%s16365_s17 + $0x70] sm:$0xff] %v9945_v60  ;;  %v9836_v42 = vmax.f32 %v9372_v39, %v9582_v1  ;;  %v9837_v18 = vmax.f32 %v9373_v13, %v9584_v36  ;;  %v9587_v33 = vrot.slane %v9376_v9, 1  ;;  %v9282_v41 = vadd.f32 %v13274_v16, %v16335_v12 }
 0x3bd   : > { %v9585_v4 = vrot.slane %v9375_v38, 1  ;;  %v9281_v5 = vadd.f32 %v13275_v7, %v16335_v12  ;;  %v13145_v48 = vpop.f32.mrb[26].mxu0 }
 0x3be   : > { %v9946_v6 = vmax.f32 %v9832_v46, %v9836_v42  ;;  %v9947_v17 = vmax.f32 %v9833_v27, %v9837_v18  ;;  %v9378_v47 = vmax.f32 %v9282_v41, 0.0  ;;  %v13276_v3 = vadd.f32 %v13145_v48, %v16246_v15  ;;  %v8805_v21 = vpop.f32.mrb[27].mxu0 }
 0x3bf   : > { %v9586_v11 = vsel %vm9541_vm2, %v9583_v20, %v9585_v4  ;;  %v9588_v39 = vsel %vm9541_vm2, %v9585_v4, %v9587_v33  ;;  %v9377_v63 = vmax.f32 %v9281_v5, 0.0  ;;  %v13277_v52 = vadd.f32 %v8805_v21, %v16248_v19 }
 0x3c0   : > { %10038 = vst [vmem:[%s16365_s17 + $0x78] sm:$0xff] %v9946_v6  ;;  %10039 = vst [vmem:[%s16365_s17 + $0x80] sm:$0xff] %v9947_v17  ;;  %v9838_v14 = vmax.f32 %v9374_v55, %v9586_v11  ;;  %v9839_v54 = vmax.f32 %v9375_v38, %v9588_v39  ;;  %v9591_v8 = vrot.slane %v9378_v47, 1  ;;  %v9284_v46 = vadd.f32 %v13276_v3, %v16335_v12 }
 0x3c1   : > { %v9589_v27 = vrot.slane %v9377_v63, 1  ;;  %v9283_v15 = vadd.f32 %v13277_v52, %v16335_v12  ;;  %v13148_v51 = vpop.f32.mrb[28].mxu0 }
 0x3c2   : > { %v9948_v50 = vmax.f32 %v9834_v34, %v9838_v14  ;;  %v9949_v56 = vmax.f32 %v9835_v59, %v9839_v54  ;;  %v9380_v25 = vmax.f32 %v9284_v46, 0.0  ;;  %v13278_v13 = vadd.f32 %v13148_v51, %v16258_v22  ;;  %v8815_v58 = vpop.f32.mrb[29].mxu0 }
 0x3c3   : > { %v9590_v19 = vsel %vm9541_vm2, %v9587_v33, %v9589_v27  ;;  %v9592_v55 = vsel %vm9541_vm2, %v9589_v27, %v9591_v8  ;;  %v9379_v20 = vmax.f32 %v9283_v15, 0.0  ;;  %v13279_v62 = vadd.f32 %v8815_v58, %v16260_v24 }
 0x3c4   : > { %10040 = vst [vmem:[%s16365_s17 + $0x88] sm:$0xff] %v9948_v50  ;;  %10041 = vst [vmem:[%s16365_s17 + $0x90] sm:$0xff] %v9949_v56  ;;  %v9840_v31 = vmax.f32 %v9376_v9, %v9590_v19  ;;  %v9841_v61 = vmax.f32 %v9377_v63, %v9592_v55  ;;  %v9595_v0 = vrot.slane %v9380_v25, 1  ;;  %v9286_v34 = vadd.f32 %v13278_v13, %v16335_v12 }
 0x3c5   : > { %v9593_v59 = vrot.slane %v9379_v20, 1  ;;  %v9285_v22 = vadd.f32 %v13279_v62, %v16335_v12  ;;  %v13151_v23 = vpop.f32.mrb[30].mxu0 }
 0x3c6   : > { %v9950_v60 = vmax.f32 %v9836_v42, %v9840_v31  ;;  %v9951_v16 = vmax.f32 %v9837_v18, %v9841_v61  ;;  %v9382_v44 = vmax.f32 %v9286_v34, 0.0  ;;  %v13280_v1 = vadd.f32 %v13151_v23, %v16270_v26  ;;  %v8825_v36 = vpop.f32.mrb[31].mxu0 }
 0x3c7   : > { %v9594_v24 = vsel %vm9541_vm2, %v9591_v8, %v9593_v59  ;;  %v9596_v9 = vsel %vm9541_vm2, %v9593_v59, %v9595_v0  ;;  %v9381_v38 = vmax.f32 %v9285_v22, 0.0  ;;  %v13281_v7 = vadd.f32 %v8825_v36, %v16272_v30 }
 0x3c8   : > { %10042 = vst [vmem:[%s16365_s17 + $0x98] sm:$0xff] %v9950_v60  ;;  %10043 = vst [vmem:[%s16365_s17 + $0xa0] sm:$0xff] %v9951_v16  ;;  %v9842_v33 = vmax.f32 %v9378_v47, %v9594_v24  ;;  %v9843_v41 = vmax.f32 %v9379_v20, %v9596_v9  ;;  %v9599_v4 = vrot.slane %v9382_v44, 1  ;;  %v9288_v42 = vadd.f32 %v13280_v1, %v16335_v12 }
 0x3c9   : > { %v9597_v18 = vrot.slane %v9381_v38, 1  ;;  %v9287_v26 = vadd.f32 %v13281_v7, %v16335_v12  ;;  %v13154_v5 = vpop.f32.mrb[32].mxu0 }
 0x3ca   : > { %v9952_v48 = vmax.f32 %v9838_v14, %v9842_v33  ;;  %v9953_v6 = vmax.f32 %v9839_v54, %v9843_v41  ;;  %v9384_v17 = vmax.f32 %v9288_v42, 0.0  ;;  %v13282_v3 = vadd.f32 %v13154_v5, %v16282_v32  ;;  %v8835_v21 = vpop.f32.mrb[33].mxu0 }
 0x3cb   : > { %v9598_v30 = vsel %vm9541_vm2, %v9595_v0, %v9597_v18  ;;  %v9600_v47 = vsel %vm9541_vm2, %v9597_v18, %v9599_v4  ;;  %v9383_v11 = vmax.f32 %v9287_v26, 0.0  ;;  %v13283_v39 = vadd.f32 %v8835_v21, %v16284_v43 }
 0x3cc   : > { %10044 = vst [vmem:[%s16365_s17 + $0xa8] sm:$0xff] %v9952_v48  ;;  %10045 = vst [vmem:[%s16365_s17 + $0xb0] sm:$0xff] %v9953_v6  ;;  %v9844_v63 = vmax.f32 %v9380_v25, %v9598_v30  ;;  %v9845_v52 = vmax.f32 %v9381_v38, %v9600_v47  ;;  %v9603_v8 = vrot.slane %v9384_v17, 1  ;;  %v9290_v14 = vadd.f32 %v13282_v3, %v16335_v12 }
 0x3cd   : > { %v9601_v54 = vrot.slane %v9383_v11, 1  ;;  %v9289_v32 = vadd.f32 %v13283_v39, %v16335_v12  ;;  %v13157_v46 = vpop.f32.mrb[34].mxu0 }
 0x3ce   : > { %v9954_v27 = vmax.f32 %v9840_v31, %v9844_v63  ;;  %v9955_v15 = vmax.f32 %v9841_v61, %v9845_v52  ;;  %v9386_v51 = vmax.f32 %v9290_v14, 0.0  ;;  %v13284_v50 = vadd.f32 %v13157_v46, %v16294_v35  ;;  %v8845_v56 = vpop.f32.mrb[35].mxu0 }
 0x3cf   : > { %v9602_v43 = vsel %vm9541_vm2, %v9599_v4, %v9601_v54  ;;  %v9604_v25 = vsel %vm9541_vm2, %v9601_v54, %v9603_v8  ;;  %v9385_v13 = vmax.f32 %v9289_v32, 0.0  ;;  %v13285_v58 = vadd.f32 %v8845_v56, %v16296_v37 }
 0x3d0   : > { %10046 = vst [vmem:[%s16365_s17 + $0xb8] sm:$0xff] %v9954_v27  ;;  %10047 = vst [vmem:[%s16365_s17 + $0xc0] sm:$0xff] %v9955_v15  ;;  %v9846_v19 = vmax.f32 %v9382_v44, %v9602_v43  ;;  %v9847_v55 = vmax.f32 %v9383_v11, %v9604_v25  ;;  %v9607_v20 = vrot.slane %v9386_v51, 1  ;;  %v9292_v62 = vadd.f32 %v13284_v50, %v16335_v12 }
 0x3d1   : > { %v9605_v31 = vrot.slane %v9385_v13, 1  ;;  %v9291_v35 = vadd.f32 %v13285_v58, %v16335_v12  ;;  %v13160_v61 = vpop.f32.mrb[36].mxu0 }
 0x3d2   : > { %v9956_v0 = vmax.f32 %v9842_v33, %v9846_v19  ;;  %v9957_v34 = vmax.f32 %v9843_v41, %v9847_v55  ;;  %v9388_v59 = vmax.f32 %v9292_v62, 0.0  ;;  %v13286_v22 = vadd.f32 %v13160_v61, %v16305_v57  ;;  %v8855_v23 = vpop.f32.mrb[37].mxu0 }
 0x3d3   : > { %v9606_v37 = vsel %vm9541_vm2, %v9603_v8, %v9605_v31  ;;  %v9608_v60 = vsel %vm9541_vm2, %v9605_v31, %v9607_v20  ;;  %v9387_v16 = vmax.f32 %v9291_v35, 0.0  ;;  %v13287_v44 = vadd.f32 %v8855_v23, %v16307_v40 }
 0x3d4   : > { %10048 = vst [vmem:[%s16365_s17 + $0xc8] sm:$0xff] %v9956_v0  ;;  %10049 = vst [vmem:[%s16365_s17 + $0xd0] sm:$0xff] %v9957_v34  ;;  %v9848_v1 = vmax.f32 %v9384_v17, %v9606_v37  ;;  %v9849_v36 = vmax.f32 %v9385_v13, %v9608_v60  ;;  %v9611_v24 = vrot.slane %v9388_v59, 1  ;;  %v9294_v9 = vadd.f32 %v13286_v22, %v16335_v12 }
 0x3d5   : > { %v9609_v38 = vrot.slane %v9387_v16, 1  ;;  %v9293_v57 = vadd.f32 %v13287_v44, %v16335_v12  ;;  %v13163_v7 = vpop.f32.mrb[38].mxu0 }
 0x3d6   : > { %v9958_v33 = vmax.f32 %v9844_v63, %v9848_v1  ;;  %v9959_v41 = vmax.f32 %v9845_v52, %v9849_v36  ;;  %v9390_v4 = vmax.f32 %v9294_v9, 0.0  ;;  %v13288_v42 = vadd.f32 %v13163_v7, %v16312_v45  ;;  %v8865_v18 = vpop.f32.mrb[39].mxu0 }
 0x3d7   : > { %v9610_v40 = vsel %vm9541_vm2, %v9607_v20, %v9609_v38  ;;  %v9612_v26 = vsel %vm9541_vm2, %v9609_v38, %v9611_v24  ;;  %v9389_v5 = vmax.f32 %v9293_v57, 0.0  ;;  %v13289_v48 = vadd.f32 %v8865_v18, %v16314_v2 }
 0x3d8   : > { %10050 = vst [vmem:[%s16365_s17 + $0xd8] sm:$0xff] %v9958_v33  ;;  %10051 = vst [vmem:[%s16365_s17 + $0xe0] sm:$0xff] %v9959_v41  ;;  %v9850_v6 = vmax.f32 %v9386_v51, %v9610_v40  ;;  %v9851_v17 = vmax.f32 %v9387_v16, %v9612_v26  ;;  %v9615_v3 = vrot.slane %v9390_v4, 1  ;;  %v9296_v21 = vadd.f32 %v13288_v42, %v16335_v12  ;;  %v16690_v40 = vld [vmem:[#allocation3_spill] sm:$0xff] }
 0x3d9   : > { %v9613_v30 = vrot.slane %v9389_v5, 1  ;;  %v9295_v45 = vadd.f32 %v13289_v48, %v16335_v12  ;;  %v13166_v47 = vpop.f32.mrb[40].mxu0 }
 0x3da   : > { %v9960_v11 = vmax.f32 %v9846_v19, %v9850_v6  ;;  %v9961_v39 = vmax.f32 %v9847_v55, %v9851_v17  ;;  %v9392_v63 = vmax.f32 %v9296_v21, 0.0  ;;  %v13290_v52 = vadd.f32 %v13166_v47, %v16316_v49  ;;  %v8875_v8 = vpop.f32.mrb[41].mxu0 }
 0x3db   : > { %v9614_v2 = vsel %vm9541_vm2, %v9611_v24, %v9613_v30  ;;  %v9616_v14 = vsel %vm9541_vm2, %v9613_v30, %v9615_v3  ;;  %v9391_v54 = vmax.f32 %v9295_v45, 0.0  ;;  %v13291_v32 = vadd.f32 %v8875_v8, %v16318_v53 }
 0x3dc   : > { %10052 = vst [vmem:[%s16365_s17 + $0xe8] sm:$0xff] %v9960_v11  ;;  %10053 = vst [vmem:[%s16365_s17 + $0xf0] sm:$0xff] %v9961_v39  ;;  %v9852_v46 = vmax.f32 %v9388_v59, %v9614_v2  ;;  %v9853_v27 = vmax.f32 %v9389_v5, %v9616_v14  ;;  %v9619_v15 = vrot.slane %v9392_v63, 1  ;;  %v9298_v51 = vadd.f32 %v13290_v52, %v16335_v12 }
 0x3dd   : > { %v9617_v50 = vrot.slane %v9391_v54, 1  ;;  %v9297_v49 = vadd.f32 %v13291_v32, %v16335_v12  ;;  %v13169_v56 = vpop.f32.mrb[42].mxu0 }
 0x3de   : > { %v9962_v43 = vmax.f32 %v9848_v1, %v9852_v46  ;;  %v9963_v25 = vmax.f32 %v9849_v36, %v9853_v27  ;;  %v9394_v13 = vmax.f32 %v9298_v51, 0.0  ;;  %v13292_v58 = vadd.f32 %v13169_v56, %v16320_v10  ;;  %v8885_v19 = vpop.f32.mrb[43].mxu0  ;;  %v16689_v36 = vld [vmem:[#allocation2_spill] sm:$0xff] }
 0x3df   : > { %v9618_v53 = vsel %vm9541_vm2, %v9615_v3, %v9617_v50  ;;  %v9620_v55 = vsel %vm9541_vm2, %v9617_v50, %v9619_v15  ;;  %v9393_v20 = vmax.f32 %v9297_v49, 0.0  ;;  %v13293_v62 = vadd.f32 %v8885_v19, %v16322_v28  ;;  %v16691_v3 = vld [vmem:[#allocation4_spill] sm:$0xff] }
 0x3e0   : > { %10054 = vst [vmem:[%s16365_s17 + $0xf8] sm:$0xff] %v9962_v43  ;;  %10055 = vst [vmem:[%s16365_s17 + $0x100] sm:$0xff] %v9963_v25  ;;  %v9854_v31 = vmax.f32 %v9390_v4, %v9618_v53  ;;  %v9855_v35 = vmax.f32 %v9391_v54, %v9620_v55  ;;  %v9623_v61 = vrot.slane %v9394_v13, 1  ;;  %v9300_v0 = vadd.f32 %v13292_v58, %v16335_v12 }
 0x3e1   : > { %v9621_v34 = vrot.slane %v9393_v20, 1  ;;  %v9299_v10 = vadd.f32 %v13293_v62, %v16335_v12  ;;  %v13172_v59 = vpop.f32.mrb[44].mxu0 }
 0x3e2   : > { %v9964_v22 = vmax.f32 %v9850_v6, %v9854_v31  ;;  %v9965_v23 = vmax.f32 %v9851_v17, %v9855_v35  ;;  %v9396_v37 = vmax.f32 %v9300_v0, 0.0  ;;  %v13294_v60 = vadd.f32 %v13172_v59, %v16324_v29  ;;  %v8895_v16 = vpop.f32.mrb[45].mxu0 }
 0x3e3   : > { %v9622_v28 = vsel %vm9541_vm2, %v9619_v15, %v9621_v34  ;;  %v9624_v44 = vsel %vm9541_vm2, %v9621_v34, %v9623_v61  ;;  %v9395_v1 = vmax.f32 %v9299_v10, 0.0  ;;  %v13295_v24 = vadd.f32 %v8895_v16, %v16689_v36 }
 0x3e4   : > { %10056 = vst [vmem:[%s16365_s17 + $0x108] sm:$0xff] %v9964_v22  ;;  %10057 = vst [vmem:[%s16365_s17 + $0x110] sm:$0xff] %v9965_v23  ;;  %v9856_v9 = vmax.f32 %v9392_v63, %v9622_v28  ;;  %v9857_v38 = vmax.f32 %v9393_v20, %v9624_v44  ;;  %v9627_v57 = vrot.slane %v9396_v37, 1  ;;  %v9302_v7 = vadd.f32 %v13294_v60, %v16335_v12 }
 0x3e5   : > { %v9625_v33 = vrot.slane %v9395_v1, 1  ;;  %v9301_v29 = vadd.f32 %v13295_v24, %v16335_v12  ;;  %v13175_v41 = vpop.f32.mrb[46].mxu0 }
 0x3e6   : > { %v9966_v4 = vmax.f32 %v9852_v46, %v9856_v9  ;;  %v9967_v42 = vmax.f32 %v9853_v27, %v9857_v38  ;;  %v9398_v18 = vmax.f32 %v9302_v7, 0.0  ;;  %v13296_v26 = vadd.f32 %v13175_v41, %v16690_v40  ;;  %v8905_v5 = vpop.f32.mrb[47].mxu0 }
 0x3e7   : > { %v9626_v48 = vsel %vm9541_vm2, %v9623_v61, %v9625_v33  ;;  %v9628_v6 = vsel %vm9541_vm2, %v9625_v33, %v9627_v57  ;;  %v9397_v17 = vmax.f32 %v9301_v29, 0.0  ;;  %v13297_v21 = vadd.f32 %v8905_v5, %v16691_v3 }
 0x3e8   : > { %10058 = vst [vmem:[%s16365_s17 + $0x118] sm:$0xff] %v9966_v4  ;;  %10059 = vst [vmem:[%s16365_s17 + $0x120] sm:$0xff] %v9967_v42  ;;  %v9858_v30 = vmax.f32 %v9394_v13, %v9626_v48  ;;  %v9859_v45 = vmax.f32 %v9395_v1, %v9628_v6  ;;  %v9631_v47 = vrot.slane %v9398_v18, 1  ;;  %v9304_v11 = vadd.f32 %v13296_v26, %v16335_v12  ;;  %v12594_v52 = vpop.f32.mrb[48].mxu1 }
 0x3e9   : > { %v9629_v39 = vrot.slane %v9397_v17, 1  ;;  %v9303_v63 = vadd.f32 %v13297_v21, %v16335_v12  ;;  %v13178_v8 = vpop.f32.mrb[48].mxu0  ;;  %v4795_v46 = vpop.f32.mrb[49].mxu1 }
 0x3ea   : > { %v9968_v2 = vmax.f32 %v9854_v31, %v9858_v30  ;;  %v9969_v14 = vmax.f32 %v9855_v35, %v9859_v45  ;;  %v9400_v54 = vmax.f32 %v9304_v11, 0.0  ;;  %v13298_v32 = vadd.f32 %v13178_v8, %v12594_v52  ;;  %v8915_v27 = vpop.f32.mrb[49].mxu0 }
 0x3eb   : > { %v9630_v15 = vsel %vm9541_vm2, %v9627_v57, %v9629_v39  ;;  %v9632_v51 = vsel %vm9541_vm2, %v9629_v39, %v9631_v47  ;;  %v9399_v50 = vmax.f32 %v9303_v63, 0.0  ;;  %v13299_v49 = vadd.f32 %v8915_v27, %v4795_v46 }
 0x3ec   : > { %10060 = vst [vmem:[%s16365_s17 + $0x128] sm:$0xff] %v9968_v2  ;;  %10061 = vst [vmem:[%s16365_s17 + $0x130] sm:$0xff] %v9969_v14  ;;  %v9860_v56 = vmax.f32 %v9396_v37, %v9630_v15  ;;  %v9861_v43 = vmax.f32 %v9397_v17, %v9632_v51  ;;  %v9635_v25 = vrot.slane %v9400_v54, 1  ;;  %v9306_v13 = vadd.f32 %v13298_v32, %v16335_v12  ;;  %v12597_v53 = vpop.f32.mrb[50].mxu1 }
 0x3ed   : > { %v9633_v58 = vrot.slane %v9399_v50, 1  ;;  %v9305_v19 = vadd.f32 %v13299_v49, %v16335_v12  ;;  %v13181_v55 = vpop.f32.mrb[50].mxu0  ;;  %v4805_v61 = vpop.f32.mrb[51].mxu1 }
 0x3ee   : > { %v9970_v20 = vmax.f32 %v9856_v9, %v9860_v56  ;;  %v9971_v62 = vmax.f32 %v9857_v38, %v9861_v43  ;;  %v9402_v31 = vmax.f32 %v9306_v13, 0.0  ;;  %v13300_v35 = vadd.f32 %v13181_v55, %v12597_v53  ;;  %v8925_v0 = vpop.f32.mrb[51].mxu0 }
 0x3ef   : > { %v9634_v34 = vsel %vm9541_vm2, %v9631_v47, %v9633_v58  ;;  %v9636_v10 = vsel %vm9541_vm2, %v9633_v58, %v9635_v25  ;;  %v9401_v59 = vmax.f32 %v9305_v19, 0.0  ;;  %v13301_v22 = vadd.f32 %v8925_v0, %v4805_v61 }
 0x3f0   : > { %10062 = vst [vmem:[%s16365_s17 + $0x138] sm:$0xff] %v9970_v20  ;;  %10063 = vst [vmem:[%s16365_s17 + $0x140] sm:$0xff] %v9971_v62  ;;  %v9862_v23 = vmax.f32 %v9398_v18, %v9634_v34  ;;  %v9863_v37 = vmax.f32 %v9399_v50, %v9636_v10  ;;  %v9639_v60 = vrot.slane %v9402_v31, 1  ;;  %v9308_v16 = vadd.f32 %v13300_v35, %v16335_v12  ;;  %v12600_v1 = vpop.f32.mrb[52].mxu1 }
 0x3f1   : > { %v9637_v28 = vrot.slane %v9401_v59, 1  ;;  %v9307_v44 = vadd.f32 %v13301_v22, %v16335_v12  ;;  %v13184_v36 = vpop.f32.mrb[52].mxu0  ;;  %v4815_v7 = vpop.f32.mrb[53].mxu1 }
 0x3f2   : > { %v9972_v24 = vmax.f32 %v9858_v30, %v9862_v23  ;;  %v9973_v9 = vmax.f32 %v9859_v45, %v9863_v37  ;;  %v9404_v38 = vmax.f32 %v9308_v16, 0.0  ;;  %v13302_v57 = vadd.f32 %v13184_v36, %v12600_v1  ;;  %v8935_v33 = vpop.f32.mrb[53].mxu0 }
 0x3f3   : > { %v9638_v29 = vsel %vm9541_vm2, %v9635_v25, %v9637_v28  ;;  %v9640_v41 = vsel %vm9541_vm2, %v9637_v28, %v9639_v60  ;;  %v9403_v4 = vmax.f32 %v9307_v44, 0.0  ;;  %v13303_v42 = vadd.f32 %v8935_v33, %v4815_v7 }
 0x3f4   : > { %10064 = vst [vmem:[%s16365_s17 + $0x148] sm:$0xff] %v9972_v24  ;;  %10065 = vst [vmem:[%s16365_s17 + $0x150] sm:$0xff] %v9973_v9  ;;  %v9864_v18 = vmax.f32 %v9400_v54, %v9638_v29  ;;  %v9865_v40 = vmax.f32 %v9401_v59, %v9640_v41  ;;  %v9643_v26 = vrot.slane %v9404_v38, 1  ;;  %v9310_v5 = vadd.f32 %v13302_v57, %v16335_v12  ;;  %v12603_v17 = vpop.f32.mrb[54].mxu1 }
 0x3f5   : > { %v9641_v48 = vrot.slane %v9403_v4, 1  ;;  %v9309_v6 = vadd.f32 %v13303_v42, %v16335_v12  ;;  %v13187_v3 = vpop.f32.mrb[54].mxu0  ;;  %v4825_v11 = vpop.f32.mrb[55].mxu1 }
 0x3f6   : > { %v9974_v21 = vmax.f32 %v9860_v56, %v9864_v18  ;;  %v9975_v30 = vmax.f32 %v9861_v43, %v9865_v40  ;;  %v9406_v45 = vmax.f32 %v9310_v5, 0.0  ;;  %v13304_v47 = vadd.f32 %v13187_v3, %v12603_v17  ;;  %v8945_v39 = vpop.f32.mrb[55].mxu0 }
 0x3f7   : > { %v9642_v63 = vsel %vm9541_vm2, %v9639_v60, %v9641_v48  ;;  %v9644_v52 = vsel %vm9541_vm2, %v9641_v48, %v9643_v26  ;;  %v9405_v8 = vmax.f32 %v9309_v6, 0.0  ;;  %v13305_v2 = vadd.f32 %v8945_v39, %v4825_v11 }
 0x3f8   : > { %10066 = vst [vmem:[%s16365_s17 + $0x158] sm:$0xff] %v9974_v21  ;;  %10067 = vst [vmem:[%s16365_s17 + $0x160] sm:$0xff] %v9975_v30  ;;  %v9866_v14 = vmax.f32 %v9402_v31, %v9642_v63  ;;  %v9867_v54 = vmax.f32 %v9403_v4, %v9644_v52  ;;  %v9647_v32 = vrot.slane %v9406_v45, 1  ;;  %v9312_v46 = vadd.f32 %v13304_v47, %v16335_v12  ;;  %v12606_v51 = vpop.f32.mrb[56].mxu1 }
 0x3f9   : > { %v9645_v27 = vrot.slane %v9405_v8, 1  ;;  %v9311_v15 = vadd.f32 %v13305_v2, %v16335_v12  ;;  %v13190_v50 = vpop.f32.mrb[56].mxu0  ;;  %v4835_v13 = vpop.f32.mrb[57].mxu1 }
 0x3fa   : > { %v9976_v49 = vmax.f32 %v9862_v23, %v9866_v14  ;;  %v9977_v56 = vmax.f32 %v9863_v37, %v9867_v54  ;;  %v9408_v43 = vmax.f32 %v9312_v46, 0.0  ;;  %v13306_v25 = vadd.f32 %v13190_v50, %v12606_v51  ;;  %v8955_v58 = vpop.f32.mrb[57].mxu0 }
 0x3fb   : > { %v9646_v19 = vsel %vm9541_vm2, %v9643_v26, %v9645_v27  ;;  %v9648_v53 = vsel %vm9541_vm2, %v9645_v27, %v9647_v32  ;;  %v9407_v55 = vmax.f32 %v9311_v15, 0.0  ;;  %v13307_v20 = vadd.f32 %v8955_v58, %v4835_v13 }
 0x3fc   : > { %10068 = vst [vmem:[%s16365_s17 + $0x168] sm:$0xff] %v9976_v49  ;;  %10069 = vst [vmem:[%s16365_s17 + $0x170] sm:$0xff] %v9977_v56  ;;  %v9868_v62 = vmax.f32 %v9404_v38, %v9646_v19  ;;  %v9869_v31 = vmax.f32 %v9405_v8, %v9648_v53  ;;  %v9651_v35 = vrot.slane %v9408_v43, 1  ;;  %v9314_v61 = vadd.f32 %v13306_v25, %v16335_v12  ;;  %v12609_v10 = vpop.f32.mrb[58].mxu1 }
 0x3fd   : > { %v9649_v0 = vrot.slane %v9407_v55, 1  ;;  %v9313_v34 = vadd.f32 %v13307_v20, %v16335_v12  ;;  %v13193_v59 = vpop.f32.mrb[58].mxu0  ;;  %v4845_v16 = vpop.f32.mrb[59].mxu1  ;;  %v16556_v12 = vld [vmem:[%s16684_s2] ss:$0 sm:$0xff] }
 0x3fe   : > { %v9978_v22 = vmax.f32 %v9864_v18, %v9868_v62  ;;  %v9979_v23 = vmax.f32 %v9865_v40, %v9869_v31  ;;  %v9410_v37 = vmax.f32 %v9314_v61, 0.0  ;;  %v13308_v60 = vadd.f32 %v13193_v59, %v12609_v10  ;;  %v8965_v28 = vpop.f32.mrb[59].mxu0 }
 0x3ff   : > { %v9650_v44 = vsel %vm9541_vm2, %v9647_v32, %v9649_v0  ;;  %v9652_v1 = vsel %vm9541_vm2, %v9649_v0, %v9651_v35  ;;  %v9409_v36 = vmax.f32 %v9313_v34, 0.0  ;;  %v13309_v24 = vadd.f32 %v8965_v28, %v4845_v16 }
 0x400   : > { %10070 = vst [vmem:[%s16365_s17 + $0x178] sm:$0xff] %v9978_v22  ;;  %10071 = vst [vmem:[%s16365_s17 + $0x180] sm:$0xff] %v9979_v23  ;;  %v9870_v9 = vmax.f32 %v9406_v45, %v9650_v44  ;;  %v9871_v38 = vmax.f32 %v9407_v55, %v9652_v1  ;;  %v9655_v57 = vrot.slane %v9410_v37, 1  ;;  %v9316_v7 = vadd.f32 %v16556_v12, %v13308_v60  ;;  %v12612_v41 = vpop.f32.mrb[60].mxu1 }
 0x401   : > { %v9653_v33 = vrot.slane %v9409_v36, 1  ;;  %v9315_v29 = vadd.f32 %v16556_v12, %v13309_v24  ;;  %v13196_v4 = vpop.f32.mrb[60].mxu0  ;;  %v4855_v5 = vpop.f32.mrb[61].mxu1 }
 0x402   : > { %v9980_v42 = vmax.f32 %v9866_v14, %v9870_v9  ;;  %v9981_v18 = vmax.f32 %v9867_v54, %v9871_v38  ;;  %v9412_v40 = vmax.f32 %v9316_v7, 0.0  ;;  %v13310_v26 = vadd.f32 %v13196_v4, %v12612_v41  ;;  %v8975_v48 = vpop.f32.mrb[61].mxu0 }
 0x403   : > { %v9654_v6 = vsel %vm9541_vm2, %v9651_v35, %v9653_v33  ;;  %v9656_v17 = vsel %vm9541_vm2, %v9653_v33, %v9655_v57  ;;  %v9411_v3 = vmax.f32 %v9315_v29, 0.0  ;;  %v13311_v21 = vadd.f32 %v8975_v48, %v4855_v5 }
 0x404   : > { %10072 = vst [vmem:[%s16365_s17 + $0x188] sm:$0xff] %v9980_v42  ;;  %10073 = vst [vmem:[%s16365_s17 + $0x190] sm:$0xff] %v9981_v18  ;;  %v9872_v30 = vmax.f32 %v9408_v43, %v9654_v6  ;;  %v9873_v45 = vmax.f32 %v9409_v36, %v9656_v17  ;;  %v9659_v47 = vrot.slane %v9412_v40, 1  ;;  %v9318_v11 = vadd.f32 %v16556_v12, %v13310_v26  ;;  %v12615_v52 = vpop.f32.mrb[62].mxu1 }
 0x405   : > { %v9657_v39 = vrot.slane %v9411_v3, 1  ;;  %v9317_v63 = vadd.f32 %v16556_v12, %v13311_v21  ;;  %v13199_v8 = vpop.f32.mrb[62].mxu0  ;;  %v4865_v46 = vpop.f32.mrb[63].mxu1 }
 0x406   : > { %v9982_v2 = vmax.f32 %v9868_v62, %v9872_v30  ;;  %v9983_v14 = vmax.f32 %v9869_v31, %v9873_v45  ;;  %v9414_v54 = vmax.f32 %v9318_v11, 0.0  ;;  %v13312_v32 = vadd.f32 %v13199_v8, %v12615_v52  ;;  %v8985_v27 = vpop.f32.mrb[63].mxu0 }
 0x407   : > { %v9658_v15 = vsel %vm9541_vm2, %v9655_v57, %v9657_v39  ;;  %v9660_v51 = vsel %vm9541_vm2, %v9657_v39, %v9659_v47  ;;  %v9413_v50 = vmax.f32 %v9317_v63, 0.0  ;;  %v13313_v49 = vadd.f32 %v8985_v27, %v4865_v46 }
 0x408   : > { %10074 = vst [vmem:[%s16365_s17 + $0x198] sm:$0xff] %v9982_v2  ;;  %10075 = vst [vmem:[%s16365_s17 + $0x1a0] sm:$0xff] %v9983_v14  ;;  %v9874_v56 = vmax.f32 %v9410_v37, %v9658_v15  ;;  %v9875_v43 = vmax.f32 %v9411_v3, %v9660_v51  ;;  %v9663_v25 = vrot.slane %v9414_v54, 1  ;;  %v9320_v13 = vadd.f32 %v16556_v12, %v13312_v32  ;;  %v12618_v53 = vpop.f32.mrb[64].mxu1 }
 0x409   : > { %v9661_v58 = vrot.slane %v9413_v50, 1  ;;  %v9319_v19 = vadd.f32 %v16556_v12, %v13313_v49  ;;  %v13202_v55 = vpop.f32.mrb[64].mxu0  ;;  %v4875_v61 = vpop.f32.mrb[65].mxu1 }
 0x40a   : > { %v9984_v20 = vmax.f32 %v9870_v9, %v9874_v56  ;;  %v9985_v62 = vmax.f32 %v9871_v38, %v9875_v43  ;;  %v9416_v31 = vmax.f32 %v9320_v13, 0.0  ;;  %v13314_v35 = vadd.f32 %v13202_v55, %v12618_v53  ;;  %v8995_v0 = vpop.f32.mrb[65].mxu0 }
 0x40b   : > { %v9662_v34 = vsel %vm9541_vm2, %v9659_v47, %v9661_v58  ;;  %v9664_v10 = vsel %vm9541_vm2, %v9661_v58, %v9663_v25  ;;  %v9415_v59 = vmax.f32 %v9319_v19, 0.0  ;;  %v13315_v22 = vadd.f32 %v8995_v0, %v4875_v61 }
 0x40c   : > { %10076 = vst [vmem:[%s16365_s17 + $0x1a8] sm:$0xff] %v9984_v20  ;;  %10077 = vst [vmem:[%s16365_s17 + $0x1b0] sm:$0xff] %v9985_v62  ;;  %v9876_v23 = vmax.f32 %v9412_v40, %v9662_v34  ;;  %v9877_v37 = vmax.f32 %v9413_v50, %v9664_v10  ;;  %v9667_v60 = vrot.slane %v9416_v31, 1  ;;  %v9322_v16 = vadd.f32 %v16556_v12, %v13314_v35  ;;  %v12621_v1 = vpop.f32.mrb[66].mxu1 }
 0x40d   : > { %v9665_v28 = vrot.slane %v9415_v59, 1  ;;  %v9321_v44 = vadd.f32 %v16556_v12, %v13315_v22  ;;  %v13205_v36 = vpop.f32.mrb[66].mxu0  ;;  %v4885_v7 = vpop.f32.mrb[67].mxu1 }
 0x40e   : > { %v9986_v24 = vmax.f32 %v9872_v30, %v9876_v23  ;;  %v9987_v9 = vmax.f32 %v9873_v45, %v9877_v37  ;;  %v9418_v38 = vmax.f32 %v9322_v16, 0.0  ;;  %v13316_v57 = vadd.f32 %v13205_v36, %v12621_v1  ;;  %v9005_v33 = vpop.f32.mrb[67].mxu0 }
 0x40f   : > { %v9666_v29 = vsel %vm9541_vm2, %v9663_v25, %v9665_v28  ;;  %v9668_v41 = vsel %vm9541_vm2, %v9665_v28, %v9667_v60  ;;  %v9417_v4 = vmax.f32 %v9321_v44, 0.0  ;;  %v13317_v42 = vadd.f32 %v9005_v33, %v4885_v7 }
 0x410   : > { %10078 = vst [vmem:[%s16365_s17 + $0x1b8] sm:$0xff] %v9986_v24  ;;  %10079 = vst [vmem:[%s16365_s17 + $0x1c0] sm:$0xff] %v9987_v9  ;;  %v9878_v18 = vmax.f32 %v9414_v54, %v9666_v29  ;;  %v9879_v40 = vmax.f32 %v9415_v59, %v9668_v41  ;;  %v9671_v26 = vrot.slane %v9418_v38, 1  ;;  %v9324_v5 = vadd.f32 %v16556_v12, %v13316_v57  ;;  %v12624_v17 = vpop.f32.mrb[68].mxu1 }
 0x411   : > { %v9669_v48 = vrot.slane %v9417_v4, 1  ;;  %v9323_v6 = vadd.f32 %v16556_v12, %v13317_v42  ;;  %v13208_v3 = vpop.f32.mrb[68].mxu0  ;;  %v4895_v11 = vpop.f32.mrb[69].mxu1 }
 0x412   : > { %v9988_v21 = vmax.f32 %v9874_v56, %v9878_v18  ;;  %v9989_v30 = vmax.f32 %v9875_v43, %v9879_v40  ;;  %v9420_v45 = vmax.f32 %v9324_v5, 0.0  ;;  %v13318_v47 = vadd.f32 %v13208_v3, %v12624_v17  ;;  %v9015_v39 = vpop.f32.mrb[69].mxu0 }
 0x413   : > { %v9670_v63 = vsel %vm9541_vm2, %v9667_v60, %v9669_v48  ;;  %v9672_v52 = vsel %vm9541_vm2, %v9669_v48, %v9671_v26  ;;  %v9419_v8 = vmax.f32 %v9323_v6, 0.0  ;;  %v13319_v2 = vadd.f32 %v9015_v39, %v4895_v11 }
 0x414   : > { %10080 = vst [vmem:[%s16365_s17 + $0x1c8] sm:$0xff] %v9988_v21  ;;  %10081 = vst [vmem:[%s16365_s17 + $0x1d0] sm:$0xff] %v9989_v30  ;;  %v9880_v14 = vmax.f32 %v9416_v31, %v9670_v63  ;;  %v9881_v54 = vmax.f32 %v9417_v4, %v9672_v52  ;;  %v9675_v32 = vrot.slane %v9420_v45, 1  ;;  %v9326_v46 = vadd.f32 %v16556_v12, %v13318_v47  ;;  %v12627_v51 = vpop.f32.mrb[70].mxu1 }
 0x415   : > { %v9673_v27 = vrot.slane %v9419_v8, 1  ;;  %v9325_v15 = vadd.f32 %v16556_v12, %v13319_v2  ;;  %v13211_v50 = vpop.f32.mrb[70].mxu0  ;;  %v4905_v13 = vpop.f32.mrb[71].mxu1 }
 0x416   : > { %v9990_v49 = vmax.f32 %v9876_v23, %v9880_v14  ;;  %v9991_v56 = vmax.f32 %v9877_v37, %v9881_v54  ;;  %v9422_v43 = vmax.f32 %v9326_v46, 0.0  ;;  %v13320_v25 = vadd.f32 %v13211_v50, %v12627_v51  ;;  %v9025_v58 = vpop.f32.mrb[71].mxu0 }
 0x417   : > { %v9674_v19 = vsel %vm9541_vm2, %v9671_v26, %v9673_v27  ;;  %v9676_v53 = vsel %vm9541_vm2, %v9673_v27, %v9675_v32  ;;  %v9421_v55 = vmax.f32 %v9325_v15, 0.0  ;;  %v13321_v20 = vadd.f32 %v9025_v58, %v4905_v13 }
 0x418   : > { %10082 = vst [vmem:[%s16365_s17 + $0x1d8] sm:$0xff] %v9990_v49  ;;  %10083 = vst [vmem:[%s16365_s17 + $0x1e0] sm:$0xff] %v9991_v56  ;;  %v9882_v62 = vmax.f32 %v9418_v38, %v9674_v19  ;;  %v9883_v31 = vmax.f32 %v9419_v8, %v9676_v53  ;;  %v9679_v35 = vrot.slane %v9422_v43, 1  ;;  %v9328_v61 = vadd.f32 %v16556_v12, %v13320_v25  ;;  %v12630_v10 = vpop.f32.mrb[72].mxu1 }
 0x419   : > { %v9677_v0 = vrot.slane %v9421_v55, 1  ;;  %v9327_v34 = vadd.f32 %v16556_v12, %v13321_v20  ;;  %v13214_v59 = vpop.f32.mrb[72].mxu0  ;;  %v4915_v16 = vpop.f32.mrb[73].mxu1 }
 0x41a   : > { %v9992_v22 = vmax.f32 %v9878_v18, %v9882_v62  ;;  %v9993_v23 = vmax.f32 %v9879_v40, %v9883_v31  ;;  %v9424_v37 = vmax.f32 %v9328_v61, 0.0  ;;  %v13322_v60 = vadd.f32 %v13214_v59, %v12630_v10  ;;  %v9035_v28 = vpop.f32.mrb[73].mxu0 }
 0x41b   : > { %v9678_v44 = vsel %vm9541_vm2, %v9675_v32, %v9677_v0  ;;  %v9680_v1 = vsel %vm9541_vm2, %v9677_v0, %v9679_v35  ;;  %v9423_v36 = vmax.f32 %v9327_v34, 0.0  ;;  %v13323_v24 = vadd.f32 %v9035_v28, %v4915_v16 }
 0x41c   : > { %10084 = vst [vmem:[%s16365_s17 + $0x1e8] sm:$0xff] %v9992_v22  ;;  %10085 = vst [vmem:[%s16365_s17 + $0x1f0] sm:$0xff] %v9993_v23  ;;  %v9884_v9 = vmax.f32 %v9420_v45, %v9678_v44  ;;  %v9885_v38 = vmax.f32 %v9421_v55, %v9680_v1  ;;  %v9683_v57 = vrot.slane %v9424_v37, 1  ;;  %v9330_v7 = vadd.f32 %v16556_v12, %v13322_v60  ;;  %v12633_v41 = vpop.f32.mrb[74].mxu1 }
 0x41d   : > { %v9681_v33 = vrot.slane %v9423_v36, 1  ;;  %v9329_v29 = vadd.f32 %v16556_v12, %v13323_v24  ;;  %v13217_v4 = vpop.f32.mrb[74].mxu0  ;;  %v4925_v5 = vpop.f32.mrb[75].mxu1 }
 0x41e   : > { %v9994_v42 = vmax.f32 %v9880_v14, %v9884_v9  ;;  %v9995_v18 = vmax.f32 %v9881_v54, %v9885_v38  ;;  %v9426_v40 = vmax.f32 %v9330_v7, 0.0  ;;  %v13324_v26 = vadd.f32 %v13217_v4, %v12633_v41  ;;  %v9045_v48 = vpop.f32.mrb[75].mxu0 }
 0x41f   : > { %v9682_v6 = vsel %vm9541_vm2, %v9679_v35, %v9681_v33  ;;  %v9684_v17 = vsel %vm9541_vm2, %v9681_v33, %v9683_v57  ;;  %v9425_v3 = vmax.f32 %v9329_v29, 0.0  ;;  %v13325_v21 = vadd.f32 %v9045_v48, %v4925_v5 }
 0x420   : > { %10086 = vst [vmem:[%s16365_s17 + $0x1f8] sm:$0xff] %v9994_v42  ;;  %10087 = vst [vmem:[%s16365_s17 + $0x200] sm:$0xff] %v9995_v18  ;;  %v9886_v30 = vmax.f32 %v9422_v43, %v9682_v6  ;;  %v9887_v45 = vmax.f32 %v9423_v36, %v9684_v17  ;;  %v9687_v47 = vrot.slane %v9426_v40, 1  ;;  %v9332_v11 = vadd.f32 %v16556_v12, %v13324_v26  ;;  %v12636_v52 = vpop.f32.mrb[76].mxu1 }
 0x421   : > { %v9685_v39 = vrot.slane %v9425_v3, 1  ;;  %v9331_v63 = vadd.f32 %v16556_v12, %v13325_v21  ;;  %v13220_v8 = vpop.f32.mrb[76].mxu0  ;;  %v4935_v46 = vpop.f32.mrb[77].mxu1 }
 0x422   : > { %v9996_v2 = vmax.f32 %v9882_v62, %v9886_v30  ;;  %v9997_v14 = vmax.f32 %v9883_v31, %v9887_v45  ;;  %v9428_v54 = vmax.f32 %v9332_v11, 0.0  ;;  %v13326_v32 = vadd.f32 %v13220_v8, %v12636_v52  ;;  %v9055_v27 = vpop.f32.mrb[77].mxu0 }
 0x423   : > { %v9686_v15 = vsel %vm9541_vm2, %v9683_v57, %v9685_v39  ;;  %v9688_v51 = vsel %vm9541_vm2, %v9685_v39, %v9687_v47  ;;  %v9427_v50 = vmax.f32 %v9331_v63, 0.0  ;;  %v13327_v49 = vadd.f32 %v9055_v27, %v4935_v46 }
 0x424   : > { %10088 = vst [vmem:[%s16365_s17 + $0x208] sm:$0xff] %v9996_v2  ;;  %10089 = vst [vmem:[%s16365_s17 + $0x210] sm:$0xff] %v9997_v14  ;;  %v9888_v56 = vmax.f32 %v9424_v37, %v9686_v15  ;;  %v9889_v43 = vmax.f32 %v9425_v3, %v9688_v51  ;;  %v9691_v25 = vrot.slane %v9428_v54, 1  ;;  %v9334_v13 = vadd.f32 %v16556_v12, %v13326_v32  ;;  %v12639_v53 = vpop.f32.mrb[78].mxu1 }
 0x425   : > { %v9689_v58 = vrot.slane %v9427_v50, 1  ;;  %v9333_v19 = vadd.f32 %v16556_v12, %v13327_v49  ;;  %v13223_v55 = vpop.f32.mrb[78].mxu0  ;;  %v4945_v61 = vpop.f32.mrb[79].mxu1 }
 0x426   : > { %v9998_v20 = vmax.f32 %v9884_v9, %v9888_v56  ;;  %v9999_v62 = vmax.f32 %v9885_v38, %v9889_v43  ;;  %v9430_v31 = vmax.f32 %v9334_v13, 0.0  ;;  %v13328_v35 = vadd.f32 %v13223_v55, %v12639_v53  ;;  %v9065_v0 = vpop.f32.mrb[79].mxu0 }
 0x427   : > { %v9690_v34 = vsel %vm9541_vm2, %v9687_v47, %v9689_v58  ;;  %v9692_v10 = vsel %vm9541_vm2, %v9689_v58, %v9691_v25  ;;  %v9429_v59 = vmax.f32 %v9333_v19, 0.0  ;;  %v13329_v22 = vadd.f32 %v9065_v0, %v4945_v61 }
 0x428   : > { %10090 = vst [vmem:[%s16365_s17 + $0x218] sm:$0xff] %v9998_v20  ;;  %10091 = vst [vmem:[%s16365_s17 + $0x220] sm:$0xff] %v9999_v62  ;;  %v9890_v23 = vmax.f32 %v9426_v40, %v9690_v34  ;;  %v9891_v37 = vmax.f32 %v9427_v50, %v9692_v10  ;;  %v9695_v60 = vrot.slane %v9430_v31, 1  ;;  %v9336_v16 = vadd.f32 %v16556_v12, %v13328_v35  ;;  %v12642_v1 = vpop.f32.mrb[80].mxu1 }
 0x429   : > { %v9693_v28 = vrot.slane %v9429_v59, 1  ;;  %v9335_v44 = vadd.f32 %v16556_v12, %v13329_v22  ;;  %v13226_v36 = vpop.f32.mrb[80].mxu0  ;;  %v4955_v7 = vpop.f32.mrb[81].mxu1 }
 0x42a   : > { %v10000_v24 = vmax.f32 %v9886_v30, %v9890_v23  ;;  %v10001_v9 = vmax.f32 %v9887_v45, %v9891_v37  ;;  %v9432_v38 = vmax.f32 %v9336_v16, 0.0  ;;  %v13330_v57 = vadd.f32 %v13226_v36, %v12642_v1  ;;  %v9075_v33 = vpop.f32.mrb[81].mxu0 }
 0x42b   : > { %v9694_v29 = vsel %vm9541_vm2, %v9691_v25, %v9693_v28  ;;  %v9696_v41 = vsel %vm9541_vm2, %v9693_v28, %v9695_v60  ;;  %v9431_v4 = vmax.f32 %v9335_v44, 0.0  ;;  %v13331_v42 = vadd.f32 %v9075_v33, %v4955_v7 }
 0x42c   : > { %10092 = vst [vmem:[%s16365_s17 + $0x228] sm:$0xff] %v10000_v24  ;;  %10093 = vst [vmem:[%s16365_s17 + $0x230] sm:$0xff] %v10001_v9  ;;  %v9892_v18 = vmax.f32 %v9428_v54, %v9694_v29  ;;  %v9893_v40 = vmax.f32 %v9429_v59, %v9696_v41  ;;  %v9699_v26 = vrot.slane %v9432_v38, 1  ;;  %v9338_v5 = vadd.f32 %v16556_v12, %v13330_v57  ;;  %v12645_v17 = vpop.f32.mrb[82].mxu1 }
 0x42d   : > { %v9697_v48 = vrot.slane %v9431_v4, 1  ;;  %v9337_v6 = vadd.f32 %v16556_v12, %v13331_v42  ;;  %v13229_v3 = vpop.f32.mrb[82].mxu0  ;;  %v4965_v11 = vpop.f32.mrb[83].mxu1 }
 0x42e   : > { %v10002_v21 = vmax.f32 %v9888_v56, %v9892_v18  ;;  %v10003_v30 = vmax.f32 %v9889_v43, %v9893_v40  ;;  %v9434_v45 = vmax.f32 %v9338_v5, 0.0  ;;  %v13332_v47 = vadd.f32 %v13229_v3, %v12645_v17  ;;  %v9085_v39 = vpop.f32.mrb[83].mxu0 }
 0x42f   : > { %v9698_v63 = vsel %vm9541_vm2, %v9695_v60, %v9697_v48  ;;  %v9700_v52 = vsel %vm9541_vm2, %v9697_v48, %v9699_v26  ;;  %v9433_v8 = vmax.f32 %v9337_v6, 0.0  ;;  %v13333_v2 = vadd.f32 %v9085_v39, %v4965_v11 }
 0x430   : > { %10094 = vst [vmem:[%s16365_s17 + $0x238] sm:$0xff] %v10002_v21  ;;  %10095 = vst [vmem:[%s16365_s17 + $0x240] sm:$0xff] %v10003_v30  ;;  %v9894_v14 = vmax.f32 %v9430_v31, %v9698_v63  ;;  %v9895_v54 = vmax.f32 %v9431_v4, %v9700_v52  ;;  %v9703_v32 = vrot.slane %v9434_v45, 1  ;;  %v9340_v46 = vadd.f32 %v16556_v12, %v13332_v47  ;;  %v12648_v51 = vpop.f32.mrb[84].mxu1 }
 0x431   : > { %v9701_v27 = vrot.slane %v9433_v8, 1  ;;  %v9339_v15 = vadd.f32 %v16556_v12, %v13333_v2  ;;  %v13232_v50 = vpop.f32.mrb[84].mxu0  ;;  %v4975_v13 = vpop.f32.mrb[85].mxu1 }
 0x432   : > { %v10004_v49 = vmax.f32 %v9890_v23, %v9894_v14  ;;  %v10005_v56 = vmax.f32 %v9891_v37, %v9895_v54  ;;  %v9436_v43 = vmax.f32 %v9340_v46, 0.0  ;;  %v13334_v25 = vadd.f32 %v13232_v50, %v12648_v51  ;;  %v9095_v58 = vpop.f32.mrb[85].mxu0 }
 0x433   : > { %v9702_v19 = vsel %vm9541_vm2, %v9699_v26, %v9701_v27  ;;  %v9704_v53 = vsel %vm9541_vm2, %v9701_v27, %v9703_v32  ;;  %v9435_v55 = vmax.f32 %v9339_v15, 0.0  ;;  %v13335_v20 = vadd.f32 %v9095_v58, %v4975_v13 }
 0x434   : > { %10096 = vst [vmem:[%s16365_s17 + $0x248] sm:$0xff] %v10004_v49  ;;  %10097 = vst [vmem:[%s16365_s17 + $0x250] sm:$0xff] %v10005_v56  ;;  %v9896_v62 = vmax.f32 %v9432_v38, %v9702_v19  ;;  %v9897_v31 = vmax.f32 %v9433_v8, %v9704_v53  ;;  %v9707_v35 = vrot.slane %v9436_v43, 1  ;;  %v9342_v61 = vadd.f32 %v16556_v12, %v13334_v25  ;;  %v12651_v10 = vpop.f32.mrb[86].mxu1 }
 0x435   : > { %v9705_v0 = vrot.slane %v9435_v55, 1  ;;  %v9341_v34 = vadd.f32 %v16556_v12, %v13335_v20  ;;  %v13235_v59 = vpop.f32.mrb[86].mxu0  ;;  %v4985_v16 = vpop.f32.mrb[87].mxu1 }
 0x436   : > { %v10006_v22 = vmax.f32 %v9892_v18, %v9896_v62  ;;  %v10007_v23 = vmax.f32 %v9893_v40, %v9897_v31  ;;  %v9438_v37 = vmax.f32 %v9342_v61, 0.0  ;;  %v13336_v60 = vadd.f32 %v13235_v59, %v12651_v10  ;;  %v9105_v28 = vpop.f32.mrb[87].mxu0 }
 0x437   : > { %v9706_v44 = vsel %vm9541_vm2, %v9703_v32, %v9705_v0  ;;  %v9708_v1 = vsel %vm9541_vm2, %v9705_v0, %v9707_v35  ;;  %v9437_v36 = vmax.f32 %v9341_v34, 0.0  ;;  %v13337_v24 = vadd.f32 %v9105_v28, %v4985_v16 }
 0x438   : > { %10098 = vst [vmem:[%s16365_s17 + $0x258] sm:$0xff] %v10006_v22  ;;  %10099 = vst [vmem:[%s16365_s17 + $0x260] sm:$0xff] %v10007_v23  ;;  %v9898_v9 = vmax.f32 %v9434_v45, %v9706_v44  ;;  %v9899_v38 = vmax.f32 %v9435_v55, %v9708_v1  ;;  %v9711_v57 = vrot.slane %v9438_v37, 1  ;;  %v9344_v7 = vadd.f32 %v16556_v12, %v13336_v60  ;;  %v12654_v41 = vpop.f32.mrb[88].mxu1 }
 0x439   : > { %v9709_v33 = vrot.slane %v9437_v36, 1  ;;  %v9343_v29 = vadd.f32 %v16556_v12, %v13337_v24  ;;  %v13238_v4 = vpop.f32.mrb[88].mxu0  ;;  %v4995_v5 = vpop.f32.mrb[89].mxu1 }
 0x43a   : > { %v10008_v42 = vmax.f32 %v9894_v14, %v9898_v9  ;;  %v10009_v18 = vmax.f32 %v9895_v54, %v9899_v38  ;;  %v9440_v40 = vmax.f32 %v9344_v7, 0.0  ;;  %v13338_v26 = vadd.f32 %v13238_v4, %v12654_v41  ;;  %v9115_v48 = vpop.f32.mrb[89].mxu0 }
 0x43b   : > { %v9710_v6 = vsel %vm9541_vm2, %v9707_v35, %v9709_v33  ;;  %v9712_v17 = vsel %vm9541_vm2, %v9709_v33, %v9711_v57  ;;  %v9439_v3 = vmax.f32 %v9343_v29, 0.0  ;;  %v13339_v21 = vadd.f32 %v9115_v48, %v4995_v5 }
 0x43c   : > { %10100 = vst [vmem:[%s16365_s17 + $0x268] sm:$0xff] %v10008_v42  ;;  %10101 = vst [vmem:[%s16365_s17 + $0x270] sm:$0xff] %v10009_v18  ;;  %v9900_v30 = vmax.f32 %v9436_v43, %v9710_v6  ;;  %v9901_v45 = vmax.f32 %v9437_v36, %v9712_v17  ;;  %v9715_v47 = vrot.slane %v9440_v40, 1  ;;  %v9346_v11 = vadd.f32 %v16556_v12, %v13338_v26  ;;  %v12657_v52 = vpop.f32.mrb[90].mxu1 }
 0x43d   : > { %v9713_v39 = vrot.slane %v9439_v3, 1  ;;  %v9345_v63 = vadd.f32 %v16556_v12, %v13339_v21  ;;  %v13241_v8 = vpop.f32.mrb[90].mxu0  ;;  %v5005_v46 = vpop.f32.mrb[91].mxu1 }
 0x43e   : > { %v10010_v2 = vmax.f32 %v9896_v62, %v9900_v30  ;;  %v10011_v14 = vmax.f32 %v9897_v31, %v9901_v45  ;;  %v9442_v54 = vmax.f32 %v9346_v11, 0.0  ;;  %v13340_v32 = vadd.f32 %v13241_v8, %v12657_v52  ;;  %v9125_v27 = vpop.f32.mrb[91].mxu0 }
 0x43f   : > { %v9714_v15 = vsel %vm9541_vm2, %v9711_v57, %v9713_v39  ;;  %v9716_v51 = vsel %vm9541_vm2, %v9713_v39, %v9715_v47  ;;  %v9441_v50 = vmax.f32 %v9345_v63, 0.0  ;;  %v13341_v49 = vadd.f32 %v9125_v27, %v5005_v46 }
 0x440   : > { %10102 = vst [vmem:[%s16365_s17 + $0x278] sm:$0xff] %v10010_v2  ;;  %10103 = vst [vmem:[%s16365_s17 + $0x280] sm:$0xff] %v10011_v14  ;;  %v9902_v56 = vmax.f32 %v9438_v37, %v9714_v15  ;;  %v9903_v43 = vmax.f32 %v9439_v3, %v9716_v51  ;;  %v9719_v25 = vrot.slane %v9442_v54, 1  ;;  %v9348_v13 = vadd.f32 %v16556_v12, %v13340_v32  ;;  %v12660_v53 = vpop.f32.mrb[92].mxu1 }
 0x441   : > { %v9717_v58 = vrot.slane %v9441_v50, 1  ;;  %v9347_v19 = vadd.f32 %v16556_v12, %v13341_v49  ;;  %v13244_v55 = vpop.f32.mrb[92].mxu0  ;;  %v5015_v61 = vpop.f32.mrb[93].mxu1 }
 0x442   : > { %v10012_v20 = vmax.f32 %v9898_v9, %v9902_v56  ;;  %v10013_v62 = vmax.f32 %v9899_v38, %v9903_v43  ;;  %v9444_v31 = vmax.f32 %v9348_v13, 0.0  ;;  %v13342_v35 = vadd.f32 %v13244_v55, %v12660_v53  ;;  %v9135_v0 = vpop.f32.mrb[93].mxu0 }
 0x443   : > { %v9718_v34 = vsel %vm9541_vm2, %v9715_v47, %v9717_v58  ;;  %v9720_v10 = vsel %vm9541_vm2, %v9717_v58, %v9719_v25  ;;  %v9443_v59 = vmax.f32 %v9347_v19, 0.0  ;;  %v13343_v22 = vadd.f32 %v9135_v0, %v5015_v61 }
 0x444   : > { %10104 = vst [vmem:[%s16365_s17 + $0x288] sm:$0xff] %v10012_v20  ;;  %10105 = vst [vmem:[%s16365_s17 + $0x290] sm:$0xff] %v10013_v62  ;;  %v9904_v23 = vmax.f32 %v9440_v40, %v9718_v34  ;;  %v9905_v37 = vmax.f32 %v9441_v50, %v9720_v10  ;;  %v9723_v60 = vrot.slane %v9444_v31, 1  ;;  %v9350_v16 = vadd.f32 %v16556_v12, %v13342_v35  ;;  %v12663_v1 = vpop.f32.mrb[94].mxu1 }
 0x445   : > { %v9721_v28 = vrot.slane %v9443_v59, 1  ;;  %v9349_v44 = vadd.f32 %v16556_v12, %v13343_v22  ;;  %v13247_v36 = vpop.f32.mrb[94].mxu0  ;;  %v5025_v57 = vpop.f32.mrb[95].mxu1 }
 0x446   : > { %v10014_v24 = vmax.f32 %v9900_v30, %v9904_v23  ;;  %v10015_v9 = vmax.f32 %v9901_v45, %v9905_v37  ;;  %v9446_v38 = vmax.f32 %v9350_v16, 0.0  ;;  %v9145_v7 = vpop.f32.mrb[95].mxu0  ;;  %v13344_v4 = vadd.f32 %v13247_v36, %v12663_v1 }
 0x447   : > { %v9722_v33 = vsel %vm9541_vm2, %v9719_v25, %v9721_v28  ;;  %v9724_v29 = vsel %vm9541_vm2, %v9721_v28, %v9723_v60  ;;  %v9445_v41 = vmax.f32 %v9349_v44, 0.0  ;;  %v13345_v26 = vadd.f32 %v9145_v7, %v5025_v57 }
 0x448   : > { %10106 = vst [vmem:[%s16365_s17 + $0x298] sm:$0xff] %v10014_v24  ;;  %10107 = vst [vmem:[%s16365_s17 + $0x2a0] sm:$0xff] %v10015_v9  ;;  %v9906_v42 = vmax.f32 %v9442_v54, %v9722_v33  ;;  %v9907_v18 = vmax.f32 %v9443_v59, %v9724_v29  ;;  %v9915_v40 = vrot.slane %v9446_v38, 1  ;;  %v9352_v48 = vadd.f32 %v16556_v12, %v13344_v4 }
 0x449   : > { %v9913_v5 = vrot.slane %v9445_v41, 1  ;;  %v9351_v3 = vadd.f32 %v16556_v12, %v13345_v26  ;;  %v9908_v14 = vmax.f32 %v9444_v31, %v9723_v60 }
 0x44a   : > { %v10016_v6 = vmax.f32 %v9902_v56, %v9906_v42  ;;  %v10017_v17 = vmax.f32 %v9903_v43, %v9907_v18  ;;  %v9448_v45 = vmax.f32 %v9352_v48, 0.0 }
 0x44b   : > { %v9914_v21 = vsel %vm9541_vm2, %v9723_v60, %v9913_v5  ;;  %v9916_v30 = vsel %vm9541_vm2, %v9913_v5, %v9915_v40  ;;  %v9447_v39 = vmax.f32 %v9351_v3, 0.0 }
 0x44c   : > { %10108 = vst [vmem:[%s16365_s17 + $0x2a8] sm:$0xff] %v10016_v6  ;;  %10109 = vst [vmem:[%s16365_s17 + $0x2b0] sm:$0xff] %v10017_v17  ;;  %v9926_v47 = vmax.f32 %v9444_v31, %v9914_v21  ;;  %v9927_v11 = vmax.f32 %v9445_v41, %v9916_v30  ;;  %v9919_v63 = vrot.slane %v9448_v45, 1 }
 0x44d   : > { %v9917_v2 = vrot.slane %v9447_v39, 1 }
 0x44e   : > { %v10018_v52 = vmax.f32 %v9904_v23, %v9926_v47  ;;  %v10019_v8 = vmax.f32 %v9905_v37, %v9927_v11  ;;  %v9930_v12 = vmax.f32 %v9448_v45, %v9919_v63 }
 0x44f   : > { %v9918_v54 = vsel %vm9541_vm2, %v9915_v40, %v9917_v2  ;;  %v9920_v32 = vsel %vm9541_vm2, %v9917_v2, %v9919_v63 }
 0x450   : > { %10110 = vst [vmem:[%s16365_s17 + $0x2b8] sm:$0xff] %v10018_v52  ;;  %10111 = vst [vmem:[%s16365_s17 + $0x2c0] sm:$0xff] %v10019_v8  ;;  %v10022_v46 = vmax.f32 %v9908_v14, %v9930_v12  ;;  %v9928_v27 = vmax.f32 %v9446_v38, %v9918_v54  ;;  %v9929_v15 = vmax.f32 %v9447_v39, %v9920_v32 }
 0x452   : > { %10114 = vst [vmem:[%s16365_s17 + $0x2d8] sm:$0x7f] %v10022_v46  ;;  %v10020_v51 = vmax.f32 %v9906_v42, %v9928_v27  ;;  %v10021_v50 = vmax.f32 %v9907_v18, %v9929_v15 }
 0x454   : > { %10112 = vst [vmem:[%s16365_s17 + $0x2c8] sm:$0xff] %v10020_v51  ;;  %10113 = vst [vmem:[%s16365_s17 + $0x2d0] sm:$0xff] %v10021_v50 }
 0x455 PF: > { %s13_s12 = sadd.s32 1, %s14036_s12  }
 0x456   : > { %p10_p4 = scmp.ge.s32.totalorder %s13_s12, 4  }
 0x458   :  { %12 = sbr.rel (!%p10_p4) target bundleno = 1 (0x1), region = 70 }

</bundles_post_ra>
